<compile_context>
chip_gen: v5e
topology: v5e:2x2
jax: 0.10.0
libtpu: 0.0.40
codegen_flags: <defaults>
</compile_context>

<pallas_src>
import functools

import jax
import jax.numpy as jnp
from jax.experimental import pallas as pl
from jax.experimental.pallas import tpu as pltpu

IN_EPS = 1e-5   # torch.nn.InstanceNorm2d default eps
LANE = 128


def _round_up(n, m):
    return (n + m - 1) // m * m


# ---------------------------------------------------------------------- fused kernel
def _partnet_fused_kernel(ecount_ref, x_ref, gemmT_ref, avgT_ref, ivT_ref, *rest,
                          leaky, layer_cfg, e_pad, parts_per_block):
    # rest = (w0, b0, ..., w_{L-1}, b_{L-1}, out_ref, abcd_scratch)
    abcd_ref = rest[-1]                                   # (E_pad, 4*E_pad) bf16 VMEM
    out_ref = rest[-2]                                    # (ppb, 3, V_pad)
    wb = rest[:-2]
    n_layers = len(layer_cfg)
    pblk = pl.program_id(0)

    for j in range(parts_per_block):                      # small static unroll
        n_real = ecount_ref[pblk * parts_per_block + j]   # real edge count (SMEM)
        inv_n = 1.0 / n_real.astype(jnp.float32)
        lane = jax.lax.broadcasted_iota(jnp.int32, (1, e_pad), 1)
        mask = (lane < n_real).astype(jnp.float32)        # (1, E_pad) valid-edge mask

        # ---- build the fused gather-as-matmul selector slab [A|B|C|D] in VMEM ----
        # A = S1+S3, B = S2+S4, C = S1-S3, D = S2-S4 with S_k[src,dst] = 1 iff
        # gemm[dst,k] == src.  Padded dst columns are zero (gemm pad = -1 matches
        # nothing); padded src rows are zero because real gemm entries < n_real —
        # this is the invariant that keeps padded-lane garbage out of real lanes.
        src = jax.lax.broadcasted_iota(jnp.int32, (e_pad, e_pad), 0)
        g = gemmT_ref[j]                                  # (4, E_pad) int32
        sel = [(src == g[k:k + 1, :]).astype(jnp.float32) for k in range(4)]
        abcd_ref[:, 0 * e_pad:1 * e_pad] = (sel[0] + sel[2]).astype(jnp.bfloat16)
        abcd_ref[:, 1 * e_pad:2 * e_pad] = (sel[1] + sel[3]).astype(jnp.bfloat16)
        abcd_ref[:, 2 * e_pad:3 * e_pad] = (sel[0] - sel[2]).astype(jnp.bfloat16)
        abcd_ref[:, 3 * e_pad:4 * e_pad] = (sel[1] - sel[3]).astype(jnp.bfloat16)

        def inorm(y):
            # one-pass masked InstanceNorm2d: biased variance, eps=1e-5,
            # statistics over real edges only (two concurrent XLU reductions).
            ym = y * mask
            s_1 = jnp.sum(ym, axis=1, keepdims=True)
            s_2 = jnp.sum(ym * y, axis=1, keepdims=True)
            mu = s_1 * inv_n
            var = jnp.maximum(s_2 * inv_n - mu * mu, 0.0)
            return (y - mu) * jax.lax.rsqrt(var + IN_EPS)

        def mesh_conv(x, w_ref, b_ref, act, norm):
            # MeshCNN GeMM conv: ONE wide gather matmul + ONE merged-tap matmul.
            xb16 = x.astype(jnp.bfloat16)
            gth = jnp.dot(xb16, abcd_ref[...],            # (C_in, 4*E_pad)
                          preferred_element_type=jnp.float32)
            taps = jnp.concatenate(                       # (5*C_in, E_pad) bf16
                [xb16,
                 gth[:, 0 * e_pad:1 * e_pad].astype(jnp.bfloat16),
                 gth[:, 1 * e_pad:2 * e_pad].astype(jnp.bfloat16),
                 jnp.abs(gth[:, 2 * e_pad:3 * e_pad]).astype(jnp.bfloat16),
                 jnp.abs(gth[:, 3 * e_pad:4 * e_pad]).astype(jnp.bfloat16)],
                axis=0)
            y = jnp.dot(w_ref[...], taps,                 # (C_out, E_pad) f32
                        preferred_element_type=jnp.float32) + b_ref[...]
            if act:                                       # F.leaky_relu
                y = jnp.where(y >= 0.0, y, leaky * y)
            if norm:                                      # nn.InstanceNorm2d
                y = inorm(y)
            return y

        fe = x_ref[j].astype(jnp.float32)                 # (C_in, E_pad)
        for li, (act, norm) in enumerate(layer_cfg):
            fe = mesh_conv(fe, wb[2 * li], wb[2 * li + 1], act, norm)
            if li == n_layers - 2:
                # MeshEncoderDecoder.bn: standalone trailing InstanceNorm2d applied
                # after the decoder (which already normalized in final_c1) and before
                # PriorNet.last_conv.  The reference really normalizes twice here.
                fe = inorm(fe)

        # build_v fused, transposed:  vs^T = x0 @ avgT0 + x1 @ avgT1 + init_verts^T
        x0 = fe[0:3, :].astype(jnp.bfloat16)              # half-edge 0 xyz
        x1 = fe[3:6, :].astype(jnp.bfloat16)              # half-edge 1 xyz
        vsT = (jnp.dot(x0, avgT_ref[j, :e_pad, :], preferred_element_type=jnp.float32)
               + jnp.dot(x1, avgT_ref[j, e_pad:, :], preferred_element_type=jnp.float32)
               + ivT_ref[j])
        out_ref[j] = vsT                                  # (3, V_pad)


# -------------------------------------------------------------------- network config
def partnet_layer_specs(in_ch, convs):
    """Layer chain of the pool-free PriorNet: (name, c_in, c_out, act, norm)."""
    convs = list(convs)
    down = [in_ch] + convs                  # MeshEncoder channel chain
    up = convs[::-1] + [in_ch]              # MeshDecoder channel chain
    specs = []
    for i in range(len(convs)):
        specs.append((f"down{i}", down[i], down[i + 1], True, True))
    for i in range(len(convs) - 1):
        specs.append((f"dec{i}_up", up[i], up[i + 1], False, False))
        specs.append((f"dec{i}_c1", up[i + 1], up[i + 1], True, True))
    specs.append(("final_up", up[-2], up[-1], False, False))
    specs.append(("final_c1", up[-1], up[-1], True, True))
    specs.append(("last", in_ch, in_ch, False, False))       # PriorNet.last_conv
    return specs


def init_partnet_params(key, in_ch=6, convs=(32, 64), init_weights_size=0.002):
    specs = partnet_layer_specs(in_ch, convs)
    params = []
    for name, ci, co, _, _ in specs:
        key, kw, kb = jax.random.split(key, 3)
        if name == "last":
            # PriorNet: last_conv weight/bias ~ U(-1e-8, 1e-8)
            eps = 1e-8
            w = jax.random.uniform(kw, (co, ci, 5), jnp.float32, -eps, eps)
            b = jax.random.uniform(kb, (co, 1), jnp.float32, -eps, eps)
        else:
            # init_weights(..., 'normal', 0.002): weight ~ N(0, 0.002); bias 0
            w = init_weights_size * jax.random.normal(kw, (co, ci, 5), jnp.float32)
            b = jnp.zeros((co, 1), jnp.float32)
        # merge the 5 GeMM taps into the contraction axis, tap-major:
        #   w_merged[o, k*ci + i] = w[o, i, k]   ->   (c_out, 5*c_in) bf16 MXU operand
        w_merged = jnp.transpose(w, (0, 2, 1)).reshape(co, 5 * ci).astype(jnp.bfloat16)
        params.append((w_merged, b))
    return params, specs


# ----------------------------------------------------------------------- mesh setup
def make_mesh(key, n_edges, n_verts, e_pad, v_pad):
    """Synthetic deterministic mesh connectivity (stand-in for MeshCNN Mesh),
    pre-lowered to kernel-ready padded operands."""
    kg, kv = jax.random.split(key)
    gemm = jax.random.randint(kg, (n_edges, 4), 0, n_edges, dtype=jnp.int32)
    # pad with -1 so padded dst columns of the in-kernel selector build are all-zero
    gpad = jnp.concatenate(
        [gemm, -jnp.ones((e_pad - n_edges, 4), jnp.int32)], axis=0)     # (E_pad, 4)
    gemmT = jnp.transpose(gpad)                                         # (4, E_pad)

    # vertex incidence / averaging (build_v)
    e = jnp.arange(n_edges)
    ev = jnp.stack([e % n_verts, (e + 7) % n_verts], axis=1)            # (E, 2)
    vid = jnp.arange(n_verts)
    inc0 = (ev[:, 0][None, :] == vid[:, None]).astype(jnp.float32)      # (V, E)
    inc1 = (ev[:, 1][None, :] == vid[:, None]).astype(jnp.float32)
    deg = jnp.maximum(inc0.sum(axis=1) + inc1.sum(axis=1), 1.0)         # mesh.nvs (guarded)
    avg0 = inc0 / deg[:, None]
    avg1 = inc1 / deg[:, None]

    def pad_t(a):                                                       # (V,E) -> (E_pad,V_pad)
        return jnp.zeros((e_pad, v_pad), jnp.float32).at[:n_edges, :n_verts].set(a.T)

    avgT = jnp.concatenate([pad_t(avg0), pad_t(avg1)], axis=0).astype(jnp.bfloat16)
    init_verts = 0.1 * jax.random.normal(kv, (n_verts, 3), jnp.float32)
    ivT = jnp.zeros((3, v_pad), jnp.float32).at[:, :n_verts].set(init_verts.T)
    return dict(gemmT=gemmT, avgT=avgT, ivT=ivT, init_verts=init_verts,
                n_edges=n_edges, n_verts=n_verts)


def prepare_part_operands(part_meshes, sub_edge_index, e_pad):
    """Pre-stack all STATIC per-part operands once (not per forward call)."""
    gemmT = jnp.stack([m["gemmT"] for m in part_meshes], axis=0)         # (P, 4, E_pad)
    avgT = jnp.stack([m["avgT"] for m in part_meshes], axis=0)           # (P, 2E, V_pad)
    ivT = jnp.stack([m["ivT"] for m in part_meshes], axis=0)             # (P, 3, V_pad)
    ecounts = jnp.array([m["n_edges"] for m in part_meshes], jnp.int32)  # (P,)
    edge_idx = jnp.stack([jnp.concatenate(
        [jnp.asarray(si, jnp.int32),
         jnp.zeros((e_pad - len(si),), jnp.int32)]) for si in sub_edge_index], axis=0)
    edge_mask = jnp.stack([jnp.concatenate(
        [jnp.ones((len(si),), jnp.float32),
         jnp.zeros((e_pad - len(si),), jnp.float32)]) for si in sub_edge_index], axis=0)
    return dict(gemmT=gemmT, avgT=avgT, ivT=ivT, ecounts=ecounts,
                edge_idx=edge_idx, edge_mask=edge_mask)


# ---------------------------------------------------------------- fused-call builder
def make_fused_partnet(params, specs, n_parts, c_in, e_pad, v_pad,
                       leaky=0.0, parts_per_block=1):
    assert n_parts % parts_per_block == 0
    ppb = parts_per_block
    layer_cfg = tuple((a, n) for (_, _, _, a, n) in specs)
    kern = functools.partial(_partnet_fused_kernel, leaky=leaky, layer_cfg=layer_cfg,
                             e_pad=e_pad, parts_per_block=ppb)

    in_specs = [
        pl.BlockSpec((ppb, c_in, e_pad), lambda p, ec: (p, 0, 0)),        # x per part
        pl.BlockSpec((ppb, 4, e_pad), lambda p, ec: (p, 0, 0)),           # gemm^T (int32)
        pl.BlockSpec((ppb, 2 * e_pad, v_pad), lambda p, ec: (p, 0, 0)),   # avg^T (bf16)
        pl.BlockSpec((ppb, 3, v_pad), lambda p, ec: (p, 0, 0)),           # init_verts^T
    ]
    for w, b in params:   # tiny bf16 merged weights + f32 biases, resident, shared
        in_specs.append(pl.BlockSpec(w.shape, lambda p, ec: (0, 0)))
        in_specs.append(pl.BlockSpec(b.shape, lambda p, ec: (0, 0)))

    # advisory cost estimate for XLA scheduling
    flops = 0
    for (_, ci, co, _, _) in specs:
        flops += 2 * ci * e_pad * (4 * e_pad) + 2 * co * (5 * ci) * e_pad
    flops += 2 * 2 * 3 * e_pad * v_pad
    flops *= n_parts
    transcendentals = n_parts * sum(co for (_, _, co, _, nrm) in specs if nrm)
    weight_bytes = sum(w.size * w.dtype.itemsize + b.size * 4 for w, b in params)
    bytes_accessed = (n_parts * (4 * c_in * e_pad + 4 * 4 * e_pad
                                 + 2 * 2 * e_pad * v_pad + 2 * 4 * 3 * v_pad)
                      + weight_bytes)

    grid_spec = pltpu.PrefetchScalarGridSpec(
        num_scalar_prefetch=1,                        # per-part real edge counts -> SMEM
        grid=(n_parts // ppb,),
        in_specs=in_specs,
        out_specs=pl.BlockSpec((ppb, 3, v_pad), lambda p, ec: (p, 0, 0)),
        scratch_shapes=[pltpu.VMEM((e_pad, 4 * e_pad), jnp.bfloat16)],   # [A|B|C|D] slab
    )
    call = pl.pallas_call(
        kern,
        out_shape=jax.ShapeDtypeStruct((n_parts, 3, v_pad), jnp.float32),
        grid_spec=grid_spec,
        compiler_params=pltpu.CompilerParams(
            dimension_semantics=("parallel",),        # shard part-blocks across TCs
            vmem_limit_bytes=32 * 1024 * 1024),       # safe on v5e/v6e/v7x at these sizes
        cost_estimate=pl.CostEstimate(flops=flops,
                                      transcendentals=transcendentals,
                                      bytes_accessed=bytes_accessed),
    )

    flat_wb = tuple(a for wb in params for a in wb)

    @jax.jit
    def run(ecounts, x_full, edge_idx, edge_mask, gemmT, avgT, ivT):
        # per-part relevant-edge gather + lane padding, done inside the jit
        xg = x_full[0][:, edge_idx]                               # (C, P, E_pad)
        x_stack = jnp.transpose(xg, (1, 0, 2)) * edge_mask[:, None, :]
        return call(ecounts, x_stack, gemmT, avgT, ivT, *flat_wb)

    return run


# ---------------------------------------------------------------------- forward pass
def partnet_forward(run_fn, x, part_meshes, static_ops):
    """PartNet.forward: one fused pallas_call over all parts, then yield per part."""
    out = run_fn(static_ops["ecounts"], x, static_ops["edge_idx"],
                 static_ops["edge_mask"], static_ops["gemmT"],
                 static_ops["avgT"], static_ops["ivT"])           # (P, 3, V_pad)
    vs = jnp.transpose(out, (0, 2, 1))                            # (P, V_pad, 3)
    for i, m in enumerate(part_meshes):
        yield vs[i, :m["n_verts"], :][None]                       # (len(meshes)=1, V, 3)


# -------------------------------------------------------------------------------- main
if __name__ == "__main__":
    key = jax.random.PRNGKey(0)
    in_ch = 6
    convs = (32, 64)
    n_parts = 4
    parts_per_block = 2                           # parts processed per grid step
    edges_per_part = 64
    verts_per_part = 16
    total_edges = n_parts * edges_per_part
    e_pad = _round_up(edges_per_part, LANE)       # lane-dense edge axis
    v_pad = _round_up(verts_per_part, LANE)       # lane-dense vertex axis for build_v

    kx, kp, km = jax.random.split(key, 3)
    x = jax.random.normal(kx, (1, in_ch, total_edges), dtype=jnp.float32)  # B x f x n_edges
    params, specs = init_partnet_params(kp, in_ch=in_ch, convs=convs)

    mesh_keys = jax.random.split(km, n_parts)
    part_meshes = [make_mesh(mesh_keys[i], edges_per_part, verts_per_part, e_pad, v_pad)
                   for i in range(n_parts)]
    sub_edge_index = [jnp.arange(i * edges_per_part, (i + 1) * edges_per_part,
                                 dtype=jnp.int32) for i in range(n_parts)]
    static_ops = prepare_part_operands(part_meshes, sub_edge_index, e_pad)

    # leaky=0.0: PartNet/PriorNet default (F.leaky_relu(x, 0) == relu)
    run_fn = make_fused_partnet(params, specs, n_parts, in_ch, e_pad, v_pad,
                                leaky=0.0, parts_per_block=parts_per_block)
    results = list(partnet_forward(run_fn, x, part_meshes, static_ops))
    for r in results:
        jax.block_until_ready(r)
        assert r.shape == (1, verts_per_part, 3)
        assert bool(jnp.all(jnp.isfinite(r)))
    print("KERNEL_OK")
</pallas_src>

<mosaic_0001>
module attributes {stable_mosaic.version = 11 : i64} {
  func.func @_partnet_fused_kernel(%arg0: i32, %arg1: memref<4xi32, #tpu.memory_space<smem>>, %arg2: memref<2x6x128xf32, #tpu.memory_space<vmem>>, %arg3: memref<2x4x128xi32, #tpu.memory_space<vmem>>, %arg4: memref<2x256x128xbf16, #tpu.memory_space<vmem>>, %arg5: memref<2x3x128xf32, #tpu.memory_space<vmem>>, %arg6: memref<32x30xbf16, #tpu.memory_space<vmem>>, %arg7: memref<32x1xf32, #tpu.memory_space<vmem>>, %arg8: memref<64x160xbf16, #tpu.memory_space<vmem>>, %arg9: memref<64x1xf32, #tpu.memory_space<vmem>>, %arg10: memref<32x320xbf16, #tpu.memory_space<vmem>>, %arg11: memref<32x1xf32, #tpu.memory_space<vmem>>, %arg12: memref<32x160xbf16, #tpu.memory_space<vmem>>, %arg13: memref<32x1xf32, #tpu.memory_space<vmem>>, %arg14: memref<6x160xbf16, #tpu.memory_space<vmem>>, %arg15: memref<6x1xf32, #tpu.memory_space<vmem>>, %arg16: memref<6x30xbf16, #tpu.memory_space<vmem>>, %arg17: memref<6x1xf32, #tpu.memory_space<vmem>>, %arg18: memref<6x30xbf16, #tpu.memory_space<vmem>>, %arg19: memref<6x1xf32, #tpu.memory_space<vmem>>, %arg20: memref<2x3x128xf32, #tpu.memory_space<vmem>>, %arg21: memref<128x512xbf16, #tpu.memory_space<vmem>>) attributes {dimension_semantics = [#tpu.dimension_semantics<parallel>], iteration_bounds = array<i64: 2>, scalar_prefetch = 1 : i64, scratch_operands = 1 : i64, tpu.core_type = #tpu.core_type<tc>, window_params = [{transform_indices = @transform_0, window_bounds = array<i64: 2, 6, 128>}, {transform_indices = @transform_1, window_bounds = array<i64: 2, 4, 128>}, {transform_indices = @transform_2, window_bounds = array<i64: 2, 256, 128>}, {transform_indices = @transform_3, window_bounds = array<i64: 2, 3, 128>}, {pipeline_mode = #tpu.pipeline_mode<synchronous>, transform_indices = @transform_4, window_bounds = array<i64: 32, 30>}, {pipeline_mode = #tpu.pipeline_mode<synchronous>, transform_indices = @transform_5, window_bounds = array<i64: 32, 1>}, {pipeline_mode = #tpu.pipeline_mode<synchronous>, transform_indices = @transform_6, window_bounds = array<i64: 64, 160>}, {pipeline_mode = #tpu.pipeline_mode<synchronous>, transform_indices = @transform_7, window_bounds = array<i64: 64, 1>}, {pipeline_mode = #tpu.pipeline_mode<synchronous>, transform_indices = @transform_8, window_bounds = array<i64: 32, 320>}, {pipeline_mode = #tpu.pipeline_mode<synchronous>, transform_indices = @transform_9, window_bounds = array<i64: 32, 1>}, {pipeline_mode = #tpu.pipeline_mode<synchronous>, transform_indices = @transform_10, window_bounds = array<i64: 32, 160>}, {pipeline_mode = #tpu.pipeline_mode<synchronous>, transform_indices = @transform_11, window_bounds = array<i64: 32, 1>}, {pipeline_mode = #tpu.pipeline_mode<synchronous>, transform_indices = @transform_12, window_bounds = array<i64: 6, 160>}, {pipeline_mode = #tpu.pipeline_mode<synchronous>, transform_indices = @transform_13, window_bounds = array<i64: 6, 1>}, {pipeline_mode = #tpu.pipeline_mode<synchronous>, transform_indices = @transform_14, window_bounds = array<i64: 6, 30>}, {pipeline_mode = #tpu.pipeline_mode<synchronous>, transform_indices = @transform_15, window_bounds = array<i64: 6, 1>}, {pipeline_mode = #tpu.pipeline_mode<synchronous>, transform_indices = @transform_16, window_bounds = array<i64: 6, 30>}, {pipeline_mode = #tpu.pipeline_mode<synchronous>, transform_indices = @transform_17, window_bounds = array<i64: 6, 1>}, {transform_indices = @transform_18, window_bounds = array<i64: 2, 3, 128>}]} {
    %c2_i32 = arith.constant 2 : i32
    %0 = arith.muli %arg0, %c2_i32 : i32
    %c0_i32 = arith.constant 0 : i32
    %1 = arith.addi %0, %c0_i32 : i32
    %2 = arith.index_cast %1 : i32 to index
    %3 = memref.load %arg1[%2] : memref<4xi32, #tpu.memory_space<smem>>
    %4 = arith.sitofp %3 : i32 to f32
    %cst = arith.constant 1.000000e+00 : f32
    %5 = arith.divf %cst, %4 : f32
    %6 = tpu.iota {dimensions = array<i32: 1>} : vector<1x128xi32>
    %7 = vector.broadcast %3 : i32 to vector<1x128xi32>
    %8 = arith.cmpi slt, %6, %7 : vector<1x128xi32>
    %9 = arith.extui %8 : vector<1x128xi1> to vector<1x128xi32>
    %10 = arith.sitofp %9 : vector<1x128xi32> to vector<1x128xf32>
    %11 = tpu.iota {dimensions = array<i32: 0>} : vector<128x128xi32>
    %c0 = arith.constant 0 : index
    %c0_0 = arith.constant 0 : index
    %c0_1 = arith.constant 0 : index
    %12 = vector.load %arg3[%c0, %c0_0, %c0_1] : memref<2x4x128xi32, #tpu.memory_space<vmem>>, vector<1x4x128xi32>
    %13 = vector.shape_cast %12 : vector<1x4x128xi32> to vector<4x128xi32>
    %14 = vector.extract_strided_slice %13 {offsets = [0, 0], sizes = [1, 128], strides = [1, 1]} : vector<4x128xi32> to vector<1x128xi32>
    %15 = vector.broadcast %14 : vector<1x128xi32> to vector<128x128xi32>
    %16 = arith.cmpi eq, %11, %15 : vector<128x128xi32>
    %17 = arith.extui %16 : vector<128x128xi1> to vector<128x128xi32>
    %18 = arith.sitofp %17 : vector<128x128xi32> to vector<128x128xf32>
    %19 = vector.extract_strided_slice %13 {offsets = [1, 0], sizes = [1, 128], strides = [1, 1]} : vector<4x128xi32> to vector<1x128xi32>
    %20 = vector.broadcast %19 : vector<1x128xi32> to vector<128x128xi32>
    %21 = arith.cmpi eq, %11, %20 : vector<128x128xi32>
    %22 = arith.extui %21 : vector<128x128xi1> to vector<128x128xi32>
    %23 = arith.sitofp %22 : vector<128x128xi32> to vector<128x128xf32>
    %24 = vector.extract_strided_slice %13 {offsets = [2, 0], sizes = [1, 128], strides = [1, 1]} : vector<4x128xi32> to vector<1x128xi32>
    %25 = vector.broadcast %24 : vector<1x128xi32> to vector<128x128xi32>
    %26 = arith.cmpi eq, %11, %25 : vector<128x128xi32>
    %27 = arith.extui %26 : vector<128x128xi1> to vector<128x128xi32>
    %28 = arith.sitofp %27 : vector<128x128xi32> to vector<128x128xf32>
    %29 = vector.extract_strided_slice %13 {offsets = [3, 0], sizes = [1, 128], strides = [1, 1]} : vector<4x128xi32> to vector<1x128xi32>
    %30 = vector.broadcast %29 : vector<1x128xi32> to vector<128x128xi32>
    %31 = arith.cmpi eq, %11, %30 : vector<128x128xi32>
    %32 = arith.extui %31 : vector<128x128xi1> to vector<128x128xi32>
    %33 = arith.sitofp %32 : vector<128x128xi32> to vector<128x128xf32>
    %34 = arith.addf %18, %28 : vector<128x128xf32>
    %35 = arith.truncf %34 : vector<128x128xf32> to vector<128x128xbf16>
    %c0_2 = arith.constant 0 : index
    %c0_3 = arith.constant 0 : index
    %36 = vector.load %arg21[%c0_2, %c0_3] : memref<128x512xbf16, #tpu.memory_space<vmem>>, vector<128x128xbf16>
    tpu.vector_store %arg21[%c0_2, %c0_3], %35 {strides = array<i32>} : memref<128x512xbf16, #tpu.memory_space<vmem>>, vector<128x128xbf16>,
    %37 = arith.addf %23, %33 : vector<128x128xf32>
    %38 = arith.truncf %37 : vector<128x128xf32> to vector<128x128xbf16>
    %c0_4 = arith.constant 0 : index
    %c128 = arith.constant 128 : index
    %39 = vector.load %arg21[%c0_4, %c128] : memref<128x512xbf16, #tpu.memory_space<vmem>>, vector<128x128xbf16>
    tpu.vector_store %arg21[%c0_4, %c128], %38 {strides = array<i32>} : memref<128x512xbf16, #tpu.memory_space<vmem>>, vector<128x128xbf16>,
    %40 = arith.subf %18, %28 : vector<128x128xf32>
    %41 = arith.truncf %40 : vector<128x128xf32> to vector<128x128xbf16>
    %c0_5 = arith.constant 0 : index
    %c256 = arith.constant 256 : index
    %42 = vector.load %arg21[%c0_5, %c256] : memref<128x512xbf16, #tpu.memory_space<vmem>>, vector<128x128xbf16>
    tpu.vector_store %arg21[%c0_5, %c256], %41 {strides = array<i32>} : memref<128x512xbf16, #tpu.memory_space<vmem>>, vector<128x128xbf16>,
    %43 = arith.subf %23, %33 : vector<128x128xf32>
    %44 = arith.truncf %43 : vector<128x128xf32> to vector<128x128xbf16>
    %c0_6 = arith.constant 0 : index
    %c384 = arith.constant 384 : index
    %45 = vector.load %arg21[%c0_6, %c384] : memref<128x512xbf16, #tpu.memory_space<vmem>>, vector<128x128xbf16>
    tpu.vector_store %arg21[%c0_6, %c384], %44 {strides = array<i32>} : memref<128x512xbf16, #tpu.memory_space<vmem>>, vector<128x128xbf16>,
    %c0_7 = arith.constant 0 : index
    %c0_8 = arith.constant 0 : index
    %c0_9 = arith.constant 0 : index
    %46 = vector.load %arg2[%c0_7, %c0_8, %c0_9] : memref<2x6x128xf32, #tpu.memory_space<vmem>>, vector<1x6x128xf32>
    %47 = vector.shape_cast %46 : vector<1x6x128xf32> to vector<6x128xf32>
    %48 = arith.truncf %47 : vector<6x128xf32> to vector<6x128xbf16>
    %c0_10 = arith.constant 0 : index
    %c0_11 = arith.constant 0 : index
    %49 = vector.load %arg21[%c0_10, %c0_11] : memref<128x512xbf16, #tpu.memory_space<vmem>>, vector<128x512xbf16>
    %cst_12 = arith.constant dense<0.000000e+00> : vector<6x512xf32>
    %50 = tpu.matmul %48, %49, %cst_12 {dimension_numbers = #tpu.dot_dimension_numbers<[1], [0], [0], [1], [0, 0, 1, 1], [], []>} : vector<6x128xbf16>, vector<128x512xbf16>, vector<6x512xf32> -> vector<6x512xf32>
    %51 = vector.extract_strided_slice %50 {offsets = [0, 0], sizes = [6, 128], strides = [1, 1]} : vector<6x512xf32> to vector<6x128xf32>
    %52 = arith.truncf %51 : vector<6x128xf32> to vector<6x128xbf16>
    %53 = vector.extract_strided_slice %50 {offsets = [0, 128], sizes = [6, 128], strides = [1, 1]} : vector<6x512xf32> to vector<6x128xf32>
    %54 = arith.truncf %53 : vector<6x128xf32> to vector<6x128xbf16>
    %55 = vector.extract_strided_slice %50 {offsets = [0, 256], sizes = [6, 128], strides = [1, 1]} : vector<6x512xf32> to vector<6x128xf32>
    %56 = math.absf %55 : vector<6x128xf32>
    %57 = arith.truncf %56 : vector<6x128xf32> to vector<6x128xbf16>
    %58 = vector.extract_strided_slice %50 {offsets = [0, 384], sizes = [6, 128], strides = [1, 1]} : vector<6x512xf32> to vector<6x128xf32>
    %59 = math.absf %58 : vector<6x128xf32>
    %60 = arith.truncf %59 : vector<6x128xf32> to vector<6x128xbf16>
    %61 = tpu.concatenate %48, %52, %54, %57, %60 in 0 : vector<6x128xbf16>, vector<6x128xbf16>, vector<6x128xbf16>, vector<6x128xbf16>, vector<6x128xbf16> -> vector<30x128xbf16>
    %c0_13 = arith.constant 0 : index
    %c0_14 = arith.constant 0 : index
    %62 = vector.load %arg6[%c0_13, %c0_14] : memref<32x30xbf16, #tpu.memory_space<vmem>>, vector<32x30xbf16>
    %cst_15 = arith.constant dense<0.000000e+00> : vector<32x128xf32>
    %63 = tpu.matmul %62, %61, %cst_15 {dimension_numbers = #tpu.dot_dimension_numbers<[1], [0], [0], [1], [0, 0, 1, 1], [], []>} : vector<32x30xbf16>, vector<30x128xbf16>, vector<32x128xf32> -> vector<32x128xf32>
    %c0_16 = arith.constant 0 : index
    %c0_17 = arith.constant 0 : index
    %64 = vector.load %arg7[%c0_16, %c0_17] : memref<32x1xf32, #tpu.memory_space<vmem>>, vector<32x1xf32>
    %65 = vector.broadcast %64 : vector<32x1xf32> to vector<32x128xf32>
    %66 = arith.addf %63, %65 : vector<32x128xf32>
    %cst_18 = arith.constant 0.000000e+00 : f32
    %67 = vector.broadcast %cst_18 : f32 to vector<32x128xf32>
    %68 = arith.cmpf oge, %66, %67 : vector<32x128xf32>
    %cst_19 = arith.constant 0.000000e+00 : f32
    %69 = vector.broadcast %cst_19 : f32 to vector<32x128xf32>
    %70 = arith.mulf %69, %66 : vector<32x128xf32>
    %71 = arith.select %68, %66, %70 : vector<32x128xi1>, vector<32x128xf32>
    %72 = vector.broadcast %10 : vector<1x128xf32> to vector<32x128xf32>
    %73 = arith.mulf %71, %72 : vector<32x128xf32>
    %cst_20 = arith.constant dense<0.000000e+00> : vector<32xf32>
    %74 = vector.multi_reduction <add>, %73, %cst_20 [1] : vector<32x128xf32> to vector<32xf32>
    %75 = vector.shape_cast %74 : vector<32xf32> to vector<32x1xf32>
    %76 = arith.mulf %73, %71 : vector<32x128xf32>
    %cst_21 = arith.constant dense<0.000000e+00> : vector<32xf32>
    %77 = vector.multi_reduction <add>, %76, %cst_21 [1] : vector<32x128xf32> to vector<32xf32>
    %78 = vector.shape_cast %77 : vector<32xf32> to vector<32x1xf32>
    %79 = vector.broadcast %5 : f32 to vector<32x1xf32>
    %80 = arith.mulf %75, %79 : vector<32x1xf32>
    %81 = vector.broadcast %5 : f32 to vector<32x1xf32>
    %82 = arith.mulf %78, %81 : vector<32x1xf32>
    %83 = arith.mulf %80, %80 : vector<32x1xf32>
    %84 = arith.subf %82, %83 : vector<32x1xf32>
    %cst_22 = arith.constant 0.000000e+00 : f32
    %85 = vector.broadcast %cst_22 : f32 to vector<32x1xf32>
    %86 = arith.maximumf %84, %85 : vector<32x1xf32>
    %87 = vector.broadcast %80 : vector<32x1xf32> to vector<32x128xf32>
    %88 = arith.subf %71, %87 : vector<32x128xf32>
    %cst_23 = arith.constant 9.99999974E-6 : f32
    %89 = vector.broadcast %cst_23 : f32 to vector<32x1xf32>
    %90 = arith.addf %86, %89 : vector<32x1xf32>
    %91 = math.rsqrt %90 : vector<32x1xf32>
    %92 = vector.broadcast %91 : vector<32x1xf32> to vector<32x128xf32>
    %93 = arith.mulf %88, %92 : vector<32x128xf32>
    %94 = arith.truncf %93 : vector<32x128xf32> to vector<32x128xbf16>
    %c0_24 = arith.constant 0 : index
    %c0_25 = arith.constant 0 : index
    %95 = vector.load %arg21[%c0_24, %c0_25] : memref<128x512xbf16, #tpu.memory_space<vmem>>, vector<128x512xbf16>
    %cst_26 = arith.constant dense<0.000000e+00> : vector<32x512xf32>
    %96 = tpu.matmul %94, %95, %cst_26 {dimension_numbers = #tpu.dot_dimension_numbers<[1], [0], [0], [1], [0, 0, 1, 1], [], []>} : vector<32x128xbf16>, vector<128x512xbf16>, vector<32x512xf32> -> vector<32x512xf32>
    %97 = vector.extract_strided_slice %96 {offsets = [0, 0], sizes = [32, 128], strides = [1, 1]} : vector<32x512xf32> to vector<32x128xf32>
    %98 = arith.truncf %97 : vector<32x128xf32> to vector<32x128xbf16>
    %99 = vector.extract_strided_slice %96 {offsets = [0, 128], sizes = [32, 128], strides = [1, 1]} : vector<32x512xf32> to vector<32x128xf32>
    %100 = arith.truncf %99 : vector<32x128xf32> to vector<32x128xbf16>
    %101 = vector.extract_strided_slice %96 {offsets = [0, 256], sizes = [32, 128], strides = [1, 1]} : vector<32x512xf32> to vector<32x128xf32>
    %102 = math.absf %101 : vector<32x128xf32>
    %103 = arith.truncf %102 : vector<32x128xf32> to vector<32x128xbf16>
    %104 = vector.extract_strided_slice %96 {offsets = [0, 384], sizes = [32, 128], strides = [1, 1]} : vector<32x512xf32> to vector<32x128xf32>
    %105 = math.absf %104 : vector<32x128xf32>
    %106 = arith.truncf %105 : vector<32x128xf32> to vector<32x128xbf16>
    %107 = tpu.concatenate %94, %98, %100, %103, %106 in 0 : vector<32x128xbf16>, vector<32x128xbf16>, vector<32x128xbf16>, vector<32x128xbf16>, vector<32x128xbf16> -> vector<160x128xbf16>
    %c0_27 = arith.constant 0 : index
    %c0_28 = arith.constant 0 : index
    %108 = vector.load %arg8[%c0_27, %c0_28] : memref<64x160xbf16, #tpu.memory_space<vmem>>, vector<64x160xbf16>
    %cst_29 = arith.constant dense<0.000000e+00> : vector<64x128xf32>
    %109 = tpu.matmul %108, %107, %cst_29 {dimension_numbers = #tpu.dot_dimension_numbers<[1], [0], [0], [1], [0, 0, 1, 1], [], []>} : vector<64x160xbf16>, vector<160x128xbf16>, vector<64x128xf32> -> vector<64x128xf32>
    %c0_30 = arith.constant 0 : index
    %c0_31 = arith.constant 0 : index
    %110 = vector.load %arg9[%c0_30, %c0_31] : memref<64x1xf32, #tpu.memory_space<vmem>>, vector<64x1xf32>
    %111 = vector.broadcast %110 : vector<64x1xf32> to vector<64x128xf32>
    %112 = arith.addf %109, %111 : vector<64x128xf32>
    %cst_32 = arith.constant 0.000000e+00 : f32
    %113 = vector.broadcast %cst_32 : f32 to vector<64x128xf32>
    %114 = arith.cmpf oge, %112, %113 : vector<64x128xf32>
    %cst_33 = arith.constant 0.000000e+00 : f32
    %115 = vector.broadcast %cst_33 : f32 to vector<64x128xf32>
    %116 = arith.mulf %115, %112 : vector<64x128xf32>
    %117 = arith.select %114, %112, %116 : vector<64x128xi1>, vector<64x128xf32>
    %118 = vector.broadcast %10 : vector<1x128xf32> to vector<64x128xf32>
    %119 = arith.mulf %117, %118 : vector<64x128xf32>
    %cst_34 = arith.constant dense<0.000000e+00> : vector<64xf32>
    %120 = vector.multi_reduction <add>, %119, %cst_34 [1] : vector<64x128xf32> to vector<64xf32>
    %121 = vector.shape_cast %120 : vector<64xf32> to vector<64x1xf32>
    %122 = arith.mulf %119, %117 : vector<64x128xf32>
    %cst_35 = arith.constant dense<0.000000e+00> : vector<64xf32>
    %123 = vector.multi_reduction <add>, %122, %cst_35 [1] : vector<64x128xf32> to vector<64xf32>
    %124 = vector.shape_cast %123 : vector<64xf32> to vector<64x1xf32>
    %125 = vector.broadcast %5 : f32 to vector<64x1xf32>
    %126 = arith.mulf %121, %125 : vector<64x1xf32>
    %127 = vector.broadcast %5 : f32 to vector<64x1xf32>
    %128 = arith.mulf %124, %127 : vector<64x1xf32>
    %129 = arith.mulf %126, %126 : vector<64x1xf32>
    %130 = arith.subf %128, %129 : vector<64x1xf32>
    %cst_36 = arith.constant 0.000000e+00 : f32
    %131 = vector.broadcast %cst_36 : f32 to vector<64x1xf32>
    %132 = arith.maximumf %130, %131 : vector<64x1xf32>
    %133 = vector.broadcast %126 : vector<64x1xf32> to vector<64x128xf32>
    %134 = arith.subf %117, %133 : vector<64x128xf32>
    %cst_37 = arith.constant 9.99999974E-6 : f32
    %135 = vector.broadcast %cst_37 : f32 to vector<64x1xf32>
    %136 = arith.addf %132, %135 : vector<64x1xf32>
    %137 = math.rsqrt %136 : vector<64x1xf32>
    %138 = vector.broadcast %137 : vector<64x1xf32> to vector<64x128xf32>
    %139 = arith.mulf %134, %138 : vector<64x128xf32>
    %140 = arith.truncf %139 : vector<64x128xf32> to vector<64x128xbf16>
    %c0_38 = arith.constant 0 : index
    %c0_39 = arith.constant 0 : index
    %141 = vector.load %arg21[%c0_38, %c0_39] : memref<128x512xbf16, #tpu.memory_space<vmem>>, vector<128x512xbf16>
    %cst_40 = arith.constant dense<0.000000e+00> : vector<64x512xf32>
    %142 = tpu.matmul %140, %141, %cst_40 {dimension_numbers = #tpu.dot_dimension_numbers<[1], [0], [0], [1], [0, 0, 1, 1], [], []>} : vector<64x128xbf16>, vector<128x512xbf16>, vector<64x512xf32> -> vector<64x512xf32>
    %143 = vector.extract_strided_slice %142 {offsets = [0, 0], sizes = [64, 128], strides = [1, 1]} : vector<64x512xf32> to vector<64x128xf32>
    %144 = arith.truncf %143 : vector<64x128xf32> to vector<64x128xbf16>
    %145 = vector.extract_strided_slice %142 {offsets = [0, 128], sizes = [64, 128], strides = [1, 1]} : vector<64x512xf32> to vector<64x128xf32>
    %146 = arith.truncf %145 : vector<64x128xf32> to vector<64x128xbf16>
    %147 = vector.extract_strided_slice %142 {offsets = [0, 256], sizes = [64, 128], strides = [1, 1]} : vector<64x512xf32> to vector<64x128xf32>
    %148 = math.absf %147 : vector<64x128xf32>
    %149 = arith.truncf %148 : vector<64x128xf32> to vector<64x128xbf16>
    %150 = vector.extract_strided_slice %142 {offsets = [0, 384], sizes = [64, 128], strides = [1, 1]} : vector<64x512xf32> to vector<64x128xf32>
    %151 = math.absf %150 : vector<64x128xf32>
    %152 = arith.truncf %151 : vector<64x128xf32> to vector<64x128xbf16>
    %153 = tpu.concatenate %140, %144, %146, %149, %152 in 0 : vector<64x128xbf16>, vector<64x128xbf16>, vector<64x128xbf16>, vector<64x128xbf16>, vector<64x128xbf16> -> vector<320x128xbf16>
    %c0_41 = arith.constant 0 : index
    %c0_42 = arith.constant 0 : index
    %154 = vector.load %arg10[%c0_41, %c0_42] : memref<32x320xbf16, #tpu.memory_space<vmem>>, vector<32x320xbf16>
    %cst_43 = arith.constant dense<0.000000e+00> : vector<32x128xf32>
    %155 = tpu.matmul %154, %153, %cst_43 {dimension_numbers = #tpu.dot_dimension_numbers<[1], [0], [0], [1], [0, 0, 1, 1], [], []>} : vector<32x320xbf16>, vector<320x128xbf16>, vector<32x128xf32> -> vector<32x128xf32>
    %c0_44 = arith.constant 0 : index
    %c0_45 = arith.constant 0 : index
    %156 = vector.load %arg11[%c0_44, %c0_45] : memref<32x1xf32, #tpu.memory_space<vmem>>, vector<32x1xf32>
    %157 = vector.broadcast %156 : vector<32x1xf32> to vector<32x128xf32>
    %158 = arith.addf %155, %157 : vector<32x128xf32>
    %159 = arith.truncf %158 : vector<32x128xf32> to vector<32x128xbf16>
    %c0_46 = arith.constant 0 : index
    %c0_47 = arith.constant 0 : index
    %160 = vector.load %arg21[%c0_46, %c0_47] : memref<128x512xbf16, #tpu.memory_space<vmem>>, vector<128x512xbf16>
    %cst_48 = arith.constant dense<0.000000e+00> : vector<32x512xf32>
    %161 = tpu.matmul %159, %160, %cst_48 {dimension_numbers = #tpu.dot_dimension_numbers<[1], [0], [0], [1], [0, 0, 1, 1], [], []>} : vector<32x128xbf16>, vector<128x512xbf16>, vector<32x512xf32> -> vector<32x512xf32>
    %162 = vector.extract_strided_slice %161 {offsets = [0, 0], sizes = [32, 128], strides = [1, 1]} : vector<32x512xf32> to vector<32x128xf32>
    %163 = arith.truncf %162 : vector<32x128xf32> to vector<32x128xbf16>
    %164 = vector.extract_strided_slice %161 {offsets = [0, 128], sizes = [32, 128], strides = [1, 1]} : vector<32x512xf32> to vector<32x128xf32>
    %165 = arith.truncf %164 : vector<32x128xf32> to vector<32x128xbf16>
    %166 = vector.extract_strided_slice %161 {offsets = [0, 256], sizes = [32, 128], strides = [1, 1]} : vector<32x512xf32> to vector<32x128xf32>
    %167 = math.absf %166 : vector<32x128xf32>
    %168 = arith.truncf %167 : vector<32x128xf32> to vector<32x128xbf16>
    %169 = vector.extract_strided_slice %161 {offsets = [0, 384], sizes = [32, 128], strides = [1, 1]} : vector<32x512xf32> to vector<32x128xf32>
    %170 = math.absf %169 : vector<32x128xf32>
    %171 = arith.truncf %170 : vector<32x128xf32> to vector<32x128xbf16>
    %172 = tpu.concatenate %159, %163, %165, %168, %171 in 0 : vector<32x128xbf16>, vector<32x128xbf16>, vector<32x128xbf16>, vector<32x128xbf16>, vector<32x128xbf16> -> vector<160x128xbf16>
    %c0_49 = arith.constant 0 : index
    %c0_50 = arith.constant 0 : index
    %173 = vector.load %arg12[%c0_49, %c0_50] : memref<32x160xbf16, #tpu.memory_space<vmem>>, vector<32x160xbf16>
    %cst_51 = arith.constant dense<0.000000e+00> : vector<32x128xf32>
    %174 = tpu.matmul %173, %172, %cst_51 {dimension_numbers = #tpu.dot_dimension_numbers<[1], [0], [0], [1], [0, 0, 1, 1], [], []>} : vector<32x160xbf16>, vector<160x128xbf16>, vector<32x128xf32> -> vector<32x128xf32>
    %c0_52 = arith.constant 0 : index
    %c0_53 = arith.constant 0 : index
    %175 = vector.load %arg13[%c0_52, %c0_53] : memref<32x1xf32, #tpu.memory_space<vmem>>, vector<32x1xf32>
    %176 = vector.broadcast %175 : vector<32x1xf32> to vector<32x128xf32>
    %177 = arith.addf %174, %176 : vector<32x128xf32>
    %cst_54 = arith.constant 0.000000e+00 : f32
    %178 = vector.broadcast %cst_54 : f32 to vector<32x128xf32>
    %179 = arith.cmpf oge, %177, %178 : vector<32x128xf32>
    %cst_55 = arith.constant 0.000000e+00 : f32
    %180 = vector.broadcast %cst_55 : f32 to vector<32x128xf32>
    %181 = arith.mulf %180, %177 : vector<32x128xf32>
    %182 = arith.select %179, %177, %181 : vector<32x128xi1>, vector<32x128xf32>
    %183 = vector.broadcast %10 : vector<1x128xf32> to vector<32x128xf32>
    %184 = arith.mulf %182, %183 : vector<32x128xf32>
    %cst_56 = arith.constant dense<0.000000e+00> : vector<32xf32>
    %185 = vector.multi_reduction <add>, %184, %cst_56 [1] : vector<32x128xf32> to vector<32xf32>
    %186 = vector.shape_cast %185 : vector<32xf32> to vector<32x1xf32>
    %187 = arith.mulf %184, %182 : vector<32x128xf32>
    %cst_57 = arith.constant dense<0.000000e+00> : vector<32xf32>
    %188 = vector.multi_reduction <add>, %187, %cst_57 [1] : vector<32x128xf32> to vector<32xf32>
    %189 = vector.shape_cast %188 : vector<32xf32> to vector<32x1xf32>
    %190 = vector.broadcast %5 : f32 to vector<32x1xf32>
    %191 = arith.mulf %186, %190 : vector<32x1xf32>
    %192 = vector.broadcast %5 : f32 to vector<32x1xf32>
    %193 = arith.mulf %189, %192 : vector<32x1xf32>
    %194 = arith.mulf %191, %191 : vector<32x1xf32>
    %195 = arith.subf %193, %194 : vector<32x1xf32>
    %cst_58 = arith.constant 0.000000e+00 : f32
    %196 = vector.broadcast %cst_58 : f32 to vector<32x1xf32>
    %197 = arith.maximumf %195, %196 : vector<32x1xf32>
    %198 = vector.broadcast %191 : vector<32x1xf32> to vector<32x128xf32>
    %199 = arith.subf %182, %198 : vector<32x128xf32>
    %cst_59 = arith.constant 9.99999974E-6 : f32
    %200 = vector.broadcast %cst_59 : f32 to vector<32x1xf32>
    %201 = arith.addf %197, %200 : vector<32x1xf32>
    %202 = math.rsqrt %201 : vector<32x1xf32>
    %203 = vector.broadcast %202 : vector<32x1xf32> to vector<32x128xf32>
    %204 = arith.mulf %199, %203 : vector<32x128xf32>
    %205 = arith.truncf %204 : vector<32x128xf32> to vector<32x128xbf16>
    %c0_60 = arith.constant 0 : index
    %c0_61 = arith.constant 0 : index
    %206 = vector.load %arg21[%c0_60, %c0_61] : memref<128x512xbf16, #tpu.memory_space<vmem>>, vector<128x512xbf16>
    %cst_62 = arith.constant dense<0.000000e+00> : vector<32x512xf32>
    %207 = tpu.matmul %205, %206, %cst_62 {dimension_numbers = #tpu.dot_dimension_numbers<[1], [0], [0], [1], [0, 0, 1, 1], [], []>} : vector<32x128xbf16>, vector<128x512xbf16>, vector<32x512xf32> -> vector<32x512xf32>
    %208 = vector.extract_strided_slice %207 {offsets = [0, 0], sizes = [32, 128], strides = [1, 1]} : vector<32x512xf32> to vector<32x128xf32>
    %209 = arith.truncf %208 : vector<32x128xf32> to vector<32x128xbf16>
    %210 = vector.extract_strided_slice %207 {offsets = [0, 128], sizes = [32, 128], strides = [1, 1]} : vector<32x512xf32> to vector<32x128xf32>
    %211 = arith.truncf %210 : vector<32x128xf32> to vector<32x128xbf16>
    %212 = vector.extract_strided_slice %207 {offsets = [0, 256], sizes = [32, 128], strides = [1, 1]} : vector<32x512xf32> to vector<32x128xf32>
    %213 = math.absf %212 : vector<32x128xf32>
    %214 = arith.truncf %213 : vector<32x128xf32> to vector<32x128xbf16>
    %215 = vector.extract_strided_slice %207 {offsets = [0, 384], sizes = [32, 128], strides = [1, 1]} : vector<32x512xf32> to vector<32x128xf32>
    %216 = math.absf %215 : vector<32x128xf32>
    %217 = arith.truncf %216 : vector<32x128xf32> to vector<32x128xbf16>
    %218 = tpu.concatenate %205, %209, %211, %214, %217 in 0 : vector<32x128xbf16>, vector<32x128xbf16>, vector<32x128xbf16>, vector<32x128xbf16>, vector<32x128xbf16> -> vector<160x128xbf16>
    %c0_63 = arith.constant 0 : index
    %c0_64 = arith.constant 0 : index
    %219 = vector.load %arg14[%c0_63, %c0_64] : memref<6x160xbf16, #tpu.memory_space<vmem>>, vector<6x160xbf16>
    %cst_65 = arith.constant dense<0.000000e+00> : vector<6x128xf32>
    %220 = tpu.matmul %219, %218, %cst_65 {dimension_numbers = #tpu.dot_dimension_numbers<[1], [0], [0], [1], [0, 0, 1, 1], [], []>} : vector<6x160xbf16>, vector<160x128xbf16>, vector<6x128xf32> -> vector<6x128xf32>
    %c0_66 = arith.constant 0 : index
    %c0_67 = arith.constant 0 : index
    %221 = vector.load %arg15[%c0_66, %c0_67] : memref<6x1xf32, #tpu.memory_space<vmem>>, vector<6x1xf32>
    %222 = vector.broadcast %221 : vector<6x1xf32> to vector<6x128xf32>
    %223 = arith.addf %220, %222 : vector<6x128xf32>
    %224 = arith.truncf %223 : vector<6x128xf32> to vector<6x128xbf16>
    %c0_68 = arith.constant 0 : index
    %c0_69 = arith.constant 0 : index
    %225 = vector.load %arg21[%c0_68, %c0_69] : memref<128x512xbf16, #tpu.memory_space<vmem>>, vector<128x512xbf16>
    %cst_70 = arith.constant dense<0.000000e+00> : vector<6x512xf32>
    %226 = tpu.matmul %224, %225, %cst_70 {dimension_numbers = #tpu.dot_dimension_numbers<[1], [0], [0], [1], [0, 0, 1, 1], [], []>} : vector<6x128xbf16>, vector<128x512xbf16>, vector<6x512xf32> -> vector<6x512xf32>
    %227 = vector.extract_strided_slice %226 {offsets = [0, 0], sizes = [6, 128], strides = [1, 1]} : vector<6x512xf32> to vector<6x128xf32>
    %228 = arith.truncf %227 : vector<6x128xf32> to vector<6x128xbf16>
    %229 = vector.extract_strided_slice %226 {offsets = [0, 128], sizes = [6, 128], strides = [1, 1]} : vector<6x512xf32> to vector<6x128xf32>
    %230 = arith.truncf %229 : vector<6x128xf32> to vector<6x128xbf16>
    %231 = vector.extract_strided_slice %226 {offsets = [0, 256], sizes = [6, 128], strides = [1, 1]} : vector<6x512xf32> to vector<6x128xf32>
    %232 = math.absf %231 : vector<6x128xf32>
    %233 = arith.truncf %232 : vector<6x128xf32> to vector<6x128xbf16>
    %234 = vector.extract_strided_slice %226 {offsets = [0, 384], sizes = [6, 128], strides = [1, 1]} : vector<6x512xf32> to vector<6x128xf32>
    %235 = math.absf %234 : vector<6x128xf32>
    %236 = arith.truncf %235 : vector<6x128xf32> to vector<6x128xbf16>
    %237 = tpu.concatenate %224, %228, %230, %233, %236 in 0 : vector<6x128xbf16>, vector<6x128xbf16>, vector<6x128xbf16>, vector<6x128xbf16>, vector<6x128xbf16> -> vector<30x128xbf16>
    %c0_71 = arith.constant 0 : index
    %c0_72 = arith.constant 0 : index
    %238 = vector.load %arg16[%c0_71, %c0_72] : memref<6x30xbf16, #tpu.memory_space<vmem>>, vector<6x30xbf16>
    %cst_73 = arith.constant dense<0.000000e+00> : vector<6x128xf32>
    %239 = tpu.matmul %238, %237, %cst_73 {dimension_numbers = #tpu.dot_dimension_numbers<[1], [0], [0], [1], [0, 0, 1, 1], [], []>} : vector<6x30xbf16>, vector<30x128xbf16>, vector<6x128xf32> -> vector<6x128xf32>
    %c0_74 = arith.constant 0 : index
    %c0_75 = arith.constant 0 : index
    %240 = vector.load %arg17[%c0_74, %c0_75] : memref<6x1xf32, #tpu.memory_space<vmem>>, vector<6x1xf32>
    %241 = vector.broadcast %240 : vector<6x1xf32> to vector<6x128xf32>
    %242 = arith.addf %239, %241 : vector<6x128xf32>
    %cst_76 = arith.constant 0.000000e+00 : f32
    %243 = vector.broadcast %cst_76 : f32 to vector<6x128xf32>
    %244 = arith.cmpf oge, %242, %243 : vector<6x128xf32>
    %cst_77 = arith.constant 0.000000e+00 : f32
    %245 = vector.broadcast %cst_77 : f32 to vector<6x128xf32>
    %246 = arith.mulf %245, %242 : vector<6x128xf32>
    %247 = arith.select %244, %242, %246 : vector<6x128xi1>, vector<6x128xf32>
    %248 = vector.broadcast %10 : vector<1x128xf32> to vector<6x128xf32>
    %249 = arith.mulf %247, %248 : vector<6x128xf32>
    %cst_78 = arith.constant dense<0.000000e+00> : vector<6xf32>
    %250 = vector.multi_reduction <add>, %249, %cst_78 [1] : vector<6x128xf32> to vector<6xf32>
    %251 = vector.shape_cast %250 : vector<6xf32> to vector<6x1xf32>
    %252 = arith.mulf %249, %247 : vector<6x128xf32>
    %cst_79 = arith.constant dense<0.000000e+00> : vector<6xf32>
    %253 = vector.multi_reduction <add>, %252, %cst_79 [1] : vector<6x128xf32> to vector<6xf32>
    %254 = vector.shape_cast %253 : vector<6xf32> to vector<6x1xf32>
    %255 = vector.broadcast %5 : f32 to vector<6x1xf32>
    %256 = arith.mulf %251, %255 : vector<6x1xf32>
    %257 = vector.broadcast %5 : f32 to vector<6x1xf32>
    %258 = arith.mulf %254, %257 : vector<6x1xf32>
    %259 = arith.mulf %256, %256 : vector<6x1xf32>
    %260 = arith.subf %258, %259 : vector<6x1xf32>
    %cst_80 = arith.constant 0.000000e+00 : f32
    %261 = vector.broadcast %cst_80 : f32 to vector<6x1xf32>
    %262 = arith.maximumf %260, %261 : vector<6x1xf32>
    %263 = vector.broadcast %256 : vector<6x1xf32> to vector<6x128xf32>
    %264 = arith.subf %247, %263 : vector<6x128xf32>
    %cst_81 = arith.constant 9.99999974E-6 : f32
    %265 = vector.broadcast %cst_81 : f32 to vector<6x1xf32>
    %266 = arith.addf %262, %265 : vector<6x1xf32>
    %267 = math.rsqrt %266 : vector<6x1xf32>
    %268 = vector.broadcast %267 : vector<6x1xf32> to vector<6x128xf32>
    %269 = arith.mulf %264, %268 : vector<6x128xf32>
    %270 = vector.broadcast %10 : vector<1x128xf32> to vector<6x128xf32>
    %271 = arith.mulf %269, %270 : vector<6x128xf32>
    %cst_82 = arith.constant dense<0.000000e+00> : vector<6xf32>
    %272 = vector.multi_reduction <add>, %271, %cst_82 [1] : vector<6x128xf32> to vector<6xf32>
    %273 = vector.shape_cast %272 : vector<6xf32> to vector<6x1xf32>
    %274 = arith.mulf %271, %269 : vector<6x128xf32>
    %cst_83 = arith.constant dense<0.000000e+00> : vector<6xf32>
    %275 = vector.multi_reduction <add>, %274, %cst_83 [1] : vector<6x128xf32> to vector<6xf32>
    %276 = vector.shape_cast %275 : vector<6xf32> to vector<6x1xf32>
    %277 = vector.broadcast %5 : f32 to vector<6x1xf32>
    %278 = arith.mulf %273, %277 : vector<6x1xf32>
    %279 = vector.broadcast %5 : f32 to vector<6x1xf32>
    %280 = arith.mulf %276, %279 : vector<6x1xf32>
    %281 = arith.mulf %278, %278 : vector<6x1xf32>
    %282 = arith.subf %280, %281 : vector<6x1xf32>
    %cst_84 = arith.constant 0.000000e+00 : f32
    %283 = vector.broadcast %cst_84 : f32 to vector<6x1xf32>
    %284 = arith.maximumf %282, %283 : vector<6x1xf32>
    %285 = vector.broadcast %278 : vector<6x1xf32> to vector<6x128xf32>
    %286 = arith.subf %269, %285 : vector<6x128xf32>
    %cst_85 = arith.constant 9.99999974E-6 : f32
    %287 = vector.broadcast %cst_85 : f32 to vector<6x1xf32>
    %288 = arith.addf %284, %287 : vector<6x1xf32>
    %289 = math.rsqrt %288 : vector<6x1xf32>
    %290 = vector.broadcast %289 : vector<6x1xf32> to vector<6x128xf32>
    %291 = arith.mulf %286, %290 : vector<6x128xf32>
    %292 = arith.truncf %291 : vector<6x128xf32> to vector<6x128xbf16>
    %c0_86 = arith.constant 0 : index
    %c0_87 = arith.constant 0 : index
    %293 = vector.load %arg21[%c0_86, %c0_87] : memref<128x512xbf16, #tpu.memory_space<vmem>>, vector<128x512xbf16>
    %cst_88 = arith.constant dense<0.000000e+00> : vector<6x512xf32>
    %294 = tpu.matmul %292, %293, %cst_88 {dimension_numbers = #tpu.dot_dimension_numbers<[1], [0], [0], [1], [0, 0, 1, 1], [], []>} : vector<6x128xbf16>, vector<128x512xbf16>, vector<6x512xf32> -> vector<6x512xf32>
    %295 = vector.extract_strided_slice %294 {offsets = [0, 0], sizes = [6, 128], strides = [1, 1]} : vector<6x512xf32> to vector<6x128xf32>
    %296 = arith.truncf %295 : vector<6x128xf32> to vector<6x128xbf16>
    %297 = vector.extract_strided_slice %294 {offsets = [0, 128], sizes = [6, 128], strides = [1, 1]} : vector<6x512xf32> to vector<6x128xf32>
    %298 = arith.truncf %297 : vector<6x128xf32> to vector<6x128xbf16>
    %299 = vector.extract_strided_slice %294 {offsets = [0, 256], sizes = [6, 128], strides = [1, 1]} : vector<6x512xf32> to vector<6x128xf32>
    %300 = math.absf %299 : vector<6x128xf32>
    %301 = arith.truncf %300 : vector<6x128xf32> to vector<6x128xbf16>
    %302 = vector.extract_strided_slice %294 {offsets = [0, 384], sizes = [6, 128], strides = [1, 1]} : vector<6x512xf32> to vector<6x128xf32>
    %303 = math.absf %302 : vector<6x128xf32>
    %304 = arith.truncf %303 : vector<6x128xf32> to vector<6x128xbf16>
    %305 = tpu.concatenate %292, %296, %298, %301, %304 in 0 : vector<6x128xbf16>, vector<6x128xbf16>, vector<6x128xbf16>, vector<6x128xbf16>, vector<6x128xbf16> -> vector<30x128xbf16>
    %c0_89 = arith.constant 0 : index
    %c0_90 = arith.constant 0 : index
    %306 = vector.load %arg18[%c0_89, %c0_90] : memref<6x30xbf16, #tpu.memory_space<vmem>>, vector<6x30xbf16>
    %cst_91 = arith.constant dense<0.000000e+00> : vector<6x128xf32>
    %307 = tpu.matmul %306, %305, %cst_91 {dimension_numbers = #tpu.dot_dimension_numbers<[1], [0], [0], [1], [0, 0, 1, 1], [], []>} : vector<6x30xbf16>, vector<30x128xbf16>, vector<6x128xf32> -> vector<6x128xf32>
    %c0_92 = arith.constant 0 : index
    %c0_93 = arith.constant 0 : index
    %308 = vector.load %arg19[%c0_92, %c0_93] : memref<6x1xf32, #tpu.memory_space<vmem>>, vector<6x1xf32>
    %309 = vector.broadcast %308 : vector<6x1xf32> to vector<6x128xf32>
    %310 = arith.addf %307, %309 : vector<6x128xf32>
    %311 = vector.extract_strided_slice %310 {offsets = [0, 0], sizes = [3, 128], strides = [1, 1]} : vector<6x128xf32> to vector<3x128xf32>
    %312 = arith.truncf %311 : vector<3x128xf32> to vector<3x128xbf16>
    %313 = vector.extract_strided_slice %310 {offsets = [3, 0], sizes = [3, 128], strides = [1, 1]} : vector<6x128xf32> to vector<3x128xf32>
    %314 = arith.truncf %313 : vector<3x128xf32> to vector<3x128xbf16>
    %c0_94 = arith.constant 0 : index
    %c0_95 = arith.constant 0 : index
    %c0_96 = arith.constant 0 : index
    %315 = vector.load %arg4[%c0_94, %c0_95, %c0_96] : memref<2x256x128xbf16, #tpu.memory_space<vmem>>, vector<1x128x128xbf16>
    %316 = vector.shape_cast %315 : vector<1x128x128xbf16> to vector<128x128xbf16>
    %cst_97 = arith.constant dense<0.000000e+00> : vector<3x128xf32>
    %317 = tpu.matmul %312, %316, %cst_97 {dimension_numbers = #tpu.dot_dimension_numbers<[1], [0], [0], [1], [0, 0, 1, 1], [], []>} : vector<3x128xbf16>, vector<128x128xbf16>, vector<3x128xf32> -> vector<3x128xf32>
    %c0_98 = arith.constant 0 : index
    %c128_99 = arith.constant 128 : index
    %c0_100 = arith.constant 0 : index
    %318 = vector.load %arg4[%c0_98, %c128_99, %c0_100] : memref<2x256x128xbf16, #tpu.memory_space<vmem>>, vector<1x128x128xbf16>
    %319 = vector.shape_cast %318 : vector<1x128x128xbf16> to vector<128x128xbf16>
    %cst_101 = arith.constant dense<0.000000e+00> : vector<3x128xf32>
    %320 = tpu.matmul %314, %319, %cst_101 {dimension_numbers = #tpu.dot_dimension_numbers<[1], [0], [0], [1], [0, 0, 1, 1], [], []>} : vector<3x128xbf16>, vector<128x128xbf16>, vector<3x128xf32> -> vector<3x128xf32>
    %321 = arith.addf %317, %320 : vector<3x128xf32>
    %c0_102 = arith.constant 0 : index
    %c0_103 = arith.constant 0 : index
    %c0_104 = arith.constant 0 : index
    %322 = vector.load %arg5[%c0_102, %c0_103, %c0_104] : memref<2x3x128xf32, #tpu.memory_space<vmem>>, vector<1x3x128xf32>
    %323 = vector.shape_cast %322 : vector<1x3x128xf32> to vector<3x128xf32>
    %324 = arith.addf %321, %323 : vector<3x128xf32>
    %c0_105 = arith.constant 0 : index
    %c0_106 = arith.constant 0 : index
    %c0_107 = arith.constant 0 : index
    %325 = vector.load %arg20[%c0_105, %c0_106, %c0_107] : memref<2x3x128xf32, #tpu.memory_space<vmem>>, vector<1x3x128xf32>
    %326 = vector.shape_cast %325 : vector<1x3x128xf32> to vector<3x128xf32>
    %327 = vector.shape_cast %324 : vector<3x128xf32> to vector<1x3x128xf32>
    tpu.vector_store %arg20[%c0_105, %c0_106, %c0_107], %327 {strides = array<i32>} : memref<2x3x128xf32, #tpu.memory_space<vmem>>, vector<1x3x128xf32>,
    %c2_i32_108 = arith.constant 2 : i32
    %328 = arith.muli %arg0, %c2_i32_108 : i32
    %c1_i32 = arith.constant 1 : i32
    %329 = arith.addi %328, %c1_i32 : i32
    %330 = arith.index_cast %329 : i32 to index
    %331 = memref.load %arg1[%330] : memref<4xi32, #tpu.memory_space<smem>>
    %332 = arith.sitofp %331 : i32 to f32
    %cst_109 = arith.constant 1.000000e+00 : f32
    %333 = arith.divf %cst_109, %332 : f32
    %334 = tpu.iota {dimensions = array<i32: 1>} : vector<1x128xi32>
    %335 = vector.broadcast %331 : i32 to vector<1x128xi32>
    %336 = arith.cmpi slt, %334, %335 : vector<1x128xi32>
    %337 = arith.extui %336 : vector<1x128xi1> to vector<1x128xi32>
    %338 = arith.sitofp %337 : vector<1x128xi32> to vector<1x128xf32>
    %339 = tpu.iota {dimensions = array<i32: 0>} : vector<128x128xi32>
    %c1 = arith.constant 1 : index
    %c0_110 = arith.constant 0 : index
    %c0_111 = arith.constant 0 : index
    %340 = vector.load %arg3[%c1, %c0_110, %c0_111] : memref<2x4x128xi32, #tpu.memory_space<vmem>>, vector<1x4x128xi32>
    %341 = vector.shape_cast %340 : vector<1x4x128xi32> to vector<4x128xi32>
    %342 = vector.extract_strided_slice %341 {offsets = [0, 0], sizes = [1, 128], strides = [1, 1]} : vector<4x128xi32> to vector<1x128xi32>
    %343 = vector.broadcast %342 : vector<1x128xi32> to vector<128x128xi32>
    %344 = arith.cmpi eq, %339, %343 : vector<128x128xi32>
    %345 = arith.extui %344 : vector<128x128xi1> to vector<128x128xi32>
    %346 = arith.sitofp %345 : vector<128x128xi32> to vector<128x128xf32>
    %347 = vector.extract_strided_slice %341 {offsets = [1, 0], sizes = [1, 128], strides = [1, 1]} : vector<4x128xi32> to vector<1x128xi32>
    %348 = vector.broadcast %347 : vector<1x128xi32> to vector<128x128xi32>
    %349 = arith.cmpi eq, %339, %348 : vector<128x128xi32>
    %350 = arith.extui %349 : vector<128x128xi1> to vector<128x128xi32>
    %351 = arith.sitofp %350 : vector<128x128xi32> to vector<128x128xf32>
    %352 = vector.extract_strided_slice %341 {offsets = [2, 0], sizes = [1, 128], strides = [1, 1]} : vector<4x128xi32> to vector<1x128xi32>
    %353 = vector.broadcast %352 : vector<1x128xi32> to vector<128x128xi32>
    %354 = arith.cmpi eq, %339, %353 : vector<128x128xi32>
    %355 = arith.extui %354 : vector<128x128xi1> to vector<128x128xi32>
    %356 = arith.sitofp %355 : vector<128x128xi32> to vector<128x128xf32>
    %357 = vector.extract_strided_slice %341 {offsets = [3, 0], sizes = [1, 128], strides = [1, 1]} : vector<4x128xi32> to vector<1x128xi32>
    %358 = vector.broadcast %357 : vector<1x128xi32> to vector<128x128xi32>
    %359 = arith.cmpi eq, %339, %358 : vector<128x128xi32>
    %360 = arith.extui %359 : vector<128x128xi1> to vector<128x128xi32>
    %361 = arith.sitofp %360 : vector<128x128xi32> to vector<128x128xf32>
    %362 = arith.addf %346, %356 : vector<128x128xf32>
    %363 = arith.truncf %362 : vector<128x128xf32> to vector<128x128xbf16>
    %c0_112 = arith.constant 0 : index
    %c0_113 = arith.constant 0 : index
    %364 = vector.load %arg21[%c0_112, %c0_113] : memref<128x512xbf16, #tpu.memory_space<vmem>>, vector<128x128xbf16>
    tpu.vector_store %arg21[%c0_112, %c0_113], %363 {strides = array<i32>} : memref<128x512xbf16, #tpu.memory_space<vmem>>, vector<128x128xbf16>,
    %365 = arith.addf %351, %361 : vector<128x128xf32>
    %366 = arith.truncf %365 : vector<128x128xf32> to vector<128x128xbf16>
    %c0_114 = arith.constant 0 : index
    %c128_115 = arith.constant 128 : index
    %367 = vector.load %arg21[%c0_114, %c128_115] : memref<128x512xbf16, #tpu.memory_space<vmem>>, vector<128x128xbf16>
    tpu.vector_store %arg21[%c0_114, %c128_115], %366 {strides = array<i32>} : memref<128x512xbf16, #tpu.memory_space<vmem>>, vector<128x128xbf16>,
    %368 = arith.subf %346, %356 : vector<128x128xf32>
    %369 = arith.truncf %368 : vector<128x128xf32> to vector<128x128xbf16>
    %c0_116 = arith.constant 0 : index
    %c256_117 = arith.constant 256 : index
    %370 = vector.load %arg21[%c0_116, %c256_117] : memref<128x512xbf16, #tpu.memory_space<vmem>>, vector<128x128xbf16>
    tpu.vector_store %arg21[%c0_116, %c256_117], %369 {strides = array<i32>} : memref<128x512xbf16, #tpu.memory_space<vmem>>, vector<128x128xbf16>,
    %371 = arith.subf %351, %361 : vector<128x128xf32>
    %372 = arith.truncf %371 : vector<128x128xf32> to vector<128x128xbf16>
    %c0_118 = arith.constant 0 : index
    %c384_119 = arith.constant 384 : index
    %373 = vector.load %arg21[%c0_118, %c384_119] : memref<128x512xbf16, #tpu.memory_space<vmem>>, vector<128x128xbf16>
    tpu.vector_store %arg21[%c0_118, %c384_119], %372 {strides = array<i32>} : memref<128x512xbf16, #tpu.memory_space<vmem>>, vector<128x128xbf16>,
    %c1_120 = arith.constant 1 : index
    %c0_121 = arith.constant 0 : index
    %c0_122 = arith.constant 0 : index
    %374 = vector.load %arg2[%c1_120, %c0_121, %c0_122] : memref<2x6x128xf32, #tpu.memory_space<vmem>>, vector<1x6x128xf32>
    %375 = vector.shape_cast %374 : vector<1x6x128xf32> to vector<6x128xf32>
    %376 = arith.truncf %375 : vector<6x128xf32> to vector<6x128xbf16>
    %c0_123 = arith.constant 0 : index
    %c0_124 = arith.constant 0 : index
    %377 = vector.load %arg21[%c0_123, %c0_124] : memref<128x512xbf16, #tpu.memory_space<vmem>>, vector<128x512xbf16>
    %cst_125 = arith.constant dense<0.000000e+00> : vector<6x512xf32>
    %378 = tpu.matmul %376, %377, %cst_125 {dimension_numbers = #tpu.dot_dimension_numbers<[1], [0], [0], [1], [0, 0, 1, 1], [], []>} : vector<6x128xbf16>, vector<128x512xbf16>, vector<6x512xf32> -> vector<6x512xf32>
    %379 = vector.extract_strided_slice %378 {offsets = [0, 0], sizes = [6, 128], strides = [1, 1]} : vector<6x512xf32> to vector<6x128xf32>
    %380 = arith.truncf %379 : vector<6x128xf32> to vector<6x128xbf16>
    %381 = vector.extract_strided_slice %378 {offsets = [0, 128], sizes = [6, 128], strides = [1, 1]} : vector<6x512xf32> to vector<6x128xf32>
    %382 = arith.truncf %381 : vector<6x128xf32> to vector<6x128xbf16>
    %383 = vector.extract_strided_slice %378 {offsets = [0, 256], sizes = [6, 128], strides = [1, 1]} : vector<6x512xf32> to vector<6x128xf32>
    %384 = math.absf %383 : vector<6x128xf32>
    %385 = arith.truncf %384 : vector<6x128xf32> to vector<6x128xbf16>
    %386 = vector.extract_strided_slice %378 {offsets = [0, 384], sizes = [6, 128], strides = [1, 1]} : vector<6x512xf32> to vector<6x128xf32>
    %387 = math.absf %386 : vector<6x128xf32>
    %388 = arith.truncf %387 : vector<6x128xf32> to vector<6x128xbf16>
    %389 = tpu.concatenate %376, %380, %382, %385, %388 in 0 : vector<6x128xbf16>, vector<6x128xbf16>, vector<6x128xbf16>, vector<6x128xbf16>, vector<6x128xbf16> -> vector<30x128xbf16>
    %c0_126 = arith.constant 0 : index
    %c0_127 = arith.constant 0 : index
    %390 = vector.load %arg6[%c0_126, %c0_127] : memref<32x30xbf16, #tpu.memory_space<vmem>>, vector<32x30xbf16>
    %cst_128 = arith.constant dense<0.000000e+00> : vector<32x128xf32>
    %391 = tpu.matmul %390, %389, %cst_128 {dimension_numbers = #tpu.dot_dimension_numbers<[1], [0], [0], [1], [0, 0, 1, 1], [], []>} : vector<32x30xbf16>, vector<30x128xbf16>, vector<32x128xf32> -> vector<32x128xf32>
    %c0_129 = arith.constant 0 : index
    %c0_130 = arith.constant 0 : index
    %392 = vector.load %arg7[%c0_129, %c0_130] : memref<32x1xf32, #tpu.memory_space<vmem>>, vector<32x1xf32>
    %393 = vector.broadcast %392 : vector<32x1xf32> to vector<32x128xf32>
    %394 = arith.addf %391, %393 : vector<32x128xf32>
    %cst_131 = arith.constant 0.000000e+00 : f32
    %395 = vector.broadcast %cst_131 : f32 to vector<32x128xf32>
    %396 = arith.cmpf oge, %394, %395 : vector<32x128xf32>
    %cst_132 = arith.constant 0.000000e+00 : f32
    %397 = vector.broadcast %cst_132 : f32 to vector<32x128xf32>
    %398 = arith.mulf %397, %394 : vector<32x128xf32>
    %399 = arith.select %396, %394, %398 : vector<32x128xi1>, vector<32x128xf32>
    %400 = vector.broadcast %338 : vector<1x128xf32> to vector<32x128xf32>
    %401 = arith.mulf %399, %400 : vector<32x128xf32>
    %cst_133 = arith.constant dense<0.000000e+00> : vector<32xf32>
    %402 = vector.multi_reduction <add>, %401, %cst_133 [1] : vector<32x128xf32> to vector<32xf32>
    %403 = vector.shape_cast %402 : vector<32xf32> to vector<32x1xf32>
    %404 = arith.mulf %401, %399 : vector<32x128xf32>
    %cst_134 = arith.constant dense<0.000000e+00> : vector<32xf32>
    %405 = vector.multi_reduction <add>, %404, %cst_134 [1] : vector<32x128xf32> to vector<32xf32>
    %406 = vector.shape_cast %405 : vector<32xf32> to vector<32x1xf32>
    %407 = vector.broadcast %333 : f32 to vector<32x1xf32>
    %408 = arith.mulf %403, %407 : vector<32x1xf32>
    %409 = vector.broadcast %333 : f32 to vector<32x1xf32>
    %410 = arith.mulf %406, %409 : vector<32x1xf32>
    %411 = arith.mulf %408, %408 : vector<32x1xf32>
    %412 = arith.subf %410, %411 : vector<32x1xf32>
    %cst_135 = arith.constant 0.000000e+00 : f32
    %413 = vector.broadcast %cst_135 : f32 to vector<32x1xf32>
    %414 = arith.maximumf %412, %413 : vector<32x1xf32>
    %415 = vector.broadcast %408 : vector<32x1xf32> to vector<32x128xf32>
    %416 = arith.subf %399, %415 : vector<32x128xf32>
    %cst_136 = arith.constant 9.99999974E-6 : f32
    %417 = vector.broadcast %cst_136 : f32 to vector<32x1xf32>
    %418 = arith.addf %414, %417 : vector<32x1xf32>
    %419 = math.rsqrt %418 : vector<32x1xf32>
    %420 = vector.broadcast %419 : vector<32x1xf32> to vector<32x128xf32>
    %421 = arith.mulf %416, %420 : vector<32x128xf32>
    %422 = arith.truncf %421 : vector<32x128xf32> to vector<32x128xbf16>
    %c0_137 = arith.constant 0 : index
    %c0_138 = arith.constant 0 : index
    %423 = vector.load %arg21[%c0_137, %c0_138] : memref<128x512xbf16, #tpu.memory_space<vmem>>, vector<128x512xbf16>
    %cst_139 = arith.constant dense<0.000000e+00> : vector<32x512xf32>
    %424 = tpu.matmul %422, %423, %cst_139 {dimension_numbers = #tpu.dot_dimension_numbers<[1], [0], [0], [1], [0, 0, 1, 1], [], []>} : vector<32x128xbf16>, vector<128x512xbf16>, vector<32x512xf32> -> vector<32x512xf32>
    %425 = vector.extract_strided_slice %424 {offsets = [0, 0], sizes = [32, 128], strides = [1, 1]} : vector<32x512xf32> to vector<32x128xf32>
    %426 = arith.truncf %425 : vector<32x128xf32> to vector<32x128xbf16>
    %427 = vector.extract_strided_slice %424 {offsets = [0, 128], sizes = [32, 128], strides = [1, 1]} : vector<32x512xf32> to vector<32x128xf32>
    %428 = arith.truncf %427 : vector<32x128xf32> to vector<32x128xbf16>
    %429 = vector.extract_strided_slice %424 {offsets = [0, 256], sizes = [32, 128], strides = [1, 1]} : vector<32x512xf32> to vector<32x128xf32>
    %430 = math.absf %429 : vector<32x128xf32>
    %431 = arith.truncf %430 : vector<32x128xf32> to vector<32x128xbf16>
    %432 = vector.extract_strided_slice %424 {offsets = [0, 384], sizes = [32, 128], strides = [1, 1]} : vector<32x512xf32> to vector<32x128xf32>
    %433 = math.absf %432 : vector<32x128xf32>
    %434 = arith.truncf %433 : vector<32x128xf32> to vector<32x128xbf16>
    %435 = tpu.concatenate %422, %426, %428, %431, %434 in 0 : vector<32x128xbf16>, vector<32x128xbf16>, vector<32x128xbf16>, vector<32x128xbf16>, vector<32x128xbf16> -> vector<160x128xbf16>
    %c0_140 = arith.constant 0 : index
    %c0_141 = arith.constant 0 : index
    %436 = vector.load %arg8[%c0_140, %c0_141] : memref<64x160xbf16, #tpu.memory_space<vmem>>, vector<64x160xbf16>
    %cst_142 = arith.constant dense<0.000000e+00> : vector<64x128xf32>
    %437 = tpu.matmul %436, %435, %cst_142 {dimension_numbers = #tpu.dot_dimension_numbers<[1], [0], [0], [1], [0, 0, 1, 1], [], []>} : vector<64x160xbf16>, vector<160x128xbf16>, vector<64x128xf32> -> vector<64x128xf32>
    %c0_143 = arith.constant 0 : index
    %c0_144 = arith.constant 0 : index
    %438 = vector.load %arg9[%c0_143, %c0_144] : memref<64x1xf32, #tpu.memory_space<vmem>>, vector<64x1xf32>
    %439 = vector.broadcast %438 : vector<64x1xf32> to vector<64x128xf32>
    %440 = arith.addf %437, %439 : vector<64x128xf32>
    %cst_145 = arith.constant 0.000000e+00 : f32
    %441 = vector.broadcast %cst_145 : f32 to vector<64x128xf32>
    %442 = arith.cmpf oge, %440, %441 : vector<64x128xf32>
    %cst_146 = arith.constant 0.000000e+00 : f32
    %443 = vector.broadcast %cst_146 : f32 to vector<64x128xf32>
    %444 = arith.mulf %443, %440 : vector<64x128xf32>
    %445 = arith.select %442, %440, %444 : vector<64x128xi1>, vector<64x128xf32>
    %446 = vector.broadcast %338 : vector<1x128xf32> to vector<64x128xf32>
    %447 = arith.mulf %445, %446 : vector<64x128xf32>
    %cst_147 = arith.constant dense<0.000000e+00> : vector<64xf32>
    %448 = vector.multi_reduction <add>, %447, %cst_147 [1] : vector<64x128xf32> to vector<64xf32>
    %449 = vector.shape_cast %448 : vector<64xf32> to vector<64x1xf32>
    %450 = arith.mulf %447, %445 : vector<64x128xf32>
    %cst_148 = arith.constant dense<0.000000e+00> : vector<64xf32>
    %451 = vector.multi_reduction <add>, %450, %cst_148 [1] : vector<64x128xf32> to vector<64xf32>
    %452 = vector.shape_cast %451 : vector<64xf32> to vector<64x1xf32>
    %453 = vector.broadcast %333 : f32 to vector<64x1xf32>
    %454 = arith.mulf %449, %453 : vector<64x1xf32>
    %455 = vector.broadcast %333 : f32 to vector<64x1xf32>
    %456 = arith.mulf %452, %455 : vector<64x1xf32>
    %457 = arith.mulf %454, %454 : vector<64x1xf32>
    %458 = arith.subf %456, %457 : vector<64x1xf32>
    %cst_149 = arith.constant 0.000000e+00 : f32
    %459 = vector.broadcast %cst_149 : f32 to vector<64x1xf32>
    %460 = arith.maximumf %458, %459 : vector<64x1xf32>
    %461 = vector.broadcast %454 : vector<64x1xf32> to vector<64x128xf32>
    %462 = arith.subf %445, %461 : vector<64x128xf32>
    %cst_150 = arith.constant 9.99999974E-6 : f32
    %463 = vector.broadcast %cst_150 : f32 to vector<64x1xf32>
    %464 = arith.addf %460, %463 : vector<64x1xf32>
    %465 = math.rsqrt %464 : vector<64x1xf32>
    %466 = vector.broadcast %465 : vector<64x1xf32> to vector<64x128xf32>
    %467 = arith.mulf %462, %466 : vector<64x128xf32>
    %468 = arith.truncf %467 : vector<64x128xf32> to vector<64x128xbf16>
    %c0_151 = arith.constant 0 : index
    %c0_152 = arith.constant 0 : index
    %469 = vector.load %arg21[%c0_151, %c0_152] : memref<128x512xbf16, #tpu.memory_space<vmem>>, vector<128x512xbf16>
    %cst_153 = arith.constant dense<0.000000e+00> : vector<64x512xf32>
    %470 = tpu.matmul %468, %469, %cst_153 {dimension_numbers = #tpu.dot_dimension_numbers<[1], [0], [0], [1], [0, 0, 1, 1], [], []>} : vector<64x128xbf16>, vector<128x512xbf16>, vector<64x512xf32> -> vector<64x512xf32>
    %471 = vector.extract_strided_slice %470 {offsets = [0, 0], sizes = [64, 128], strides = [1, 1]} : vector<64x512xf32> to vector<64x128xf32>
    %472 = arith.truncf %471 : vector<64x128xf32> to vector<64x128xbf16>
    %473 = vector.extract_strided_slice %470 {offsets = [0, 128], sizes = [64, 128], strides = [1, 1]} : vector<64x512xf32> to vector<64x128xf32>
    %474 = arith.truncf %473 : vector<64x128xf32> to vector<64x128xbf16>
    %475 = vector.extract_strided_slice %470 {offsets = [0, 256], sizes = [64, 128], strides = [1, 1]} : vector<64x512xf32> to vector<64x128xf32>
    %476 = math.absf %475 : vector<64x128xf32>
    %477 = arith.truncf %476 : vector<64x128xf32> to vector<64x128xbf16>
    %478 = vector.extract_strided_slice %470 {offsets = [0, 384], sizes = [64, 128], strides = [1, 1]} : vector<64x512xf32> to vector<64x128xf32>
    %479 = math.absf %478 : vector<64x128xf32>
    %480 = arith.truncf %479 : vector<64x128xf32> to vector<64x128xbf16>
    %481 = tpu.concatenate %468, %472, %474, %477, %480 in 0 : vector<64x128xbf16>, vector<64x128xbf16>, vector<64x128xbf16>, vector<64x128xbf16>, vector<64x128xbf16> -> vector<320x128xbf16>
    %c0_154 = arith.constant 0 : index
    %c0_155 = arith.constant 0 : index
    %482 = vector.load %arg10[%c0_154, %c0_155] : memref<32x320xbf16, #tpu.memory_space<vmem>>, vector<32x320xbf16>
    %cst_156 = arith.constant dense<0.000000e+00> : vector<32x128xf32>
    %483 = tpu.matmul %482, %481, %cst_156 {dimension_numbers = #tpu.dot_dimension_numbers<[1], [0], [0], [1], [0, 0, 1, 1], [], []>} : vector<32x320xbf16>, vector<320x128xbf16>, vector<32x128xf32> -> vector<32x128xf32>
    %c0_157 = arith.constant 0 : index
    %c0_158 = arith.constant 0 : index
    %484 = vector.load %arg11[%c0_157, %c0_158] : memref<32x1xf32, #tpu.memory_space<vmem>>, vector<32x1xf32>
    %485 = vector.broadcast %484 : vector<32x1xf32> to vector<32x128xf32>
    %486 = arith.addf %483, %485 : vector<32x128xf32>
    %487 = arith.truncf %486 : vector<32x128xf32> to vector<32x128xbf16>
    %c0_159 = arith.constant 0 : index
    %c0_160 = arith.constant 0 : index
    %488 = vector.load %arg21[%c0_159, %c0_160] : memref<128x512xbf16, #tpu.memory_space<vmem>>, vector<128x512xbf16>
    %cst_161 = arith.constant dense<0.000000e+00> : vector<32x512xf32>
    %489 = tpu.matmul %487, %488, %cst_161 {dimension_numbers = #tpu.dot_dimension_numbers<[1], [0], [0], [1], [0, 0, 1, 1], [], []>} : vector<32x128xbf16>, vector<128x512xbf16>, vector<32x512xf32> -> vector<32x512xf32>
    %490 = vector.extract_strided_slice %489 {offsets = [0, 0], sizes = [32, 128], strides = [1, 1]} : vector<32x512xf32> to vector<32x128xf32>
    %491 = arith.truncf %490 : vector<32x128xf32> to vector<32x128xbf16>
    %492 = vector.extract_strided_slice %489 {offsets = [0, 128], sizes = [32, 128], strides = [1, 1]} : vector<32x512xf32> to vector<32x128xf32>
    %493 = arith.truncf %492 : vector<32x128xf32> to vector<32x128xbf16>
    %494 = vector.extract_strided_slice %489 {offsets = [0, 256], sizes = [32, 128], strides = [1, 1]} : vector<32x512xf32> to vector<32x128xf32>
    %495 = math.absf %494 : vector<32x128xf32>
    %496 = arith.truncf %495 : vector<32x128xf32> to vector<32x128xbf16>
    %497 = vector.extract_strided_slice %489 {offsets = [0, 384], sizes = [32, 128], strides = [1, 1]} : vector<32x512xf32> to vector<32x128xf32>
    %498 = math.absf %497 : vector<32x128xf32>
    %499 = arith.truncf %498 : vector<32x128xf32> to vector<32x128xbf16>
    %500 = tpu.concatenate %487, %491, %493, %496, %499 in 0 : vector<32x128xbf16>, vector<32x128xbf16>, vector<32x128xbf16>, vector<32x128xbf16>, vector<32x128xbf16> -> vector<160x128xbf16>
    %c0_162 = arith.constant 0 : index
    %c0_163 = arith.constant 0 : index
    %501 = vector.load %arg12[%c0_162, %c0_163] : memref<32x160xbf16, #tpu.memory_space<vmem>>, vector<32x160xbf16>
    %cst_164 = arith.constant dense<0.000000e+00> : vector<32x128xf32>
    %502 = tpu.matmul %501, %500, %cst_164 {dimension_numbers = #tpu.dot_dimension_numbers<[1], [0], [0], [1], [0, 0, 1, 1], [], []>} : vector<32x160xbf16>, vector<160x128xbf16>, vector<32x128xf32> -> vector<32x128xf32>
    %c0_165 = arith.constant 0 : index
    %c0_166 = arith.constant 0 : index
    %503 = vector.load %arg13[%c0_165, %c0_166] : memref<32x1xf32, #tpu.memory_space<vmem>>, vector<32x1xf32>
    %504 = vector.broadcast %503 : vector<32x1xf32> to vector<32x128xf32>
    %505 = arith.addf %502, %504 : vector<32x128xf32>
    %cst_167 = arith.constant 0.000000e+00 : f32
    %506 = vector.broadcast %cst_167 : f32 to vector<32x128xf32>
    %507 = arith.cmpf oge, %505, %506 : vector<32x128xf32>
    %cst_168 = arith.constant 0.000000e+00 : f32
    %508 = vector.broadcast %cst_168 : f32 to vector<32x128xf32>
    %509 = arith.mulf %508, %505 : vector<32x128xf32>
    %510 = arith.select %507, %505, %509 : vector<32x128xi1>, vector<32x128xf32>
    %511 = vector.broadcast %338 : vector<1x128xf32> to vector<32x128xf32>
    %512 = arith.mulf %510, %511 : vector<32x128xf32>
    %cst_169 = arith.constant dense<0.000000e+00> : vector<32xf32>
    %513 = vector.multi_reduction <add>, %512, %cst_169 [1] : vector<32x128xf32> to vector<32xf32>
    %514 = vector.shape_cast %513 : vector<32xf32> to vector<32x1xf32>
    %515 = arith.mulf %512, %510 : vector<32x128xf32>
    %cst_170 = arith.constant dense<0.000000e+00> : vector<32xf32>
    %516 = vector.multi_reduction <add>, %515, %cst_170 [1] : vector<32x128xf32> to vector<32xf32>
    %517 = vector.shape_cast %516 : vector<32xf32> to vector<32x1xf32>
    %518 = vector.broadcast %333 : f32 to vector<32x1xf32>
    %519 = arith.mulf %514, %518 : vector<32x1xf32>
    %520 = vector.broadcast %333 : f32 to vector<32x1xf32>
    %521 = arith.mulf %517, %520 : vector<32x1xf32>
    %522 = arith.mulf %519, %519 : vector<32x1xf32>
    %523 = arith.subf %521, %522 : vector<32x1xf32>
    %cst_171 = arith.constant 0.000000e+00 : f32
    %524 = vector.broadcast %cst_171 : f32 to vector<32x1xf32>
    %525 = arith.maximumf %523, %524 : vector<32x1xf32>
    %526 = vector.broadcast %519 : vector<32x1xf32> to vector<32x128xf32>
    %527 = arith.subf %510, %526 : vector<32x128xf32>
    %cst_172 = arith.constant 9.99999974E-6 : f32
    %528 = vector.broadcast %cst_172 : f32 to vector<32x1xf32>
    %529 = arith.addf %525, %528 : vector<32x1xf32>
    %530 = math.rsqrt %529 : vector<32x1xf32>
    %531 = vector.broadcast %530 : vector<32x1xf32> to vector<32x128xf32>
    %532 = arith.mulf %527, %531 : vector<32x128xf32>
    %533 = arith.truncf %532 : vector<32x128xf32> to vector<32x128xbf16>
    %c0_173 = arith.constant 0 : index
    %c0_174 = arith.constant 0 : index
    %534 = vector.load %arg21[%c0_173, %c0_174] : memref<128x512xbf16, #tpu.memory_space<vmem>>, vector<128x512xbf16>
    %cst_175 = arith.constant dense<0.000000e+00> : vector<32x512xf32>
    %535 = tpu.matmul %533, %534, %cst_175 {dimension_numbers = #tpu.dot_dimension_numbers<[1], [0], [0], [1], [0, 0, 1, 1], [], []>} : vector<32x128xbf16>, vector<128x512xbf16>, vector<32x512xf32> -> vector<32x512xf32>
    %536 = vector.extract_strided_slice %535 {offsets = [0, 0], sizes = [32, 128], strides = [1, 1]} : vector<32x512xf32> to vector<32x128xf32>
    %537 = arith.truncf %536 : vector<32x128xf32> to vector<32x128xbf16>
    %538 = vector.extract_strided_slice %535 {offsets = [0, 128], sizes = [32, 128], strides = [1, 1]} : vector<32x512xf32> to vector<32x128xf32>
    %539 = arith.truncf %538 : vector<32x128xf32> to vector<32x128xbf16>
    %540 = vector.extract_strided_slice %535 {offsets = [0, 256], sizes = [32, 128], strides = [1, 1]} : vector<32x512xf32> to vector<32x128xf32>
    %541 = math.absf %540 : vector<32x128xf32>
    %542 = arith.truncf %541 : vector<32x128xf32> to vector<32x128xbf16>
    %543 = vector.extract_strided_slice %535 {offsets = [0, 384], sizes = [32, 128], strides = [1, 1]} : vector<32x512xf32> to vector<32x128xf32>
    %544 = math.absf %543 : vector<32x128xf32>
    %545 = arith.truncf %544 : vector<32x128xf32> to vector<32x128xbf16>
    %546 = tpu.concatenate %533, %537, %539, %542, %545 in 0 : vector<32x128xbf16>, vector<32x128xbf16>, vector<32x128xbf16>, vector<32x128xbf16>, vector<32x128xbf16> -> vector<160x128xbf16>
    %c0_176 = arith.constant 0 : index
    %c0_177 = arith.constant 0 : index
    %547 = vector.load %arg14[%c0_176, %c0_177] : memref<6x160xbf16, #tpu.memory_space<vmem>>, vector<6x160xbf16>
    %cst_178 = arith.constant dense<0.000000e+00> : vector<6x128xf32>
    %548 = tpu.matmul %547, %546, %cst_178 {dimension_numbers = #tpu.dot_dimension_numbers<[1], [0], [0], [1], [0, 0, 1, 1], [], []>} : vector<6x160xbf16>, vector<160x128xbf16>, vector<6x128xf32> -> vector<6x128xf32>
    %c0_179 = arith.constant 0 : index
    %c0_180 = arith.constant 0 : index
    %549 = vector.load %arg15[%c0_179, %c0_180] : memref<6x1xf32, #tpu.memory_space<vmem>>, vector<6x1xf32>
    %550 = vector.broadcast %549 : vector<6x1xf32> to vector<6x128xf32>
    %551 = arith.addf %548, %550 : vector<6x128xf32>
    %552 = arith.truncf %551 : vector<6x128xf32> to vector<6x128xbf16>
    %c0_181 = arith.constant 0 : index
    %c0_182 = arith.constant 0 : index
    %553 = vector.load %arg21[%c0_181, %c0_182] : memref<128x512xbf16, #tpu.memory_space<vmem>>, vector<128x512xbf16>
    %cst_183 = arith.constant dense<0.000000e+00> : vector<6x512xf32>
    %554 = tpu.matmul %552, %553, %cst_183 {dimension_numbers = #tpu.dot_dimension_numbers<[1], [0], [0], [1], [0, 0, 1, 1], [], []>} : vector<6x128xbf16>, vector<128x512xbf16>, vector<6x512xf32> -> vector<6x512xf32>
    %555 = vector.extract_strided_slice %554 {offsets = [0, 0], sizes = [6, 128], strides = [1, 1]} : vector<6x512xf32> to vector<6x128xf32>
    %556 = arith.truncf %555 : vector<6x128xf32> to vector<6x128xbf16>
    %557 = vector.extract_strided_slice %554 {offsets = [0, 128], sizes = [6, 128], strides = [1, 1]} : vector<6x512xf32> to vector<6x128xf32>
    %558 = arith.truncf %557 : vector<6x128xf32> to vector<6x128xbf16>
    %559 = vector.extract_strided_slice %554 {offsets = [0, 256], sizes = [6, 128], strides = [1, 1]} : vector<6x512xf32> to vector<6x128xf32>
    %560 = math.absf %559 : vector<6x128xf32>
    %561 = arith.truncf %560 : vector<6x128xf32> to vector<6x128xbf16>
    %562 = vector.extract_strided_slice %554 {offsets = [0, 384], sizes = [6, 128], strides = [1, 1]} : vector<6x512xf32> to vector<6x128xf32>
    %563 = math.absf %562 : vector<6x128xf32>
    %564 = arith.truncf %563 : vector<6x128xf32> to vector<6x128xbf16>
    %565 = tpu.concatenate %552, %556, %558, %561, %564 in 0 : vector<6x128xbf16>, vector<6x128xbf16>, vector<6x128xbf16>, vector<6x128xbf16>, vector<6x128xbf16> -> vector<30x128xbf16>
    %c0_184 = arith.constant 0 : index
    %c0_185 = arith.constant 0 : index
    %566 = vector.load %arg16[%c0_184, %c0_185] : memref<6x30xbf16, #tpu.memory_space<vmem>>, vector<6x30xbf16>
    %cst_186 = arith.constant dense<0.000000e+00> : vector<6x128xf32>
    %567 = tpu.matmul %566, %565, %cst_186 {dimension_numbers = #tpu.dot_dimension_numbers<[1], [0], [0], [1], [0, 0, 1, 1], [], []>} : vector<6x30xbf16>, vector<30x128xbf16>, vector<6x128xf32> -> vector<6x128xf32>
    %c0_187 = arith.constant 0 : index
    %c0_188 = arith.constant 0 : index
    %568 = vector.load %arg17[%c0_187, %c0_188] : memref<6x1xf32, #tpu.memory_space<vmem>>, vector<6x1xf32>
    %569 = vector.broadcast %568 : vector<6x1xf32> to vector<6x128xf32>
    %570 = arith.addf %567, %569 : vector<6x128xf32>
    %cst_189 = arith.constant 0.000000e+00 : f32
    %571 = vector.broadcast %cst_189 : f32 to vector<6x128xf32>
    %572 = arith.cmpf oge, %570, %571 : vector<6x128xf32>
    %cst_190 = arith.constant 0.000000e+00 : f32
    %573 = vector.broadcast %cst_190 : f32 to vector<6x128xf32>
    %574 = arith.mulf %573, %570 : vector<6x128xf32>
    %575 = arith.select %572, %570, %574 : vector<6x128xi1>, vector<6x128xf32>
    %576 = vector.broadcast %338 : vector<1x128xf32> to vector<6x128xf32>
    %577 = arith.mulf %575, %576 : vector<6x128xf32>
    %cst_191 = arith.constant dense<0.000000e+00> : vector<6xf32>
    %578 = vector.multi_reduction <add>, %577, %cst_191 [1] : vector<6x128xf32> to vector<6xf32>
    %579 = vector.shape_cast %578 : vector<6xf32> to vector<6x1xf32>
    %580 = arith.mulf %577, %575 : vector<6x128xf32>
    %cst_192 = arith.constant dense<0.000000e+00> : vector<6xf32>
    %581 = vector.multi_reduction <add>, %580, %cst_192 [1] : vector<6x128xf32> to vector<6xf32>
    %582 = vector.shape_cast %581 : vector<6xf32> to vector<6x1xf32>
    %583 = vector.broadcast %333 : f32 to vector<6x1xf32>
    %584 = arith.mulf %579, %583 : vector<6x1xf32>
    %585 = vector.broadcast %333 : f32 to vector<6x1xf32>
    %586 = arith.mulf %582, %585 : vector<6x1xf32>
    %587 = arith.mulf %584, %584 : vector<6x1xf32>
    %588 = arith.subf %586, %587 : vector<6x1xf32>
    %cst_193 = arith.constant 0.000000e+00 : f32
    %589 = vector.broadcast %cst_193 : f32 to vector<6x1xf32>
    %590 = arith.maximumf %588, %589 : vector<6x1xf32>
    %591 = vector.broadcast %584 : vector<6x1xf32> to vector<6x128xf32>
    %592 = arith.subf %575, %591 : vector<6x128xf32>
    %cst_194 = arith.constant 9.99999974E-6 : f32
    %593 = vector.broadcast %cst_194 : f32 to vector<6x1xf32>
    %594 = arith.addf %590, %593 : vector<6x1xf32>
    %595 = math.rsqrt %594 : vector<6x1xf32>
    %596 = vector.broadcast %595 : vector<6x1xf32> to vector<6x128xf32>
    %597 = arith.mulf %592, %596 : vector<6x128xf32>
    %598 = vector.broadcast %338 : vector<1x128xf32> to vector<6x128xf32>
    %599 = arith.mulf %597, %598 : vector<6x128xf32>
    %cst_195 = arith.constant dense<0.000000e+00> : vector<6xf32>
    %600 = vector.multi_reduction <add>, %599, %cst_195 [1] : vector<6x128xf32> to vector<6xf32>
    %601 = vector.shape_cast %600 : vector<6xf32> to vector<6x1xf32>
    %602 = arith.mulf %599, %597 : vector<6x128xf32>
    %cst_196 = arith.constant dense<0.000000e+00> : vector<6xf32>
    %603 = vector.multi_reduction <add>, %602, %cst_196 [1] : vector<6x128xf32> to vector<6xf32>
    %604 = vector.shape_cast %603 : vector<6xf32> to vector<6x1xf32>
    %605 = vector.broadcast %333 : f32 to vector<6x1xf32>
    %606 = arith.mulf %601, %605 : vector<6x1xf32>
    %607 = vector.broadcast %333 : f32 to vector<6x1xf32>
    %608 = arith.mulf %604, %607 : vector<6x1xf32>
    %609 = arith.mulf %606, %606 : vector<6x1xf32>
    %610 = arith.subf %608, %609 : vector<6x1xf32>
    %cst_197 = arith.constant 0.000000e+00 : f32
    %611 = vector.broadcast %cst_197 : f32 to vector<6x1xf32>
    %612 = arith.maximumf %610, %611 : vector<6x1xf32>
    %613 = vector.broadcast %606 : vector<6x1xf32> to vector<6x128xf32>
    %614 = arith.subf %597, %613 : vector<6x128xf32>
    %cst_198 = arith.constant 9.99999974E-6 : f32
    %615 = vector.broadcast %cst_198 : f32 to vector<6x1xf32>
    %616 = arith.addf %612, %615 : vector<6x1xf32>
    %617 = math.rsqrt %616 : vector<6x1xf32>
    %618 = vector.broadcast %617 : vector<6x1xf32> to vector<6x128xf32>
    %619 = arith.mulf %614, %618 : vector<6x128xf32>
    %620 = arith.truncf %619 : vector<6x128xf32> to vector<6x128xbf16>
    %c0_199 = arith.constant 0 : index
    %c0_200 = arith.constant 0 : index
    %621 = vector.load %arg21[%c0_199, %c0_200] : memref<128x512xbf16, #tpu.memory_space<vmem>>, vector<128x512xbf16>
    %cst_201 = arith.constant dense<0.000000e+00> : vector<6x512xf32>
    %622 = tpu.matmul %620, %621, %cst_201 {dimension_numbers = #tpu.dot_dimension_numbers<[1], [0], [0], [1], [0, 0, 1, 1], [], []>} : vector<6x128xbf16>, vector<128x512xbf16>, vector<6x512xf32> -> vector<6x512xf32>
    %623 = vector.extract_strided_slice %622 {offsets = [0, 0], sizes = [6, 128], strides = [1, 1]} : vector<6x512xf32> to vector<6x128xf32>
    %624 = arith.truncf %623 : vector<6x128xf32> to vector<6x128xbf16>
    %625 = vector.extract_strided_slice %622 {offsets = [0, 128], sizes = [6, 128], strides = [1, 1]} : vector<6x512xf32> to vector<6x128xf32>
    %626 = arith.truncf %625 : vector<6x128xf32> to vector<6x128xbf16>
    %627 = vector.extract_strided_slice %622 {offsets = [0, 256], sizes = [6, 128], strides = [1, 1]} : vector<6x512xf32> to vector<6x128xf32>
    %628 = math.absf %627 : vector<6x128xf32>
    %629 = arith.truncf %628 : vector<6x128xf32> to vector<6x128xbf16>
    %630 = vector.extract_strided_slice %622 {offsets = [0, 384], sizes = [6, 128], strides = [1, 1]} : vector<6x512xf32> to vector<6x128xf32>
    %631 = math.absf %630 : vector<6x128xf32>
    %632 = arith.truncf %631 : vector<6x128xf32> to vector<6x128xbf16>
    %633 = tpu.concatenate %620, %624, %626, %629, %632 in 0 : vector<6x128xbf16>, vector<6x128xbf16>, vector<6x128xbf16>, vector<6x128xbf16>, vector<6x128xbf16> -> vector<30x128xbf16>
    %c0_202 = arith.constant 0 : index
    %c0_203 = arith.constant 0 : index
    %634 = vector.load %arg18[%c0_202, %c0_203] : memref<6x30xbf16, #tpu.memory_space<vmem>>, vector<6x30xbf16>
    %cst_204 = arith.constant dense<0.000000e+00> : vector<6x128xf32>
    %635 = tpu.matmul %634, %633, %cst_204 {dimension_numbers = #tpu.dot_dimension_numbers<[1], [0], [0], [1], [0, 0, 1, 1], [], []>} : vector<6x30xbf16>, vector<30x128xbf16>, vector<6x128xf32> -> vector<6x128xf32>
    %c0_205 = arith.constant 0 : index
    %c0_206 = arith.constant 0 : index
    %636 = vector.load %arg19[%c0_205, %c0_206] : memref<6x1xf32, #tpu.memory_space<vmem>>, vector<6x1xf32>
    %637 = vector.broadcast %636 : vector<6x1xf32> to vector<6x128xf32>
    %638 = arith.addf %635, %637 : vector<6x128xf32>
    %639 = vector.extract_strided_slice %638 {offsets = [0, 0], sizes = [3, 128], strides = [1, 1]} : vector<6x128xf32> to vector<3x128xf32>
    %640 = arith.truncf %639 : vector<3x128xf32> to vector<3x128xbf16>
    %641 = vector.extract_strided_slice %638 {offsets = [3, 0], sizes = [3, 128], strides = [1, 1]} : vector<6x128xf32> to vector<3x128xf32>
    %642 = arith.truncf %641 : vector<3x128xf32> to vector<3x128xbf16>
    %c1_207 = arith.constant 1 : index
    %c0_208 = arith.constant 0 : index
    %c0_209 = arith.constant 0 : index
    %643 = vector.load %arg4[%c1_207, %c0_208, %c0_209] : memref<2x256x128xbf16, #tpu.memory_space<vmem>>, vector<1x128x128xbf16>
    %644 = vector.shape_cast %643 : vector<1x128x128xbf16> to vector<128x128xbf16>
    %cst_210 = arith.constant dense<0.000000e+00> : vector<3x128xf32>
    %645 = tpu.matmul %640, %644, %cst_210 {dimension_numbers = #tpu.dot_dimension_numbers<[1], [0], [0], [1], [0, 0, 1, 1], [], []>} : vector<3x128xbf16>, vector<128x128xbf16>, vector<3x128xf32> -> vector<3x128xf32>
    %c1_211 = arith.constant 1 : index
    %c128_212 = arith.constant 128 : index
    %c0_213 = arith.constant 0 : index
    %646 = vector.load %arg4[%c1_211, %c128_212, %c0_213] : memref<2x256x128xbf16, #tpu.memory_space<vmem>>, vector<1x128x128xbf16>
    %647 = vector.shape_cast %646 : vector<1x128x128xbf16> to vector<128x128xbf16>
    %cst_214 = arith.constant dense<0.000000e+00> : vector<3x128xf32>
    %648 = tpu.matmul %642, %647, %cst_214 {dimension_numbers = #tpu.dot_dimension_numbers<[1], [0], [0], [1], [0, 0, 1, 1], [], []>} : vector<3x128xbf16>, vector<128x128xbf16>, vector<3x128xf32> -> vector<3x128xf32>
    %649 = arith.addf %645, %648 : vector<3x128xf32>
    %c1_215 = arith.constant 1 : index
    %c0_216 = arith.constant 0 : index
    %c0_217 = arith.constant 0 : index
    %650 = vector.load %arg5[%c1_215, %c0_216, %c0_217] : memref<2x3x128xf32, #tpu.memory_space<vmem>>, vector<1x3x128xf32>
    %651 = vector.shape_cast %650 : vector<1x3x128xf32> to vector<3x128xf32>
    %652 = arith.addf %649, %651 : vector<3x128xf32>
    %c1_218 = arith.constant 1 : index
    %c0_219 = arith.constant 0 : index
    %c0_220 = arith.constant 0 : index
    %653 = vector.load %arg20[%c1_218, %c0_219, %c0_220] : memref<2x3x128xf32, #tpu.memory_space<vmem>>, vector<1x3x128xf32>
    %654 = vector.shape_cast %653 : vector<1x3x128xf32> to vector<3x128xf32>
    %655 = vector.shape_cast %652 : vector<3x128xf32> to vector<1x3x128xf32>
    tpu.vector_store %arg20[%c1_218, %c0_219, %c0_220], %655 {strides = array<i32>} : memref<2x3x128xf32, #tpu.memory_space<vmem>>, vector<1x3x128xf32>,
    return
  }
  func.func @transform_0(%arg0: i32, %arg1: memref<4xi32, #tpu.memory_space<smem>>) -> (i32, i32, i32) {
    %c0_i32 = arith.constant 0 : i32
    %c0_i32_0 = arith.constant 0 : i32
    %c0_i32_1 = arith.constant 0 : i32
    return %arg0, %c0_i32, %c0_i32_0 : i32, i32, i32
  }
  func.func @transform_1(%arg0: i32, %arg1: memref<4xi32, #tpu.memory_space<smem>>) -> (i32, i32, i32) {
    %c0_i32 = arith.constant 0 : i32
    %c0_i32_0 = arith.constant 0 : i32
    %c0_i32_1 = arith.constant 0 : i32
    return %arg0, %c0_i32, %c0_i32_0 : i32, i32, i32
  }
  func.func @transform_2(%arg0: i32, %arg1: memref<4xi32, #tpu.memory_space<smem>>) -> (i32, i32, i32) {
    %c0_i32 = arith.constant 0 : i32
    %c0_i32_0 = arith.constant 0 : i32
    %c0_i32_1 = arith.constant 0 : i32
    return %arg0, %c0_i32, %c0_i32_0 : i32, i32, i32
  }
  func.func @transform_3(%arg0: i32, %arg1: memref<4xi32, #tpu.memory_space<smem>>) -> (i32, i32, i32) {
    %c0_i32 = arith.constant 0 : i32
    %c0_i32_0 = arith.constant 0 : i32
    %c0_i32_1 = arith.constant 0 : i32
    return %arg0, %c0_i32, %c0_i32_0 : i32, i32, i32
  }
  func.func @transform_4(%arg0: i32, %arg1: memref<4xi32, #tpu.memory_space<smem>>) -> (i32, i32) {
    %c0_i32 = arith.constant 0 : i32
    %c0_i32_0 = arith.constant 0 : i32
    %c0_i32_1 = arith.constant 0 : i32
    return %c0_i32, %c0_i32_0 : i32, i32
  }
  func.func @transform_5(%arg0: i32, %arg1: memref<4xi32, #tpu.memory_space<smem>>) -> (i32, i32) {
    %c0_i32 = arith.constant 0 : i32
    %c0_i32_0 = arith.constant 0 : i32
    %c0_i32_1 = arith.constant 0 : i32
    return %c0_i32, %c0_i32_0 : i32, i32
  }
  func.func @transform_6(%arg0: i32, %arg1: memref<4xi32, #tpu.memory_space<smem>>) -> (i32, i32) {
    %c0_i32 = arith.constant 0 : i32
    %c0_i32_0 = arith.constant 0 : i32
    %c0_i32_1 = arith.constant 0 : i32
    return %c0_i32, %c0_i32_0 : i32, i32
  }
  func.func @transform_7(%arg0: i32, %arg1: memref<4xi32, #tpu.memory_space<smem>>) -> (i32, i32) {
    %c0_i32 = arith.constant 0 : i32
    %c0_i32_0 = arith.constant 0 : i32
    %c0_i32_1 = arith.constant 0 : i32
    return %c0_i32, %c0_i32_0 : i32, i32
  }
  func.func @transform_8(%arg0: i32, %arg1: memref<4xi32, #tpu.memory_space<smem>>) -> (i32, i32) {
    %c0_i32 = arith.constant 0 : i32
    %c0_i32_0 = arith.constant 0 : i32
    %c0_i32_1 = arith.constant 0 : i32
    return %c0_i32, %c0_i32_0 : i32, i32
  }
  func.func @transform_9(%arg0: i32, %arg1: memref<4xi32, #tpu.memory_space<smem>>) -> (i32, i32) {
    %c0_i32 = arith.constant 0 : i32
    %c0_i32_0 = arith.constant 0 : i32
    %c0_i32_1 = arith.constant 0 : i32
    return %c0_i32, %c0_i32_0 : i32, i32
  }
  func.func @transform_10(%arg0: i32, %arg1: memref<4xi32, #tpu.memory_space<smem>>) -> (i32, i32) {
    %c0_i32 = arith.constant 0 : i32
    %c0_i32_0 = arith.constant 0 : i32
    %c0_i32_1 = arith.constant 0 : i32
    return %c0_i32, %c0_i32_0 : i32, i32
  }
  func.func @transform_11(%arg0: i32, %arg1: memref<4xi32, #tpu.memory_space<smem>>) -> (i32, i32) {
    %c0_i32 = arith.constant 0 : i32
    %c0_i32_0 = arith.constant 0 : i32
    %c0_i32_1 = arith.constant 0 : i32
    return %c0_i32, %c0_i32_0 : i32, i32
  }
  func.func @transform_12(%arg0: i32, %arg1: memref<4xi32, #tpu.memory_space<smem>>) -> (i32, i32) {
    %c0_i32 = arith.constant 0 : i32
    %c0_i32_0 = arith.constant 0 : i32
    %c0_i32_1 = arith.constant 0 : i32
    return %c0_i32, %c0_i32_0 : i32, i32
  }
  func.func @transform_13(%arg0: i32, %arg1: memref<4xi32, #tpu.memory_space<smem>>) -> (i32, i32) {
    %c0_i32 = arith.constant 0 : i32
    %c0_i32_0 = arith.constant 0 : i32
    %c0_i32_1 = arith.constant 0 : i32
    return %c0_i32, %c0_i32_0 : i32, i32
  }
  func.func @transform_14(%arg0: i32, %arg1: memref<4xi32, #tpu.memory_space<smem>>) -> (i32, i32) {
    %c0_i32 = arith.constant 0 : i32
    %c0_i32_0 = arith.constant 0 : i32
    %c0_i32_1 = arith.constant 0 : i32
    return %c0_i32, %c0_i32_0 : i32, i32
  }
  func.func @transform_15(%arg0: i32, %arg1: memref<4xi32, #tpu.memory_space<smem>>) -> (i32, i32) {
    %c0_i32 = arith.constant 0 : i32
    %c0_i32_0 = arith.constant 0 : i32
    %c0_i32_1 = arith.constant 0 : i32
    return %c0_i32, %c0_i32_0 : i32, i32
  }
  func.func @transform_16(%arg0: i32, %arg1: memref<4xi32, #tpu.memory_space<smem>>) -> (i32, i32) {
    %c0_i32 = arith.constant 0 : i32
    %c0_i32_0 = arith.constant 0 : i32
    %c0_i32_1 = arith.constant 0 : i32
    return %c0_i32, %c0_i32_0 : i32, i32
  }
  func.func @transform_17(%arg0: i32, %arg1: memref<4xi32, #tpu.memory_space<smem>>) -> (i32, i32) {
    %c0_i32 = arith.constant 0 : i32
    %c0_i32_0 = arith.constant 0 : i32
    %c0_i32_1 = arith.constant 0 : i32
    return %c0_i32, %c0_i32_0 : i32, i32
  }
  func.func @transform_18(%arg0: i32, %arg1: memref<4xi32, #tpu.memory_space<smem>>) -> (i32, i32, i32) {
    %c0_i32 = arith.constant 0 : i32
    %c0_i32_0 = arith.constant 0 : i32
    %c0_i32_1 = arith.constant 0 : i32
    return %arg0, %c0_i32, %c0_i32_0 : i32, i32, i32
  }
}

</mosaic_0001>

<bundles_post_ra>
// kernel: run.1
= control target key start
LH: loop header
LB: loop body
LE: loop exit
PB: predicated region body
PF: predicated region fallthrough
CT: control target
= control target key end

     0   :  { %s7450_s21 = smov [#allocation4]   ;;  %s10240_s0 = inlined_call_operand.vmem [shape: s32[4], index: 0, kind: input, shape index: {}]   ;;  %s10241_s1 = inlined_call_operand.vmem [shape: f32[4,6,128], index: 1, kind: input, shape index: {}]   ;;  %s10242_s2 = inlined_call_operand.vmem [shape: s32[4,4,128], index: 2, kind: input, shape index: {}]   ;;  %s10243_s3 = inlined_call_operand.vmem [shape: bf16[4,256,128], index: 3, kind: input, shape index: {}]   ;;  %s10244_s4 = inlined_call_operand.vmem [shape: f32[4,3,128], index: 4, kind: input, shape index: {}]   ;;  %s10245_s5 = inlined_call_operand.vmem [shape: bf16[32,30], index: 5, kind: input, shape index: {}]   ;;  %s10246_s6 = inlined_call_operand.vmem [shape: f32[32,1], index: 6, kind: input, shape index: {}, may-alias: {6,10,12}]   ;;  %s10247_s7 = inlined_call_operand.vmem [shape: bf16[64,160], index: 7, kind: input, shape index: {}]   ;;  %s10248_s8 = inlined_call_operand.vmem [shape: f32[64,1], index: 8, kind: input, shape index: {}]   ;;  %s10249_s9 = inlined_call_operand.vmem [shape: bf16[32,320], index: 9, kind: input, shape index: {}]   ;;  %s10250_s10 = inlined_call_operand.vmem [shape: f32[32,1], index: 10, kind: input, shape index: {}, may-alias: {6,10,12}]   ;;  %s10251_s11 = inlined_call_operand.vmem [shape: bf16[32,160], index: 11, kind: input, shape index: {}]   ;;  %s10252_s12 = inlined_call_operand.vmem [shape: f32[32,1], index: 12, kind: input, shape index: {}, may-alias: {6,10,12}]   ;;  %s10253_s13 = inlined_call_operand.vmem [shape: bf16[6,160], index: 13, kind: input, shape index: {}]   ;;  %s10254_s14 = inlined_call_operand.vmem [shape: f32[6,1], index: 14, kind: input, shape index: {}, may-alias: {14,16}]   ;;  %s10255_s15 = inlined_call_operand.vmem [shape: bf16[6,30], index: 15, kind: input, shape index: {}]   ;;  %s10256_s16 = inlined_call_operand.vmem [shape: f32[6,1], index: 16, kind: input, shape index: {}, may-alias: {14,16}]   ;;  %s10257_s17 = inlined_call_operand.vmem [shape: bf16[6,30], index: 17, kind: input, shape index: {}]   ;;  %s10258_s18 = inlined_call_operand.vmem [shape: f32[6,1], index: 18, kind: input, shape index: {}]   ;;  %s10259_s19 = inlined_call_operand.vmem [shape: f32[4,3,128], index: 19, kind: output, shape index: {}]  }
   0x1   :  { %10379 = sst [smem:[#allocation33_spill]] %s10240_s0 }
   0x2   :  { %10380 = sst [smem:[#allocation34_spill]] %s10241_s1 }
   0x3   :  { %10381 = sst [smem:[#allocation35_spill]] %s10242_s2 }
   0x4   :  { %10382 = sst [smem:[#allocation36_spill]] %s10243_s3 }
   0x5   :  { %10383 = sst [smem:[#allocation37_spill]] %s10244_s4 }
   0x6   :  { %s10384_s20 = sld [smem:[#allocation33_spill]] }
   0xc   :  { %s25_s4 = sshll.u32 %s10384_s20, 4  ;;  %s26_s4 = int_to_ptr.vmem [resolvable:$true] %s25_s4 }
   0xd   :  { %28 = dma.vmem_to_smem %s26_s4, 16, %s7450_s21, [#allocation3] }
   0xe   :  { %7444 = dma.done.wait [#allocation3], 16 }
   0xf   :  { %7445 = vsyncadd [#allocation3], 4294967280 }
  0x10   :  { %31 = sfence }
  0x11   :  { %s7556_s1 = smov 0  }
  0x12 LB: > { %s6442_s22 = sadd.s32 4294967295, %s7448_s1   ;;  %p6446_p0 = scmp.ge.s32.totalorder %s7448_s1, 1  ;;  %s7448_s1 = sphi %s7556_s1, %s37_s1  }
  0x13   : > { %p556_p1 = scmp.lt.s32.totalorder %s7448_s1, 3 }
  0x15   : > { %p557_p2 = pnand %p6446_p0, %p556_p1 }
  0x17   : > { %560 = sbr.rel (%p557_p2) target bundleno = 6454 (0x1936), region = 92 }
  0x1c   : > { %s7564_s2 = sshll.u32 %s6442_s22, 1  ;;  %v10260_v0 = vlaneseq  ;;  %s10385_s3 = sld [smem:[#allocation35_spill]]  ;;  %v10265_v16 = vmov 0.0  }
  0x1d   : > { %p627_p3 = scmp.lt.s32.totalorder %s7564_s2, 3  ;;  %s10409_s0 = sld [smem:[#allocation34_spill]] }
  0x1e   : > { %v7568_v1 = vshrl.u32 %v10260_v0, 7  ;;  %s8596_s21 = sld [smem:[#allocation4 + %s7564_s2]] }
  0x1f   : > { %s7571_s4 = scalar_select %p627_p3, %s7564_s2, 3 }
  0x20   : > { %v698_v2 = vadd.s32 112, %v7568_v1  ;;  %v699_v3 = vadd.s32 120, %v7568_v1  ;;  %v7583_v6 = vadd.s32 96, %v7568_v1  ;;  %v7586_v7 = vadd.s32 104, %v7568_v1  ;;  %s10451_s28 = sld [smem:[#allocation36_spill]] }
  0x21   : > { %s7574_s23 = sshll.u32 %s7571_s4, 2  ;;  %s6448_s27 = sshll.u32 %s7571_s4, 3 }
  0x22   : > { %s636_s26 = scalar_lea.vmem %s10385_s3, %s7574_s23  ;;  %s7197_s3 = sshll.u32 %s7571_s4, 7 }
  0x23   : > { %v700_v4 = vld [vmem:[%s636_s26] sm:$0xf]  ;;  %v6810_v5 = vld [vmem:[%s636_s26 + $0x4] sm:$0xf]  ;;  %s8474_s30 = scalar_lea.vmem %s10409_s0, %s6448_s27  ;;  %s3515_s4 = sadd.s32 1, %s7564_s2 }
  0x24   : > { %v7588_v8 = vperm.slane %v700_v4, 1  ;;  %v7590_v9 = vperm.slane %v700_v4, 3  ;;  %v7592_v10 = vperm.slane %v6810_v5, 1  ;;  %v7594_v11 = vperm.slane %v6810_v5, 3  ;;  %s660_s22 = scvt.s32.f32 %s8596_s21  ;;  %s9518_s0 = sld [smem:[#allocation4 + %s3515_s4]] }
  0x25   : > { %v7596_v12 = vperm.slane %v700_v4, 0  ;;  %v7598_v13 = vperm.slane %v700_v4, 2  ;;  %v7600_v14 = vperm.slane %v6810_v5, 0  ;;  %v7602_v15 = vperm.slane %v6810_v5, 2 }
  0x26   : > { %vm765_vm0 = vcmp.eq.s32.totalorder %v698_v2, %v7588_v8  ;;  %vm766_vm1 = vcmp.eq.s32.totalorder %v699_v3, %v7588_v8  ;;  %vm863_vm2 = vcmp.eq.s32.totalorder %v698_v2, %v7590_v9  ;;  %vm864_vm3 = vcmp.eq.s32.totalorder %v699_v3, %v7590_v9  ;;  %s9310_s29 = scalar_lea.vmem %s10451_s28, %s7197_s3  ;;  %s9492_s3 = scalar_lea.vmem %s10259_s19, %s7574_s23 }
  0x27   : > { %v6490_v17 = vsel %vm765_vm0, 1.0, %v10265_v16  ;;  %v6491_v18 = vsel %vm766_vm1, 1.0, %v10265_v16  ;;  %v6522_v19 = vsel %vm863_vm2, 1.0, %v10265_v16  ;;  %v6523_v20 = vsel %vm864_vm3, 1.0, %v10265_v16 }
  0x28   : > { %v959_v21 = vadd.f32 %v6522_v19, %v6490_v17  ;;  %v960_v22 = vadd.f32 %v6523_v20, %v6491_v18  ;;  %vm3604_vm4 = vcmp.eq.s32.totalorder %v698_v2, %v7592_v10  ;;  %vm3605_vm5 = vcmp.eq.s32.totalorder %v699_v3, %v7592_v10 }
  0x29   : > { %v6841_v23 = vsel %vm3604_vm4, 1.0, %v10265_v16  ;;  %v6842_v24 = vsel %vm3605_vm5, 1.0, %v10265_v16  ;;  %vm3702_vm6 = vcmp.eq.s32.totalorder %v698_v2, %v7594_v11  ;;  %vm3703_vm7 = vcmp.eq.s32.totalorder %v699_v3, %v7594_v11 }
  0x2a   : > { %v975_v25 = vpack.c.bf16 %v959_v21, %v959_v21  ;;  %v976_v26 = vpack.c.bf16 %v960_v22, %v960_v22  ;;  %v6873_v27 = vsel %vm3702_vm6, 1.0, %v10265_v16  ;;  %v6874_v28 = vsel %vm3703_vm7, 1.0, %v10265_v16  ;;  %s3517_s2 = scvt.s32.f32 %s9518_s0 }
  0x2b   : > { %v3798_v29 = vadd.f32 %v6873_v27, %v6841_v23  ;;  %v3799_v30 = vadd.f32 %v6874_v28, %v6842_v24  ;;  %vm716_vm8 = vcmp.eq.s32.totalorder %v698_v2, %v7596_v12  ;;  %vm717_vm9 = vcmp.eq.s32.totalorder %v699_v3, %v7596_v12 }
  0x2c   : > { %991 = vst [vmem:[#allocation2 + $0xe4] sm:$0xf] %v975_v25  ;;  %v7623_v31 = vsel %vm716_vm8, 1.0, %v10265_v16  ;;  %v7626_v32 = vsel %vm717_vm9, 1.0, %v10265_v16  ;;  %vm814_vm10 = vcmp.eq.s32.totalorder %v698_v2, %v7598_v13  ;;  %vm815_vm11 = vcmp.eq.s32.totalorder %v699_v3, %v7598_v13 }
  0x2d   : > { %992 = vst [vmem:[#allocation2 + $0xf4] sm:$0xf] %v976_v26  ;;  %v3814_v33 = vpack.c.bf16 %v3798_v29, %v3798_v29  ;;  %v3815_v34 = vpack.c.bf16 %v3799_v30, %v3799_v30  ;;  %v7631_v35 = vsel %vm814_vm10, 1.0, %v10265_v16  ;;  %v7634_v36 = vsel %vm815_vm11, 1.0, %v10265_v16 }
  0x2e   : > { %v1007_v37 = vsub.f32 %v7623_v31, %v7631_v35  ;;  %v1008_v38 = vsub.f32 %v7626_v32, %v7634_v36  ;;  %vm3555_vm12 = vcmp.eq.s32.totalorder %v698_v2, %v7600_v14  ;;  %vm3556_vm13 = vcmp.eq.s32.totalorder %v699_v3, %v7600_v14 }
  0x2f   : > { %v7643_v39 = vsel %vm3555_vm12, 1.0, %v10265_v16  ;;  %v7646_v40 = vsel %vm3556_vm13, 1.0, %v10265_v16  ;;  %vm3653_vm14 = vcmp.eq.s32.totalorder %v698_v2, %v7602_v15  ;;  %vm3654_vm15 = vcmp.eq.s32.totalorder %v699_v3, %v7602_v15 }
  0x30   : > { %v1023_v41 = vpack.c.bf16 %v1007_v37, %v1007_v37  ;;  %v1024_v42 = vpack.c.bf16 %v1008_v38, %v1008_v38  ;;  %v7651_v43 = vsel %vm3653_vm14, 1.0, %v10265_v16  ;;  %v7654_v44 = vsel %vm3654_vm15, 1.0, %v10265_v16 }
  0x31   : > { %v3846_v45 = vsub.f32 %v7643_v39, %v7651_v43  ;;  %v3847_v46 = vsub.f32 %v7646_v40, %v7654_v44  ;;  %v1055_v47 = vsub.f32 %v6490_v17, %v6522_v19  ;;  %v1056_v48 = vsub.f32 %v6491_v18, %v6523_v20 }
  0x32   : > { %1039 = vst [vmem:[#allocation2 + $0xe8] sm:$0xf] %v1023_v41  ;;  %v7660_v49 = vsub.f32 %v6841_v23, %v6873_v27  ;;  %v7662_v50 = vsub.f32 %v6842_v24, %v6874_v28  ;;  %vm763_vm0 = vcmp.eq.s32.totalorder %v7583_v6, %v7588_v8  ;;  %vm764_vm1 = vcmp.eq.s32.totalorder %v7586_v7, %v7588_v8 }
  0x33   : > { %v7226_v51 = vld [vmem:[#allocation2 + $0xe4] sm:$0xf]  ;;  %1040 = vst [vmem:[#allocation2 + $0xf8] sm:$0xf] %v1024_v42  ;;  %v3862_v52 = vpack.c.bf16 %v3846_v45, %v3846_v45  ;;  %v3863_v53 = vpack.c.bf16 %v3847_v46, %v3847_v46  ;;  %v1071_v54 = vpack.c.bf16 %v1055_v47, %v1055_v47  ;;  %v1072_v55 = vpack.c.bf16 %v1056_v48, %v1056_v48 }
  0x34   : > { %v6640_v56 = vld [vmem:[#allocation2 + $0xf0] sm:$0xf0]  ;;  %3830 = vst [vmem:[#allocation2 + $0xe4] sm:$0xf] %v3814_v33  ;;  %v3910_v57 = vpack.c.bf16 %v7660_v49, %v7660_v49  ;;  %v3911_v58 = vpack.c.bf16 %v7662_v50, %v7662_v50  ;;  %v7673_v59 = vsel %vm763_vm0, 1.0, %v10265_v16  ;;  %v7676_v60 = vsel %vm764_vm1, 1.0, %v10265_v16 }
  0x35   : > { %v7678_v61 = vor.u32 %v7226_v51, %v6640_v56  ;;  %3831 = vst [vmem:[#allocation2 + $0xf4] sm:$0xf] %v3815_v34  ;;  %vm861_vm2 = vcmp.eq.s32.totalorder %v7583_v6, %v7590_v9  ;;  %vm862_vm3 = vcmp.eq.s32.totalorder %v7586_v7, %v7590_v9  ;;  %vm3602_vm4 = vcmp.eq.s32.totalorder %v7583_v6, %v7592_v10 }
  0x36   : > { %1087 = vst [vmem:[#allocation2 + $0xec] sm:$0xf] %v1071_v54  ;;  %v6520_v62 = vsel %vm861_vm2, 1.0, %v10265_v16  ;;  %v6521_v63 = vsel %vm862_vm3, 1.0, %v10265_v16  ;;  %vm3603_vm5 = vcmp.eq.s32.totalorder %v7586_v7, %v7592_v10  ;;  %v6839_v2 = vsel %vm3602_vm4, 1.0, %v10265_v16 }
  0x37   : > { %10386 = vst [vmem:[#allocation6_spill] sm:$0xff] %v7678_v61  ;;  %1296 = vmatpush.bf16.msra.mxu1 %v7678_v61  ;;  %v957_v3 = vadd.f32 %v6520_v62, %v7673_v59  ;;  %v958_v4 = vadd.f32 %v6521_v63, %v7676_v60  ;;  %v6840_v5 = vsel %vm3603_vm5, 1.0, %v10265_v16  ;;  %vm3700_vm6 = vcmp.eq.s32.totalorder %v7583_v6, %v7594_v11 }
  0x38   : > { %1088 = vst [vmem:[#allocation2 + $0xfc] sm:$0xf] %v1072_v55  ;;  %vm3701_vm7 = vcmp.eq.s32.totalorder %v7586_v7, %v7594_v11  ;;  %v6871_v17 = vsel %vm3700_vm6, 1.0, %v10265_v16  ;;  %vm714_vm8 = vcmp.eq.s32.totalorder %v7583_v6, %v7596_v12  ;;  %vm715_vm9 = vcmp.eq.s32.totalorder %v7586_v7, %v7596_v12 }
  0x39   : > { %v6646_v18 = vld [vmem:[#allocation2 + $0xe8] sm:$0xf]  ;;  %v973_v19 = vpack.c.bf16 %v957_v3, %v957_v3  ;;  %v974_v20 = vpack.c.bf16 %v958_v4, %v958_v4  ;;  %v6872_v21 = vsel %vm3701_vm7, 1.0, %v10265_v16  ;;  %v3796_v22 = vadd.f32 %v6871_v17, %v6839_v2 }
  0x3a   : > { %v7229_v23 = vld [vmem:[#allocation2 + $0xf4] sm:$0xf0]  ;;  %3878 = vst [vmem:[#allocation2 + $0xe8] sm:$0xf] %v3862_v52  ;;  %v3797_v24 = vadd.f32 %v6872_v21, %v6840_v5  ;;  %v7706_v25 = vsel %vm714_vm8, 1.0, %v10265_v16  ;;  %v7709_v26 = vsel %vm715_vm9, 1.0, %v10265_v16  ;;  %vm812_vm10 = vcmp.eq.s32.totalorder %v7583_v6, %v7598_v13 }
  0x3b   : > { %v7713_v27 = vor.u32 %v7229_v23, %v6646_v18  ;;  %3879 = vst [vmem:[#allocation2 + $0xf8] sm:$0xf] %v3863_v53  ;;  %v3812_v28 = vpack.c.bf16 %v3796_v22, %v3796_v22  ;;  %vm813_vm11 = vcmp.eq.s32.totalorder %v7586_v7, %v7598_v13  ;;  %v7718_v29 = vsel %vm812_vm10, 1.0, %v10265_v16 }
  0x3c   : > { %989 = vst [vmem:[#allocation2 + $0xc4] sm:$0xf] %v973_v19  ;;  %v3813_v30 = vpack.c.bf16 %v3797_v24, %v3797_v24  ;;  %v7721_v33 = vsel %vm813_vm11, 1.0, %v10265_v16  ;;  %v1005_v34 = vsub.f32 %v7706_v25, %v7718_v29  ;;  %vm3553_vm12 = vcmp.eq.s32.totalorder %v7583_v6, %v7600_v14 }
  0x3d   : > { %10387 = vst [vmem:[#allocation7_spill] sm:$0xff] %v7713_v27  ;;  %1309 = vmatpush.bf16.msra.mxu2 %v7713_v27  ;;  %v7227_v37 = vld [vmem:[#allocation2 + $0xec] sm:$0xf]  ;;  %v1006_v38 = vsub.f32 %v7709_v26, %v7721_v33  ;;  %vm3554_vm13 = vcmp.eq.s32.totalorder %v7586_v7, %v7600_v14  ;;  %v7733_v41 = vsel %vm3553_vm12, 1.0, %v10265_v16  ;;  %vm3651_vm14 = vcmp.eq.s32.totalorder %v7583_v6, %v7602_v15 }
  0x3e   : > { %990 = vst [vmem:[#allocation2 + $0xd4] sm:$0xf] %v974_v20  ;;  %v1021_v45 = vpack.c.bf16 %v1005_v34, %v1005_v34  ;;  %v7738_v46 = vsel %vm3554_vm13, 1.0, %v10265_v16  ;;  %vm3652_vm15 = vcmp.eq.s32.totalorder %v7586_v7, %v7602_v15  ;;  %v7743_v47 = vsel %vm3651_vm14, 1.0, %v10265_v16 }
  0x3f   : > { %v6648_v42 = vld [vmem:[#allocation2 + $0xf8] sm:$0xf0]  ;;  %3926 = vst [vmem:[#allocation2 + $0xec] sm:$0xf] %v3910_v57  ;;  %v1022_v49 = vpack.c.bf16 %v1006_v38, %v1006_v38  ;;  %v7748_v50 = vsel %vm3652_vm15, 1.0, %v10265_v16  ;;  %v3844_v6 = vsub.f32 %v7733_v41, %v7743_v47  ;;  %v1053_v52 = vsub.f32 %v7673_v59, %v6520_v62 }
  0x40   : > { %v7745_v48 = vor.u32 %v7227_v37, %v6648_v42  ;;  %3927 = vst [vmem:[#allocation2 + $0xfc] sm:$0xf] %v3911_v58  ;;  %v3845_v51 = vsub.f32 %v7738_v46, %v7748_v50  ;;  %v1054_v7 = vsub.f32 %v7676_v60, %v6521_v63  ;;  %v7756_v53 = vsub.f32 %v6839_v2, %v6871_v17 }
  0x41   : > { %1037 = vst [vmem:[#allocation2 + $0xc8] sm:$0xf] %v1021_v45  ;;  %v3860_v54 = vpack.c.bf16 %v3844_v6, %v3844_v6  ;;  %v7759_v55 = vsub.f32 %v6840_v5, %v6872_v21  ;;  %v911_v56 = vadd.f32 %v7631_v35, %v7623_v31  ;;  %v7764_v57 = vadd.s32 80, %v7568_v1 }
  0x42   : > { %1322 = vmatpush.bf16.msra.mxu3 %v7745_v48  ;;  %1038 = vst [vmem:[#allocation2 + $0xd8] sm:$0xf] %v1022_v49  ;;  %v3861_v58 = vpack.c.bf16 %v3845_v51, %v3845_v51  ;;  %v1069_v3 = vpack.c.bf16 %v1053_v52, %v1053_v52  ;;  %v1070_v4 = vpack.c.bf16 %v1054_v7, %v1054_v7  ;;  %v7781_v17 = vadd.s32 88, %v7568_v1 }
  0x43   : > { %v3908_v59 = vpack.c.bf16 %v7756_v53, %v7756_v53  ;;  %v7222_v60 = vld [vmem:[#allocation2 + $0xc4] sm:$0xf]  ;;  %v3909_v62 = vpack.c.bf16 %v7759_v55, %v7759_v55  ;;  %v912_v63 = vadd.f32 %v7634_v36, %v7626_v32  ;;  %v927_v2 = vpack.c.bf16 %v911_v56, %v911_v56 }
  0x44   : > { %v7774_v31 = vadd.f32 %v7651_v43, %v7643_v39  ;;  %3828 = vst [vmem:[#allocation2 + $0xc4] sm:$0xf] %v3812_v28  ;;  %v7778_v5 = vadd.f32 %v7654_v44, %v7646_v40  ;;  %vm761_vm0 = vcmp.eq.s32.totalorder %v7764_v57, %v7588_v8  ;;  %vm859_vm1 = vcmp.eq.s32.totalorder %v7764_v57, %v7590_v9 }
  0x45   : > { %v6624_v35 = vld [vmem:[#allocation2 + $0xd0] sm:$0xf0]  ;;  %v928_v36 = vpack.c.bf16 %v912_v63, %v912_v63  ;;  %v7792_v43 = vsel %vm761_vm0, 1.0, %v10265_v16  ;;  %1085 = vst [vmem:[#allocation2 + $0xcc] sm:$0xf] %v1069_v3  ;;  %vm762_vm2 = vcmp.eq.s32.totalorder %v7781_v17, %v7588_v8  ;;  %vm860_vm3 = vcmp.eq.s32.totalorder %v7781_v17, %v7590_v9 }
  0x46   : > { %v7787_v32 = vor.u32 %v7222_v60, %v6624_v35  ;;  %3829 = vst [vmem:[#allocation2 + $0xd4] sm:$0xf] %v3813_v30  ;;  %v3766_v39 = vpack.c.bf16 %v7774_v31, %v7774_v31  ;;  %v3767_v40 = vpack.c.bf16 %v7778_v5, %v7778_v5  ;;  %v6518_v44 = vsel %vm859_vm1, 1.0, %v10265_v16 }
  0x47   : > { %1086 = vst [vmem:[#allocation2 + $0xdc] sm:$0xf] %v1070_v4  ;;  %v6487_v19 = vsel %vm762_vm2, 1.0, %v10265_v16  ;;  %v6519_v20 = vsel %vm860_vm3, 1.0, %v10265_v16  ;;  %v955_v21 = vadd.f32 %v6518_v44, %v7792_v43  ;;  %vm3600_vm4 = vcmp.eq.s32.totalorder %v7764_v57, %v7592_v10 }
  0x48   : > { %10388 = vst [vmem:[#allocation8_spill] sm:$0xff] %v7787_v32  ;;  %1297 = vmatpush.bf16.msra.mxu1 %v7787_v32  ;;  %v6630_v18 = vld [vmem:[#allocation2 + $0xc8] sm:$0xf]  ;;  %v956_v23 = vadd.f32 %v6519_v20, %v6487_v19  ;;  %vm3601_vm5 = vcmp.eq.s32.totalorder %v7781_v17, %v7592_v10  ;;  %v6837_v24 = vsel %vm3600_vm4, 1.0, %v10265_v16  ;;  %vm3698_vm6 = vcmp.eq.s32.totalorder %v7764_v57, %v7594_v11 }
  0x49   : > { %v7225_v22 = vld [vmem:[#allocation2 + $0xd4] sm:$0xf0]  ;;  %3876 = vst [vmem:[#allocation2 + $0xc8] sm:$0xf] %v3860_v54  ;;  %v971_v30 = vpack.c.bf16 %v955_v21, %v955_v21  ;;  %v6838_v34 = vsel %vm3601_vm5, 1.0, %v10265_v16  ;;  %vm3699_vm7 = vcmp.eq.s32.totalorder %v7781_v17, %v7594_v11  ;;  %v6869_v38 = vsel %vm3698_vm6, 1.0, %v10265_v16 }
  0x4a   : > { %v7812_v28 = vor.u32 %v7225_v22, %v6630_v18  ;;  %3877 = vst [vmem:[#allocation2 + $0xd8] sm:$0xf] %v3861_v58  ;;  %v972_v37 = vpack.c.bf16 %v956_v23, %v956_v23  ;;  %v6870_v42 = vsel %vm3699_vm7, 1.0, %v10265_v16  ;;  %vm712_vm8 = vcmp.eq.s32.totalorder %v7764_v57, %v7596_v12 }
  0x4b   : > { %943 = vst [vmem:[#allocation2 + $0xe0] sm:$0xf] %v927_v2  ;;  %v3794_v45 = vadd.f32 %v6869_v38, %v6837_v24  ;;  %v3795_v49 = vadd.f32 %v6870_v42, %v6838_v34  ;;  %vm713_vm9 = vcmp.eq.s32.totalorder %v7781_v17, %v7596_v12  ;;  %v6470_v6 = vsel %vm712_vm8, 1.0, %v10265_v16 }
  0x4c   : > { %10389 = vst [vmem:[#allocation9_spill] sm:$0xff] %v7812_v28  ;;  %1310 = vmatpush.bf16.msra.mxu2 %v7812_v28  ;;  %v6471_v51 = vsel %vm713_vm9, 1.0, %v10265_v16  ;;  %vm810_vm10 = vcmp.eq.s32.totalorder %v7764_v57, %v7598_v13  ;;  %vm811_vm11 = vcmp.eq.s32.totalorder %v7781_v17, %v7598_v13  ;;  %vm3551_vm12 = vcmp.eq.s32.totalorder %v7764_v57, %v7600_v14  ;;  %v7223_v52 = vld [vmem:[#allocation2 + $0xcc] sm:$0xf] }
  0x4d   : > { %944 = vst [vmem:[#allocation2 + $0xf0] sm:$0xf] %v928_v36  ;;  %v3810_v7 = vpack.c.bf16 %v3794_v45, %v3794_v45  ;;  %v3811_v53 = vpack.c.bf16 %v3795_v49, %v3795_v49  ;;  %v6502_v54 = vsel %vm810_vm10, 1.0, %v10265_v16  ;;  %v6503_v56 = vsel %vm811_vm11, 1.0, %v10265_v16 }
  0x4e   : > { %987 = vst [vmem:[#allocation2 + $0xa4] sm:$0xf] %v971_v30  ;;  %v6632_v58 = vld [vmem:[#allocation2 + $0xd8] sm:$0xf0]  ;;  %v1003_v3 = vsub.f32 %v6470_v6, %v6502_v54  ;;  %v1004_v4 = vsub.f32 %v6471_v51, %v6503_v56  ;;  %vm3552_vm13 = vcmp.eq.s32.totalorder %v7781_v17, %v7600_v14  ;;  %v7837_v60 = vsel %vm3551_vm12, 1.0, %v10265_v16 }
  0x4f   : > { %988 = vst [vmem:[#allocation2 + $0xb4] sm:$0xf] %v972_v37  ;;  %v7839_v63 = vor.u32 %v7223_v52, %v6632_v58  ;;  %v7845_v2 = vsel %vm3552_vm13, 1.0, %v10265_v16  ;;  %vm3649_vm14 = vcmp.eq.s32.totalorder %v7764_v57, %v7602_v15  ;;  %vm3650_vm15 = vcmp.eq.s32.totalorder %v7781_v17, %v7602_v15 }
  0x50   : > { %3924 = vst [vmem:[#allocation2 + $0xcc] sm:$0xf] %v3908_v59  ;;  %v1019_v59 = vpack.c.bf16 %v1003_v3, %v1003_v3  ;;  %v1020_v35 = vpack.c.bf16 %v1004_v4, %v1004_v4  ;;  %v7852_v36 = vsel %vm3649_vm14, 1.0, %v10265_v16  ;;  %v7855_v18 = vsel %vm3650_vm15, 1.0, %v10265_v16 }
  0x51   : > { %10390 = vst [vmem:[#allocation10_spill] sm:$0xff] %v7839_v63  ;;  %1323 = vmatpush.bf16.msra.mxu3 %v7839_v63  ;;  %v7864_v57 = vsub.f32 %v7845_v2, %v7855_v18  ;;  %v1051_v17 = vsub.f32 %v7792_v43, %v6518_v44  ;;  %v1052_v21 = vsub.f32 %v6487_v19, %v6519_v20 }
  0x52   : > { %3925 = vst [vmem:[#allocation2 + $0xdc] sm:$0xf] %v3909_v62  ;;  %v6638_v55 = vld [vmem:[#allocation2 + $0xe0] sm:$0xf]  ;;  %v7860_v62 = vsub.f32 %v7837_v60, %v7852_v36  ;;  %v7870_v23 = vsub.f32 %v6837_v24, %v6869_v38  ;;  %v7872_v30 = vsub.f32 %v6838_v34, %v6870_v42  ;;  %v909_v37 = vadd.f32 %v7718_v29, %v7706_v25 }
  0x53   : > { %3782 = vst [vmem:[#allocation2 + $0xe0] sm:$0xf] %v3766_v39  ;;  %v910_v45 = vadd.f32 %v7721_v33, %v7709_v26  ;;  %v3859_v39 = vpack.c.bf16 %v7864_v57, %v7864_v57  ;;  %v1067_v44 = vpack.c.bf16 %v1051_v17, %v1051_v17  ;;  %v1068_v25 = vpack.c.bf16 %v1052_v21, %v1052_v21 }
  0x54   : > { %v7228_v22 = vld [vmem:[#allocation2 + $0xec] sm:$0xf0]  ;;  %v3858_v31 = vpack.c.bf16 %v7860_v62, %v7860_v62  ;;  %v3906_v26 = vpack.c.bf16 %v7870_v23, %v7870_v23  ;;  %v3907_v29 = vpack.c.bf16 %v7872_v30, %v7872_v30  ;;  %v925_v33 = vpack.c.bf16 %v909_v37, %v909_v37  ;;  %1035 = vst [vmem:[#allocation2 + $0xa8] sm:$0xf] %v1019_v59 }
  0x55   : > { %v7878_v49 = vor.u32 %v7228_v22, %v6638_v55  ;;  %3783 = vst [vmem:[#allocation2 + $0xf0] sm:$0xf] %v3767_v40  ;;  %v7218_v43 = vld [vmem:[#allocation2 + $0xa4] sm:$0xf]  ;;  %v926_v40 = vpack.c.bf16 %v910_v45, %v910_v45  ;;  %v7896_v20 = vadd.f32 %v7743_v47, %v7733_v41  ;;  %v7899_v24 = vadd.s32 64, %v7568_v1 }
  0x56   : > { %v6608_v19 = vld [vmem:[#allocation2 + $0xb0] sm:$0xf0]  ;;  %3826 = vst [vmem:[#allocation2 + $0xa4] sm:$0xf] %v3810_v7  ;;  %v7903_v34 = vadd.f32 %v7748_v50, %v7738_v46  ;;  %v7906_v38 = vadd.s32 72, %v7568_v1  ;;  %v7908_v42 = vadd.f32 %v6502_v54, %v6470_v6  ;;  %v7910_v52 = vadd.f32 %v6503_v56, %v6471_v51 }
  0x57   : > { %1283 = vmatpush.bf16.msra.mxu0 %v7878_v49  ;;  %v7892_v5 = vor.u32 %v7218_v43, %v6608_v19  ;;  %3827 = vst [vmem:[#allocation2 + $0xb4] sm:$0xf] %v3811_v53  ;;  %v3764_v41 = vpack.c.bf16 %v7896_v20, %v7896_v20  ;;  %vm759_vm0 = vcmp.eq.s32.totalorder %v7899_v24, %v7588_v8  ;;  %v7925_v47 = vadd.s32 48, %v7568_v1 }
  0x58   : > { %1036 = vst [vmem:[#allocation2 + $0xb8] sm:$0xf] %v1020_v35  ;;  %vm857_vm1 = vcmp.eq.s32.totalorder %v7899_v24, %v7590_v9  ;;  %vm760_vm2 = vcmp.eq.s32.totalorder %v7906_v38, %v7588_v8  ;;  %v6484_v46 = vsel %vm759_vm0, 1.0, %v10265_v16  ;;  %vm858_vm3 = vcmp.eq.s32.totalorder %v7906_v38, %v7590_v9 }
  0x59   : > { %10391 = vst [vmem:[#allocation11_spill] sm:$0xff] %v7892_v5  ;;  %1298 = vmatpush.bf16.msra.mxu1 %v7892_v5  ;;  %v6485_v50 = vsel %vm760_vm2, 1.0, %v10265_v16  ;;  %v6516_v6 = vsel %vm857_vm1, 1.0, %v10265_v16  ;;  %v6517_v51 = vsel %vm858_vm3, 1.0, %v10265_v16  ;;  %vm3598_vm4 = vcmp.eq.s32.totalorder %v7899_v24, %v7592_v10 }
  0x5a   : > { %1083 = vst [vmem:[#allocation2 + $0xac] sm:$0xf] %v1067_v44  ;;  %v953_v7 = vadd.f32 %v6516_v6, %v6484_v46  ;;  %v954_v53 = vadd.f32 %v6517_v51, %v6485_v50  ;;  %vm3599_vm5 = vcmp.eq.s32.totalorder %v7906_v38, %v7592_v10  ;;  %v6835_v54 = vsel %vm3598_vm4, 1.0, %v10265_v16 }
  0x5b   : > { %1084 = vst [vmem:[#allocation2 + $0xbc] sm:$0xf] %v1068_v25  ;;  %v3765_v56 = vpack.c.bf16 %v7903_v34, %v7903_v34  ;;  %vm3696_vm6 = vcmp.eq.s32.totalorder %v7899_v24, %v7594_v11  ;;  %vm3697_vm7 = vcmp.eq.s32.totalorder %v7906_v38, %v7594_v11  ;;  %vm710_vm8 = vcmp.eq.s32.totalorder %v7899_v24, %v7596_v12  ;;  %v6614_v35 = vld [vmem:[#allocation2 + $0xa8] sm:$0xf] }
  0x5c   : > { %941 = vst [vmem:[#allocation2 + $0xc0] sm:$0xf] %v925_v33  ;;  %v969_v58 = vpack.c.bf16 %v953_v7, %v953_v7  ;;  %v6836_v3 = vsel %vm3599_vm5, 1.0, %v10265_v16  ;;  %v6867_v4 = vsel %vm3696_vm6, 1.0, %v10265_v16  ;;  %v6868_v59 = vsel %vm3697_vm7, 1.0, %v10265_v16 }
  0x5d   : > { %942 = vst [vmem:[#allocation2 + $0xd0] sm:$0xf] %v926_v40  ;;  %v970_v55 = vpack.c.bf16 %v954_v53, %v954_v53  ;;  %v7946_v62 = vadd.f32 %v6867_v4, %v6835_v54  ;;  %vm711_vm9 = vcmp.eq.s32.totalorder %v7906_v38, %v7596_v12  ;;  %v7951_v57 = vsel %vm710_vm8, 1.0, %v10265_v16 }
  0x5e   : > { %3874 = vst [vmem:[#allocation2 + $0xa8] sm:$0xf] %v3858_v31  ;;  %v7954_v21 = vsel %vm711_vm9, 1.0, %v10265_v16  ;;  %vm808_vm10 = vcmp.eq.s32.totalorder %v7899_v24, %v7598_v13  ;;  %vm809_vm11 = vcmp.eq.s32.totalorder %v7906_v38, %v7598_v13  ;;  %vm3549_vm12 = vcmp.eq.s32.totalorder %v7899_v24, %v7600_v14 }
  0x5f   : > { %v7221_v17 = vld [vmem:[#allocation2 + $0xb4] sm:$0xf0]  ;;  %v7964_v37 = vadd.f32 %v6868_v59, %v6836_v3  ;;  %v3808_v45 = vpack.c.bf16 %v7946_v62, %v7946_v62  ;;  %v7969_v43 = vsel %vm808_vm10, 1.0, %v10265_v16  ;;  %v7972_v44 = vsel %vm809_vm11, 1.0, %v10265_v16  ;;  %985 = vst [vmem:[#allocation2 + $0x84] sm:$0xf] %v969_v58 }
  0x60   : > { %v7962_v22 = vor.u32 %v7221_v17, %v6614_v35  ;;  %3875 = vst [vmem:[#allocation2 + $0xb8] sm:$0xf] %v3859_v39  ;;  %v1001_v19 = vsub.f32 %v7951_v57, %v7969_v43  ;;  %vm3550_vm13 = vcmp.eq.s32.totalorder %v7906_v38, %v7600_v14  ;;  %v7979_v39 = vsel %vm3549_vm12, 1.0, %v10265_v16 }
  0x61   : > { %v7219_v23 = vld [vmem:[#allocation2 + $0xac] sm:$0xf]  ;;  %v1002_v33 = vsub.f32 %v7954_v21, %v7972_v44  ;;  %v7990_v40 = vsel %vm3550_vm13, 1.0, %v10265_v16  ;;  %vm3647_vm14 = vcmp.eq.s32.totalorder %v7899_v24, %v7602_v15  ;;  %vm3648_vm15 = vcmp.eq.s32.totalorder %v7906_v38, %v7602_v15  ;;  %986 = vst [vmem:[#allocation2 + $0x94] sm:$0xf] %v970_v55 }
  0x62   : > { %10392 = vst [vmem:[#allocation12_spill] sm:$0xff] %v7962_v22  ;;  %v6616_v31 = vld [vmem:[#allocation2 + $0xb8] sm:$0xf0]  ;;  %1311 = vmatpush.bf16.msra.mxu2 %v7962_v22  ;;  %v1017_v34 = vpack.c.bf16 %v1001_v19, %v1001_v19  ;;  %v7997_v7 = vsel %vm3647_vm14, 1.0, %v10265_v16  ;;  %v1049_v30 = vsub.f32 %v6484_v46, %v6516_v6  ;;  %v8003_v35 = vsel %vm3648_vm15, 1.0, %v10265_v16 }
  0x63   : > { %3922 = vst [vmem:[#allocation2 + $0xac] sm:$0xf] %v3906_v26  ;;  %v7982_v25 = vor.u32 %v7219_v23, %v6616_v31  ;;  %v6622_v26 = vld [vmem:[#allocation2 + $0xc0] sm:$0xf]  ;;  %v1018_v53 = vpack.c.bf16 %v1002_v33, %v1002_v33  ;;  %v3840_v24 = vsub.f32 %v7979_v39, %v7997_v7  ;;  %v3841_v38 = vsub.f32 %v7990_v40, %v8003_v35 }
  0x64   : > { %3923 = vst [vmem:[#allocation2 + $0xbc] sm:$0xf] %v3907_v29  ;;  %v7224_v20 = vld [vmem:[#allocation2 + $0xcc] sm:$0xf0]  ;;  %v1065_v17 = vpack.c.bf16 %v1049_v30, %v1049_v30  ;;  %v8009_v23 = vsub.f32 %v6835_v54, %v6867_v4  ;;  %v3809_v46 = vpack.c.bf16 %v7964_v37, %v7964_v37  ;;  %v8017_v31 = vadd.s32 56, %v7568_v1 }
  0x65   : > { %10393 = vst [vmem:[#allocation13_spill] sm:$0xff] %v7982_v25  ;;  %1324 = vmatpush.bf16.msra.mxu3 %v7982_v25  ;;  %v8000_v29 = vor.u32 %v7224_v20, %v6622_v26  ;;  %v3856_v6 = vpack.c.bf16 %v3840_v24, %v3840_v24  ;;  %v3857_v58 = vpack.c.bf16 %v3841_v38, %v3841_v38 }
  0x66   : > { %3780 = vst [vmem:[#allocation2 + $0xc0] sm:$0xf] %v3764_v41  ;;  %v1050_v41 = vsub.f32 %v6485_v50, %v6517_v51  ;;  %v3904_v50 = vpack.c.bf16 %v8009_v23, %v8009_v23  ;;  %v923_v51 = vpack.c.bf16 %v7908_v42, %v7908_v42  ;;  %v924_v54 = vpack.c.bf16 %v7910_v52, %v7910_v52  ;;  %v7214_v55 = vld [vmem:[#allocation2 + $0x84] sm:$0xf] }
  0x67   : > { %3781 = vst [vmem:[#allocation2 + $0xd0] sm:$0xf] %v3765_v56  ;;  %1284 = vmatpush.bf16.msra.mxu0 %v8000_v29  ;;  %v8014_v56 = vsub.f32 %v6836_v3, %v6868_v59  ;;  %v8027_v3 = vadd.f32 %v7852_v36, %v7837_v60  ;;  %v8031_v4 = vadd.f32 %v7855_v18, %v7845_v2 }
  0x68   : > { %1033 = vst [vmem:[#allocation2 + $0x88] sm:$0xf] %v1017_v34  ;;  %v1066_v19 = vpack.c.bf16 %v1050_v41, %v1050_v41  ;;  %vm757_vm0 = vcmp.eq.s32.totalorder %v7925_v47, %v7588_v8  ;;  %vm758_vm1 = vcmp.eq.s32.totalorder %v8017_v31, %v7588_v8  ;;  %vm855_vm2 = vcmp.eq.s32.totalorder %v7925_v47, %v7590_v9  ;;  %v6592_v20 = vld [vmem:[#allocation2 + $0x90] sm:$0xf0] }
  0x69   : > { %1034 = vst [vmem:[#allocation2 + $0x98] sm:$0xf] %v1018_v53  ;;  %v6482_v42 = vsel %vm757_vm0, 1.0, %v10265_v16  ;;  %vm856_vm3 = vcmp.eq.s32.totalorder %v8017_v31, %v7590_v9  ;;  %v3905_v60 = vpack.c.bf16 %v8014_v56, %v8014_v56  ;;  %v3762_v2 = vpack.c.bf16 %v8027_v3, %v8027_v3 }
  0x6a   : > { %1081 = vst [vmem:[#allocation2 + $0x8c] sm:$0xf] %v1065_v17  ;;  %v8047_v36 = vsel %vm758_vm1, 1.0, %v10265_v16  ;;  %v6514_v18 = vsel %vm855_vm2, 1.0, %v10265_v16  ;;  %v8051_v52 = vsel %vm856_vm3, 1.0, %v10265_v16  ;;  %vm3596_vm4 = vcmp.eq.s32.totalorder %v7925_v47, %v7592_v10 }
  0x6b   : > { %1082 = vst [vmem:[#allocation2 + $0x9c] sm:$0xf] %v1066_v19  ;;  %v951_v59 = vadd.f32 %v6514_v18, %v6482_v42  ;;  %vm3597_vm5 = vcmp.eq.s32.totalorder %v8017_v31, %v7592_v10  ;;  %v3763_v37 = vpack.c.bf16 %v8031_v4, %v8031_v4  ;;  %v952_v26 = vadd.f32 %v8051_v52, %v8047_v36 }
  0x6c   : > { %939 = vst [vmem:[#allocation2 + $0xa0] sm:$0xf] %v923_v51  ;;  %v6833_v33 = vsel %vm3596_vm4, 1.0, %v10265_v16  ;;  %vm3694_vm6 = vcmp.eq.s32.totalorder %v7925_v47, %v7594_v11  ;;  %v6834_v34 = vsel %vm3597_vm5, 1.0, %v10265_v16  ;;  %vm3695_vm7 = vcmp.eq.s32.totalorder %v8017_v31, %v7594_v11 }
  0x6d   : > { %940 = vst [vmem:[#allocation2 + $0xb0] sm:$0xf] %v924_v54  ;;  %v6865_v30 = vsel %vm3694_vm6, 1.0, %v10265_v16  ;;  %vm708_vm8 = vcmp.eq.s32.totalorder %v7925_v47, %v7596_v12  ;;  %v8073_v53 = vor.u32 %v7214_v55, %v6592_v20  ;;  %v967_v38 = vpack.c.bf16 %v951_v59, %v951_v59 }
  0x6e   : > { %3824 = vst [vmem:[#allocation2 + $0x84] sm:$0xf] %v3808_v45  ;;  %v6866_v41 = vsel %vm3695_vm7, 1.0, %v10265_v16  ;;  %v8076_v17 = vadd.f32 %v6865_v30, %v6833_v33  ;;  %v968_v45 = vpack.c.bf16 %v952_v26, %v952_v26  ;;  %vm709_vm9 = vcmp.eq.s32.totalorder %v8017_v31, %v7596_v12 }
  0x6f   : > { %10394 = vst [vmem:[#allocation14_spill] sm:$0xff] %v8073_v53  ;;  %v6598_v24 = vld [vmem:[#allocation2 + $0x88] sm:$0xf]  ;;  %v8081_v23 = vsel %vm708_vm8, 1.0, %v10265_v16  ;;  %vm806_vm10 = vcmp.eq.s32.totalorder %v7925_v47, %v7598_v13  ;;  %1299 = vmatpush.bf16.msra.mxu1 %v8073_v53  ;;  %v8088_v19 = vadd.f32 %v6866_v41, %v6834_v34  ;;  %vm807_vm11 = vcmp.eq.s32.totalorder %v8017_v31, %v7598_v13 }
  0x70   : > { %3825 = vst [vmem:[#allocation2 + $0x94] sm:$0xf] %v3809_v46  ;;  %v7217_v62 = vld [vmem:[#allocation2 + $0x94] sm:$0xf0]  ;;  %v3806_v54 = vpack.c.bf16 %v8076_v17, %v8076_v17  ;;  %v8098_v3 = vsel %vm806_vm10, 1.0, %v10265_v16  ;;  %v8101_v4 = vsel %vm807_vm11, 1.0, %v10265_v16  ;;  %vm3547_vm12 = vcmp.eq.s32.totalorder %v7925_v47, %v7600_v14 }
  0x71   : > { %3872 = vst [vmem:[#allocation2 + $0x88] sm:$0xf] %v3856_v6  ;;  %v8086_v46 = vor.u32 %v7217_v62, %v6598_v24  ;;  %v7215_v56 = vld [vmem:[#allocation2 + $0x8c] sm:$0xf]  ;;  %v8091_v6 = vsel %vm709_vm9, 1.0, %v10265_v16  ;;  %v8113_v26 = vsel %vm3547_vm12, 1.0, %v10265_v16  ;;  %vm3548_vm13 = vcmp.eq.s32.totalorder %v8017_v31, %v7600_v14 }
  0x72   : > { %3873 = vst [vmem:[#allocation2 + $0x98] sm:$0xf] %v3857_v58  ;;  %v6600_v51 = vld [vmem:[#allocation2 + $0x98] sm:$0xf0]  ;;  %v1000_v55 = vsub.f32 %v8091_v6, %v8101_v4  ;;  %vm3645_vm14 = vcmp.eq.s32.totalorder %v7925_v47, %v7602_v15  ;;  %vm3646_vm15 = vcmp.eq.s32.totalorder %v8017_v31, %v7602_v15  ;;  %v1048_v31 = vsub.f32 %v8047_v36, %v8051_v52 }
  0x73   : > { %10395 = vst [vmem:[#allocation15_spill] sm:$0xff] %v8086_v46  ;;  %1312 = vmatpush.bf16.msra.mxu2 %v8086_v46  ;;  %v8106_v58 = vor.u32 %v7215_v56, %v6600_v51  ;;  %v6606_v59 = vld [vmem:[#allocation2 + $0xa0] sm:$0xf]  ;;  %v8125_v51 = vsel %vm3548_vm13, 1.0, %v10265_v16  ;;  %v8131_v47 = vsel %vm3646_vm15, 1.0, %v10265_v16  ;;  %v905_v36 = vadd.f32 %v7969_v43, %v7951_v57 }
  0x74   : > { %3920 = vst [vmem:[#allocation2 + $0x8c] sm:$0xf] %v3904_v50  ;;  %v999_v50 = vsub.f32 %v8081_v23, %v8098_v3  ;;  %v7220_v20 = vld [vmem:[#allocation2 + $0xac] sm:$0xf0]  ;;  %v1016_v56 = vpack.c.bf16 %v1000_v55, %v1000_v55  ;;  %v3887_v55 = vsub.f32 %v6834_v34, %v6866_v41  ;;  %v906_v52 = vadd.f32 %v7972_v44, %v7954_v21 }
  0x75   : > { %10396 = vst [vmem:[#allocation16_spill] sm:$0xff] %v8106_v58  ;;  %1325 = vmatpush.bf16.msra.mxu3 %v8106_v58  ;;  %v8122_v24 = vor.u32 %v7220_v20, %v6606_v59  ;;  %v8141_v59 = vadd.s32 32, %v7568_v1  ;;  %v3745_v57 = vadd.f32 %v8003_v35, %v7990_v40  ;;  %v8154_v21 = vadd.s32 40, %v7568_v1 }
  0x76   : > { %3921 = vst [vmem:[#allocation2 + $0x9c] sm:$0xf] %v3905_v60  ;;  %v1047_v60 = vsub.f32 %v6482_v42, %v6514_v18  ;;  %v1015_v62 = vpack.c.bf16 %v999_v50, %v999_v50  ;;  %v1064_v50 = vpack.c.bf16 %v1048_v31, %v1048_v31  ;;  %v921_v31 = vpack.c.bf16 %v905_v36, %v905_v36 }
  0x77   : > { %3778 = vst [vmem:[#allocation2 + $0xa0] sm:$0xf] %v3762_v2  ;;  %v8128_v2 = vsel %vm3645_vm14, 1.0, %v10265_v16  ;;  %1285 = vmatpush.bf16.msra.mxu0 %v8122_v24  ;;  %v922_v34 = vpack.c.bf16 %v906_v52, %v906_v52  ;;  %vm755_vm0 = vcmp.eq.s32.totalorder %v8141_v59, %v7588_v8  ;;  %vm853_vm1 = vcmp.eq.s32.totalorder %v8141_v59, %v7590_v9 }
  0x78   : > { %3779 = vst [vmem:[#allocation2 + $0xb0] sm:$0xf] %v3763_v37  ;;  %v1063_v42 = vpack.c.bf16 %v1047_v60, %v1047_v60  ;;  %v3838_v18 = vsub.f32 %v8113_v26, %v8128_v2  ;;  %v3839_v37 = vsub.f32 %v8125_v51, %v8131_v47  ;;  %v8161_v44 = vsel %vm755_vm0, 1.0, %v10265_v16 }
  0x79   : > { %983 = vst [vmem:[#allocation2 + $0x64] sm:$0xf] %v967_v38  ;;  %v3886_v38 = vsub.f32 %v6833_v33, %v6865_v30  ;;  %v3744_v33 = vadd.f32 %v7997_v7, %v7979_v39  ;;  %v8164_v39 = vsel %vm853_vm1, 1.0, %v10265_v16  ;;  %vm3594_vm2 = vcmp.eq.s32.totalorder %v8141_v59, %v7592_v10 }
  0x7a   : > { %984 = vst [vmem:[#allocation2 + $0x74] sm:$0xf] %v968_v45  ;;  %v3807_v45 = vpack.c.bf16 %v8088_v19, %v8088_v19  ;;  %v3854_v20 = vpack.c.bf16 %v3838_v18, %v3838_v18  ;;  %v3855_v60 = vpack.c.bf16 %v3839_v37, %v3839_v37  ;;  %vm756_vm3 = vcmp.eq.s32.totalorder %v8154_v21, %v7588_v8 }
  0x7b   : > { %1031 = vst [vmem:[#allocation2 + $0x68] sm:$0xf] %v1015_v62  ;;  %v3902_v30 = vpack.c.bf16 %v3886_v38, %v3886_v38  ;;  %v3903_v62 = vpack.c.bf16 %v3887_v55, %v3887_v55  ;;  %v3760_v43 = vpack.c.bf16 %v3744_v33, %v3744_v33  ;;  %vm854_vm4 = vcmp.eq.s32.totalorder %v8154_v21, %v7590_v9 }
  0x7c   : > { %1032 = vst [vmem:[#allocation2 + $0x78] sm:$0xf] %v1016_v56  ;;  %v949_v7 = vadd.f32 %v8164_v39, %v8161_v44  ;;  %vm3595_vm5 = vcmp.eq.s32.totalorder %v8154_v21, %v7592_v10  ;;  %v6481_v41 = vsel %vm756_vm3, 1.0, %v10265_v16  ;;  %v6513_v19 = vsel %vm854_vm4, 1.0, %v10265_v16 }
  0x7d   : > { %1079 = vst [vmem:[#allocation2 + $0x6c] sm:$0xf] %v1063_v42  ;;  %vm3692_vm6 = vcmp.eq.s32.totalorder %v8141_v59, %v7594_v11  ;;  %vm3693_vm7 = vcmp.eq.s32.totalorder %v8154_v21, %v7594_v11  ;;  %v3761_v18 = vpack.c.bf16 %v3745_v57, %v3745_v57  ;;  %v950_v37 = vadd.f32 %v6513_v19, %v6481_v41 }
  0x7e   : > { %1080 = vst [vmem:[#allocation2 + $0x7c] sm:$0xf] %v1064_v50  ;;  %v6831_v17 = vsel %vm3594_vm2, 1.0, %v10265_v16  ;;  %v6832_v38 = vsel %vm3595_vm5, 1.0, %v10265_v16  ;;  %v6863_v50 = vsel %vm3692_vm6, 1.0, %v10265_v16  ;;  %vm706_vm8 = vcmp.eq.s32.totalorder %v8141_v59, %v7596_v12 }
  0x7f   : > { %937 = vst [vmem:[#allocation2 + $0x80] sm:$0xf] %v921_v31  ;;  %vm707_vm9 = vcmp.eq.s32.totalorder %v8154_v21, %v7596_v12  ;;  %v965_v52 = vpack.c.bf16 %v949_v7, %v949_v7  ;;  %v966_v31 = vpack.c.bf16 %v950_v37, %v950_v37  ;;  %vm804_vm10 = vcmp.eq.s32.totalorder %v8141_v59, %v7598_v13 }
  0x80   : > { %v7210_v40 = vld [vmem:[#allocation2 + $0x64] sm:$0xf]  ;;  %938 = vst [vmem:[#allocation2 + $0x90] sm:$0xf] %v922_v34  ;;  %v6464_v34 = vsel %vm706_vm8, 1.0, %v10265_v16  ;;  %v6465_v57 = vsel %vm707_vm9, 1.0, %v10265_v16  ;;  %vm805_vm11 = vcmp.eq.s32.totalorder %v8154_v21, %v7598_v13  ;;  %vm3545_vm12 = vcmp.eq.s32.totalorder %v8141_v59, %v7600_v14 }
  0x81   : > { %v6576_v35 = vld [vmem:[#allocation2 + $0x70] sm:$0xf0]  ;;  %3822 = vst [vmem:[#allocation2 + $0x64] sm:$0xf] %v3806_v54  ;;  %v6497_v37 = vsel %vm805_vm11, 1.0, %v10265_v16  ;;  %vm3546_vm13 = vcmp.eq.s32.totalorder %v8154_v21, %v7600_v14  ;;  %vm3643_vm14 = vcmp.eq.s32.totalorder %v8141_v59, %v7602_v15  ;;  %vm3644_vm15 = vcmp.eq.s32.totalorder %v8154_v21, %v7602_v15 }
  0x82   : > { %v8185_v56 = vor.u32 %v7210_v40, %v6576_v35  ;;  %3823 = vst [vmem:[#allocation2 + $0x74] sm:$0xf] %v3807_v45  ;;  %v6582_v42 = vld [vmem:[#allocation2 + $0x68] sm:$0xf]  ;;  %v6864_v45 = vsel %vm3693_vm7, 1.0, %v10265_v16  ;;  %v1046_v0 = vsub.f32 %v6481_v41, %v6513_v19  ;;  %v3742_v19 = vadd.f32 %v8128_v2, %v8113_v26 }
  0x83   : > { %v7213_v54 = vld [vmem:[#allocation2 + $0x74] sm:$0xf0]  ;;  %3870 = vst [vmem:[#allocation2 + $0x68] sm:$0xf] %v3854_v20  ;;  %v8204_v20 = vadd.f32 %v6863_v50, %v6831_v17  ;;  %v8213_v7 = vadd.f32 %v6864_v45, %v6832_v38  ;;  %v3885_v58 = vsub.f32 %v6832_v38, %v6864_v45  ;;  %v8265_v38 = vadd.f32 %v6497_v37, %v6465_v57 }
  0x84   : > { %10397 = vst [vmem:[#allocation17_spill] sm:$0xff] %v8185_v56  ;;  %1300 = vmatpush.bf16.msra.mxu1 %v8185_v56  ;;  %v8198_v55 = vor.u32 %v7213_v54, %v6582_v42  ;;  %v7211_v36 = vld [vmem:[#allocation2 + $0x6c] sm:$0xf]  ;;  %v10401_v45 = vmov 0.0  }
  0x85   : > { %3871 = vst [vmem:[#allocation2 + $0x78] sm:$0xf] %v3855_v60  ;;  %v6584_v33 = vld [vmem:[#allocation2 + $0x78] sm:$0xf0]  ;;  %v3804_v42 = vpack.c.bf16 %v8204_v20, %v8204_v20  ;;  %v8230_v20 = vsel %vm3546_vm13, 1.0, %v10265_v16  ;;  %v3901_v63 = vpack.c.bf16 %v3885_v58, %v3885_v58 }
  0x86   : > { %10398 = vst [vmem:[#allocation18_spill] sm:$0xff] %v8198_v55  ;;  %1313 = vmatpush.bf16.msra.mxu2 %v8198_v55  ;;  %v8211_v60 = vor.u32 %v7211_v36, %v6584_v33  ;;  %v6590_v40 = vld [vmem:[#allocation2 + $0x80] sm:$0xf]  ;;  %v998_v36 = vsub.f32 %v6465_v57, %v6497_v37 }
  0x87   : > { %3918 = vst [vmem:[#allocation2 + $0x6c] sm:$0xf] %v3902_v30  ;;  %v6496_v30 = vsel %vm804_vm10, 1.0, %v10265_v16  ;;  %v7216_v35 = vld [vmem:[#allocation2 + $0x8c] sm:$0xf0] }
  0x88   : > { %10399 = vst [vmem:[#allocation19_spill] sm:$0xff] %v8211_v60  ;;  %v997_v54 = vsub.f32 %v6464_v34, %v6496_v30  ;;  %1326 = vmatpush.bf16.msra.mxu3 %v8211_v60  ;;  %v3884_v60 = vsub.f32 %v6831_v17, %v6863_v50  ;;  %v8263_v58 = vadd.f32 %v6496_v30, %v6464_v34 }
  0x89   : > { %3919 = vst [vmem:[#allocation2 + $0x7c] sm:$0xf] %v3903_v62  ;;  %v8224_v62 = vor.u32 %v7216_v35, %v6590_v40  ;;  %v6847_v40 = vsel %vm3643_vm14, 1.0, %v10265_v16  ;;  %v8239_v35 = vsel %vm3644_vm15, 1.0, %v10265_v16 }
  0x8a   : > { %3776 = vst [vmem:[#allocation2 + $0x80] sm:$0xf] %v3760_v43  ;;  %v6815_v43 = vsel %vm3545_vm12, 1.0, %v10265_v16  ;;  %v1013_v33 = vpack.c.bf16 %v997_v54, %v997_v54  ;;  %v3837_v59 = vsub.f32 %v8230_v20, %v8239_v35  ;;  %v3805_v16 = vpack.c.bf16 %v8213_v7, %v8213_v7 }
  0x8b   : > { %3777 = vst [vmem:[#allocation2 + $0x90] sm:$0xf] %v3761_v18  ;;  %1286 = vmatpush.bf16.msra.mxu0 %v8224_v62  ;;  %v1014_v18 = vpack.c.bf16 %v998_v36, %v998_v36  ;;  %v3836_v54 = vsub.f32 %v6815_v43, %v6847_v40  ;;  %v904_v36 = vadd.f32 %v8101_v4, %v8091_v6  ;;  %v8258_v6 = vadd.s32 16, %v7568_v1 }
  0x8c   : > { %981 = vst [vmem:[#allocation2 + $0x44] sm:$0xf] %v965_v52  ;;  %v1045_v52 = vsub.f32 %v8161_v44, %v8164_v39  ;;  %v3853_v39 = vpack.c.bf16 %v3837_v59, %v3837_v59  ;;  %v3900_v25 = vpack.c.bf16 %v3884_v60, %v3884_v60  ;;  %v3758_v4 = vpack.c.bf16 %v3742_v19, %v3742_v19 }
  0x8d   : > { %982 = vst [vmem:[#allocation2 + $0x54] sm:$0xf] %v966_v31  ;;  %v903_v31 = vadd.f32 %v8098_v3, %v8081_v23  ;;  %v3852_v44 = vpack.c.bf16 %v3836_v54, %v3836_v54  ;;  %v920_v17 = vpack.c.bf16 %v904_v36, %v904_v36  ;;  %v8255_v23 = vadd.f32 %v8131_v47, %v8125_v51 }
  0x8e   : > { %1029 = vst [vmem:[#allocation2 + $0x48] sm:$0xf] %v1013_v33  ;;  %v1061_v21 = vpack.c.bf16 %v1045_v52, %v1045_v52  ;;  %v1062_v33 = vpack.c.bf16 %v1046_v0, %v1046_v0  ;;  %v8261_v3 = vadd.s32 24, %v7568_v1  ;;  %v8267_v26 = vadd.f32 %v6847_v40, %v6815_v43 }
  0x8f   : > { %1030 = vst [vmem:[#allocation2 + $0x58] sm:$0xf] %v1014_v18  ;;  %v919_v41 = vpack.c.bf16 %v903_v31, %v903_v31  ;;  %v3759_v51 = vpack.c.bf16 %v8255_v23, %v8255_v23  ;;  %vm753_vm0 = vcmp.eq.s32.totalorder %v8258_v6, %v7588_v8  ;;  %vm851_vm2 = vcmp.eq.s32.totalorder %v8258_v6, %v7590_v9 }
  0x90   : > { %1077 = vst [vmem:[#allocation2 + $0x4c] sm:$0xf] %v1061_v21  ;;  %vm754_vm1 = vcmp.eq.s32.totalorder %v8261_v3, %v7588_v8  ;;  %v8280_v34 = vsel %vm753_vm0, 1.0, %v10401_v45  ;;  %vm852_vm3 = vcmp.eq.s32.totalorder %v8261_v3, %v7590_v9  ;;  %v6510_v7 = vsel %vm851_vm2, 1.0, %v10401_v45 }
  0x91   : > { %1078 = vst [vmem:[#allocation2 + $0x5c] sm:$0xf] %v1062_v33  ;;  %v8283_v57 = vsel %vm754_vm1, 1.0, %v10401_v45  ;;  %v6511_v30 = vsel %vm852_vm3, 1.0, %v10401_v45  ;;  %vm3592_vm4 = vcmp.eq.s32.totalorder %v8258_v6, %v7592_v10  ;;  %vm3593_vm5 = vcmp.eq.s32.totalorder %v8261_v3, %v7592_v10 }
  0x92   : > { %935 = vst [vmem:[#allocation2 + $0x60] sm:$0xf] %v919_v41  ;;  %v948_v37 = vadd.f32 %v6511_v30, %v8283_v57  ;;  %v6829_v43 = vsel %vm3592_vm4, 1.0, %v10401_v45  ;;  %v6830_v40 = vsel %vm3593_vm5, 1.0, %v10401_v45  ;;  %vm3690_vm6 = vcmp.eq.s32.totalorder %v8258_v6, %v7594_v11 }
  0x93   : > { %v7206_v0 = vld [vmem:[#allocation2 + $0x44] sm:$0xf]  ;;  %936 = vst [vmem:[#allocation2 + $0x70] sm:$0xf] %v920_v17  ;;  %vm3691_vm7 = vcmp.eq.s32.totalorder %v8261_v3, %v7594_v11  ;;  %vm704_vm8 = vcmp.eq.s32.totalorder %v8258_v6, %v7596_v12  ;;  %v6861_v21 = vsel %vm3690_vm6, 1.0, %v10401_v45  ;;  %vm705_vm9 = vcmp.eq.s32.totalorder %v8261_v3, %v7596_v12 }
  0x94   : > { %v6560_v2 = vld [vmem:[#allocation2 + $0x50] sm:$0xf0]  ;;  %3820 = vst [vmem:[#allocation2 + $0x44] sm:$0xf] %v3804_v42  ;;  %v947_v42 = vadd.f32 %v6510_v7, %v8280_v34  ;;  %v964_v59 = vpack.c.bf16 %v948_v37, %v948_v37  ;;  %v6862_v31 = vsel %vm3691_vm7, 1.0, %v10401_v45  ;;  %v8314_v41 = vsel %vm704_vm8, 1.0, %v10401_v45 }
  0x95   : > { %v8277_v47 = vor.u32 %v7206_v0, %v6560_v2  ;;  %3821 = vst [vmem:[#allocation2 + $0x54] sm:$0xf] %v3805_v16  ;;  %v6566_v50 = vld [vmem:[#allocation2 + $0x48] sm:$0xf]  ;;  %v3787_v33 = vadd.f32 %v6862_v31, %v6830_v40  ;;  %vm802_vm10 = vcmp.eq.s32.totalorder %v8258_v6, %v7598_v13  ;;  %vm803_vm11 = vcmp.eq.s32.totalorder %v8261_v3, %v7598_v13 }
  0x96   : > { %v7209_v60 = vld [vmem:[#allocation2 + $0x54] sm:$0xf0]  ;;  %3868 = vst [vmem:[#allocation2 + $0x48] sm:$0xf] %v3852_v44  ;;  %v963_v54 = vpack.c.bf16 %v947_v42, %v947_v42  ;;  %v8325_v17 = vsel %vm802_vm10, 1.0, %v10401_v45  ;;  %v8328_v0 = vsel %vm803_vm11, 1.0, %v10401_v45  ;;  %vm3543_vm12 = vcmp.eq.s32.totalorder %v8258_v6, %v7600_v14 }
  0x97   : > { %10400 = vst [vmem:[#allocation20_spill] sm:$0xff] %v8277_v47  ;;  %1301 = vmatpush.bf16.msra.mxu1 %v8277_v47  ;;  %v8294_v16 = vor.u32 %v7209_v60, %v6566_v50  ;;  %v7207_v18 = vld [vmem:[#allocation2 + $0x4c] sm:$0xf]  ;;  %v3803_v19 = vpack.c.bf16 %v3787_v33, %v3787_v33  ;;  %vm3544_vm13 = vcmp.eq.s32.totalorder %v8261_v3, %v7600_v14  ;;  %v8339_v50 = vsel %vm3543_vm12, 1.0, %v10401_v45 }
  0x98   : > { %3869 = vst [vmem:[#allocation2 + $0x58] sm:$0xf] %v3853_v39  ;;  %v6568_v52 = vld [vmem:[#allocation2 + $0x58] sm:$0xf0]  ;;  %v3786_v39 = vadd.f32 %v6861_v21, %v6829_v43  ;;  %v8342_v60 = vsel %vm3544_vm13, 1.0, %v10401_v45  ;;  %vm3641_vm14 = vcmp.eq.s32.totalorder %v8258_v6, %v7602_v15  ;;  %vm3642_vm15 = vcmp.eq.s32.totalorder %v8261_v3, %v7602_v15 }
  0x99   : > { %10402 = vst [vmem:[#allocation21_spill] sm:$0xff] %v8294_v16  ;;  %1314 = vmatpush.bf16.msra.mxu2 %v8294_v16  ;;  %v8309_v36 = vor.u32 %v7207_v18, %v6568_v52  ;;  %v6574_v44 = vld [vmem:[#allocation2 + $0x60] sm:$0xf]  ;;  %v8349_v52 = vsel %vm3641_vm14, 1.0, %v10401_v45  ;;  %v1044_v33 = vsub.f32 %v8283_v57, %v6511_v30  ;;  %vm751_vm0 = vcmp.eq.s32.totalorder %v7568_v1, %v7588_v8 }
  0x9a   : > { %3916 = vst [vmem:[#allocation2 + $0x4c] sm:$0xf] %v3900_v25  ;;  %v8317_v25 = vsel %vm705_vm9, 1.0, %v10401_v45  ;;  %v7212_v42 = vld [vmem:[#allocation2 + $0x6c] sm:$0xf0]  ;;  %v3834_v6 = vsub.f32 %v8339_v50, %v8349_v52  ;;  %vm849_vm2 = vcmp.eq.s32.totalorder %v7568_v1, %v7590_v9  ;;  %vm3590_vm4 = vcmp.eq.s32.totalorder %v7568_v1, %v7592_v10 }
  0x9b   : > { %10403 = vst [vmem:[#allocation22_spill] sm:$0xff] %v8309_v36  ;;  %1327 = vmatpush.bf16.msra.mxu3 %v8309_v36  ;;  %v996_v2 = vsub.f32 %v8317_v25, %v8328_v0  ;;  %v1060_v30 = vpack.c.bf16 %v1044_v33, %v1044_v33  ;;  %vm3688_vm6 = vcmp.eq.s32.totalorder %v7568_v1, %v7594_v11 }
  0x9c   : > { %3917 = vst [vmem:[#allocation2 + $0x5c] sm:$0xf] %v3901_v63  ;;  %v3802_v63 = vpack.c.bf16 %v3786_v39, %v3786_v39  ;;  %v1043_v39 = vsub.f32 %v8280_v34, %v6510_v7  ;;  %v3850_v23 = vpack.c.bf16 %v3834_v6, %v3834_v6  ;;  %v8377_v34 = vadd.s32 8, %v7568_v1 }
  0x9d   : > { %3774 = vst [vmem:[#allocation2 + $0x60] sm:$0xf] %v3758_v4  ;;  %v995_v4 = vsub.f32 %v8314_v41, %v8325_v17  ;;  %v1012_v18 = vpack.c.bf16 %v996_v2, %v996_v2  ;;  %v8367_v2 = vsub.f32 %v6830_v40, %v6862_v31  ;;  %v8394_v31 = vsel %vm751_vm0, 1.0, %v10401_v45 }
  0x9e   : > { %979 = vst [vmem:[#allocation2 + $0x24] sm:$0xf] %v963_v54  ;;  %v8352_v54 = vsel %vm3642_vm15, 1.0, %v10401_v45  ;;  %vm752_vm1 = vcmp.eq.s32.totalorder %v8377_v34, %v7588_v8  ;;  %vm850_vm3 = vcmp.eq.s32.totalorder %v8377_v34, %v7590_v9  ;;  %vm3591_vm5 = vcmp.eq.s32.totalorder %v8377_v34, %v7592_v10 }
  0x9f   : > { %980 = vst [vmem:[#allocation2 + $0x34] sm:$0xf] %v964_v59  ;;  %v1011_v37 = vpack.c.bf16 %v995_v4, %v995_v4  ;;  %v8354_v59 = vor.u32 %v7212_v42, %v6574_v44  ;;  %v3835_v3 = vsub.f32 %v8342_v60, %v8352_v54  ;;  %v8365_v4 = vsub.f32 %v6829_v43, %v6861_v21 }
  0xa0   : > { %3775 = vst [vmem:[#allocation2 + $0x70] sm:$0xf] %v3759_v51  ;;  %v917_v44 = vpack.c.bf16 %v8263_v58, %v8263_v58  ;;  %v1059_v51 = vpack.c.bf16 %v1043_v39, %v1043_v39  ;;  %v8374_v42 = vadd.f32 %v8239_v35, %v8230_v20  ;;  %v3899_v58 = vpack.c.bf16 %v8367_v2, %v8367_v2 }
  0xa1   : > { %10404 = vst [vmem:[#allocation23_spill] sm:$0xff] %v8354_v59  ;;  %1287 = vmatpush.bf16.msra.mxu0 %v8354_v59  ;;  %v3851_v7 = vpack.c.bf16 %v3835_v3, %v3835_v3  ;;  %v3898_v43 = vpack.c.bf16 %v8365_v4, %v8365_v4  ;;  %v918_v21 = vpack.c.bf16 %v8265_v38, %v8265_v38  ;;  %v6508_v38 = vsel %vm849_vm2, 1.0, %v10401_v45 }
  0xa2   : > { %1027 = vst [vmem:[#allocation2 + $0x28] sm:$0xf] %v1011_v37  ;;  %v3756_v20 = vpack.c.bf16 %v8267_v26, %v8267_v26  ;;  %v6509_v8 = vsel %vm850_vm3, 1.0, %v10401_v45  ;;  %v945_v26 = vadd.f32 %v6508_v38, %v8394_v31  ;;  %v8415_v9 = vsel %vm3591_vm5, 1.0, %v10401_v45 }
  0xa3   : > { %1028 = vst [vmem:[#allocation2 + $0x38] sm:$0xf] %v1012_v18  ;;  %vm3689_vm7 = vcmp.eq.s32.totalorder %v8377_v34, %v7594_v11  ;;  %vm702_vm8 = vcmp.eq.s32.totalorder %v7568_v1, %v7596_v12  ;;  %v8425_v3 = vsel %vm3688_vm6, 1.0, %v10401_v45  ;;  %vm703_vm9 = vcmp.eq.s32.totalorder %v8377_v34, %v7596_v12 }
  0xa4   : > { %933 = vst [vmem:[#allocation2 + $0x40] sm:$0xf] %v917_v44  ;;  %v961_v6 = vpack.c.bf16 %v945_v26, %v945_v26  ;;  %v8428_v39 = vsel %vm3689_vm7, 1.0, %v10401_v45  ;;  %vm800_vm10 = vcmp.eq.s32.totalorder %v7568_v1, %v7598_v13  ;;  %vm801_vm11 = vcmp.eq.s32.totalorder %v8377_v34, %v7598_v13 }
  0xa5   : > { %v7202_v57 = vld [vmem:[#allocation2 + $0x24] sm:$0xf]  ;;  %1075 = vst [vmem:[#allocation2 + $0x2c] sm:$0xf] %v1059_v51  ;;  %v6460_v51 = vsel %vm702_vm8, 1.0, %v10401_v45  ;;  %v3757_v12 = vpack.c.bf16 %v8374_v42, %v8374_v42  ;;  %vm3541_vm12 = vcmp.eq.s32.totalorder %v7568_v1, %v7600_v14  ;;  %vm3542_vm13 = vcmp.eq.s32.totalorder %v8377_v34, %v7600_v14 }
  0xa6   : > { %v6544_v40 = vld [vmem:[#allocation2 + $0x30] sm:$0xf0]  ;;  %3818 = vst [vmem:[#allocation2 + $0x24] sm:$0xf] %v3802_v63  ;;  %v8397_v63 = vsel %vm752_vm1, 1.0, %v10401_v45  ;;  %vm3639_vm14 = vcmp.eq.s32.totalorder %v7568_v1, %v7602_v15  ;;  %vm3640_vm15 = vcmp.eq.s32.totalorder %v8377_v34, %v7602_v15  ;;  %v6812_v2 = vsel %vm3542_vm13, 1.0, %v10401_v45 }
  0xa7   : > { %v8391_v35 = vor.u32 %v7202_v57, %v6544_v40  ;;  %3819 = vst [vmem:[#allocation2 + $0x34] sm:$0xf] %v3803_v19  ;;  %v8412_v19 = vsel %vm3590_vm4, 1.0, %v10401_v45  ;;  %v946_v18 = vadd.f32 %v6509_v8, %v8397_v63  ;;  %v6461_v57 = vsel %vm703_vm9, 1.0, %v10401_v45  ;;  %v1089_v14 = vld [vmem:[%s8474_s30] sm:$0x3f] }
  0xa8   : > { %1076 = vst [vmem:[#allocation2 + $0x3c] sm:$0xf] %v1060_v30  ;;  %v3784_v44 = vadd.f32 %v8425_v3, %v8412_v19  ;;  %v6493_v30 = vsel %vm801_vm11, 1.0, %v10401_v45  ;;  %v6844_v1 = vsel %vm3640_vm15, 1.0, %v10401_v45  ;;  %v900_v15 = vadd.f32 %v8328_v0, %v8317_v25 }
  0xa9   : > { %10405 = vst [vmem:[#allocation24_spill] sm:$0xff] %v8391_v35  ;;  %1302 = vmatpush.bf16.msra.mxu1 %v8391_v35  ;;  %v6550_v37 = vld [vmem:[#allocation2 + $0x28] sm:$0xf]  ;;  %v962_v11 = vpack.c.bf16 %v946_v18, %v946_v18  ;;  %v3881_v25 = vsub.f32 %v8415_v9, %v8428_v39  ;;  %vm1364_vm0 = vcmask 1040384   ;;  %vm1367_vm1 = vcmask 1043456  }
  0xaa   : > { %934 = vst [vmem:[#allocation2 + $0x50] sm:$0xf] %v918_v21  ;;  %v7205_v10 = vld [vmem:[#allocation2 + $0x34] sm:$0xf0]  ;;  %v3800_v13 = vpack.c.bf16 %v3784_v44, %v3784_v44  ;;  %v6843_v44 = vsel %vm3639_vm14, 1.0, %v10401_v45  ;;  %vm1415_vm2 = vcmask 1046528  }
  0xab   : > { %3866 = vst [vmem:[#allocation2 + $0x28] sm:$0xf] %v3850_v23  ;;  %v8432_v33 = vor.u32 %v7205_v10, %v6550_v37  ;;  %v6558_v4 = vld [vmem:[#allocation2 + $0x40] sm:$0xf]  ;;  %v3785_v23 = vadd.f32 %v8428_v39, %v8415_v9  ;;  %v3739_v9 = vadd.f32 %v8352_v54, %v8342_v60  ;;  %vm1356_vm3 = vcmask 1042432  }
  0xac   : > { %3867 = vst [vmem:[#allocation2 + $0x38] sm:$0xf] %v3851_v7  ;;  %v6492_v7 = vsel %vm800_vm10, 1.0, %v10401_v45  ;;  %v7203_v40 = vld [vmem:[#allocation2 + $0x2c] sm:$0xf]  ;;  %vm1360_vm4 = vcmask 1045504  }
  0xad   : > { %10406 = vst [vmem:[#allocation25_spill] sm:$0xff] %v8432_v33  ;;  %1315 = vmatpush.bf16.msra.mxu2 %v8432_v33  ;;  %v993_v21 = vsub.f32 %v6460_v51, %v6492_v7  ;;  %v3801_v18 = vpack.c.bf16 %v3785_v23, %v3785_v23  ;;  %vm1408_vm5 = vcmask 244736  }
  0xae   : > { %3772 = vst [vmem:[#allocation2 + $0x40] sm:$0xf] %v3756_v20  ;;  %v994_v20 = vsub.f32 %v6461_v57, %v6493_v30 }
  0xaf   : > { %977 = vst [vmem:[#allocation2 + $0x4] sm:$0xf] %v961_v6  ;;  %v6552_v26 = vld [vmem:[#allocation2 + $0x38] sm:$0xf0]  ;;  %v1009_v10 = vpack.c.bf16 %v993_v21, %v993_v21  ;;  %v899_v21 = vadd.f32 %v8325_v17, %v8314_v41  ;;  %v898_v41 = vadd.f32 %v6493_v30, %v6461_v57  ;;  %v916_v17 = vpack.c.bf16 %v900_v15, %v900_v15  ;;  %v1375_v15 = vld [vmem:[%s10246_s6 + $0x8] sm:$0xff] }
  0xb0   : > { %978 = vst [vmem:[#allocation2 + $0x14] sm:$0xf] %v962_v11  ;;  %v8458_v42 = vor.u32 %v7203_v40, %v6552_v26  ;;  %v6811_v11 = vsel %vm3541_vm12, 1.0, %v10401_v45  ;;  %v1041_v40 = vsub.f32 %v8394_v31, %v6508_v38  ;;  %v1042_v31 = vsub.f32 %v8397_v63, %v6509_v8 }
  0xb1   : > { %3914 = vst [vmem:[#allocation2 + $0x2c] sm:$0xf] %v3898_v43  ;;  %v7208_v37 = vld [vmem:[#allocation2 + $0x4c] sm:$0xf0]  ;;  %v1010_v43 = vpack.c.bf16 %v994_v20, %v994_v20  ;;  %v3833_v38 = vsub.f32 %v6812_v2, %v6844_v1  ;;  %v915_v8 = vpack.c.bf16 %v899_v21, %v899_v21  ;;  %v897_v26 = vadd.f32 %v6492_v7, %v6460_v51 }
  0xb2   : > { %10407 = vst [vmem:[#allocation26_spill] sm:$0xff] %v8458_v42  ;;  %v8463_v6 = vor.u32 %v7208_v37, %v6558_v4  ;;  %1328 = vmatpush.bf16.msra.mxu3 %v8458_v42  ;;  %v1057_v4 = vpack.c.bf16 %v1041_v40, %v1041_v40  ;;  %v3738_v51 = vadd.f32 %v8349_v52, %v8339_v50  ;;  %v7452_v21 = vmov 0  }
  0xb3   : > { %3915 = vst [vmem:[#allocation2 + $0x3c] sm:$0xf] %v3899_v58  ;;  %v3832_v58 = vsub.f32 %v6811_v11, %v6843_v44  ;;  %v3849_v37 = vpack.c.bf16 %v3833_v38, %v3833_v38  ;;  %v913_v7 = vpack.c.bf16 %v897_v26, %v897_v26  ;;  %v3897_v30 = vpack.c.bf16 %v3881_v25, %v3881_v25 }
  0xb4   : > { %10408 = vst [vmem:[#allocation27_spill] sm:$0xff] %v8463_v6  ;;  %1288 = vmatpush.bf16.msra.mxu0 %v8463_v6  ;;  %v3754_v50 = vpack.c.bf16 %v3738_v51, %v3738_v51  ;;  %v3736_v52 = vadd.f32 %v6843_v44, %v6811_v11  ;;  %v3755_v38 = vpack.c.bf16 %v3739_v9, %v3739_v9 }
  0xb5   : > { %3773 = vst [vmem:[#allocation2 + $0x50] sm:$0xf] %v3757_v12  ;;  %v1058_v12 = vpack.c.bf16 %v1042_v31, %v1042_v31  ;;  %v3848_v63 = vpack.c.bf16 %v3832_v58, %v3832_v58  ;;  %7349 = vset.pattern.permute.xlu0 %v7452_v21  ;;  %7350 = vset.pattern.permute.xlu1 %v7452_v21 }
  0xb6   : > { %1025 = vst [vmem:[#allocation2 + $0x8] sm:$0xf] %v1009_v10  ;;  %v7198_v23 = vld [vmem:[#allocation2 + $0x4] sm:$0xf]  ;;  %v3880_v10 = vsub.f32 %v8412_v19, %v8425_v3  ;;  %v914_v19 = vpack.c.bf16 %v898_v41, %v898_v41  ;;  %v3752_v60 = vpack.c.bf16 %v3736_v52, %v3736_v52  ;;  %7351 = vset.pattern.permute.xlu2 %v7452_v21 }
  0xb7   : > { %1026 = vst [vmem:[#allocation2 + $0x18] sm:$0xf] %v1010_v43  ;;  %v6528_v20 = vld [vmem:[#allocation2 + $0x10] sm:$0xf0]  ;;  %v8496_v43 = vpack.c.bf16 %v1089_v14, %v1089_v14  ;;  %v10415_v21 = vld [vmem:[#allocation10_spill] sm:$0xff] }
  0xb8   : > { %3816 = vst [vmem:[#allocation2 + $0x4] sm:$0xf] %v3800_v13  ;;  %v8492_v34 = vor.u32 %v7198_v23, %v6528_v20  ;;  %v3896_v57 = vpack.c.bf16 %v3880_v10, %v3880_v10 }
  0xb9   : > { %3817 = vst [vmem:[#allocation2 + $0x14] sm:$0xf] %v3801_v18  ;;  %v3737_v18 = vadd.f32 %v6844_v1, %v6812_v2 }
  0xba   : > { %10410 = vst [vmem:[#allocation28_spill] sm:$0xff] %v8492_v34  ;;  %1303 = vmatpush.bf16.msra.mxu1 %v8492_v34 }
  0xbb   : > { %1073 = vst [vmem:[#allocation2 + $0xc] sm:$0xf] %v1057_v4  ;;  %v3753_v54 = vpack.c.bf16 %v3737_v18, %v3737_v18 }
  0xbc   : > { %1074 = vst [vmem:[#allocation2 + $0x1c] sm:$0xf] %v1058_v12  ;;  %v1374_v12 = vld [vmem:[%s10246_s6] sm:$0xff] }
  0xbd   : > { %v6534_v0 = vld [vmem:[#allocation2 + $0x8] sm:$0xf]  ;;  %931 = vst [vmem:[#allocation2 + $0x20] sm:$0xf] %v915_v8  ;;  %1304 = vmatmul.bf16.vlgmr.msra.gmra.mxu1 %v8496_v43  ;;  %1380 = vperm.xlu0 %7349, %v1374_v12   ;;  %v7230_v12 = vld [vmem:[%s10245_s5] sm:$0xff] }
  0xbe   : > { %1562 = vmatpush.bf16.msrb.mxu1 %v7878_v49  ;;  %v7201_v13 = vld [vmem:[#allocation2 + $0x14] sm:$0xf0]  ;;  %3864 = vst [vmem:[#allocation2 + $0x8] sm:$0xf] %v3848_v63 }
  0xbf   : > { %v8504_v3 = vor.u32 %v7201_v13, %v6534_v0  ;;  %3865 = vst [vmem:[#allocation2 + $0x18] sm:$0xf] %v3849_v37  ;;  %v1376_v13 = vld [vmem:[%s10246_s6 + $0x10] sm:$0xff] }
  0xc0   : > { %932 = vst [vmem:[#allocation2 + $0x30] sm:$0xf] %v916_v17  ;;  %1390 = vperm.xlu1 %7350, %v1376_v13  }
  0xc1   : > { %10411 = vst [vmem:[#allocation29_spill] sm:$0xff] %v8504_v3  ;;  %1316 = vmatpush.bf16.msra.mxu2 %v8504_v3 }
  0xc2   : > { %929 = vst [vmem:[#allocation2] sm:$0xf] %v913_v7  ;;  %1563 = vmatpush.bf16.msrb.mxu1 %v8000_v29  ;;  %v7199_v39 = vld [vmem:[#allocation2 + $0xc] sm:$0xf] }
  0xc3   : > { %930 = vst [vmem:[#allocation2 + $0x10] sm:$0xf] %v914_v19  ;;  %v6536_v40 = vld [vmem:[#allocation2 + $0x18] sm:$0xf0] }
  0xc4   : > { %3912 = vst [vmem:[#allocation2 + $0xc] sm:$0xf] %v3896_v57  ;;  %v8512_v58 = vor.u32 %v7199_v39, %v6536_v40  ;;  %v6542_v31 = vld [vmem:[#allocation2 + $0x20] sm:$0xf]  ;;  %1317 = vmatmul.bf16.vlgmr.msra.gmra.mxu2 %v8496_v43 }
  0xc5   : > { %1581 = vmatpush.bf16.msrb.mxu2 %v7678_v61  ;;  %3913 = vst [vmem:[#allocation2 + $0x1c] sm:$0xf] %v3897_v30  ;;  %1385 = vperm.xlu0 %7349, %v1375_v15   ;;  %v10418_v15 = vld [vmem:[#allocation19_spill] sm:$0xff] }
  0xc6   : > { %10412 = vst [vmem:[#allocation30_spill] sm:$0xff] %v8512_v58  ;;  %1564 = vmatpush.bf16.msrb.mxu1 %v8122_v24  ;;  %1329 = vmatpush.bf16.msra.mxu3 %v8512_v58 }
  0xc7   : > { %3770 = vst [vmem:[#allocation2 + $0x20] sm:$0xf] %v3754_v50  ;;  %v7204_v11 = vld [vmem:[#allocation2 + $0x2c] sm:$0xf0] }
  0xc8   : > { %v8519_v44 = vor.u32 %v7204_v11, %v6542_v31  ;;  %3771 = vst [vmem:[#allocation2 + $0x30] sm:$0xf] %v3755_v38  ;;  %v1377_v38 = vld [vmem:[%s10246_s6 + $0x18] sm:$0xff] }
  0xc9   : > { %1582 = vmatpush.bf16.msrb.mxu2 %v7787_v32  ;;  %v6526_v2 = vld [vmem:[#allocation2] sm:$0xf]  ;;  %1330 = vmatmul.bf16.vlgmr.msra.gmra.mxu3 %v8496_v43 }
  0xca   : > { %1600 = vmatpush.bf16.msrb.mxu3 %v7713_v27  ;;  %10413 = vst [vmem:[#allocation31_spill] sm:$0xff] %v8519_v44  ;;  %v7200_v1 = vld [vmem:[#allocation2 + $0xc] sm:$0xf0]  ;;  %1565 = vmatpush.bf16.msrb.mxu1 %v8224_v62 }
  0xcb   : > { %3768 = vst [vmem:[#allocation2] sm:$0xf] %v3752_v60  ;;  %1289 = vmatpush.bf16.msra.mxu0 %v8519_v44  ;;  %v8524_v4 = vor.u32 %v7200_v1, %v6526_v2  ;;  %1395 = vperm.xlu1 %7350, %v1377_v38   ;;  %v661_v38 = vstv %s660_s22 }
  0xcc   : > { %3769 = vst [vmem:[#allocation2 + $0x10] sm:$0xf] %v3753_v54  ;;  %7352 = vrcp.f32 %v661_v38  ;;  %vm667_vm10 = vweird.f32 %v661_v38 }
  0xcd   : > { %10414 = vst [vmem:[#allocation32_spill] sm:$0xff] %v8524_v4  ;;  %1583 = vmatpush.bf16.msrb.mxu2 %v7892_v5 }
  0xce   : > { %1601 = vmatpush.bf16.msrb.mxu3 %v7812_v28  ;;  %1566 = vmatpush.bf16.msrb.mxu1 %v8354_v59 }
  0xcf   : > { %1290 = vmatpush.bf16.msra.mxu0 %v8524_v4 }
  0xd1   : > { %1584 = vmatpush.bf16.msrb.mxu2 %v8073_v53 }
  0xd2   : > { %1602 = vmatpush.bf16.msrb.mxu3 %v7962_v22  ;;  %1291 = vmatmul.bf16.vlgmr.msra.gmra.mxu0 %v8496_v43 }
  0xd3   : > { %1567 = vmatpush.bf16.msrb.mxu1 %v8463_v6 }
  0xd5   : > { %1585 = vmatpush.bf16.msrb.mxu2 %v8185_v56 }
  0xd6   : > { %1603 = vmatpush.bf16.msrb.mxu3 %v8086_v46 }
  0xd7   : > { %1568 = vmatpush.bf16.msrb.mxu1 %v8519_v44 }
  0xd9   : > { %1586 = vmatpush.bf16.msrb.mxu2 %v8277_v47 }
  0xda   : > { %1604 = vmatpush.bf16.msrb.mxu3 %v8198_v55 }
  0xdb   : > { %1569 = vmatpush.bf16.msrb.mxu1 %v8524_v4 }
  0xdd   : > { %1587 = vmatpush.bf16.msrb.mxu2 %v8391_v35 }
  0xde   : > { %1605 = vmatpush.bf16.msrb.mxu3 %v8294_v16 }
  0xe1   : > { %1588 = vmatpush.bf16.msrb.mxu2 %v8492_v34 }
  0xe2   : > { %1606 = vmatpush.bf16.msrb.mxu3 %v8432_v33 }
  0xe6   : > { %1607 = vmatpush.bf16.msrb.mxu3 %v8504_v3 }
  0xea   : > { %2121 = vmatpush.bf16.msra.mxu3 %v7878_v49 }
  0xee   : > { %2122 = vmatpush.bf16.msra.mxu3 %v8000_v29 }
  0xf2   : > { %2123 = vmatpush.bf16.msra.mxu3 %v8122_v24 }
  0xf6   : > { %2124 = vmatpush.bf16.msra.mxu3 %v8224_v62 }
  0xfa   : > { %2125 = vmatpush.bf16.msra.mxu3 %v8354_v59 }
  0xfe   : > { %2126 = vmatpush.bf16.msra.mxu3 %v8463_v6 }
 0x102   : > { %2127 = vmatpush.bf16.msra.mxu3 %v8519_v44 }
 0x106   : > { %2128 = vmatpush.bf16.msra.mxu3 %v8524_v4 }
 0x13a   : > { %v1305_v23 = vpop.f32.mrf.mxu1 }
 0x13b   : > { %v1336_v14 = vpack.c.bf16 %v1305_v23, %v1305_v23 }
 0x13d   : > { %v1346_v63 = vunpack.c.l.b16 %v1336_v14  ;;  %v10416_v14 = vld [vmem:[#allocation13_spill] sm:$0xff] }
 0x13f   : > { %v1347_v37 = vpack.c.b16 %v1346_v63, %v1346_v63  ;;  %v10419_v63 = vlaneseq }
 0x141   : > { %v1348_v0 = vrot.slane %v1347_v37, 2  ;;  %v1381_v37 = vpop.permute.xlu0 %1380 }
 0x142   : > { %v1307_v20 = vpop.f32.mrf.mxu1 }
 0x143   : > { %v10417_v20 = vld [vmem:[#allocation16_spill] sm:$0xff] }
 0x147   : > { %v1318_v8 = vpop.f32.mrf.mxu2 }
 0x148   : > { %v1337_v26 = vand.u32 2147483647, %v1318_v8  ;;  %v8599_v8 = vand.u32 127, %v10419_v63  ;;  %v673_v63 = vand.u32 2147483648, %v661_v38 }
 0x14a   : > { %v1338_v10 = vpack.c.bf16 %v1337_v26, %v1337_v26  ;;  %10420 = vst [vmem:[#allocation10_spill] sm:$0xff] %v8599_v8  ;;  %v679_v26 = vstv %s8596_s21  ;;  %s10477_s21 = sld [smem:[#allocation37_spill]] }
 0x14b   : > { %vm680_vm6 = vcmp.lt.s32.totalorder %v8599_v8, %v679_v26 }
 0x14c   : > { %v1350_v41 = vunpack.c.l.b16 %v1338_v10  ;;  %v1331_v25 = vpop.f32.mrf.mxu3 }
 0x14d   : > { %v1339_v17 = vand.u32 2147483647, %v1331_v25 }
 0x14e   : > { %v1351_v7 = vpack.c.b16 %v1350_v41, %v1350_v41 }
 0x14f   : > { %v1292_v51 = vpop.f32.mrf.mxu0  ;;  %v1340_v57 = vpack.c.bf16 %v1339_v17, %v1339_v17  ;;  %v1320_v30 = vpop.f32.mrf.mxu2  ;;  %v8604_v17 = vsel %vm680_vm6, 1.0, %v10401_v45 }
 0x150   : > { %v1335_v19 = vpack.c.bf16 %v1292_v51, %v1292_v51  ;;  %v1352_v9 = vrot.slane %v1351_v7, 7  ;;  %10421 = vst [vmem:[#allocation13_spill] sm:$0xff] %v8604_v17  ;;  %v1386_v7 = vpop.permute.xlu0 %1385 }
 0x151   : > { %v1354_v52 = vunpack.c.l.b16 %v1340_v57 }
 0x152   : > { %v1342_v50 = vunpack.c.l.b16 %v1335_v19  ;;  %v1366_v39 = vsel %vm1364_vm0, %v1348_v0, %v1352_v9 }
 0x153   : > { %v1355_v40 = vpack.c.b16 %v1354_v52, %v1354_v52  ;;  %v1391_v52 = vpop.permute.xlu1 %1390 }
 0x154   : > { %v1343_v18 = vpack.c.b16 %v1342_v50, %v1342_v50  ;;  %v1333_v31 = vpop.f32.mrf.mxu3 }
 0x155   : > { %v1369_v54 = vsel %vm1367_vm1, %v1366_v39, %v1355_v40 }
 0x156   : > { %v1344_v60 = vrot.slane %v1343_v18, 5  ;;  %v1416_v2 = vsel %vm1415_vm2, %v1369_v54, 0 }
 0x157   : > { %v1294_v11 = vpop.f32.mrf.mxu0  ;;  %1424 = vmatpush.bf16.msrb.mxu0 %v1416_v2  ;;  %v7353_v2 = vpop.eup %7352 }
 0x158   : > { %v1359_v1 = vsel %vm1356_vm3, %v8496_v43, %v1344_v60  ;;  %v7231_v43 = vld [vmem:[%s10245_s5 + $0x8] sm:$0xff]  ;;  %vm668_vm11 = vweird.f32 %v7353_v2 }
 0x159   : > { %v1362_v23 = vsel %vm1360_vm4, %v1359_v1, %v1348_v0  ;;  %vm669_vm13 = vmor %vm667_vm10, %vm668_vm11 }
 0x15b   : > { %1425 = vmatpush.bf16.msrb.mxu0 %v1362_v23  ;;  %v1396_v1 = vpop.permute.xlu1 %1395 }
 0x15e   : > { %6660 = vmatmul.msk.bf16.vlgmr.msrb.gmra.mxu0 %vm1408_vm5, %v7230_v12  ;;  %v1719_v12 = vld [vmem:[%s10248_s8 + $0x8] sm:$0xff] }
 0x15f   : > { %1619 = vmatpush.bf16.msra.mxu0 %v7745_v48 }
 0x163   : > { %1620 = vmatpush.bf16.msra.mxu0 %v10415_v21 }
 0x167   : > { %1621 = vmatpush.bf16.msra.mxu0 %v10416_v14 }
 0x16b   : > { %1622 = vmatpush.bf16.msra.mxu0 %v10417_v20 }
 0x16e   : > { %6661 = vmatmul.msk.bf16.gmra.mxu0 %vm1408_vm5, %v7231_v43  ;;  %v663_v43 = vmul.f32 %v7353_v2, %v661_v38 }
 0x16f   : > { %1623 = vmatpush.bf16.msra.mxu0 %v10418_v15 }
 0x170   : > { %v664_v26 = vsub.f32 1.0, %v663_v43 }
 0x173   : > { %1624 = vmatpush.bf16.msra.mxu0 %v8309_v36 }
 0x177   : > { %1625 = vmatpush.bf16.msra.mxu0 %v8458_v42 }
 0x17b   : > { %1626 = vmatpush.bf16.msra.mxu0 %v8512_v58 }
 0x17f   : > { %2150 = vmatpush.bf16.msrb.mxu0 %v7678_v61 }
 0x183   : > { %2151 = vmatpush.bf16.msrb.mxu0 %v7787_v32 }
 0x187   : > { %2152 = vmatpush.bf16.msrb.mxu0 %v7892_v5 }
 0x18b   : > { %2153 = vmatpush.bf16.msrb.mxu0 %v8073_v53 }
 0x18f   : > { %2154 = vmatpush.bf16.msrb.mxu0 %v8185_v56 }
 0x193   : > { %2155 = vmatpush.bf16.msrb.mxu0 %v8277_v47 }
 0x197   : > { %2156 = vmatpush.bf16.msrb.mxu0 %v8391_v35 }
 0x19b   : > { %2157 = vmatpush.bf16.msrb.mxu0 %v8492_v34 }
 0x1db   : > { %v1427_v10 = vpop.f32.mrf.mxu0 }
 0x1dc   : > { %v1428_v41 = vadd.f32 %v1427_v10, %v1381_v37  ;;  %v671_v37 = vand.u32 2147483647, %v661_v38 }
 0x1de   : > { %vm1437_vm7 = vcmp.ge.f32.partialorder %v1428_v41, 0.0  ;;  %v1441_v25 = vmul.f32 0.0, %v1428_v41  ;;  %vm672_vm14 = vcmp.eq.f32.partialorder %v671_v37, 8.507059e+37 }
 0x1e0   : > { %v8606_v0 = vsel %vm1437_vm7, %v1428_v41, %v1441_v25  ;;  %v665_v25 = vmul.f32 %v7353_v2, %v664_v26 }
 0x1e1   : > { %v1449_v51 = vmul.f32 %v8604_v17, %v8606_v0 }
 0x1e3   : > { %v1429_v13 = vpop.f32.mrf.mxu0  ;;  %1453 = vadd.xlane.f32.xlu2 %v1449_v51  ;;  %v1461_v19 = vmul.f32 %v1449_v51, %v8606_v0  ;;  %v674_v51 = vor.u32 1.1754944e-38, %v673_v63 }
 0x1e4   : > { %v1430_v57 = vadd.f32 %v1429_v13, %v1386_v7  ;;  %v666_v7 = vadd.f32 %v7353_v2, %v665_v25  ;;  %v1722_v13 = vld [vmem:[%s10248_s8 + $0x20] sm:$0xff] }
 0x1e5   : > { %1465 = vadd.xlane.f32.xlu0 %v1461_v19 }
 0x1e6   : > { %v1442_v30 = vmul.f32 0.0, %v1430_v57  ;;  %vm1438_vm8 = vcmp.ge.f32.partialorder %v1430_v57, 0.0 }
 0x1e8   : > { %v8611_v9 = vsel %vm1438_vm8, %v1430_v57, %v1442_v30  ;;  %v670_v57 = vsel %vm669_vm13, %v7353_v2, %v666_v7 }
 0x1e9   : > { %v1450_v50 = vmul.f32 %v8604_v17, %v8611_v9  ;;  %v675_v30 = vsel %vm672_vm14, %v674_v51, %v670_v57 }
 0x1ea   : > { %7334 = vpush %v675_v30 }
 0x1eb   : > { %v1432_v39 = vpop.f32.mrf.mxu0  ;;  %1455 = vadd.xlane.f32.xlu2 %v1450_v50  ;;  %v1462_v18 = vmul.f32 %v1450_v50, %v8611_v9 }
 0x1ec   : > { %v1433_v40 = vadd.f32 %v1432_v39, %v1391_v52  ;;  %v1720_v52 = vld [vmem:[%s10248_s8 + $0x10] sm:$0xff]  ;;  %v1725_v39 = vld [vmem:[%s10248_s8 + $0x38] sm:$0xff] }
 0x1ed   : > { %1467 = vadd.xlane.f32.xlu1 %v1462_v18 }
 0x1ee   : > { %vm1439_vm9 = vcmp.ge.f32.partialorder %v1433_v40, 0.0  ;;  %v1443_v31 = vmul.f32 0.0, %v1433_v40 }
 0x1f0   : > { %v8617_v60 = vsel %vm1439_vm9, %v1433_v40, %v1443_v31  ;;  %v1724_v40 = vld [vmem:[%s10248_s8 + $0x30] sm:$0xff] }
 0x1f1   : > { %v1451_v54 = vmul.f32 %v8604_v17, %v8617_v60 }
 0x1f3   : > { %v1434_v11 = vpop.f32.mrf.mxu0  ;;  %1457 = vadd.xlane.f32.xlu2 %v1451_v54  ;;  %v1463_v10 = vmul.f32 %v1451_v54, %v8617_v60 }
 0x1f4   : > { %v1435_v23 = vadd.f32 %v1434_v11, %v1396_v1 }
 0x1f6   : > { %v1444_v41 = vmul.f32 0.0, %v1435_v23  ;;  %vm1440_vm12 = vcmp.ge.f32.partialorder %v1435_v23, 0.0 }
 0x1f8   : > { %v8628_v19 = vsel %vm1440_vm12, %v1435_v23, %v1444_v41 }
 0x1f9   : > { %1733 = vperm.xlu0 %7349, %v1719_v12   ;;  %v1452_v50 = vmul.f32 %v8604_v17, %v8628_v19 }
 0x1fb   : > { %1469 = vadd.xlane.f32.xlu2 %v1463_v10  ;;  %v1464_v18 = vmul.f32 %v1452_v50, %v8628_v19 }
 0x201   : > { %1748 = vperm.xlu0 %7349, %v1722_v13  }
 0x203   : > { %1459 = vadd.xlane.f32.xlu2 %v1452_v50 }
 0x206   : > { %1738 = vperm.xlu1 %7350, %v1720_v52  }
 0x209   : > { %1763 = vperm.xlu0 %7349, %v1725_v39  }
 0x20b   : > { %1471 = vadd.xlane.f32.xlu2 %v1464_v18 }
 0x20e   : > { %1758 = vperm.xlu1 %7350, %v1724_v40  }
 0x21b   : > { %s7335_s22 = spop %7334 }
 0x21c   : > { %v8642_v31 = vstv %s7335_s22  ;;  %s9485_s22 = scalar_lea.vmem %s10477_s21, %s7574_s23 }
 0x21d   : > { %10422 = vst [vmem:[#allocation16_spill] sm:$0xff] %v8642_v31 }
 0x256   : > { %v1454_v38 = vpop.xlane.xlu2 %1453 }
 0x257   : > { %v1474_v54 = vmul.f32 %v8642_v31, %v1454_v38 }
 0x258   : > { %v1466_v11 = vpop.xlane.xlu0 %1465 }
 0x259   : > { %v1482_v2 = vmul.f32 %v1474_v54, %v1474_v54  ;;  %v1478_v1 = vmul.f32 %v8642_v31, %v1466_v11 }
 0x25b   : > { %v1486_v23 = vsub.f32 %v1478_v1, %v1482_v2 }
 0x25d   : > { %v1490_v12 = vmax.f32 %v1486_v23, 0.0 }
 0x25e   : > { %v1456_v43 = vpop.xlane.xlu2 %1455 }
 0x25f   : > { %v1498_v63 = vadd.f32 1e-05, %v1490_v12  ;;  %v1475_v26 = vmul.f32 %v8642_v31, %v1456_v43 }
 0x260   : > { %v1468_v37 = vpop.xlane.xlu1 %1467 }
 0x261   : > { %7354 = vrsqrt.f32 %v1498_v63  ;;  %v1483_v10 = vmul.f32 %v1475_v26, %v1475_v26  ;;  %v1479_v41 = vmul.f32 %v8642_v31, %v1468_v37  ;;  %vm1508_vm6 = vweird.f32 %v1498_v63 }
 0x263   : > { %v1487_v25 = vsub.f32 %v1479_v41, %v1483_v10 }
 0x265   : > { %v1491_v51 = vmax.f32 %v1487_v25, 0.0 }
 0x266   : > { %v1458_v7 = vpop.xlane.xlu2 %1457 }
 0x267   : > { %v7355_v13 = vpop.eup %7354  ;;  %v1499_v30 = vadd.f32 1e-05, %v1491_v51  ;;  %v8649_v52 = vmul.f32 %v8642_v31, %v1458_v7  ;;  %v1494_v51 = vsub.f32 %v8606_v0, %v1474_v54 }
 0x268   : > { %v1503_v57 = vmul.f32 %v7355_v13, %v1498_v63  ;;  %vm1509_vm15 = vweird.f32 %v7355_v13 }
 0x269   : > { %7356 = vrsqrt.f32 %v1499_v30  ;;  %v1484_v38 = vmul.f32 %v8649_v52, %v8649_v52  ;;  %vm1510_vm7 = vmor %vm1508_vm6, %vm1509_vm15  ;;  %vm1518_vm9 = vweird.f32 %v1499_v30 }
 0x26a   : > { %v1504_v50 = vmul.f32 %v7355_v13, %v1503_v57 }
 0x26c   : > { %v1505_v39 = vmul.f32 0.5, %v1504_v50 }
 0x26e   : > { %v1506_v18 = vsub.f32 1.5, %v1505_v39  ;;  %v1470_v40 = vpop.xlane.xlu2 %1469 }
 0x26f   : > { %v1480_v11 = vmul.f32 %v8642_v31, %v1470_v40  ;;  %v7357_v2 = vpop.eup %7356 }
 0x270   : > { %v1507_v1 = vmul.f32 %v7355_v13, %v1506_v18  ;;  %v1513_v23 = vmul.f32 %v7357_v2, %v1499_v30  ;;  %vm1519_vm8 = vweird.f32 %v7357_v2  ;;  %v1495_v18 = vsub.f32 %v8611_v9, %v1475_v26 }
 0x271   : > { %v1488_v12 = vsub.f32 %v1480_v11, %v1484_v38  ;;  %vm1520_vm10 = vmor %vm1518_vm9, %vm1519_vm8 }
 0x272   : > { %v1514_v43 = vmul.f32 %v7357_v2, %v1513_v23  ;;  %v1511_v10 = vsel %vm1510_vm7, %v7355_v13, %v1507_v1  ;;  %vm1802_vm7 = vcmask 261120  }
 0x273   : > { %v1492_v37 = vmax.f32 %v1488_v12, 0.0  ;;  %v1542_v50 = vmul.f32 %v1511_v10, %v1494_v51 }
 0x274   : > { %v1515_v41 = vmul.f32 0.5, %v1514_v43 }
 0x275   : > { %v1500_v25 = vadd.f32 1e-05, %v1492_v37  ;;  %v1546_v38 = vpack.c.bf16 %v1542_v50, %v1542_v50 }
 0x276   : > { %v1460_v7 = vpop.xlane.xlu2 %1459  ;;  %v1516_v57 = vsub.f32 1.5, %v1515_v41 }
 0x277   : > { %7358 = vrsqrt.f32 %v1500_v25  ;;  %v1477_v63 = vmul.f32 %v8642_v31, %v1460_v7  ;;  %v1554_v43 = vunpack.c.l.b16 %v1546_v38  ;;  %vm1528_vm12 = vweird.f32 %v1500_v25 }
 0x278   : > { %v1517_v39 = vmul.f32 %v7357_v2, %v1516_v57  ;;  %v1496_v38 = vsub.f32 %v8617_v60, %v8649_v52 }
 0x279   : > { %v1485_v0 = vmul.f32 %v1477_v63, %v1477_v63 }
 0x27a   : > { %v1521_v40 = vsel %vm1520_vm10, %v7357_v2, %v1517_v39 }
 0x27b   : > { %v1543_v11 = vmul.f32 %v1521_v40, %v1495_v18 }
 0x27d   : > { %v7359_v13 = vpop.eup %7358  ;;  %v1547_v1 = vpack.c.bf16 %v1543_v11, %v1543_v11 }
 0x27e   : > { %v1523_v23 = vmul.f32 %v7359_v13, %v1500_v25  ;;  %v1472_v12 = vpop.xlane.xlu2 %1471  ;;  %vm1529_vm11 = vweird.f32 %v7359_v13 }
 0x27f   : > { %v1481_v54 = vmul.f32 %v8642_v31, %v1472_v12  ;;  %v1555_v37 = vunpack.c.l.b16 %v1547_v1  ;;  %vm1530_vm13 = vmor %vm1528_vm12, %vm1529_vm11  ;;  %v1497_v12 = vsub.f32 %v8628_v19, %v1477_v63 }
 0x280   : > { %v1524_v41 = vmul.f32 %v7359_v13, %v1523_v23 }
 0x281   : > { %v1489_v10 = vsub.f32 %v1481_v54, %v1485_v0  ;;  %v8658_v30 = vpack.c.b16 %v1555_v37, %v1554_v43 }
 0x282   : > { %v1525_v2 = vmul.f32 0.5, %v1524_v41 }
 0x283   : > { %v1493_v9 = vmax.f32 %v1489_v10, 0.0  ;;  %1570 = vmatmul.bf16.vlgmr.msrb.gmra.mxu1 %v8658_v30  ;;  %1589 = vmatmul.bf16.vlgmr.msrb.gmra.mxu2 %v8658_v30 }
 0x284   : > { %1608 = vmatmul.bf16.vlgmr.msrb.gmra.mxu3 %v8658_v30  ;;  %1627 = vmatmul.bf16.vlgmr.msra.gmra.mxu0 %v8658_v30  ;;  %v1526_v51 = vsub.f32 1.5, %v1525_v2 }
 0x285   : > { %v1501_v26 = vadd.f32 1e-05, %v1493_v9 }
 0x286   : > { %v1527_v57 = vmul.f32 %v7359_v13, %v1526_v51 }
 0x287   : > { %7360 = vrsqrt.f32 %v1501_v26  ;;  %vm1538_vm15 = vweird.f32 %v1501_v26 }
 0x288   : > { %v1531_v18 = vsel %vm1530_vm13, %v7359_v13, %v1527_v57 }
 0x289   : > { %v1544_v1 = vmul.f32 %v1531_v18, %v1496_v38 }
 0x28b   : > { %v1548_v54 = vpack.c.bf16 %v1544_v1, %v1544_v1 }
 0x28d   : > { %v7361_v7 = vpop.eup %7360  ;;  %v1556_v25 = vunpack.c.l.b16 %v1548_v54 }
 0x28e   : > { %v1533_v50 = vmul.f32 %v7361_v7, %v1501_v26  ;;  %vm1539_vm14 = vweird.f32 %v7361_v7 }
 0x28f   : > { %vm1540_vm6 = vmor %vm1538_vm15, %vm1539_vm14 }
 0x290   : > { %v1534_v39 = vmul.f32 %v7361_v7, %v1533_v50 }
 0x292   : > { %v1535_v40 = vmul.f32 0.5, %v1534_v39 }
 0x294   : > { %v1536_v11 = vsub.f32 1.5, %v1535_v40 }
 0x296   : > { %v1537_v23 = vmul.f32 %v7361_v7, %v1536_v11 }
 0x298   : > { %v1541_v0 = vsel %vm1540_vm6, %v7361_v7, %v1537_v23 }
 0x299   : > { %v1545_v43 = vmul.f32 %v1541_v0, %v1497_v12 }
 0x29b   : > { %v1549_v37 = vpack.c.bf16 %v1545_v43, %v1545_v43 }
 0x29d   : > { %v1557_v10 = vunpack.c.l.b16 %v1549_v37 }
 0x29f   : > { %v8667_v41 = vpack.c.b16 %v1557_v10, %v1556_v25 }
 0x2a1   : > { %1575 = vmatmul.bf16.gmra.mxu1 %v8667_v41  ;;  %1594 = vmatmul.bf16.gmra.mxu2 %v8667_v41 }
 0x2a2   : > { %1613 = vmatmul.bf16.gmra.mxu3 %v8667_v41  ;;  %1632 = vmatmul.bf16.gmra.mxu0 %v8667_v41 }
 0x300   : > { %v8675_v13 = vpop.f32.mrf.mxu1 }
 0x301   : > { %v1628_v60 = vpop.f32.mrf.mxu0 }
 0x302   : > { %v1654_v40 = vand.u32 2147483647, %v1628_v60  ;;  %v7232_v60 = vld [vmem:[%s10247_s7 + $0x4] sm:$0xf] }
 0x304   : > { %v1658_v0 = vpack.c.bf16 %v1654_v40, %v1654_v40 }
 0x306   : > { %v8673_v19 = vpop.f32.mrf.mxu2 }
 0x307   : > { %v1609_v52 = vpop.f32.mrf.mxu3 }
 0x308   : > { %v8677_v57 = vpop.f32.mrf.mxu1  ;;  %v1646_v25 = vand.u32 2147483647, %v1609_v52 }
 0x309   : > { %v1630_v63 = vpop.f32.mrf.mxu0 }
 0x30a   : > { %v1655_v50 = vand.u32 2147483647, %v1630_v63  ;;  %v1702_v63 = vunpack.c.l.b16 %v1658_v0  ;;  %v1650_v52 = vpack.c.bf16 %v1646_v25, %v1646_v25 }
 0x30c   : > { %v1659_v1 = vpack.c.bf16 %v1655_v50, %v1655_v50 }
 0x30e   : > { %v1592_v26 = vpop.f32.mrf.mxu2  ;;  %v1703_v45 = vunpack.c.l.b16 %v1659_v1 }
 0x30f   : > { %v1611_v9 = vpop.f32.mrf.mxu3 }
 0x310   : > { %v1647_v54 = vand.u32 2147483647, %v1611_v9  ;;  %v6666_v9 = vld [vmem:[%s10247_s7 + $0x8] sm:$0xf0] }
 0x311   : > { %v6669_v40 = vor.u32 %v7232_v60, %v6666_v9  ;;  %v1638_v60 = vpack.c.bf16 %v8675_v13, %v8675_v13  ;;  %v1721_v13 = vld [vmem:[%s10248_s8 + $0x18] sm:$0xff] }
 0x312   : > { %v1651_v6 = vpack.c.bf16 %v1647_v54, %v1647_v54 }
 0x31e   : > { %v1576_v44 = vpop.f32.mrf.mxu1 }
 0x31f   : > { %v1633_v2 = vpop.f32.mrf.mxu0  ;;  %v1640_v25 = vpack.c.bf16 %v1576_v44, %v1576_v44 }
 0x320   : > { %v1656_v51 = vand.u32 2147483647, %v1633_v2 }
 0x321   : > { %v1668_v44 = vunpack.c.l.b16 %v1640_v25 }
 0x322   : > { %v1660_v38 = vpack.c.bf16 %v1656_v51, %v1656_v51 }
 0x324   : > { %v1595_v39 = vpop.f32.mrf.mxu2  ;;  %v1704_v43 = vunpack.c.l.b16 %v1660_v38  ;;  %v1691_v38 = vunpack.c.l.b16 %v1651_v6 }
 0x325   : > { %v1614_v7 = vpop.f32.mrf.mxu3 }
 0x326   : > { %v1648_v23 = vand.u32 2147483647, %v1614_v7  ;;  %v1578_v54 = vpop.f32.mrf.mxu1 }
 0x327   : > { %v1635_v18 = vpop.f32.mrf.mxu0 }
 0x328   : > { %v1657_v11 = vand.u32 2147483647, %v1635_v18  ;;  %v1652_v2 = vpack.c.bf16 %v1648_v23, %v1648_v23  ;;  %v1706_v18 = vpack.c.b16 %v1703_v45, %v1702_v63  ;;  %v1643_v23 = vpack.c.bf16 %v1592_v26, %v1592_v26  ;;  %v7234_v63 = vld [vmem:[%s10247_s7 + $0x14] sm:$0xf] }
 0x329   : > { %v1642_v45 = vpack.c.bf16 %v8673_v19, %v8673_v19  ;;  %v1639_v26 = vpack.c.bf16 %v8677_v57, %v8677_v57  ;;  %v6674_v19 = vld [vmem:[%s10247_s7 + $0x18] sm:$0xf0] }
 0x32a   : > { %v1661_v12 = vpack.c.bf16 %v1657_v11, %v1657_v11  ;;  %v1692_v7 = vunpack.c.l.b16 %v1652_v2  ;;  %v1679_v6 = vunpack.c.l.b16 %v1643_v23  ;;  %v6677_v9 = vor.u32 %v7234_v63, %v6674_v19  ;;  %v7238_v23 = vld [vmem:[%s10247_s7 + $0x34] sm:$0xf] }
 0x32c   : > { %v1705_v37 = vunpack.c.l.b16 %v1661_v12  ;;  %v1597_v51 = vpop.f32.mrf.mxu2 }
 0x32d   : > { %v1616_v10 = vpop.f32.mrf.mxu3  ;;  %v1645_v11 = vpack.c.bf16 %v1597_v51, %v1597_v51  ;;  %v1667_v51 = vunpack.c.l.b16 %v1639_v26 }
 0x32e   : > { %v1707_v8 = vpack.c.b16 %v1705_v37, %v1704_v43  ;;  %v1649_v4 = vand.u32 2147483647, %v1616_v10  ;;  %v1641_v43 = vpack.c.bf16 %v1578_v54, %v1578_v54 }
 0x32f   : > { %v1681_v12 = vunpack.c.l.b16 %v1645_v11  ;;  %v6682_v11 = vld [vmem:[%s10247_s7 + $0x28] sm:$0xf0] }
 0x330   : > { %v1653_v59 = vpack.c.bf16 %v1649_v4, %v1649_v4  ;;  %1850 = vmatpush.bf16.msra.mxu2 %v1707_v8  ;;  %v1690_v4 = vunpack.c.l.b16 %v1650_v52  ;;  %v1644_v8 = vpack.c.bf16 %v1595_v39, %v1595_v39  ;;  %v1678_v39 = vunpack.c.l.b16 %v1642_v45  ;;  %v1718_v52 = vld [vmem:[%s10248_s8] sm:$0xff] }
 0x331   : > { %v1669_v10 = vunpack.c.l.b16 %v1641_v43  ;;  %1728 = vperm.xlu2 %7351, %v1718_v52   ;;  %v6680_v45 = vld [vmem:[%s10247_s7 + $0x20] sm:$0xf]  ;;  %v6688_v43 = vld [vmem:[%s10247_s7 + $0x30] sm:$0xf] }
 0x332   : > { %v1693_v50 = vunpack.c.l.b16 %v1653_v59  ;;  %v1694_v0 = vpack.c.b16 %v1691_v38, %v1690_v4  ;;  %v1680_v59 = vunpack.c.l.b16 %v1644_v8  ;;  %v1682_v2 = vpack.c.b16 %v1679_v6, %v1678_v39  ;;  %v7236_v38 = vld [vmem:[%s10247_s7 + $0x24] sm:$0xf]  ;;  %v1723_v4 = vld [vmem:[%s10248_s8 + $0x28] sm:$0xff]  ;;  %v7235_v8 = vld [vmem:[%s10247_s7 + $0x14] sm:$0xf0] }
 0x333   : > { %v1671_v57 = vpack.c.b16 %v1669_v10, %v1668_v44  ;;  %v1734_v44 = vpop.permute.xlu0 %1733 }
 0x334   : > { %v1695_v1 = vpack.c.b16 %v1693_v50, %v1692_v7  ;;  %1851 = vmatpush.bf16.msra.mxu2 %v1706_v18  ;;  %v1683_v37 = vpack.c.b16 %v1681_v12, %v1680_v59  ;;  %v1666_v7 = vunpack.c.l.b16 %v1638_v60  ;;  %v6664_v18 = vld [vmem:[%s10247_s7] sm:$0xf]  ;;  %v6690_v12 = vld [vmem:[%s10247_s7 + $0x38] sm:$0xf0]  ;;  %v7237_v59 = vld [vmem:[%s10247_s7 + $0x24] sm:$0xf0] }
 0x335   : > { %v6693_v54 = vor.u32 %v7238_v23, %v6690_v12  ;;  %v6681_v6 = vor.u32 %v7237_v59, %v6680_v45 }
 0x336   : > { %1815 = vmatpush.bf16.msra.mxu1 %v1695_v1  ;;  %v1670_v50 = vpack.c.b16 %v1667_v51, %v1666_v7 }
 0x337   : > { %6694 = vmatmul.msk.bf16.vlgmr.msra.gmra.mxu2 %vm1802_vm7, %v6669_v40  ;;  %v7233_v40 = vld [vmem:[%s10247_s7 + $0x4] sm:$0xf0] }
 0x338   : > { %2208 = vmatpush.bf16.msrb.mxu2 %v7745_v48  ;;  %v6665_v1 = vor.u32 %v7233_v40, %v6664_v18 }
 0x339   : > { %1743 = vperm.xlu2 %7351, %v1721_v13  }
 0x33a   : > { %1816 = vmatpush.bf16.msra.mxu1 %v1694_v0 }
 0x33c   : > { %2209 = vmatpush.bf16.msrb.mxu2 %v10415_v21 }
 0x33e   : > { %1817 = vmatpush.bf16.msra.mxu1 %v1683_v37  ;;  %v7239_v37 = vld [vmem:[%s10247_s7 + $0x34] sm:$0xf0] }
 0x33f   : > { %v6689_v39 = vor.u32 %v7239_v37, %v6688_v43 }
 0x340   : > { %2210 = vmatpush.bf16.msrb.mxu2 %v10416_v14 }
 0x341   : > { %1753 = vperm.xlu2 %7351, %v1723_v4  }
 0x342   : > { %1818 = vmatpush.bf16.msra.mxu1 %v1682_v2 }
 0x344   : > { %2211 = vmatpush.bf16.msrb.mxu2 %v10417_v20 }
 0x346   : > { %1819 = vmatpush.bf16.msra.mxu1 %v1671_v57 }
 0x347   : > { %6695 = vmatmul.msk.bf16.gmra.mxu2 %vm1802_vm7, %v6677_v9 }
 0x348   : > { %2212 = vmatpush.bf16.msrb.mxu2 %v10418_v15 }
 0x34a   : > { %1820 = vmatpush.bf16.msra.mxu1 %v1670_v50 }
 0x34c   : > { %2213 = vmatpush.bf16.msrb.mxu2 %v8309_v36 }
 0x34e   : > { %1821 = vmatpush.bf16.msra.mxu1 %v8667_v41  ;;  %v6685_v41 = vor.u32 %v7236_v38, %v6682_v11  ;;  %v1739_v38 = vpop.permute.xlu1 %1738 }
 0x350   : > { %2214 = vmatpush.bf16.msrb.mxu2 %v8458_v42 }
 0x352   : > { %1822 = vmatpush.bf16.msra.mxu1 %v8658_v30  ;;  %v6672_v30 = vld [vmem:[%s10247_s7 + $0x10] sm:$0xf] }
 0x353   : > { %v6673_v0 = vor.u32 %v7235_v8, %v6672_v30 }
 0x354   : > { %2215 = vmatpush.bf16.msrb.mxu2 %v8512_v58 }
 0x355   : > { %1823 = vmatmul.bf16.vlgmr.msra.gmra.mxu1 %v6665_v1 }
 0x356   : > { %2179 = vmatpush.bf16.msrb.mxu1 %v7713_v27 }
 0x357   : > { %6696 = vmatmul.msk.bf16.gmra.mxu2 %vm1802_vm7, %v6685_v41 }
 0x358   : > { %2561 = vmatpush.bf16.msra.mxu2 %v7713_v27 }
 0x35a   : > { %2180 = vmatpush.bf16.msrb.mxu1 %v7812_v28 }
 0x35c   : > { %2562 = vmatpush.bf16.msra.mxu2 %v7812_v28 }
 0x35e   : > { %2181 = vmatpush.bf16.msrb.mxu1 %v7962_v22 }
 0x360   : > { %2563 = vmatpush.bf16.msra.mxu2 %v7962_v22 }
 0x362   : > { %2182 = vmatpush.bf16.msrb.mxu1 %v8086_v46 }
 0x364   : > { %2564 = vmatpush.bf16.msra.mxu2 %v8086_v46 }
 0x365   : > { %1828 = vmatmul.bf16.gmra.mxu1 %v6673_v0 }
 0x366   : > { %2183 = vmatpush.bf16.msrb.mxu1 %v8198_v55 }
 0x367   : > { %6697 = vmatmul.msk.bf16.gmra.mxu2 %vm1802_vm7, %v6693_v54 }
 0x368   : > { %2565 = vmatpush.bf16.msra.mxu2 %v8198_v55 }
 0x36a   : > { %2184 = vmatpush.bf16.msrb.mxu1 %v8294_v16 }
 0x36c   : > { %2566 = vmatpush.bf16.msra.mxu2 %v8294_v16 }
 0x36e   : > { %2185 = vmatpush.bf16.msrb.mxu1 %v8432_v33 }
 0x370   : > { %2567 = vmatpush.bf16.msra.mxu2 %v8432_v33 }
 0x372   : > { %2186 = vmatpush.bf16.msrb.mxu1 %v8504_v3 }
 0x374   : > { %2568 = vmatpush.bf16.msra.mxu2 %v8504_v3 }
 0x375   : > { %1833 = vmatmul.bf16.gmra.mxu1 %v6681_v6 }
 0x376   : > { %2542 = vmatpush.bf16.msra.mxu1 %v7678_v61 }
 0x37a   : > { %2543 = vmatpush.bf16.msra.mxu1 %v7787_v32 }
 0x37e   : > { %2544 = vmatpush.bf16.msra.mxu1 %v7892_v5 }
 0x382   : > { %2545 = vmatpush.bf16.msra.mxu1 %v8073_v53 }
 0x385   : > { %1838 = vmatmul.bf16.gmra.mxu1 %v6689_v39 }
 0x386   : > { %2546 = vmatpush.bf16.msra.mxu1 %v8185_v56 }
 0x38a   : > { %2547 = vmatpush.bf16.msra.mxu1 %v8277_v47 }
 0x38b   : > { %v1729_v10 = vpop.permute.xlu2 %1728 }
 0x38e   : > { %2548 = vmatpush.bf16.msra.mxu1 %v8391_v35 }
 0x392   : > { %2549 = vmatpush.bf16.msra.mxu1 %v8492_v34 }
 0x393   : > { %v1744_v0 = vpop.permute.xlu2 %1743 }
 0x3ba   : > { %v1853_v25 = vpop.f32.mrf.mxu2 }
 0x3c2   : > { %v1855_v26 = vpop.f32.mrf.mxu2 }
 0x3ca   : > { %v1858_v57 = vpop.f32.mrf.mxu2 }
 0x3d2   : > { %v1824_v2 = vpop.f32.mrf.mxu1  ;;  %v1860_v4 = vpop.f32.mrf.mxu2 }
 0x3d3   : > { %v1825_v63 = vadd.f32 %v1824_v2, %v1729_v10 }
 0x3d5   : > { %v1854_v19 = vadd.f32 %v1853_v25, %v1825_v63 }
 0x3d7   : > { %v1881_v60 = vmul.f32 0.0, %v1854_v19  ;;  %vm1873_vm8 = vcmp.ge.f32.partialorder %v1854_v19, 0.0 }
 0x3d9   : > { %v8780_v9 = vsel %vm1873_vm8, %v1854_v19, %v1881_v60 }
 0x3da   : > { %v1826_v51 = vpop.f32.mrf.mxu1  ;;  %v1897_v52 = vmul.f32 %v8604_v17, %v8780_v9  ;;  %v1863_v37 = vpop.f32.mrf.mxu2 }
 0x3db   : > { %v1827_v7 = vadd.f32 %v1826_v51, %v1734_v44 }
 0x3dc   : > { %1905 = vadd.xlane.f32.xlu2 %v1897_v52  ;;  %v1921_v50 = vmul.f32 %v1897_v52, %v8780_v9  ;;  %v1754_v52 = vpop.permute.xlu2 %1753 }
 0x3dd   : > { %v1856_v13 = vadd.f32 %v1855_v26, %v1827_v7  ;;  %v1749_v26 = vpop.permute.xlu0 %1748 }
 0x3de   : > { %1929 = vadd.xlane.f32.xlu0 %v1921_v50 }
 0x3df   : > { %vm1874_vm9 = vcmp.ge.f32.partialorder %v1856_v13, 0.0  ;;  %v1882_v18 = vmul.f32 0.0, %v1856_v13 }
 0x3e1   : > { %v8785_v40 = vsel %vm1874_vm9, %v1856_v13, %v1882_v18 }
 0x3e2   : > { %v1829_v11 = vpop.f32.mrf.mxu1  ;;  %v1898_v1 = vmul.f32 %v8604_v17, %v8785_v40  ;;  %v1865_v51 = vpop.f32.mrf.mxu2 }
 0x3e3   : > { %v1830_v41 = vadd.f32 %v1829_v11, %v1739_v38 }
 0x3e4   : > { %1907 = vadd.xlane.f32.xlu1 %v1898_v1  ;;  %v1922_v30 = vmul.f32 %v1898_v1, %v8785_v40  ;;  %v1759_v1 = vpop.permute.xlu1 %1758 }
 0x3e5   : > { %v1859_v8 = vadd.f32 %v1858_v57, %v1830_v41 }
 0x3e6   : > { %1931 = vadd.xlane.f32.xlu2 %v1922_v30 }
 0x3e7   : > { %v1883_v23 = vmul.f32 0.0, %v1859_v8  ;;  %vm1875_vm10 = vcmp.ge.f32.partialorder %v1859_v8, 0.0 }
 0x3e9   : > { %v8790_v12 = vsel %vm1875_vm10, %v1859_v8, %v1883_v23 }
 0x3ea   : > { %v1831_v54 = vpop.f32.mrf.mxu1  ;;  %v1899_v45 = vmul.f32 %v8604_v17, %v8790_v12 }
 0x3eb   : > { %v1832_v59 = vadd.f32 %v1831_v54, %v1744_v0 }
 0x3ec   : > { %1909 = vadd.xlane.f32.xlu1 %v1899_v45  ;;  %v1923_v6 = vmul.f32 %v1899_v45, %v8790_v12 }
 0x3ed   : > { %v1861_v43 = vadd.f32 %v1860_v4, %v1832_v59  ;;  %v1868_v4 = vpop.f32.mrf.mxu2 }
 0x3ee   : > { %1933 = vadd.xlane.f32.xlu2 %v1923_v6  ;;  %v1764_v6 = vpop.permute.xlu0 %1763 }
 0x3ef   : > { %vm1876_vm11 = vcmp.ge.f32.partialorder %v1861_v43, 0.0  ;;  %v1884_v39 = vmul.f32 0.0, %v1861_v43 }
 0x3f1   : > { %v8795_v25 = vsel %vm1876_vm11, %v1861_v43, %v1884_v39 }
 0x3f2   : > { %v1834_v10 = vpop.f32.mrf.mxu1  ;;  %v1900_v2 = vmul.f32 %v8604_v17, %v8795_v25 }
 0x3f3   : > { %v1835_v63 = vadd.f32 %v1834_v10, %v1749_v26 }
 0x3f4   : > { %1911 = vadd.xlane.f32.xlu0 %v1900_v2  ;;  %v1924_v19 = vmul.f32 %v1900_v2, %v8795_v25 }
 0x3f5   : > { %v1864_v60 = vadd.f32 %v1863_v37, %v1835_v63  ;;  %v1870_v26 = vpop.f32.mrf.mxu2 }
 0x3f6   : > { %1935 = vadd.xlane.f32.xlu1 %v1924_v19 }
 0x3f7   : > { %v1885_v44 = vmul.f32 0.0, %v1864_v60  ;;  %vm1877_vm12 = vcmp.ge.f32.partialorder %v1864_v60, 0.0 }
 0x3f9   : > { %v8800_v57 = vsel %vm1877_vm12, %v1864_v60, %v1885_v44 }
 0x3fa   : > { %v1836_v7 = vpop.f32.mrf.mxu1  ;;  %v1901_v50 = vmul.f32 %v8604_v17, %v8800_v57 }
 0x3fb   : > { %v1837_v13 = vadd.f32 %v1836_v7, %v1754_v52  ;;  %v2392_v52 = vld [vmem:[%s10250_s10 + $0x18] sm:$0xff]  ;;  %v2389_v7 = vld [vmem:[%s10250_s10] sm:$0xff] }
 0x3fc   : > { %1913 = vadd.xlane.f32.xlu0 %v1901_v50  ;;  %v1925_v18 = vmul.f32 %v1901_v50, %v8800_v57  ;;  %v2391_v50 = vld [vmem:[%s10250_s10 + $0x10] sm:$0xff] }
 0x3fd   : > { %v1866_v38 = vadd.f32 %v1865_v51, %v1837_v13  ;;  %v2390_v51 = vld [vmem:[%s10250_s10 + $0x8] sm:$0xff]  ;;  %v2677_v13 = vld [vmem:[%s10252_s12 + $0x10] sm:$0xff] }
 0x3fe   : > { %1937 = vadd.xlane.f32.xlu1 %v1925_v18  ;;  %v2675_v18 = vld [vmem:[%s10252_s12] sm:$0xff] }
 0x3ff   : > { %vm1878_vm13 = vcmp.ge.f32.partialorder %v1866_v38, 0.0  ;;  %v1886_v11 = vmul.f32 0.0, %v1866_v38 }
 0x401   : > { %v8805_v41 = vsel %vm1878_vm13, %v1866_v38, %v1886_v11  ;;  %v2676_v38 = vld [vmem:[%s10252_s12 + $0x8] sm:$0xff]  ;;  %v2678_v11 = vld [vmem:[%s10252_s12 + $0x18] sm:$0xff] }
 0x402   : > { %v1839_v30 = vpop.f32.mrf.mxu1  ;;  %v1902_v8 = vmul.f32 %v8604_v17, %v8805_v41 }
 0x403   : > { %v1840_v23 = vadd.f32 %v1839_v30, %v1759_v1 }
 0x404   : > { %1915 = vadd.xlane.f32.xlu2 %v1902_v8  ;;  %v1926_v0 = vmul.f32 %v1902_v8, %v8805_v41 }
 0x405   : > { %v1869_v54 = vadd.f32 %v1868_v4, %v1840_v23 }
 0x406   : > { %1939 = vadd.xlane.f32.xlu0 %v1926_v0 }
 0x407   : > { %v1887_v45 = vmul.f32 0.0, %v1869_v54  ;;  %vm1879_vm14 = vcmp.ge.f32.partialorder %v1869_v54, 0.0 }
 0x409   : > { %v8810_v59 = vsel %vm1879_vm14, %v1869_v54, %v1887_v45 }
 0x40a   : > { %v1841_v43 = vpop.f32.mrf.mxu1  ;;  %v1903_v37 = vmul.f32 %v8604_v17, %v8810_v59 }
 0x40b   : > { %v1842_v39 = vadd.f32 %v1841_v43, %v1764_v6 }
 0x40c   : > { %1917 = vadd.xlane.f32.xlu2 %v1903_v37  ;;  %v1927_v10 = vmul.f32 %v1903_v37, %v8810_v59 }
 0x40d   : > { %v1871_v2 = vadd.f32 %v1870_v26, %v1842_v39 }
 0x40e   : > { %1941 = vadd.xlane.f32.xlu0 %v1927_v10 }
 0x40f   : > { %vm1880_vm15 = vcmp.ge.f32.partialorder %v1871_v2, 0.0  ;;  %v1888_v63 = vmul.f32 0.0, %v1871_v2 }
 0x411   : > { %v8815_v19 = vsel %vm1880_vm15, %v1871_v2, %v1888_v63 }
 0x412   : > { %v1904_v60 = vmul.f32 %v8604_v17, %v8815_v19 }
 0x414   : > { %1919 = vadd.xlane.f32.xlu1 %v1904_v60  ;;  %v1928_v44 = vmul.f32 %v1904_v60, %v8815_v19 }
 0x416   : > { %1943 = vadd.xlane.f32.xlu2 %v1928_v44 }
 0x422   : > { %2400 = vperm.xlu0 %7349, %v2390_v51  }
 0x42a   : > { %2410 = vperm.xlu0 %7349, %v2392_v52  }
 0x42d   : > { %2395 = vperm.xlu1 %7350, %v2389_v7  }
 0x42e   : > { %2405 = vperm.xlu2 %7351, %v2391_v50  }
 0x432   : > { %2691 = vperm.xlu0 %7349, %v2677_v13  }
 0x435   : > { %2681 = vperm.xlu1 %7350, %v2675_v18  }
 0x436   : > { %2686 = vperm.xlu2 %7351, %v2676_v38  }
 0x43d   : > { %2696 = vperm.xlu1 %7350, %v2678_v11  }
 0x44f   : > { %v1906_v1 = vpop.xlane.xlu2 %1905 }
 0x450   : > { %v1945_v4 = vmul.f32 %v1906_v1, %v8642_v31 }
 0x451   : > { %v1930_v30 = vpop.xlane.xlu0 %1929 }
 0x452   : > { %v1961_v8 = vmul.f32 %v1945_v4, %v1945_v4  ;;  %v1953_v23 = vmul.f32 %v1930_v30, %v8642_v31 }
 0x454   : > { %v1969_v0 = vsub.f32 %v1953_v23, %v1961_v8 }
 0x456   : > { %v1977_v54 = vmax.f32 %v1969_v0, 0.0 }
 0x457   : > { %v1908_v45 = vpop.xlane.xlu1 %1907 }
 0x458   : > { %v1993_v6 = vadd.f32 1e-05, %v1977_v54  ;;  %v1946_v43 = vmul.f32 %v1908_v45, %v8642_v31 }
 0x459   : > { %v1932_v37 = vpop.xlane.xlu2 %1931 }
 0x45a   : > { %7362 = vrsqrt.f32 %v1993_v6  ;;  %v1962_v39 = vmul.f32 %v1946_v43, %v1946_v43  ;;  %v1954_v26 = vmul.f32 %v1932_v37, %v8642_v31  ;;  %vm2007_vm8 = vweird.f32 %v1993_v6 }
 0x45c   : > { %v1970_v10 = vsub.f32 %v1954_v26, %v1962_v39 }
 0x45e   : > { %v1978_v2 = vmax.f32 %v1970_v10, 0.0 }
 0x45f   : > { %v1910_v63 = vpop.xlane.xlu1 %1909 }
 0x460   : > { %v7363_v60 = vpop.eup %7362  ;;  %v8849_v44 = vmul.f32 %v1910_v63, %v8642_v31  ;;  %v1994_v52 = vadd.f32 1e-05, %v1978_v2 }
 0x461   : > { %v2002_v51 = vmul.f32 %v7363_v60, %v1993_v6  ;;  %v1934_v7 = vpop.xlane.xlu2 %1933  ;;  %vm2008_vm6 = vweird.f32 %v7363_v60 }
 0x462   : > { %v1963_v50 = vmul.f32 %v8849_v44, %v8849_v44  ;;  %v1955_v13 = vmul.f32 %v1934_v7, %v8642_v31  ;;  %7364 = vrsqrt.f32 %v1994_v52  ;;  %vm2009_vm9 = vmor %vm2007_vm8, %vm2008_vm6  ;;  %vm2017_vm11 = vweird.f32 %v1994_v52 }
 0x463   : > { %v2003_v18 = vmul.f32 %v7363_v60, %v2002_v51 }
 0x464   : > { %v1971_v38 = vsub.f32 %v1955_v13, %v1963_v50  ;;  %v1985_v50 = vsub.f32 %v8780_v9, %v1945_v4  ;;  %v1986_v9 = vsub.f32 %v8785_v40, %v1946_v43 }
 0x465   : > { %v2004_v11 = vmul.f32 0.5, %v2003_v18 }
 0x466   : > { %v1979_v1 = vmax.f32 %v1971_v38, 0.0 }
 0x467   : > { %v2005_v30 = vsub.f32 1.5, %v2004_v11  ;;  %v1912_v8 = vpop.xlane.xlu0 %1911 }
 0x468   : > { %v1995_v23 = vadd.f32 1e-05, %v1979_v1  ;;  %v8855_v0 = vmul.f32 %v1912_v8, %v8642_v31  ;;  %v7365_v54 = vpop.eup %7364 }
 0x469   : > { %v1936_v45 = vpop.xlane.xlu1 %1935  ;;  %v2006_v37 = vmul.f32 %v7363_v60, %v2005_v30  ;;  %v2012_v39 = vmul.f32 %v7365_v54, %v1994_v52  ;;  %vm2018_vm10 = vweird.f32 %v7365_v54 }
 0x46a   : > { %7366 = vrsqrt.f32 %v1995_v23  ;;  %v1964_v26 = vmul.f32 %v8855_v0, %v8855_v0  ;;  %v1956_v10 = vmul.f32 %v1936_v45, %v8642_v31  ;;  %vm2019_vm12 = vmor %vm2017_vm11, %vm2018_vm10  ;;  %vm2027_vm14 = vweird.f32 %v1995_v23 }
 0x46b   : > { %v2013_v2 = vmul.f32 %v7365_v54, %v2012_v39  ;;  %v2010_v51 = vsel %vm2009_vm9, %v7363_v60, %v2006_v37 }
 0x46c   : > { %v1972_v63 = vsub.f32 %v1956_v10, %v1964_v26  ;;  %v2081_v30 = vmul.f32 %v2010_v51, %v1985_v50 }
 0x46d   : > { %v2014_v7 = vmul.f32 0.5, %v2013_v2 }
 0x46e   : > { %v1980_v13 = vmax.f32 %v1972_v63, 0.0  ;;  %v2089_v10 = vpack.c.bf16 %v2081_v30, %v2081_v30 }
 0x46f   : > { %v1914_v18 = vpop.xlane.xlu0 %1913  ;;  %v2015_v11 = vsub.f32 1.5, %v2014_v7 }
 0x470   : > { %v7367_v38 = vpop.eup %7366  ;;  %v8862_v1 = vmul.f32 %v1914_v18, %v8642_v31  ;;  %v1996_v17 = vadd.f32 1e-05, %v1980_v13 }
 0x471   : > { %v2022_v8 = vmul.f32 %v7367_v38, %v1995_v23  ;;  %v1938_v45 = vpop.xlane.xlu1 %1937  ;;  %v2016_v6 = vmul.f32 %v7365_v54, %v2015_v11  ;;  %vm2028_vm13 = vweird.f32 %v7367_v38 }
 0x472   : > { %v1965_v60 = vmul.f32 %v8862_v1, %v8862_v1  ;;  %v1957_v37 = vmul.f32 %v1938_v45, %v8642_v31  ;;  %7368 = vrsqrt.f32 %v1996_v17  ;;  %v2105_v45 = vunpack.c.l.b16 %v2089_v10  ;;  %vm8879_vm15 = vmor %vm2027_vm14, %vm2028_vm13 }
 0x473   : > { %v2023_v4 = vmul.f32 %v7367_v38, %v2022_v8  ;;  %v2020_v39 = vsel %vm2019_vm12, %v7365_v54, %v2016_v6  ;;  %v1987_v10 = vsub.f32 %v8790_v12, %v8849_v44  ;;  %vm2037_vm8 = vweird.f32 %v1996_v17 }
 0x474   : > { %v1973_v26 = vsub.f32 %v1957_v37, %v1965_v60  ;;  %v2082_v2 = vmul.f32 %v2020_v39, %v1986_v9 }
 0x475   : > { %v2024_v63 = vmul.f32 0.5, %v2023_v4 }
 0x476   : > { %v1981_v51 = vmax.f32 %v1973_v26, 0.0  ;;  %v2090_v7 = vpack.c.bf16 %v2082_v2, %v2082_v2 }
 0x477   : > { %v2025_v50 = vsub.f32 1.5, %v2024_v63  ;;  %v1916_v13 = vpop.xlane.xlu2 %1915 }
 0x478   : > { %v8868_v52 = vadd.f32 1e-05, %v1981_v51  ;;  %v8871_v18 = vmul.f32 %v1916_v13, %v8642_v31  ;;  %v7369_v11 = vpop.eup %7368  ;;  %v2106_v40 = vunpack.c.l.b16 %v2090_v7 }
 0x479   : > { %v1940_v43 = vpop.xlane.xlu0 %1939  ;;  %v2026_v8 = vmul.f32 %v7367_v38, %v2025_v50  ;;  %v2032_v54 = vmul.f32 %v7369_v11, %v1996_v17  ;;  %vm2038_vm6 = vweird.f32 %v7369_v11 }
 0x47a   : > { %7370 = vrsqrt.f32 %v8868_v52  ;;  %v1966_v30 = vmul.f32 %v8871_v18, %v8871_v18  ;;  %v1958_v6 = vmul.f32 %v1940_v43, %v8642_v31  ;;  %v8877_v37 = vpack.c.b16 %v2106_v40, %v2105_v45  ;;  %vm2039_vm9 = vmor %vm2037_vm8, %vm2038_vm6 }
 0x47b   : > { %v2033_v60 = vmul.f32 %v7369_v11, %v2032_v54  ;;  %v2030_v39 = vsel %vm8879_vm15, %v7367_v38, %v2026_v8  ;;  %v1988_v43 = vsub.f32 %v8795_v25, %v8855_v0  ;;  %vm2047_vm11 = vweird.f32 %v8868_v52 }
 0x47c   : > { %v1974_v4 = vsub.f32 %v1958_v6, %v1966_v30  ;;  %2129 = vmatmul.bf16.vlgmr.msra.gmra.mxu3 %v8877_v37  ;;  %2158 = vmatmul.bf16.vlgmr.msrb.gmra.mxu0 %v8877_v37  ;;  %v2083_v38 = vmul.f32 %v2030_v39, %v1987_v10 }
 0x47d   : > { %v2034_v26 = vmul.f32 0.5, %v2033_v60  ;;  %2187 = vmatmul.bf16.vlgmr.msrb.gmra.mxu1 %v8877_v37  ;;  %2216 = vmatmul.bf16.vlgmr.msrb.gmra.mxu2 %v8877_v37 }
 0x47e   : > { %v1982_v23 = vmax.f32 %v1974_v4, 0.0  ;;  %2885 = vmatpush.bf16.msrb.mxu2 %v7878_v49  ;;  %v2091_v6 = vpack.c.bf16 %v2083_v38, %v2083_v38 }
 0x47f   : > { %v1918_v2 = vpop.xlane.xlu2 %1917  ;;  %v2035_v51 = vsub.f32 1.5, %v2034_v26 }
 0x480   : > { %v7371_v63 = vpop.eup %7370  ;;  %v8892_v7 = vmul.f32 %v1918_v2, %v8642_v31  ;;  %v1998_v13 = vadd.f32 1e-05, %v1982_v23  ;;  %v2107_v0 = vunpack.c.l.b16 %v2091_v6 }
 0x481   : > { %v2042_v50 = vmul.f32 %v7371_v63, %v8868_v52  ;;  %v1942_v45 = vpop.xlane.xlu0 %1941  ;;  %v2036_v12 = vmul.f32 %v7369_v11, %v2035_v51  ;;  %vm2048_vm10 = vweird.f32 %v7371_v63 }
 0x482   : > { %v1967_v44 = vmul.f32 %v8892_v7, %v8892_v7  ;;  %v1959_v40 = vmul.f32 %v1942_v45, %v8642_v31  ;;  %7372 = vrsqrt.f32 %v1998_v13  ;;  %2886 = vmatpush.bf16.msrb.mxu2 %v8000_v29  ;;  %vm2049_vm12 = vmor %vm2047_vm11, %vm2048_vm10  ;;  %vm2057_vm14 = vweird.f32 %v1998_v13 }
 0x483   : > { %v2043_v8 = vmul.f32 %v7371_v63, %v2042_v50  ;;  %v2040_v54 = vsel %vm2039_vm9, %v7369_v11, %v2036_v12 }
 0x484   : > { %v1975_v30 = vsub.f32 %v1959_v40, %v1967_v44  ;;  %v2084_v60 = vmul.f32 %v2040_v54, %v1988_v43  ;;  %v1989_v54 = vsub.f32 %v8800_v57, %v8862_v1 }
 0x485   : > { %v2044_v9 = vmul.f32 0.5, %v2043_v8 }
 0x486   : > { %v1983_v4 = vmax.f32 %v1975_v30, 0.0  ;;  %v2092_v17 = vpack.c.bf16 %v2084_v60, %v2084_v60  ;;  %2887 = vmatpush.bf16.msrb.mxu2 %v8122_v24  ;;  %v10425_v60 = vld [vmem:[#allocation23_spill] sm:$0xff] }
 0x487   : > { %v2045_v39 = vsub.f32 1.5, %v2044_v9  ;;  %v1920_v26 = vpop.xlane.xlu1 %1919 }
 0x488   : > { %v1999_v10 = vadd.f32 1e-05, %v1983_v4  ;;  %v8903_v23 = vmul.f32 %v1920_v26, %v8642_v31  ;;  %v7373_v25 = vpop.eup %7372  ;;  %v2108_v2 = vunpack.c.l.b16 %v2092_v17  ;;  %v10426_v26 = vld [vmem:[#allocation27_spill] sm:$0xff] }
 0x489   : > { %v1944_v11 = vpop.xlane.xlu2 %1943  ;;  %v2046_v51 = vmul.f32 %v7371_v63, %v2045_v39  ;;  %v2052_v50 = vmul.f32 %v7373_v25, %v1998_v13  ;;  %vm2058_vm13 = vweird.f32 %v7373_v25  ;;  %v1990_v39 = vsub.f32 %v8805_v41, %v8871_v18 }
 0x48a   : > { %7374 = vrsqrt.f32 %v1999_v10  ;;  %v1968_v38 = vmul.f32 %v8903_v23, %v8903_v23  ;;  %v1960_v45 = vmul.f32 %v1944_v11, %v8642_v31  ;;  %v8910_v44 = vpack.c.b16 %v2108_v2, %v2107_v0  ;;  %2888 = vmatpush.bf16.msrb.mxu2 %v8224_v62  ;;  %vm2059_vm15 = vmor %vm2057_vm14, %vm2058_vm13 }
 0x48b   : > { %v2053_v12 = vmul.f32 %v7373_v25, %v2052_v50  ;;  %v2050_v43 = vsel %vm2049_vm12, %v7371_v63, %v2046_v51  ;;  %vm2067_vm8 = vweird.f32 %v1999_v10  ;;  %vm2443_vm13 = vcmask 523264  }
 0x48c   : > { %v1976_v40 = vsub.f32 %v1960_v45, %v1968_v38  ;;  %2134 = vmatmul.bf16.gmra.mxu3 %v8910_v44  ;;  %2163 = vmatmul.bf16.gmra.mxu0 %v8910_v44  ;;  %v2085_v9 = vmul.f32 %v2050_v43, %v1989_v54  ;;  %v10427_v38 = vld [vmem:[#allocation31_spill] sm:$0xff] }
 0x48d   : > { %v2054_v8 = vmul.f32 0.5, %v2053_v12  ;;  %2192 = vmatmul.bf16.gmra.mxu1 %v8910_v44  ;;  %2221 = vmatmul.bf16.gmra.mxu2 %v8910_v44 }
 0x48e   : > { %v1984_v30 = vmax.f32 %v1976_v40, 0.0  ;;  %2889 = vmatpush.bf16.msrb.mxu2 %v10425_v60  ;;  %v2093_v0 = vpack.c.bf16 %v2085_v9, %v2085_v9 }
 0x48f   : > { %v2055_v6 = vsub.f32 1.5, %v2054_v8 }
 0x490   : > { %v7375_v52 = vpop.eup %7374  ;;  %v2000_v4 = vadd.f32 1e-05, %v1984_v30  ;;  %v2109_v12 = vunpack.c.l.b16 %v2093_v0  ;;  %v1991_v30 = vsub.f32 %v8810_v59, %v8892_v7 }
 0x491   : > { %v2062_v63 = vmul.f32 %v7375_v52, %v1999_v10  ;;  %v2056_v17 = vmul.f32 %v7373_v25, %v2055_v6  ;;  %vm2068_vm6 = vweird.f32 %v7375_v52 }
 0x492   : > { %7376 = vrsqrt.f32 %v2000_v4  ;;  %2890 = vmatpush.bf16.msrb.mxu2 %v10426_v26  ;;  %vm2069_vm9 = vmor %vm2067_vm8, %vm2068_vm6  ;;  %vm2077_vm11 = vweird.f32 %v2000_v4 }
 0x493   : > { %v2063_v57 = vmul.f32 %v7375_v52, %v2062_v63  ;;  %v2060_v1 = vsel %vm2059_vm15, %v7373_v25, %v2056_v17  ;;  %v10428_v25 = vld [vmem:[#allocation32_spill] sm:$0xff] }
 0x494   : > { %v2086_v2 = vmul.f32 %v2060_v1, %v1990_v39 }
 0x495   : > { %v2064_v11 = vmul.f32 0.5, %v2063_v57 }
 0x496   : > { %v2094_v51 = vpack.c.bf16 %v2086_v2, %v2086_v2  ;;  %2891 = vmatpush.bf16.msrb.mxu2 %v10427_v38 }
 0x497   : > { %v2065_v50 = vsub.f32 1.5, %v2064_v11 }
 0x498   : > { %v7377_v45 = vpop.eup %7376  ;;  %v2110_v40 = vunpack.c.l.b16 %v2094_v51 }
 0x499   : > { %v2066_v13 = vmul.f32 %v7375_v52, %v2065_v50  ;;  %v2072_v43 = vmul.f32 %v7377_v45, %v2000_v4  ;;  %vm2078_vm10 = vweird.f32 %v7377_v45 }
 0x49a   : > { %v8924_v41 = vpack.c.b16 %v2110_v40, %v2109_v12  ;;  %2892 = vmatpush.bf16.msrb.mxu2 %v10428_v25  ;;  %vm2079_vm12 = vmor %vm2077_vm11, %vm2078_vm10 }
 0x49b   : > { %v2073_v18 = vmul.f32 %v7377_v45, %v2072_v43  ;;  %v2070_v8 = vsel %vm2069_vm9, %v7375_v52, %v2066_v13  ;;  %v1992_v52 = vsub.f32 %v8815_v19, %v8903_v23 }
 0x49c   : > { %2139 = vmatmul.bf16.gmra.mxu3 %v8924_v41  ;;  %2168 = vmatmul.bf16.gmra.mxu0 %v8924_v41  ;;  %v2087_v10 = vmul.f32 %v2070_v8, %v1991_v30 }
 0x49d   : > { %v2074_v54 = vmul.f32 0.5, %v2073_v18  ;;  %2197 = vmatmul.bf16.gmra.mxu1 %v8924_v41  ;;  %2226 = vmatmul.bf16.gmra.mxu2 %v8924_v41 }
 0x49e   : > { %v2095_v17 = vpack.c.bf16 %v2087_v10, %v2087_v10 }
 0x49f   : > { %v2075_v6 = vsub.f32 1.5, %v2074_v54 }
 0x4a0   : > { %v2111_v1 = vunpack.c.l.b16 %v2095_v17 }
 0x4a1   : > { %v2076_v9 = vmul.f32 %v7377_v45, %v2075_v6 }
 0x4a3   : > { %v2080_v63 = vsel %vm2079_vm12, %v7377_v45, %v2076_v9 }
 0x4a4   : > { %v2088_v39 = vmul.f32 %v2080_v63, %v1992_v52 }
 0x4a6   : > { %v2096_v57 = vpack.c.bf16 %v2088_v39, %v2088_v39 }
 0x4a8   : > { %v2112_v0 = vunpack.c.l.b16 %v2096_v57 }
 0x4aa   : > { %v8935_v59 = vpack.c.b16 %v2112_v0, %v2111_v1 }
 0x4ac   : > { %2144 = vmatmul.bf16.gmra.mxu3 %v8935_v59  ;;  %2173 = vmatmul.bf16.gmra.mxu0 %v8935_v59 }
 0x4ad   : > { %2202 = vmatmul.bf16.gmra.mxu1 %v8935_v59  ;;  %2231 = vmatmul.bf16.gmra.mxu2 %v8935_v59 }
 0x4f9   : > { %v8941_v7 = vpop.f32.mrf.mxu0 }
 0x4fa   : > { %v8943_v19 = vpop.f32.mrf.mxu1 }
 0x4ff   : > { %v8945_v23 = vpop.f32.mrf.mxu3 }
 0x500   : > { %v8949_v11 = vpop.f32.mrf.mxu2 }
 0x501   : > { %v8947_v4 = vpop.f32.mrf.mxu0 }
 0x502   : > { %v2190_v2 = vpop.f32.mrf.mxu1 }
 0x503   : > { %v2254_v61 = vand.u32 2147483647, %v2190_v2 }
 0x507   : > { %v8951_v51 = vpop.f32.mrf.mxu3 }
 0x508   : > { %v8955_v12 = vpop.f32.mrf.mxu2 }
 0x509   : > { %v8953_v45 = vpop.f32.mrf.mxu0 }
 0x50a   : > { %v2193_v50 = vpop.f32.mrf.mxu1 }
 0x50b   : > { %v2255_v35 = vand.u32 2147483647, %v2193_v50 }
 0x50f   : > { %v8957_v40 = vpop.f32.mrf.mxu3 }
 0x510   : > { %v8961_v8 = vpop.f32.mrf.mxu2 }
 0x511   : > { %v8959_v43 = vpop.f32.mrf.mxu0 }
 0x512   : > { %v2195_v13 = vpop.f32.mrf.mxu1 }
 0x513   : > { %v2256_v46 = vand.u32 2147483647, %v2195_v13  ;;  %v2253_v13 = vand.u32 2147483647, %v8943_v19 }
 0x517   : > { %v2137_v18 = vpop.f32.mrf.mxu3 }
 0x518   : > { %v8965_v10 = vpop.f32.mrf.mxu2 }
 0x519   : > { %v8963_v6 = vpop.f32.mrf.mxu0 }
 0x51a   : > { %v2198_v54 = vpop.f32.mrf.mxu1 }
 0x51b   : > { %v2257_v3 = vand.u32 2147483647, %v2198_v54 }
 0x51d   : > { %v2265_v47 = vpack.c.bf16 %v2257_v3, %v2257_v3 }
 0x51f   : > { %v2140_v30 = vpop.f32.mrf.mxu3 }
 0x520   : > { %v8969_v39 = vpop.f32.mrf.mxu2 }
 0x521   : > { %v8967_v63 = vpop.f32.mrf.mxu0 }
 0x522   : > { %v2200_v9 = vpop.f32.mrf.mxu1 }
 0x523   : > { %v2258_v0 = vand.u32 2147483647, %v2200_v9  ;;  %v2264_v9 = vpack.c.bf16 %v2256_v46, %v2256_v46 }
 0x525   : > { %v2266_v22 = vpack.c.bf16 %v2258_v0, %v2258_v0  ;;  %v2345_v0 = vunpack.c.l.b16 %v2265_v47 }
 0x527   : > { %v2142_v52 = vpop.f32.mrf.mxu3  ;;  %v2346_v58 = vunpack.c.l.b16 %v2266_v22 }
 0x528   : > { %v8971_v27 = vpop.f32.mrf.mxu2  ;;  %v2242_v32 = vpack.c.bf16 %v2142_v52, %v2142_v52 }
 0x529   : > { %v2174_v55 = vpop.f32.mrf.mxu0  ;;  %v2351_v36 = vpack.c.b16 %v2346_v58, %v2345_v0  ;;  %v2237_v58 = vpack.c.bf16 %v8945_v23, %v8945_v23 }
 0x52a   : > { %v2203_v17 = vpop.f32.mrf.mxu1  ;;  %v2298_v50 = vunpack.c.l.b16 %v2242_v32 }
 0x52b   : > { %v2259_v57 = vand.u32 2147483647, %v2203_v17 }
 0x52d   : > { %v2267_v33 = vpack.c.bf16 %v2259_v57, %v2259_v57  ;;  %v2241_v57 = vpack.c.bf16 %v2140_v30, %v2140_v30 }
 0x52f   : > { %v2145_v1 = vpop.f32.mrf.mxu3  ;;  %v2347_v56 = vunpack.c.l.b16 %v2267_v33  ;;  %v2262_v33 = vpack.c.bf16 %v2254_v61, %v2254_v61  ;;  %v2297_v46 = vunpack.c.l.b16 %v2241_v57 }
 0x530   : > { %v2243_v34 = vpack.c.bf16 %v2145_v1, %v2145_v1  ;;  %v2240_v1 = vpack.c.bf16 %v2137_v18, %v2137_v18  ;;  %v2251_v18 = vpack.c.bf16 %v2174_v55, %v2174_v55 }
 0x531   : > { %v2176_v22 = vpop.f32.mrf.mxu0  ;;  %v2303_v19 = vpack.c.b16 %v2298_v50, %v2297_v46  ;;  %v2342_v32 = vunpack.c.l.b16 %v2262_v33  ;;  %v2274_v46 = vand.u32 2147483647, %v8971_v27 }
 0x532   : > { %v2205_v31 = vpop.f32.mrf.mxu1  ;;  %v2296_v47 = vunpack.c.l.b16 %v2240_v1  ;;  %v2323_v57 = vunpack.c.l.b16 %v2251_v18  ;;  %v2246_v1 = vpack.c.bf16 %v8947_v4, %v8947_v4  ;;  %v2273_v4 = vand.u32 2147483647, %v8969_v39  ;;  %v7241_v39 = vld [vmem:[%s10249_s9 + $0x8] sm:$0xf0] }
 0x533   : > { %v2260_v16 = vand.u32 2147483647, %v2205_v31  ;;  %v2299_v31 = vunpack.c.l.b16 %v2243_v34  ;;  %v2232_v34 = vpop.f32.mrf.mxu2  ;;  %v2282_v27 = vpack.c.bf16 %v2274_v46, %v2274_v46  ;;  %v2269_v18 = vand.u32 2147483647, %v8949_v11  ;;  %v7243_v11 = vld [vmem:[%s10249_s9 + $0x1c] sm:$0xf] }
 0x534   : > { %v10433_v46 = vld [vmem:[#allocation8_spill] sm:$0xff] }
 0x535   : > { %v2268_v28 = vpack.c.bf16 %v2260_v16, %v2260_v16  ;;  %v2263_v16 = vpack.c.bf16 %v2255_v35, %v2255_v35  ;;  %v2238_v35 = vpack.c.bf16 %v8951_v51, %v8951_v51 }
 0x537   : > { %v2348_v53 = vunpack.c.l.b16 %v2268_v28  ;;  %v2147_v5 = vpop.f32.mrf.mxu3  ;;  %v2344_v28 = vunpack.c.l.b16 %v2264_v9  ;;  %v2294_v30 = vunpack.c.l.b16 %v2238_v35  ;;  %v2293_v9 = vunpack.c.l.b16 %v2237_v58 }
 0x538   : > { %v2244_v17 = vpack.c.bf16 %v2147_v5, %v2147_v5  ;;  %v2239_v5 = vpack.c.bf16 %v8957_v40, %v8957_v40  ;;  %v2272_v35 = vand.u32 2147483647, %v8965_v10  ;;  %v2270_v10 = vand.u32 2147483647, %v8955_v12 }
 0x539   : > { %v2352_v54 = vpack.c.b16 %v2348_v53, %v2347_v56  ;;  %v2261_v53 = vpack.c.bf16 %v2253_v13, %v2253_v13  ;;  %v2343_v56 = vunpack.c.l.b16 %v2263_v16  ;;  %v2301_v23 = vpack.c.b16 %v2294_v30, %v2293_v9 }
 0x53a   : > { %v2300_v42 = vunpack.c.l.b16 %v2244_v17  ;;  %v2295_v2 = vunpack.c.l.b16 %v2239_v5  ;;  %v2318_v5 = vunpack.c.l.b16 %v2246_v1  ;;  %v2280_v58 = vpack.c.bf16 %v2272_v35, %v2272_v35 }
 0x53b   : > { %2469 = vmatpush.bf16.msra.mxu0 %v2352_v54  ;;  %v2350_v61 = vpack.c.b16 %v2344_v28, %v2343_v56  ;;  %v2341_v40 = vunpack.c.l.b16 %v2261_v53  ;;  %v2249_v54 = vpack.c.bf16 %v8963_v6, %v8963_v6  ;;  %v2234_v16 = vpop.f32.mrf.mxu2  ;;  %v2275_v28 = vand.u32 2147483647, %v2232_v34 }
 0x53c   : > { %v2304_v3 = vpack.c.b16 %v2300_v42, %v2299_v31  ;;  %v2252_v42 = vpack.c.bf16 %v2176_v22, %v2176_v22  ;;  %v2302_v52 = vpack.c.b16 %v2296_v47, %v2295_v2  ;;  %v2248_v31 = vpack.c.bf16 %v8959_v43, %v8959_v43 }
 0x53d   : > { %v2349_v17 = vpack.c.b16 %v2342_v32, %v2341_v40  ;;  %v2321_v0 = vunpack.c.l.b16 %v2249_v54  ;;  %v2276_v6 = vand.u32 2147483647, %v2234_v16  ;;  %v2245_v43 = vpack.c.bf16 %v8941_v7, %v8941_v7  ;;  %v6702_v7 = vld [vmem:[%s10249_s9 + $0xc] sm:$0xf0] }
 0x53e   : > { %2450 = vmatpush.bf16.msrb.mxu3 %v2304_v3  ;;  %v2324_v51 = vunpack.c.l.b16 %v2252_v42  ;;  %v2320_v50 = vunpack.c.l.b16 %v2248_v31  ;;  %v2283_v56 = vpack.c.bf16 %v2275_v28, %v2275_v28  ;;  %v2271_v32 = vand.u32 2147483647, %v8961_v8  ;;  %v6712_v31 = vld [vmem:[%s10249_s9 + $0x18] sm:$0xf]  ;;  %v7245_v28 = vld [vmem:[%s10249_s9 + $0x28] sm:$0xf0] }
 0x53f   : > { %2470 = vmatpush.bf16.msra.mxu0 %v2351_v36  ;;  %v2250_v36 = vpack.c.bf16 %v8967_v63, %v8967_v63  ;;  %v2247_v63 = vpack.c.bf16 %v8953_v45, %v8953_v45  ;;  %v2284_v45 = vpack.c.bf16 %v2276_v6, %v2276_v6  ;;  %v2317_v53 = vunpack.c.l.b16 %v2245_v43  ;;  %v10430_v6 = vld [vmem:[#allocation26_spill] sm:$0xff] }
 0x540   : > { %v2328_v13 = vpack.c.b16 %v2324_v51, %v2323_v57  ;;  %v2281_v42 = vpack.c.bf16 %v2273_v4, %v2273_v4  ;;  %v2279_v30 = vpack.c.bf16 %v2271_v32, %v2271_v32  ;;  %v2278_v8 = vpack.c.bf16 %v2270_v10, %v2270_v10  ;;  %v6714_v57 = vld [vmem:[%s10249_s9 + $0x24] sm:$0xf0]  ;;  %v10432_v43 = vld [vmem:[#allocation6_spill] sm:$0xff]  ;;  %v10437_v4 = vld [vmem:[#allocation20_spill] sm:$0xff] }
 0x541   : > { %v2322_v55 = vunpack.c.l.b16 %v2250_v36  ;;  %v2319_v33 = vunpack.c.l.b16 %v2247_v63  ;;  %v2372_v47 = vunpack.c.l.b16 %v2284_v45  ;;  %v2325_v34 = vpack.c.b16 %v2318_v5, %v2317_v53  ;;  %v6708_v63 = vld [vmem:[%s10249_s9 + $0x8] sm:$0xf]  ;;  %v10436_v53 = vld [vmem:[#allocation17_spill] sm:$0xff] }
 0x542   : > { %2451 = vmatpush.bf16.msrb.mxu3 %v2303_v19  ;;  %v2368_v36 = vunpack.c.l.b16 %v2280_v58  ;;  %v2277_v51 = vpack.c.bf16 %v2269_v18, %v2269_v18  ;;  %v2366_v9 = vunpack.c.l.b16 %v2278_v8  ;;  %v10434_v45 = vld [vmem:[#allocation11_spill] sm:$0xff] }
 0x543   : > { %2471 = vmatpush.bf16.msra.mxu0 %v2350_v61  ;;  %v2327_v3 = vpack.c.b16 %v2322_v55, %v2321_v0  ;;  %v2326_v22 = vpack.c.b16 %v2320_v50, %v2319_v33  ;;  %v2371_v61 = vunpack.c.l.b16 %v2283_v56  ;;  %v7244_v55 = vld [vmem:[%s10249_s9 + $0x20] sm:$0xf0]  ;;  %v7242_v0 = vld [vmem:[%s10249_s9 + $0x10] sm:$0xf0]  ;;  %v6720_v33 = vld [vmem:[%s10249_s9 + $0x20] sm:$0xf] }
 0x544   : > { %v6713_v16 = vor.u32 %v7244_v55, %v6712_v31  ;;  %v6709_v1 = vor.u32 %v7242_v0, %v6708_v63  ;;  %v10429_v50 = vld [vmem:[#allocation22_spill] sm:$0xff]  ;;  %v6721_v5 = vor.u32 %v7245_v28, %v6720_v33  ;;  %v10438_v56 = vld [vmem:[#allocation24_spill] sm:$0xff] }
 0x545   : > { %v2376_v2 = vpack.c.b16 %v2372_v47, %v2371_v61 }
 0x546   : > { %2452 = vmatpush.bf16.msrb.mxu3 %v2302_v52  ;;  %v2369_v52 = vunpack.c.l.b16 %v2281_v42  ;;  %v2401_v42 = vpop.permute.xlu0 %2400 }
 0x547   : > { %2472 = vmatpush.bf16.msra.mxu0 %v2349_v17  ;;  %v2367_v17 = vunpack.c.l.b16 %v2279_v30 }
 0x549   : > { %v2374_v54 = vpack.c.b16 %v2368_v36, %v2367_v17 }
 0x54a   : > { %2453 = vmatpush.bf16.msrb.mxu3 %v2301_v23 }
 0x54b   : > { %2473 = vmatpush.bf16.msra.mxu0 %v2328_v13  ;;  %v6717_v13 = vor.u32 %v7243_v11, %v6714_v57 }
 0x54e   : > { %2454 = vmatpush.bf16.msrb.mxu3 %v8935_v59  ;;  %v7240_v59 = vld [vmem:[%s10249_s9 + $0x4] sm:$0xf] }
 0x54f   : > { %2474 = vmatpush.bf16.msra.mxu0 %v2327_v3  ;;  %v6705_v19 = vor.u32 %v7240_v59, %v6702_v7  ;;  %v10431_v3 = vld [vmem:[#allocation30_spill] sm:$0xff]  ;;  %v10439_v59 = vld [vmem:[#allocation28_spill] sm:$0xff] }
 0x552   : > { %2455 = vmatpush.bf16.msrb.mxu3 %v8924_v41  ;;  %v6700_v41 = vld [vmem:[%s10249_s9] sm:$0xf] }
 0x553   : > { %2475 = vmatpush.bf16.msra.mxu0 %v2326_v22  ;;  %v6701_v40 = vor.u32 %v7241_v39, %v6700_v41  ;;  %v10435_v22 = vld [vmem:[#allocation14_spill] sm:$0xff]  ;;  %v2396_v41 = vpop.permute.xlu1 %2395 }
 0x556   : > { %2456 = vmatpush.bf16.msrb.mxu3 %v8910_v44  ;;  %v2370_v44 = vunpack.c.l.b16 %v2282_v27 }
 0x557   : > { %2476 = vmatpush.bf16.msra.mxu0 %v2325_v34 }
 0x558   : > { %v2375_v12 = vpack.c.b16 %v2370_v44, %v2369_v52 }
 0x55a   : > { %2457 = vmatpush.bf16.msrb.mxu3 %v8877_v37  ;;  %2477 = vmatmul.bf16.vlgmr.msra.gmra.mxu0 %v6705_v19  ;;  %v2365_v37 = vunpack.c.l.b16 %v2277_v51 }
 0x55b   : > { %2523 = vmatpush.bf16.msrb.mxu0 %v7878_v49 }
 0x55c   : > { %v2373_v23 = vpack.c.b16 %v2366_v9, %v2365_v37 }
 0x55d   : > { %2458 = vmatmul.bf16.vlgmr.msrb.gmra.mxu3 %v6701_v40 }
 0x55e   : > { %2492 = vmatpush.bf16.msra.mxu3 %v2376_v2 }
 0x55f   : > { %2524 = vmatpush.bf16.msrb.mxu0 %v8000_v29 }
 0x562   : > { %2493 = vmatpush.bf16.msra.mxu3 %v2375_v12  ;;  %v2406_v12 = vpop.permute.xlu2 %2405 }
 0x563   : > { %2525 = vmatpush.bf16.msrb.mxu0 %v8122_v24 }
 0x566   : > { %2494 = vmatpush.bf16.msra.mxu3 %v2374_v54  ;;  %v2411_v54 = vpop.permute.xlu0 %2410 }
 0x567   : > { %2526 = vmatpush.bf16.msrb.mxu0 %v8224_v62 }
 0x56a   : > { %2495 = vmatpush.bf16.msra.mxu3 %v2373_v23  ;;  %2482 = vmatmul.bf16.gmra.mxu0 %v6717_v13 }
 0x56b   : > { %2527 = vmatpush.bf16.msrb.mxu0 %v10425_v60 }
 0x56d   : > { %2463 = vmatmul.bf16.gmra.mxu3 %v6713_v16 }
 0x56e   : > { %2580 = vmatpush.bf16.msrb.mxu3 %v7745_v48 }
 0x56f   : > { %2528 = vmatpush.bf16.msrb.mxu0 %v10426_v26 }
 0x572   : > { %2581 = vmatpush.bf16.msrb.mxu3 %v10415_v21 }
 0x573   : > { %2529 = vmatpush.bf16.msrb.mxu0 %v10427_v38 }
 0x576   : > { %2582 = vmatpush.bf16.msrb.mxu3 %v10416_v14 }
 0x577   : > { %2530 = vmatpush.bf16.msrb.mxu0 %v10428_v25 }
 0x57a   : > { %2583 = vmatpush.bf16.msrb.mxu3 %v10417_v20 }
 0x57d   : > { %6722 = vmatmul.msk.bf16.vlgmr.msra.gmra.mxu3 %vm2443_vm13, %v6709_v1 }
 0x57e   : > { %2584 = vmatpush.bf16.msrb.mxu3 %v10418_v15 }
 0x582   : > { %2585 = vmatpush.bf16.msrb.mxu3 %v10429_v50 }
 0x586   : > { %2586 = vmatpush.bf16.msrb.mxu3 %v10430_v6 }
 0x58a   : > { %2587 = vmatpush.bf16.msrb.mxu3 %v10431_v3 }
 0x58d   : > { %6723 = vmatmul.msk.bf16.gmra.mxu3 %vm2443_vm13, %v6721_v5 }
 0x58e   : > { %2904 = vmatpush.bf16.msra.mxu3 %v10432_v43 }
 0x592   : > { %2905 = vmatpush.bf16.msra.mxu3 %v10433_v46 }
 0x596   : > { %2906 = vmatpush.bf16.msra.mxu3 %v10434_v45 }
 0x59a   : > { %2907 = vmatpush.bf16.msra.mxu3 %v10435_v22 }
 0x59e   : > { %2908 = vmatpush.bf16.msra.mxu3 %v10436_v53 }
 0x5a2   : > { %2909 = vmatpush.bf16.msra.mxu3 %v10437_v4 }
 0x5a6   : > { %2910 = vmatpush.bf16.msra.mxu3 %v10438_v56 }
 0x5aa   : > { %2911 = vmatpush.bf16.msra.mxu3 %v10439_v59 }
 0x5d7   : > { %v2478_v47 = vpop.f32.mrf.mxu0 }
 0x5df   : > { %v2480_v19 = vpop.f32.mrf.mxu0 }
 0x5e0   : > { %v2459_v7 = vpop.f32.mrf.mxu3 }
 0x5e1   : > { %v2460_v39 = vadd.f32 %v2459_v7, %v2396_v41 }
 0x5e3   : > { %v2479_v61 = vadd.f32 %v2478_v47, %v2460_v39 }
 0x5e7   : > { %v2483_v30 = vpop.f32.mrf.mxu0 }
 0x5e8   : > { %v2461_v35 = vpop.f32.mrf.mxu3 }
 0x5e9   : > { %v2462_v10 = vadd.f32 %v2461_v35, %v2401_v42 }
 0x5eb   : > { %v2481_v44 = vadd.f32 %v2480_v19, %v2462_v10 }
 0x5ef   : > { %v2485_v57 = vpop.f32.mrf.mxu0 }
 0x5f0   : > { %v2464_v27 = vpop.f32.mrf.mxu3 }
 0x5f1   : > { %v2465_v51 = vadd.f32 %v2464_v27, %v2406_v12 }
 0x5f3   : > { %v2484_v37 = vadd.f32 %v2483_v30, %v2465_v51 }
 0x5f8   : > { %v2466_v34 = vpop.f32.mrf.mxu3 }
 0x5f9   : > { %v2467_v11 = vadd.f32 %v2466_v34, %v2411_v54 }
 0x5fb   : > { %v2486_v31 = vadd.f32 %v2485_v57, %v2467_v11 }
 0x600   : > { %v2497_v32 = vpop.f32.mrf.mxu3 }
 0x601   : > { %v2498_v58 = vadd.f32 %v2497_v32, %v2479_v61 }
 0x603   : > { %v2507_v40 = vpack.c.bf16 %v2498_v58, %v2498_v58 }
 0x605   : > { %v2515_v8 = vunpack.c.l.b16 %v2507_v40 }
 0x608   : > { %v2499_v2 = vpop.f32.mrf.mxu3 }
 0x609   : > { %v2500_v18 = vadd.f32 %v2499_v2, %v2481_v44 }
 0x60b   : > { %v2508_v52 = vpack.c.bf16 %v2500_v18, %v2500_v18 }
 0x60d   : > { %v2516_v36 = vunpack.c.l.b16 %v2508_v52 }
 0x60f   : > { %v9064_v17 = vpack.c.b16 %v2516_v36, %v2515_v8 }
 0x610   : > { %v2502_v9 = vpop.f32.mrf.mxu3 }
 0x611   : > { %2531 = vmatmul.bf16.vlgmr.msrb.gmra.mxu0 %v9064_v17  ;;  %2550 = vmatmul.bf16.vlgmr.msra.gmra.mxu1 %v9064_v17  ;;  %v2503_v23 = vadd.f32 %v2502_v9, %v2484_v37 }
 0x612   : > { %2569 = vmatmul.bf16.vlgmr.msra.gmra.mxu2 %v9064_v17  ;;  %2588 = vmatmul.bf16.vlgmr.msrb.gmra.mxu3 %v9064_v17 }
 0x613   : > { %v2509_v13 = vpack.c.bf16 %v2503_v23, %v2503_v23 }
 0x615   : > { %v2517_v0 = vunpack.c.l.b16 %v2509_v13 }
 0x618   : > { %v2504_v55 = vpop.f32.mrf.mxu3 }
 0x619   : > { %v2505_v16 = vadd.f32 %v2504_v55, %v2486_v31 }
 0x61b   : > { %v2510_v63 = vpack.c.bf16 %v2505_v16, %v2505_v16 }
 0x61d   : > { %v2518_v1 = vunpack.c.l.b16 %v2510_v63 }
 0x61f   : > { %v9070_v33 = vpack.c.b16 %v2518_v1, %v2517_v0 }
 0x621   : > { %2536 = vmatmul.bf16.gmra.mxu0 %v9070_v33  ;;  %2555 = vmatmul.bf16.gmra.mxu1 %v9070_v33 }
 0x622   : > { %2574 = vmatmul.bf16.gmra.mxu2 %v9070_v33  ;;  %2593 = vmatmul.bf16.gmra.mxu3 %v9070_v33 }
 0x68e   : > { %v2551_v28 = vpop.f32.mrf.mxu1  ;;  %v9076_v35 = vpop.f32.mrf.mxu0 }
 0x695   : > { %v2570_v5 = vpop.f32.mrf.mxu2  ;;  %v2589_v7 = vpop.f32.mrf.mxu3 }
 0x696   : > { %v2553_v27 = vpop.f32.mrf.mxu1  ;;  %v9078_v41 = vpop.f32.mrf.mxu0  ;;  %v2607_v44 = vand.u32 2147483647, %v2570_v5  ;;  %v2615_v2 = vand.u32 2147483647, %v2589_v7 }
 0x698   : > { %v2611_v11 = vpack.c.bf16 %v2607_v44, %v2607_v44  ;;  %v2619_v57 = vpack.c.bf16 %v2615_v2, %v2615_v2 }
 0x69d   : > { %v2572_v47 = vpop.f32.mrf.mxu2  ;;  %v2591_v34 = vpop.f32.mrf.mxu3 }
 0x69e   : > { %v2556_v32 = vpop.f32.mrf.mxu1  ;;  %v2608_v10 = vand.u32 2147483647, %v2572_v47  ;;  %v2616_v58 = vand.u32 2147483647, %v2591_v34  ;;  %v2537_v51 = vpop.f32.mrf.mxu0  ;;  %v2651_v47 = vunpack.c.l.b16 %v2611_v11  ;;  %v2663_v34 = vunpack.c.l.b16 %v2619_v57 }
 0x6a0   : > { %v2612_v12 = vpack.c.bf16 %v2608_v10, %v2608_v10  ;;  %v2620_v9 = vpack.c.bf16 %v2616_v58, %v2616_v58 }
 0x6a2   : > { %v2652_v63 = vunpack.c.l.b16 %v2612_v12  ;;  %v2664_v0 = vunpack.c.l.b16 %v2620_v9  ;;  %v2601_v12 = vpack.c.bf16 %v2537_v51, %v2537_v51  ;;  %v7248_v51 = vld [vmem:[%s10251_s11 + $0x14] sm:$0xf] }
 0x6a4   : > { %v2655_v58 = vpack.c.b16 %v2652_v63, %v2651_v47  ;;  %v2667_v44 = vpack.c.b16 %v2664_v0, %v2663_v34  ;;  %v10440_v63 = vld [vmem:[#allocation7_spill] sm:$0xff]  ;;  %v10441_v0 = vld [vmem:[#allocation9_spill] sm:$0xff]  ;;  %v10444_v47 = vld [vmem:[#allocation18_spill] sm:$0xff] }
 0x6a5   : > { %v2575_v39 = vpop.f32.mrf.mxu2  ;;  %v2594_v19 = vpop.f32.mrf.mxu3  ;;  %v10445_v34 = vld [vmem:[#allocation21_spill] sm:$0xff] }
 0x6a6   : > { %v2609_v42 = vand.u32 2147483647, %v2575_v39  ;;  %v2617_v61 = vand.u32 2147483647, %v2594_v19  ;;  %v2558_v23 = vpop.f32.mrf.mxu1  ;;  %v2605_v39 = vpack.c.bf16 %v2556_v32, %v2556_v32  ;;  %v7246_v19 = vld [vmem:[%s10251_s11 + $0x4] sm:$0xf]  ;;  %v2539_v2 = vpop.f32.mrf.mxu0 }
 0x6a7   : > { %v2606_v1 = vpack.c.bf16 %v2558_v23, %v2558_v23 }
 0x6a8   : > { %v2613_v30 = vpack.c.bf16 %v2609_v42, %v2609_v42  ;;  %v2621_v52 = vpack.c.bf16 %v2617_v61, %v2617_v61  ;;  %v6728_v42 = vld [vmem:[%s10251_s11 + $0x8] sm:$0xf0]  ;;  %v2604_v61 = vpack.c.bf16 %v2553_v27, %v2553_v27  ;;  %v2600_v27 = vpack.c.bf16 %v9078_v41, %v9078_v41  ;;  %v6736_v41 = vld [vmem:[%s10251_s11 + $0x18] sm:$0xf0] }
 0x6a9   : > { %v2642_v10 = vunpack.c.l.b16 %v2606_v1  ;;  %v6734_v1 = vld [vmem:[%s10251_s11 + $0x10] sm:$0xf] }
 0x6aa   : > { %v2653_v31 = vunpack.c.l.b16 %v2613_v30  ;;  %v2665_v55 = vunpack.c.l.b16 %v2621_v52  ;;  %v2641_v30 = vunpack.c.l.b16 %v2605_v39  ;;  %v2640_v32 = vunpack.c.l.b16 %v2604_v61  ;;  %v10446_v39 = vld [vmem:[#allocation25_spill] sm:$0xff]  ;;  %v2682_v61 = vpop.permute.xlu1 %2681 }
 0x6ab   : > { %v2602_v52 = vpack.c.bf16 %v2539_v2, %v2539_v2  ;;  %v2628_v11 = vunpack.c.l.b16 %v2600_v27 }
 0x6ad   : > { %v2577_v40 = vpop.f32.mrf.mxu2  ;;  %v2596_v18 = vpop.f32.mrf.mxu3  ;;  %v2630_v9 = vunpack.c.l.b16 %v2602_v52  ;;  %v10448_v52 = vld [vmem:[#allocation13_spill] sm:$0xff] }
 0x6ae   : > { %v2610_v8 = vand.u32 2147483647, %v2577_v40  ;;  %v2618_v36 = vand.u32 2147483647, %v2596_v18  ;;  %v6731_v40 = vor.u32 %v7246_v19, %v6728_v42  ;;  %v2603_v18 = vpack.c.bf16 %v2551_v28, %v2551_v28  ;;  %v10447_v19 = vld [vmem:[#allocation29_spill] sm:$0xff] }
 0x6b0   : > { %v2614_v54 = vpack.c.bf16 %v2610_v8, %v2610_v8  ;;  %v2622_v37 = vpack.c.bf16 %v2618_v36, %v2618_v36  ;;  %v2644_v8 = vpack.c.b16 %v2642_v10, %v2641_v30  ;;  %v2639_v36 = vunpack.c.l.b16 %v2603_v18  ;;  %v2687_v30 = vpop.permute.xlu2 %2686 }
 0x6b2   : > { %v2654_v13 = vunpack.c.l.b16 %v2614_v54  ;;  %v2666_v16 = vunpack.c.l.b16 %v2622_v37  ;;  %v2643_v28 = vpack.c.b16 %v2640_v32, %v2639_v36  ;;  %v2599_v54 = vpack.c.bf16 %v9076_v35, %v9076_v35 }
 0x6b3   : > { %v2629_v37 = vunpack.c.l.b16 %v2601_v12  ;;  %v6739_v35 = vor.u32 %v7248_v51, %v6736_v41 }
 0x6b4   : > { %v2656_v5 = vpack.c.b16 %v2654_v13, %v2653_v31  ;;  %v2668_v7 = vpack.c.b16 %v2666_v16, %v2665_v55  ;;  %v2627_v23 = vunpack.c.l.b16 %v2599_v54  ;;  %v6726_v55 = vld [vmem:[%s10251_s11] sm:$0xf]  ;;  %v7247_v13 = vld [vmem:[%s10251_s11 + $0x4] sm:$0xf0] }
 0x6b5   : > { %v2632_v57 = vpack.c.b16 %v2630_v9, %v2629_v37  ;;  %v6727_v16 = vor.u32 %v7247_v13, %v6726_v55  ;;  %v2697_v55 = vpop.permute.xlu1 %2696 }
 0x6b6   : > { %2723 = vmatpush.bf16.msra.mxu0 %v2656_v5  ;;  %2748 = vmatpush.bf16.msrb.mxu1 %v2668_v7  ;;  %v2631_v31 = vpack.c.b16 %v2628_v11, %v2627_v23  ;;  %v10443_v5 = vld [vmem:[#allocation15_spill] sm:$0xff] }
 0x6ba   : > { %2724 = vmatpush.bf16.msra.mxu0 %v2655_v58  ;;  %2749 = vmatpush.bf16.msrb.mxu1 %v2667_v44 }
 0x6bd   : > { %6740 = vmatmul.msk.bf16.vlgmr.msrb.gmra.mxu1 %vm1802_vm7, %v6731_v40 }
 0x6be   : > { %2942 = vmatpush.bf16.msra.mxu1 %v7745_v48  ;;  %2725 = vmatpush.bf16.msra.mxu0 %v2644_v8 }
 0x6c2   : > { %2943 = vmatpush.bf16.msra.mxu1 %v10415_v21  ;;  %2726 = vmatpush.bf16.msra.mxu0 %v2643_v28  ;;  %v2692_v28 = vpop.permute.xlu0 %2691 }
 0x6c6   : > { %2944 = vmatpush.bf16.msra.mxu1 %v10416_v14  ;;  %2727 = vmatpush.bf16.msra.mxu0 %v2632_v57 }
 0x6ca   : > { %2945 = vmatpush.bf16.msra.mxu1 %v10417_v20  ;;  %2728 = vmatpush.bf16.msra.mxu0 %v2631_v31 }
 0x6cd   : > { %6741 = vmatmul.msk.bf16.gmra.mxu1 %vm1802_vm7, %v6739_v35 }
 0x6ce   : > { %2946 = vmatpush.bf16.msra.mxu1 %v10418_v15  ;;  %2729 = vmatpush.bf16.msra.mxu0 %v9070_v33  ;;  %v10442_v33 = vld [vmem:[#allocation12_spill] sm:$0xff] }
 0x6d2   : > { %2947 = vmatpush.bf16.msra.mxu1 %v10429_v50  ;;  %2730 = vmatpush.bf16.msra.mxu0 %v9064_v17  ;;  %v7249_v17 = vld [vmem:[%s10251_s11 + $0x14] sm:$0xf0] }
 0x6d3   : > { %v6735_v7 = vor.u32 %v7249_v17, %v6734_v1 }
 0x6d5   : > { %2731 = vmatmul.bf16.vlgmr.msra.gmra.mxu0 %v6727_v16 }
 0x6d6   : > { %2923 = vmatpush.bf16.msrb.mxu0 %v10440_v63  ;;  %2948 = vmatpush.bf16.msra.mxu1 %v10430_v6 }
 0x6da   : > { %2924 = vmatpush.bf16.msrb.mxu0 %v10441_v0  ;;  %2949 = vmatpush.bf16.msra.mxu1 %v10431_v3 }
 0x6de   : > { %3089 = vmatpush.bf16.msrb.mxu1 %v10432_v43  ;;  %2925 = vmatpush.bf16.msrb.mxu0 %v10442_v33 }
 0x6e2   : > { %3090 = vmatpush.bf16.msrb.mxu1 %v10433_v46  ;;  %2926 = vmatpush.bf16.msrb.mxu0 %v10443_v5 }
 0x6e5   : > { %2736 = vmatmul.bf16.gmra.mxu0 %v6735_v7 }
 0x6e6   : > { %3091 = vmatpush.bf16.msrb.mxu1 %v10434_v45  ;;  %2927 = vmatpush.bf16.msrb.mxu0 %v10444_v47 }
 0x6ea   : > { %3092 = vmatpush.bf16.msrb.mxu1 %v10435_v22  ;;  %2928 = vmatpush.bf16.msrb.mxu0 %v10445_v34 }
 0x6ee   : > { %3093 = vmatpush.bf16.msrb.mxu1 %v10436_v53  ;;  %2929 = vmatpush.bf16.msrb.mxu0 %v10446_v39 }
 0x6f2   : > { %3094 = vmatpush.bf16.msrb.mxu1 %v10437_v4  ;;  %2930 = vmatpush.bf16.msrb.mxu0 %v10447_v19 }
 0x6f6   : > { %3076 = vmatpush.bf16.msra.mxu0 %v7878_v49  ;;  %3095 = vmatpush.bf16.msrb.mxu1 %v10438_v56 }
 0x6fa   : > { %3077 = vmatpush.bf16.msra.mxu0 %v8000_v29  ;;  %3096 = vmatpush.bf16.msrb.mxu1 %v10439_v59 }
 0x6fe   : > { %3078 = vmatpush.bf16.msra.mxu0 %v8122_v24 }
 0x702   : > { %3079 = vmatpush.bf16.msra.mxu0 %v8224_v62 }
 0x706   : > { %3080 = vmatpush.bf16.msra.mxu0 %v10425_v60 }
 0x70a   : > { %3081 = vmatpush.bf16.msra.mxu0 %v10426_v26 }
 0x70e   : > { %3082 = vmatpush.bf16.msra.mxu0 %v10427_v38 }
 0x712   : > { %3083 = vmatpush.bf16.msra.mxu0 %v10428_v25 }
 0x73a   : > { %v2751_v42 = vpop.f32.mrf.mxu1 }
 0x742   : > { %v2753_v40 = vpop.f32.mrf.mxu1 }
 0x74a   : > { %v2756_v37 = vpop.f32.mrf.mxu1 }
 0x752   : > { %v2732_v10 = vpop.f32.mrf.mxu0  ;;  %v2758_v17 = vpop.f32.mrf.mxu1 }
 0x753   : > { %v2733_v58 = vadd.f32 %v2732_v10, %v2682_v61 }
 0x755   : > { %v2752_v44 = vadd.f32 %v2751_v42, %v2733_v58 }
 0x757   : > { %v2765_v2 = vmul.f32 0.0, %v2752_v44  ;;  %vm2761_vm14 = vcmp.ge.f32.partialorder %v2752_v44, 0.0 }
 0x759   : > { %v9144_v18 = vsel %vm2761_vm14, %v2752_v44, %v2765_v2  ;;  %v3160_v2 = vld [vmem:[%s10256_s16] sm:$0x3f] }
 0x75a   : > { %v2734_v32 = vpop.f32.mrf.mxu0  ;;  %v2773_v8 = vmul.f32 %v10448_v52, %v9144_v18 }
 0x75b   : > { %v2735_v36 = vadd.f32 %v2734_v32, %v2687_v30  ;;  %v3324_v30 = vld [vmem:[%s10258_s18] sm:$0x3f]  ;;  %v4211_v32 = vld [vmem:[%s10246_s6 + $0x8] sm:$0xff] }
 0x75c   : > { %2777 = vadd.xlane.f32.xlu2 %v2773_v8  ;;  %v2785_v12 = vmul.f32 %v2773_v8, %v9144_v18  ;;  %v4212_v8 = vld [vmem:[%s10246_s6 + $0x10] sm:$0xff] }
 0x75d   : > { %v2754_v27 = vadd.f32 %v2753_v40, %v2735_v36  ;;  %v3034_v40 = vld [vmem:[%s10254_s14] sm:$0x3f] }
 0x75e   : > { %2789 = vadd.xlane.f32.xlu1 %v2785_v12  ;;  %v10449_v12 = vld [vmem:[#allocation16_spill] sm:$0xff] }
 0x75f   : > { %vm2762_vm15 = vcmp.ge.f32.partialorder %v2754_v27, 0.0  ;;  %v2766_v9 = vmul.f32 0.0, %v2754_v27 }
 0x761   : > { %v9149_v54 = vsel %vm2762_vm15, %v2754_v27, %v2766_v9 }
 0x762   : > { %v2737_v11 = vpop.f32.mrf.mxu0  ;;  %v2774_v57 = vmul.f32 %v10448_v52, %v9149_v54 }
 0x763   : > { %v2738_v23 = vadd.f32 %v2737_v11, %v2692_v28 }
 0x764   : > { %2779 = vadd.xlane.f32.xlu0 %v2774_v57  ;;  %v2786_v51 = vmul.f32 %v2774_v57, %v9149_v54 }
 0x765   : > { %v2757_v41 = vadd.f32 %v2756_v37, %v2738_v23 }
 0x766   : > { %2791 = vadd.xlane.f32.xlu2 %v2786_v51 }
 0x767   : > { %v2767_v31 = vmul.f32 0.0, %v2757_v41  ;;  %vm2763_vm6 = vcmp.ge.f32.partialorder %v2757_v41, 0.0 }
 0x769   : > { %v9154_v35 = vsel %vm2763_vm6, %v2757_v41, %v2767_v31 }
 0x76a   : > { %v2739_v13 = vpop.f32.mrf.mxu0  ;;  %v2775_v16 = vmul.f32 %v10448_v52, %v9154_v35 }
 0x76b   : > { %v2740_v1 = vadd.f32 %v2739_v13, %v2697_v55 }
 0x76c   : > { %2781 = vadd.xlane.f32.xlu0 %v2775_v16  ;;  %v2787_v7 = vmul.f32 %v2775_v16, %v9154_v35 }
 0x76d   : > { %v2759_v42 = vadd.f32 %v2758_v17, %v2740_v1 }
 0x76e   : > { %2793 = vadd.xlane.f32.xlu2 %v2787_v7 }
 0x76f   : > { %vm2764_vm8 = vcmp.ge.f32.partialorder %v2759_v42, 0.0  ;;  %v2768_v61 = vmul.f32 0.0, %v2759_v42 }
 0x771   : > { %v9159_v10 = vsel %vm2764_vm8, %v2759_v42, %v2768_v61 }
 0x772   : > { %v2776_v58 = vmul.f32 %v10448_v52, %v9159_v10 }
 0x774   : > { %2783 = vadd.xlane.f32.xlu1 %v2776_v58  ;;  %v2788_v44 = vmul.f32 %v2776_v58, %v9159_v10 }
 0x776   : > { %2795 = vadd.xlane.f32.xlu0 %v2788_v44 }
 0x786   : > { %3163 = vperm.xlu2 %7351, %v3160_v2  }
 0x78d   : > { %3037 = vperm.xlu1 %7350, %v3034_v40  }
 0x78e   : > { %3327 = vperm.xlu2 %7351, %v3324_v30  }
 0x796   : > { %4221 = vperm.xlu2 %7351, %v4211_v32  }
 0x79e   : > { %4226 = vperm.xlu2 %7351, %v4212_v8  }
 0x7cf   : > { %v2778_v36 = vpop.xlane.xlu2 %2777 }
 0x7d0   : > { %v2797_v27 = vmul.f32 %v2778_v36, %v10449_v12 }
 0x7d1   : > { %v2790_v9 = vpop.xlane.xlu1 %2789 }
 0x7d2   : > { %v2805_v28 = vmul.f32 %v2797_v27, %v2797_v27  ;;  %v2801_v37 = vmul.f32 %v2790_v9, %v10449_v12 }
 0x7d4   : > { %v2809_v11 = vsub.f32 %v2801_v37, %v2805_v28 }
 0x7d6   : > { %v2813_v57 = vmax.f32 %v2809_v11, 0.0 }
 0x7d7   : > { %v2780_v23 = vpop.xlane.xlu0 %2779 }
 0x7d8   : > { %v2821_v51 = vadd.f32 1e-05, %v2813_v57  ;;  %v2798_v41 = vmul.f32 %v2780_v23, %v10449_v12 }
 0x7d9   : > { %v2792_v31 = vpop.xlane.xlu2 %2791 }
 0x7da   : > { %7378 = vrsqrt.f32 %v2821_v51  ;;  %v2806_v55 = vmul.f32 %v2798_v41, %v2798_v41  ;;  %v2802_v13 = vmul.f32 %v2792_v31, %v10449_v12  ;;  %vm2831_vm10 = vweird.f32 %v2821_v51 }
 0x7db   : > { %v2818_v52 = vsub.f32 %v9149_v54, %v2798_v41 }
 0x7dc   : > { %v2810_v16 = vsub.f32 %v2802_v13, %v2806_v55 }
 0x7de   : > { %v2814_v1 = vmax.f32 %v2810_v16, 0.0 }
 0x7df   : > { %v2782_v17 = vpop.xlane.xlu0 %2781 }
 0x7e0   : > { %v7379_v7 = vpop.eup %7378  ;;  %v9184_v42 = vmul.f32 %v2782_v17, %v10449_v12  ;;  %v2822_v58 = vadd.f32 1e-05, %v2814_v1 }
 0x7e1   : > { %v2826_v61 = vmul.f32 %v7379_v7, %v2821_v51  ;;  %v2794_v44 = vpop.xlane.xlu2 %2793  ;;  %vm2832_vm9 = vweird.f32 %v7379_v7 }
 0x7e2   : > { %v2807_v2 = vmul.f32 %v9184_v42, %v9184_v42  ;;  %v2803_v40 = vmul.f32 %v2794_v44, %v10449_v12  ;;  %7380 = vrsqrt.f32 %v2822_v58  ;;  %vm2833_vm11 = vmor %vm2831_vm10, %vm2832_vm9  ;;  %vm2841_vm14 = vweird.f32 %v2822_v58 }
 0x7e3   : > { %v2827_v30 = vmul.f32 %v7379_v7, %v2826_v61  ;;  %v2819_v41 = vsub.f32 %v9154_v35, %v9184_v42 }
 0x7e4   : > { %v2811_v32 = vsub.f32 %v2803_v40, %v2807_v2  ;;  %v2817_v2 = vsub.f32 %v9144_v18, %v2797_v27 }
 0x7e5   : > { %v2828_v8 = vmul.f32 0.5, %v2827_v30 }
 0x7e6   : > { %v2815_v36 = vmax.f32 %v2811_v32, 0.0 }
 0x7e7   : > { %v2829_v9 = vsub.f32 1.5, %v2828_v8  ;;  %v2784_v28 = vpop.xlane.xlu1 %2783 }
 0x7e8   : > { %v2823_v37 = vadd.f32 1e-05, %v2815_v36  ;;  %v9190_v11 = vmul.f32 %v2784_v28, %v10449_v12  ;;  %v7381_v57 = vpop.eup %7380 }
 0x7e9   : > { %v2796_v23 = vpop.xlane.xlu0 %2795  ;;  %v2830_v31 = vmul.f32 %v7379_v7, %v2829_v9  ;;  %v2836_v55 = vmul.f32 %v7381_v57, %v2822_v58  ;;  %vm2842_vm12 = vweird.f32 %v7381_v57 }
 0x7ea   : > { %7382 = vrsqrt.f32 %v2823_v37  ;;  %v2808_v13 = vmul.f32 %v9190_v11, %v9190_v11  ;;  %v2804_v16 = vmul.f32 %v2796_v23, %v10449_v12  ;;  %vm2843_vm15 = vmor %vm2841_vm14, %vm2842_vm12  ;;  %vm2851_vm8 = vweird.f32 %v2823_v37 }
 0x7eb   : > { %v2837_v1 = vmul.f32 %v7381_v57, %v2836_v55  ;;  %v2834_v61 = vsel %vm2833_vm11, %v7379_v7, %v2830_v31 }
 0x7ec   : > { %v2812_v17 = vsub.f32 %v2804_v16, %v2808_v13  ;;  %v2865_v8 = vmul.f32 %v2834_v61, %v2817_v2 }
 0x7ed   : > { %v2838_v44 = vmul.f32 0.5, %v2837_v1 }
 0x7ee   : > { %v2816_v40 = vmax.f32 %v2812_v17, 0.0  ;;  %v2869_v55 = vpack.c.bf16 %v2865_v8, %v2865_v8 }
 0x7ef   : > { %v2839_v32 = vsub.f32 1.5, %v2838_v44 }
 0x7f0   : > { %v7383_v30 = vpop.eup %7382  ;;  %v2824_v9 = vadd.f32 1e-05, %v2816_v40  ;;  %v2877_v16 = vunpack.c.l.b16 %v2869_v55  ;;  %v2820_v40 = vsub.f32 %v9159_v10, %v9190_v11 }
 0x7f1   : > { %v2846_v36 = vmul.f32 %v7383_v30, %v2823_v37  ;;  %v2840_v28 = vmul.f32 %v7381_v57, %v2839_v32  ;;  %vm2852_vm6 = vweird.f32 %v7383_v30 }
 0x7f2   : > { %7384 = vrsqrt.f32 %v2824_v9  ;;  %vm2853_vm9 = vmor %vm2851_vm8, %vm2852_vm6  ;;  %vm2861_vm11 = vweird.f32 %v2824_v9 }
 0x7f3   : > { %v2847_v51 = vmul.f32 %v7383_v30, %v2846_v36  ;;  %v2844_v23 = vsel %vm2843_vm15, %v7381_v57, %v2840_v28 }
 0x7f4   : > { %v2866_v7 = vmul.f32 %v2844_v23, %v2818_v52 }
 0x7f5   : > { %v2848_v31 = vmul.f32 0.5, %v2847_v51 }
 0x7f6   : > { %v2870_v13 = vpack.c.bf16 %v2866_v7, %v2866_v7 }
 0x7f7   : > { %v2849_v18 = vsub.f32 1.5, %v2848_v31 }
 0x7f8   : > { %v7385_v27 = vpop.eup %7384  ;;  %v2878_v1 = vunpack.c.l.b16 %v2870_v13 }
 0x7f9   : > { %v2850_v17 = vmul.f32 %v7383_v30, %v2849_v18  ;;  %v2856_v61 = vmul.f32 %v7385_v27, %v2824_v9  ;;  %vm2862_vm10 = vweird.f32 %v7385_v27 }
 0x7fa   : > { %v9197_v44 = vpack.c.b16 %v2878_v1, %v2877_v16  ;;  %vm2863_vm12 = vmor %vm2861_vm11, %vm2862_vm10 }
 0x7fb   : > { %v2857_v58 = vmul.f32 %v7385_v27, %v2856_v61  ;;  %v2854_v54 = vsel %vm2853_vm9, %v7383_v30, %v2850_v17 }
 0x7fc   : > { %2893 = vmatmul.bf16.vlgmr.msrb.gmra.mxu2 %v9197_v44  ;;  %2912 = vmatmul.bf16.vlgmr.msra.gmra.mxu3 %v9197_v44  ;;  %v2867_v37 = vmul.f32 %v2854_v54, %v2819_v41 }
 0x7fd   : > { %v2858_v52 = vmul.f32 0.5, %v2857_v58  ;;  %2931 = vmatmul.bf16.vlgmr.msrb.gmra.mxu0 %v9197_v44  ;;  %2950 = vmatmul.bf16.vlgmr.msra.gmra.mxu1 %v9197_v44 }
 0x7fe   : > { %3253 = vmatpush.bf16.msra.mxu1 %v10432_v43  ;;  %v2871_v32 = vpack.c.bf16 %v2867_v37, %v2867_v37 }
 0x7ff   : > { %v2859_v57 = vsub.f32 1.5, %v2858_v52 }
 0x800   : > { %v2879_v35 = vunpack.c.l.b16 %v2871_v32 }
 0x801   : > { %v2860_v2 = vmul.f32 %v7385_v27, %v2859_v57 }
 0x802   : > { %3254 = vmatpush.bf16.msra.mxu1 %v10433_v46 }
 0x803   : > { %v2864_v30 = vsel %vm2863_vm12, %v7385_v27, %v2860_v2 }
 0x804   : > { %v2868_v8 = vmul.f32 %v2864_v30, %v2820_v40 }
 0x806   : > { %v2872_v36 = vpack.c.bf16 %v2868_v8, %v2868_v8  ;;  %3255 = vmatpush.bf16.msra.mxu1 %v10434_v45 }
 0x808   : > { %v2880_v42 = vunpack.c.l.b16 %v2872_v36 }
 0x80a   : > { %v9210_v43 = vpack.c.b16 %v2880_v42, %v2879_v35  ;;  %3256 = vmatpush.bf16.msra.mxu1 %v10435_v22  ;;  %v3033_v35 = vld [vmem:[%s10253_s13] sm:$0x77] }
 0x80c   : > { %2898 = vmatmul.bf16.gmra.mxu2 %v9210_v43  ;;  %2917 = vmatmul.bf16.gmra.mxu3 %v9210_v43 }
 0x80d   : > { %2936 = vmatmul.bf16.gmra.mxu0 %v9210_v43  ;;  %2955 = vmatmul.bf16.gmra.mxu1 %v9210_v43 }
 0x80e   : > { %3257 = vmatpush.bf16.msra.mxu1 %v10436_v53 }
 0x812   : > { %3258 = vmatpush.bf16.msra.mxu1 %v10437_v4 }
 0x816   : > { %3259 = vmatpush.bf16.msra.mxu1 %v10438_v56 }
 0x81a   : > { %3260 = vmatpush.bf16.msra.mxu1 %v10439_v59 }
 0x87a   : > { %v2932_v46 = vpop.f32.mrf.mxu0  ;;  %v2951_v45 = vpop.f32.mrf.mxu1 }
 0x87b   : > { %v2969_v56 = vand.u32 2147483647, %v2932_v46  ;;  %v2977_v18 = vand.u32 2147483647, %v2951_v45 }
 0x87d   : > { %v2973_v37 = vpack.c.bf16 %v2969_v56, %v2969_v56  ;;  %v2981_v2 = vpack.c.bf16 %v2977_v18, %v2977_v18 }
 0x87f   : > { %v9221_v10 = vpop.f32.mrf.mxu2  ;;  %v2913_v22 = vpop.f32.mrf.mxu3 }
 0x882   : > { %v2934_v11 = vpop.f32.mrf.mxu0  ;;  %v2953_v9 = vpop.f32.mrf.mxu1 }
 0x883   : > { %v2970_v4 = vand.u32 2147483647, %v2934_v11  ;;  %v2978_v13 = vand.u32 2147483647, %v2953_v9 }
 0x885   : > { %v2974_v58 = vpack.c.bf16 %v2970_v4, %v2970_v4  ;;  %v2982_v52 = vpack.c.bf16 %v2978_v13, %v2978_v13 }
 0x887   : > { %v2915_v28 = vpop.f32.mrf.mxu3  ;;  %v9223_v51 = vpop.f32.mrf.mxu2  ;;  %v3014_v42 = vunpack.c.l.b16 %v2974_v58  ;;  %v3026_v46 = vunpack.c.l.b16 %v2982_v52 }
 0x888   : > { %v2966_v4 = vpack.c.bf16 %v2915_v28, %v2915_v28  ;;  %v2962_v28 = vpack.c.bf16 %v9223_v51, %v9223_v51  ;;  %v3041_v51 = vunpack.c.l.b16 %v3033_v35 }
 0x88a   : > { %v2937_v23 = vpop.f32.mrf.mxu0  ;;  %v2956_v55 = vpop.f32.mrf.mxu1 }
 0x88b   : > { %v2971_v7 = vand.u32 2147483647, %v2937_v23  ;;  %v2979_v53 = vand.u32 2147483647, %v2956_v55  ;;  %v3042_v23 = vunpack.c.h.b16 %v3033_v35  ;;  %v3013_v55 = vunpack.c.l.b16 %v2973_v37 }
 0x88d   : > { %v2975_v16 = vpack.c.bf16 %v2971_v7, %v2971_v7  ;;  %v2983_v1 = vpack.c.bf16 %v2979_v53, %v2979_v53  ;;  %v3025_v7 = vunpack.c.l.b16 %v2981_v2  ;;  %v3017_v56 = vpack.c.b16 %v3014_v42, %v3013_v55 }
 0x88e   : > { %v2990_v2 = vunpack.c.l.b16 %v2962_v28 }
 0x88f   : > { %v2918_v31 = vpop.f32.mrf.mxu3  ;;  %v2899_v54 = vpop.f32.mrf.mxu2  ;;  %v3015_v40 = vunpack.c.l.b16 %v2975_v16  ;;  %v3027_v30 = vunpack.c.l.b16 %v2983_v1  ;;  %v3029_v18 = vpack.c.b16 %v3026_v46, %v3025_v7  ;;  %v2965_v16 = vpack.c.bf16 %v2913_v22, %v2913_v22 }
 0x890   : > { %v2967_v53 = vpack.c.bf16 %v2918_v31, %v2918_v31  ;;  %v2963_v52 = vpack.c.bf16 %v2899_v54, %v2899_v54 }
 0x891   : > { %v3001_v31 = vunpack.c.l.b16 %v2965_v16 }
 0x892   : > { %v2939_v59 = vpop.f32.mrf.mxu0  ;;  %v2958_v27 = vpop.f32.mrf.mxu1  ;;  %v3003_v1 = vunpack.c.l.b16 %v2967_v53  ;;  %v2991_v37 = vunpack.c.l.b16 %v2963_v52  ;;  %v10450_v52 = vld [vmem:[#allocation13_spill] sm:$0xff] }
 0x893   : > { %v2972_v17 = vand.u32 2147483647, %v2939_v59  ;;  %v2980_v61 = vand.u32 2147483647, %v2958_v27  ;;  %v3044_v27 = vpack.c.b16 %v3042_v23, %v3042_v23 }
 0x895   : > { %v2976_v41 = vpack.c.bf16 %v2972_v17, %v2972_v17  ;;  %v2984_v57 = vpack.c.bf16 %v2980_v61, %v2980_v61  ;;  %v3002_v17 = vunpack.c.l.b16 %v2966_v4 }
 0x897   : > { %v3016_v32 = vunpack.c.l.b16 %v2976_v41  ;;  %v3028_v8 = vunpack.c.l.b16 %v2984_v57  ;;  %v2920_v36 = vpop.f32.mrf.mxu3  ;;  %v2901_v59 = vpop.f32.mrf.mxu2  ;;  %v3005_v22 = vpack.c.b16 %v3002_v17, %v3001_v31  ;;  %v2961_v57 = vpack.c.bf16 %v9221_v10, %v9221_v10 }
 0x898   : > { %v2968_v9 = vpack.c.bf16 %v2920_v36, %v2920_v36  ;;  %v2964_v61 = vpack.c.bf16 %v2901_v59, %v2901_v59  ;;  %v3043_v10 = vpack.c.b16 %v3041_v51, %v3041_v51  ;;  %v3164_v17 = vpop.permute.xlu2 %3163 }
 0x899   : > { %v3018_v45 = vpack.c.b16 %v3016_v32, %v3015_v40  ;;  %v3030_v11 = vpack.c.b16 %v3028_v8, %v3027_v30  ;;  %v2989_v30 = vunpack.c.l.b16 %v2961_v57 }
 0x89a   : > { %v3004_v13 = vunpack.c.l.b16 %v2968_v9  ;;  %v2992_v41 = vunpack.c.l.b16 %v2964_v61 }
 0x89b   : > { %3049 = vmatpush.bf16.msra.mxu2 %v3018_v45  ;;  %3068 = vmatpush.bf16.msrb.mxu3 %v3030_v11  ;;  %v2993_v54 = vpack.c.b16 %v2990_v2, %v2989_v30 }
 0x89c   : > { %v3006_v58 = vpack.c.b16 %v3004_v13, %v3003_v1  ;;  %v2994_v40 = vpack.c.b16 %v2992_v41, %v2991_v37  ;;  %v3159_v1 = vld [vmem:[%s10255_s15] sm:$0x7] }
 0x89f   : > { %3050 = vmatpush.bf16.msra.mxu2 %v3017_v56  ;;  %3069 = vmatpush.bf16.msrb.mxu3 %v3029_v18 }
 0x8a2   : > { %6742 = vmatmul.msk.bf16.vlgmr.msrb.gmra.mxu3 %vm1802_vm7, %v3044_v27 }
 0x8a3   : > { %3115 = vmatpush.bf16.msra.mxu3 %v7745_v48  ;;  %3051 = vmatpush.bf16.msra.mxu2 %v3006_v58 }
 0x8a7   : > { %3116 = vmatpush.bf16.msra.mxu3 %v10415_v21  ;;  %3052 = vmatpush.bf16.msra.mxu2 %v3005_v22 }
 0x8ab   : > { %3117 = vmatpush.bf16.msra.mxu3 %v10416_v14  ;;  %3053 = vmatpush.bf16.msra.mxu2 %v2994_v40 }
 0x8af   : > { %3118 = vmatpush.bf16.msra.mxu3 %v10417_v20  ;;  %3054 = vmatpush.bf16.msra.mxu2 %v2993_v54 }
 0x8b3   : > { %3119 = vmatpush.bf16.msra.mxu3 %v10418_v15  ;;  %3055 = vmatpush.bf16.msra.mxu2 %v9210_v43 }
 0x8b7   : > { %3120 = vmatpush.bf16.msra.mxu3 %v10429_v50  ;;  %3056 = vmatpush.bf16.msra.mxu2 %v9197_v44 }
 0x8ba   : > { %3057 = vmatmul.bf16.vlgmr.msra.gmra.mxu2 %v3043_v10 }
 0x8bb   : > { %3102 = vmatpush.bf16.msrb.mxu2 %v10440_v63  ;;  %3121 = vmatpush.bf16.msra.mxu3 %v10430_v6 }
 0x8bf   : > { %3103 = vmatpush.bf16.msrb.mxu2 %v10441_v0  ;;  %3122 = vmatpush.bf16.msra.mxu3 %v10431_v3 }
 0x8c3   : > { %3279 = vmatpush.bf16.msrb.mxu3 %v7745_v48  ;;  %3104 = vmatpush.bf16.msrb.mxu2 %v10442_v33 }
 0x8c7   : > { %3280 = vmatpush.bf16.msrb.mxu3 %v10415_v21  ;;  %3105 = vmatpush.bf16.msrb.mxu2 %v10443_v5 }
 0x8cb   : > { %3281 = vmatpush.bf16.msrb.mxu3 %v10416_v14  ;;  %3106 = vmatpush.bf16.msrb.mxu2 %v10444_v47  ;;  %v3038_v14 = vpop.permute.xlu1 %3037 }
 0x8cf   : > { %3282 = vmatpush.bf16.msrb.mxu3 %v10417_v20  ;;  %3107 = vmatpush.bf16.msrb.mxu2 %v10445_v34 }
 0x8d3   : > { %3283 = vmatpush.bf16.msrb.mxu3 %v10418_v15  ;;  %3108 = vmatpush.bf16.msrb.mxu2 %v10446_v39 }
 0x8d7   : > { %3284 = vmatpush.bf16.msrb.mxu3 %v10429_v50  ;;  %3109 = vmatpush.bf16.msrb.mxu2 %v10447_v19 }
 0x8db   : > { %3266 = vmatpush.bf16.msra.mxu2 %v10440_v63  ;;  %3285 = vmatpush.bf16.msrb.mxu3 %v10430_v6 }
 0x8df   : > { %3267 = vmatpush.bf16.msra.mxu2 %v10441_v0  ;;  %3286 = vmatpush.bf16.msrb.mxu3 %v10431_v3 }
 0x8e3   : > { %3268 = vmatpush.bf16.msra.mxu2 %v10442_v33 }
 0x8e7   : > { %3269 = vmatpush.bf16.msra.mxu2 %v10443_v5 }
 0x8eb   : > { %3270 = vmatpush.bf16.msra.mxu2 %v10444_v47 }
 0x8ef   : > { %3271 = vmatpush.bf16.msra.mxu2 %v10445_v34 }
 0x8f3   : > { %3272 = vmatpush.bf16.msra.mxu2 %v10446_v39 }
 0x8f7   : > { %3273 = vmatpush.bf16.msra.mxu2 %v10447_v19 }
 0x925   : > { %v3071_v48 = vpop.f32.mrf.mxu3 }
 0x92d   : > { %v3073_v21 = vpop.f32.mrf.mxu3 }
 0x93d   : > { %v3058_v20 = vpop.f32.mrf.mxu2 }
 0x93e   : > { %v3059_v15 = vadd.f32 %v3058_v20, %v3038_v14 }
 0x940   : > { %v3072_v50 = vadd.f32 %v3071_v48, %v3059_v15 }
 0x942   : > { %v3075_v6 = vpack.c.bf16 %v3072_v50, %v3072_v50 }
 0x944   : > { %3084 = vmatmul.bf16.vlgmr.msra.gmra.mxu0 %v3075_v6  ;;  %3097 = vmatmul.bf16.vlgmr.msrb.gmra.mxu1 %v3075_v6 }
 0x945   : > { %3110 = vmatmul.bf16.vlgmr.msrb.gmra.mxu2 %v3075_v6  ;;  %3123 = vmatmul.bf16.vlgmr.msra.gmra.mxu3 %v3075_v6  ;;  %v3060_v3 = vpop.f32.mrf.mxu2 }
 0x9c1   : > { %v3085_v63 = vpop.f32.mrf.mxu0  ;;  %v3098_v0 = vpop.f32.mrf.mxu1 }
 0x9c2   : > { %v3129_v33 = vpack.c.bf16 %v3098_v0, %v3098_v0  ;;  %v3128_v5 = vpack.c.bf16 %v3085_v63, %v3085_v63  ;;  %v4210_v63 = vld [vmem:[%s10246_s6] sm:$0xff]  ;;  %v4213_v0 = vld [vmem:[%s10246_s6 + $0x18] sm:$0xff] }
 0x9c4   : > { %v3139_v39 = vunpack.c.l.b16 %v3129_v33  ;;  %v3135_v8 = vunpack.c.l.b16 %v3128_v5 }
 0x9c6   : > { %v3140_v42 = vpack.c.b16 %v3139_v39, %v3139_v39  ;;  %v3136_v45 = vpack.c.b16 %v3135_v8, %v3135_v8 }
 0x9c8   : > { %v3111_v47 = vpop.f32.mrf.mxu2  ;;  %v3124_v34 = vpop.f32.mrf.mxu3  ;;  %v3141_v7 = vrot.slane %v3140_v42, 2  ;;  %v3137_v4 = vrot.slane %v3136_v45, 5 }
 0x9c9   : > { %v3130_v19 = vand.u32 2147483647, %v3111_v47  ;;  %v3132_v44 = vand.u32 2147483647, %v3124_v34  ;;  %v3087_v43 = vpop.f32.mrf.mxu0  ;;  %v3100_v32 = vpop.f32.mrf.mxu1 }
 0x9ca   : > { %v3151_v27 = vsel %vm1356_vm3, %v3075_v6, %v3137_v4 }
 0x9cb   : > { %v3131_v36 = vpack.c.bf16 %v3130_v19, %v3130_v19  ;;  %v3133_v35 = vpack.c.bf16 %v3132_v44, %v3132_v44  ;;  %v3153_v16 = vsel %vm1360_vm4, %v3151_v27, %v3141_v7  ;;  %v7263_v27 = vld [vmem:[%s9310_s29 + $0x68] sm:$0xff] }
 0x9cd   : > { %v3143_v46 = vunpack.c.l.b16 %v3131_v36  ;;  %v3147_v11 = vunpack.c.l.b16 %v3133_v35 }
 0x9cf   : > { %v3144_v9 = vpack.c.b16 %v3143_v46, %v3143_v46  ;;  %v3148_v13 = vpack.c.b16 %v3147_v11, %v3147_v11 }
 0x9d0   : > { %v3113_v23 = vpop.f32.mrf.mxu2  ;;  %v3126_v55 = vpop.f32.mrf.mxu3 }
 0x9d1   : > { %v3145_v53 = vrot.slane %v3144_v9, 7  ;;  %v7265_v55 = vld [vmem:[%s9310_s29 + $0x78] sm:$0xff] }
 0x9d2   : > { %3438 = vmatpush.bf16.msrb.mxu1 %v7265_v55 }
 0x9d3   : > { %v3156_v56 = vsel %vm1364_vm0, %v3141_v7, %v3145_v53  ;;  %v7256_v7 = vld [vmem:[%s9310_s29 + $0x30] sm:$0xff] }
 0x9d4   : > { %v3158_v18 = vsel %vm1367_vm1, %v3156_v56, %v3148_v13  ;;  %v7264_v53 = vld [vmem:[%s9310_s29 + $0x70] sm:$0xff]  ;;  %v6990_v56 = vld [vmem:[#allocation2 + $0xe0] sm:$0xf] }
 0x9d5   : > { %v3169_v59 = vsel %vm1415_vm2, %v3158_v18, 0  ;;  %v7296_v18 = vld [vmem:[#allocation2 + $0xec] sm:$0xf0] }
 0x9d6   : > { %3177 = vmatpush.bf16.msrb.mxu0 %v3169_v59  ;;  %v7255_v59 = vld [vmem:[%s9310_s29 + $0x28] sm:$0xff]  ;;  %3439 = vmatpush.bf16.msrb.mxu1 %v7264_v53  ;;  %v6984_v53 = vld [vmem:[#allocation2 + $0xd8] sm:$0xf0] }
 0x9da   : > { %3178 = vmatpush.bf16.msrb.mxu0 %v3153_v16  ;;  %v9318_v16 = vor.u32 %v7296_v18, %v6990_v56  ;;  %3440 = vmatpush.bf16.msrb.mxu1 %v7263_v27  ;;  %v7286_v18 = vld [vmem:[#allocation2 + $0xa4] sm:$0xf]  ;;  %v7287_v27 = vld [vmem:[#allocation2 + $0xac] sm:$0xf] }
 0x9dc   : > { %4123 = vmatpush.bf16.msra.mxu3 %v9318_v16 }
 0x9dd   : > { %6743 = vmatmul.msk.bf16.vlgmr.msrb.gmra.mxu0 %vm1408_vm5, %v3159_v1  ;;  %v6974_v1 = vld [vmem:[#allocation2 + $0xc0] sm:$0xf] }
 0x9de   : > { %3240 = vmatpush.bf16.msra.mxu0 %v7878_v49 }
 0x9e2   : > { %3241 = vmatpush.bf16.msra.mxu0 %v8000_v29 }
 0x9e6   : > { %3242 = vmatpush.bf16.msra.mxu0 %v8122_v24 }
 0x9ea   : > { %3243 = vmatpush.bf16.msra.mxu0 %v8224_v62 }
 0x9ee   : > { %3244 = vmatpush.bf16.msra.mxu0 %v10425_v60 }
 0x9f2   : > { %3245 = vmatpush.bf16.msra.mxu0 %v10426_v26 }
 0x9f6   : > { %3246 = vmatpush.bf16.msra.mxu0 %v10427_v38 }
 0x9fa   : > { %3247 = vmatpush.bf16.msra.mxu0 %v10428_v25 }
 0xa5a   : > { %v3180_v61 = vpop.f32.mrf.mxu0 }
 0xa5b   : > { %v3181_v58 = vadd.f32 %v3180_v61, %v3164_v17  ;;  %v7292_v17 = vld [vmem:[#allocation2 + $0xcc] sm:$0xf0] }
 0xa5d   : > { %vm3184_vm14 = vcmp.ge.f32.partialorder %v3181_v58, 0.0  ;;  %v3185_v49 = vmul.f32 0.0, %v3181_v58 }
 0xa5f   : > { %v3186_v31 = vsel %vm3184_vm14, %v3181_v58, %v3185_v49  ;;  %v9321_v58 = vor.u32 %v7292_v17, %v6974_v1  ;;  %v6968_v1 = vld [vmem:[#allocation2 + $0xb8] sm:$0xf0] }
 0xa60   : > { %v3187_v29 = vmul.f32 %v10450_v52, %v3186_v31 }
 0xa61   : > { %4124 = vmatpush.bf16.msra.mxu3 %v9321_v58 }
 0xa62   : > { %v3182_v28 = vpop.f32.mrf.mxu0  ;;  %v3188_v24 = vsel %vm1360_vm4, %v3187_v29, 0.0  ;;  %v3191_v62 = vmul.f32 %v3187_v29, %v3186_v31  ;;  %v6958_v29 = vld [vmem:[#allocation2 + $0xa0] sm:$0xf] }
 0xa63   : > { %3189 = vadd.xlane.f32.xlu0 %v3188_v24  ;;  %v7288_v28 = vld [vmem:[#allocation2 + $0xac] sm:$0xf0] }
 0xa64   : > { %v3192_v60 = vsel %vm1360_vm4, %v3191_v62, 0.0 }
 0xa6b   : > { %3193 = vadd.xlane.f32.xlu0 %v3192_v60 }
 0xad6   : > { %v3190_v26 = vpop.xlane.xlu0 %3189 }
 0xad7   : > { %v3195_v38 = vmul.f32 %v3190_v26, %v10449_v12 }
 0xad9   : > { %v3197_v41 = vmul.f32 %v3195_v38, %v3195_v38  ;;  %v3200_v21 = vsub.f32 %v3186_v31, %v3195_v38  ;;  %v7254_v31 = vld [vmem:[%s9310_s29 + $0x20] sm:$0xff] }
 0xade   : > { %v3194_v25 = vpop.xlane.xlu0 %3193 }
 0xadf   : > { %v3196_v22 = vmul.f32 %v3194_v25, %v10449_v12 }
 0xae1   : > { %v3198_v57 = vsub.f32 %v3196_v22, %v3197_v41  ;;  %v9326_v22 = vor.u32 %v7288_v28, %v6958_v29  ;;  %v6942_v29 = vld [vmem:[#allocation2 + $0x80] sm:$0xf]  ;;  %v7284_v28 = vld [vmem:[#allocation2 + $0x8c] sm:$0xf0] }
 0xae3   : > { %v3199_v37 = vmax.f32 %v3198_v57, 0.0  ;;  %10452 = vst [vmem:[#allocation19_spill] sm:$0xff] %v9326_v22  ;;  %4125 = vmatpush.bf16.msra.mxu3 %v9326_v22 }
 0xae5   : > { %v3201_v2 = vadd.f32 1e-05, %v3199_v37 }
 0xae7   : > { %7386 = vrsqrt.f32 %v3201_v2  ;;  %vm3208_vm6 = vweird.f32 %v3201_v2 }
 0xaed   : > { %v7387_v40 = vpop.eup %7386 }
 0xaee   : > { %v3203_v30 = vmul.f32 %v7387_v40, %v3201_v2  ;;  %vm3209_vm15 = vweird.f32 %v7387_v40 }
 0xaef   : > { %vm3210_vm8 = vmor %vm3208_vm6, %vm3209_vm15 }
 0xaf0   : > { %v3204_v54 = vmul.f32 %v7387_v40, %v3203_v30  ;;  %v7261_v30 = vld [vmem:[%s9310_s29 + $0x58] sm:$0xff] }
 0xaf2   : > { %v3205_v51 = vmul.f32 0.5, %v3204_v54 }
 0xaf4   : > { %v3206_v10 = vsub.f32 1.5, %v3205_v51 }
 0xaf6   : > { %v3207_v48 = vmul.f32 %v7387_v40, %v3206_v10 }
 0xaf8   : > { %v3211_v14 = vsel %vm3210_vm8, %v7387_v40, %v3207_v48  ;;  %v7253_v40 = vld [vmem:[%s9310_s29 + $0x18] sm:$0xff] }
 0xaf9   : > { %v3212_v20 = vmul.f32 %v3211_v14, %v3200_v21  ;;  %v7252_v14 = vld [vmem:[%s9310_s29 + $0x10] sm:$0xff] }
 0xafb   : > { %v3213_v15 = vmul.f32 %v10450_v52, %v3212_v20  ;;  %v7262_v52 = vld [vmem:[%s9310_s29 + $0x60] sm:$0xff] }
 0xafc   : > { %3441 = vmatpush.bf16.msrb.mxu1 %v7262_v52 }
 0xafd   : > { %v3214_v50 = vsel %vm1360_vm4, %v3213_v15, 0.0  ;;  %v3217_v6 = vmul.f32 %v3213_v15, %v3212_v20 }
 0xafe   : > { %3215 = vadd.xlane.f32.xlu0 %v3214_v50 }
 0xaff   : > { %v3218_v3 = vsel %vm1360_vm4, %v3217_v6, 0.0 }
 0xb00   : > { %3219 = vadd.xlane.f32.xlu1 %v3218_v3  ;;  %3442 = vmatpush.bf16.msrb.mxu1 %v7261_v30  ;;  %v7280_v30 = vld [vmem:[#allocation2 + $0x6c] sm:$0xf0] }
 0xb12   : > { %4216 = vperm.xlu0 %7349, %v4210_v63  }
 0xb1a   : > { %4231 = vperm.xlu0 %7349, %v4213_v0  }
 0xb71   : > { %v3216_v33 = vpop.xlane.xlu0 %3215 }
 0xb72   : > { %v3221_v5 = vmul.f32 %v3216_v33, %v10449_v12 }
 0xb73   : > { %v3220_v47 = vpop.xlane.xlu1 %3219 }
 0xb74   : > { %v3223_v34 = vmul.f32 %v3221_v5, %v3221_v5  ;;  %v3222_v39 = vmul.f32 %v3220_v47, %v10449_v12  ;;  %v3226_v45 = vsub.f32 %v3212_v20, %v3221_v5  ;;  %v7257_v12 = vld [vmem:[%s9310_s29 + $0x38] sm:$0xff]  ;;  %v7260_v20 = vld [vmem:[%s9310_s29 + $0x50] sm:$0xff]  ;;  %v7251_v5 = vld [vmem:[%s9310_s29 + $0x8] sm:$0xff] }
 0xb75   : > { %3499 = vmatpush.bf16.msrb.mxu2 %v7257_v12  ;;  %3443 = vmatpush.bf16.msrb.mxu1 %v7260_v20  ;;  %v7259_v47 = vld [vmem:[%s9310_s29 + $0x48] sm:$0xff]  ;;  %v7258_v12 = vld [vmem:[%s9310_s29 + $0x40] sm:$0xff] }
 0xb76   : > { %v3224_v19 = vsub.f32 %v3222_v39, %v3223_v34  ;;  %v7294_v39 = vld [vmem:[#allocation2 + $0xe4] sm:$0xf] }
 0xb78   : > { %v3225_v44 = vmax.f32 %v3224_v19, 0.0  ;;  %v6992_v19 = vld [vmem:[#allocation2 + $0xf0] sm:$0xf0] }
 0xb79   : > { %3500 = vmatpush.bf16.msrb.mxu2 %v7256_v7  ;;  %3444 = vmatpush.bf16.msrb.mxu1 %v7259_v47  ;;  %v7291_v7 = vld [vmem:[#allocation2 + $0xcc] sm:$0xf] }
 0xb7a   : > { %v3227_v43 = vadd.f32 1e-05, %v3225_v44  ;;  %v9356_v56 = vor.u32 %v7291_v7, %v6984_v53  ;;  %v7275_v47 = vld [vmem:[#allocation2 + $0x4c] sm:$0xf]  ;;  %v6918_v7 = vld [vmem:[#allocation2 + $0x48] sm:$0xf] }
 0xb7b   : > { %v7277_v53 = vld [vmem:[#allocation2 + $0x54] sm:$0xf0] }
 0xb7c   : > { %7388 = vrsqrt.f32 %v3227_v43  ;;  %vm3234_vm10 = vweird.f32 %v3227_v43 }
 0xb7d   : > { %3501 = vmatpush.bf16.msrb.mxu2 %v7255_v59  ;;  %3445 = vmatpush.bf16.msrb.mxu1 %v7258_v12  ;;  %v6960_v59 = vld [vmem:[#allocation2 + $0xb0] sm:$0xf0] }
 0xb7e   : > { %v9361_v17 = vor.u32 %v7286_v18, %v6960_v59  ;;  %v9414_v18 = vor.u32 %v7277_v53, %v6918_v7  ;;  %v6878_v59 = vld [vmem:[#allocation2] sm:$0xf] }
 0xb80   : > { %10456 = vst [vmem:[#allocation32_spill] sm:$0xff] %v9361_v17 }
 0xb81   : > { %3502 = vmatpush.bf16.msrb.mxu2 %v7254_v31  ;;  %v7293_v31 = vld [vmem:[#allocation2 + $0xd4] sm:$0xf0]  ;;  %10471 = vst [vmem:[#allocation15_spill] sm:$0xff] %v9414_v18 }
 0xb82   : > { %v7389_v32 = vpop.eup %7388 }
 0xb83   : > { %v3229_v8 = vmul.f32 %v7389_v32, %v3227_v43  ;;  %vm3235_vm9 = vweird.f32 %v7389_v32  ;;  %v7295_v43 = vld [vmem:[#allocation2 + $0xec] sm:$0xf] }
 0xb84   : > { %vm3236_vm11 = vmor %vm3234_vm10, %vm3235_vm9 }
 0xb85   : > { %v3230_v36 = vmul.f32 %v7389_v32, %v3229_v8  ;;  %3503 = vmatpush.bf16.msrb.mxu2 %v7253_v40  ;;  %v6926_v40 = vld [vmem:[#allocation2 + $0x60] sm:$0xf] }
 0xb87   : > { %v3231_v35 = vmul.f32 0.5, %v3230_v36  ;;  %v6998_v36 = vld [vmem:[#allocation2 + $0xe8] sm:$0xf] }
 0xb89   : > { %v3232_v42 = vsub.f32 1.5, %v3231_v35  ;;  %3504 = vmatpush.bf16.msrb.mxu2 %v7252_v14  ;;  %v7297_v35 = vld [vmem:[#allocation2 + $0xf4] sm:$0xf0]  ;;  %v6936_v14 = vld [vmem:[#allocation2 + $0x78] sm:$0xf0] }
 0xb8b   : > { %v3233_v46 = vmul.f32 %v7389_v32, %v3232_v42  ;;  %v7250_v42 = vld [vmem:[%s9310_s29] sm:$0xff] }
 0xb8d   : > { %v3237_v11 = vsel %vm3236_vm11, %v7389_v32, %v3233_v46  ;;  %v7000_v32 = vld [vmem:[#allocation2 + $0xf8] sm:$0xf0]  ;;  %3505 = vmatpush.bf16.msrb.mxu2 %v7251_v5  ;;  %v9341_v46 = vor.u32 %v7294_v39, %v6992_v19  ;;  %v6912_v5 = vld [vmem:[#allocation2 + $0x50] sm:$0xf0] }
 0xb8e   : > { %v3238_v9 = vmul.f32 %v3237_v11, %v3226_v45  ;;  %v9343_v45 = vor.u32 %v7295_v43, %v7000_v32  ;;  %v7290_v11 = vld [vmem:[#allocation2 + $0xc4] sm:$0xf]  ;;  %v6920_v39 = vld [vmem:[#allocation2 + $0x58] sm:$0xf0]  ;;  %v7281_v43 = vld [vmem:[#allocation2 + $0x74] sm:$0xf0] }
 0xb8f   : > { %10453 = vst [vmem:[#allocation23_spill] sm:$0xff] %v9341_v46  ;;  %v9400_v19 = vor.u32 %v7275_v47, %v6920_v39 }
 0xb90   : > { %v9300_v23 = vpack.c.bf16 %v3238_v9, %v3238_v9  ;;  %v6976_v9 = vld [vmem:[#allocation2 + $0xd0] sm:$0xf0] }
 0xb91   : > { %3506 = vmatpush.bf16.msrb.mxu2 %v7250_v42  ;;  %10466 = vst [vmem:[#allocation24_spill] sm:$0xff] %v9400_v19  ;;  %v7270_v42 = vld [vmem:[#allocation2 + $0x24] sm:$0xf] }
 0xb92   : > { %3248 = vmatmul.bf16.vlgmr.msra.gmra.mxu0 %v9300_v23  ;;  %3261 = vmatmul.bf16.vlgmr.msra.gmra.mxu1 %v9300_v23 }
 0xb93   : > { %3274 = vmatmul.bf16.vlgmr.msra.gmra.mxu2 %v9300_v23  ;;  %3287 = vmatmul.bf16.vlgmr.msrb.gmra.mxu3 %v9300_v23 }
 0xb95   : > { %4162 = vmatpush.bf16.msra.mxu2 %v9343_v45 }
 0xb99   : > { %4163 = vmatpush.bf16.msra.mxu2 %v9356_v56 }
 0xc0f   : > { %v3249_v4 = vpop.f32.mrf.mxu0  ;;  %v3262_v13 = vpop.f32.mrf.mxu1 }
 0xc10   : > { %v3293_v61 = vpack.c.bf16 %v3262_v13, %v3262_v13  ;;  %v3292_v49 = vpack.c.bf16 %v3249_v4, %v3249_v4  ;;  %v9347_v4 = vor.u32 %v7297_v35, %v6998_v36  ;;  %v9353_v13 = vor.u32 %v7290_v11, %v6976_v9  ;;  %v7272_v36 = vld [vmem:[#allocation2 + $0x2c] sm:$0xf0]  ;;  %v6896_v11 = vld [vmem:[#allocation2 + $0x30] sm:$0xf0]  ;;  %v7271_v9 = vld [vmem:[#allocation2 + $0x2c] sm:$0xf] }
 0xc11   : > { %v9409_v12 = vor.u32 %v7270_v42, %v6896_v11 }
 0xc12   : > { %v3303_v60 = vunpack.c.l.b16 %v3293_v61  ;;  %v3299_v57 = vunpack.c.l.b16 %v3292_v49  ;;  %10454 = vst [vmem:[#allocation27_spill] sm:$0xff] %v9347_v4  ;;  %4149 = vmatpush.bf16.msra.mxu1 %v9347_v4  ;;  %v9364_v61 = vor.u32 %v7287_v27, %v6968_v1  ;;  %v6982_v49 = vld [vmem:[#allocation2 + $0xc8] sm:$0xf]  ;;  %v7268_v27 = vld [vmem:[#allocation2 + $0xc] sm:$0xf0] }
 0xc13   : > { %10455 = vst [vmem:[#allocation31_spill] sm:$0xff] %v9353_v13  ;;  %v9368_v52 = vor.u32 %v7293_v31, %v6982_v49  ;;  %v7266_v1 = vld [vmem:[#allocation2 + $0x4] sm:$0xf]  ;;  %v9417_v49 = vor.u32 %v7268_v27, %v6878_v59  ;;  %v6880_v31 = vld [vmem:[#allocation2 + $0x10] sm:$0xf0] }
 0xc14   : > { %v3304_v54 = vpack.c.b16 %v3303_v60, %v3303_v60  ;;  %v3300_v10 = vpack.c.b16 %v3299_v57, %v3299_v57  ;;  %4164 = vmatpush.bf16.msra.mxu2 %v9364_v61  ;;  %v6944_v60 = vld [vmem:[#allocation2 + $0x90] sm:$0xf0]  ;;  %v6966_v57 = vld [vmem:[#allocation2 + $0xa8] sm:$0xf]  ;;  %10469 = vst [vmem:[#allocation9_spill] sm:$0xff] %v9409_v12 }
 0xc15   : > { %10457 = vst [vmem:[#allocation22_spill] sm:$0xff] %v9368_v52 }
 0xc16   : > { %v3275_v24 = vpop.f32.mrf.mxu2  ;;  %v3288_v62 = vpop.f32.mrf.mxu3  ;;  %v3305_v6 = vrot.slane %v3304_v54, 2  ;;  %v3301_v63 = vrot.slane %v3300_v10, 5  ;;  %4150 = vmatpush.bf16.msra.mxu1 %v9368_v52  ;;  %v9382_v54 = vor.u32 %v7280_v30, %v6926_v40  ;;  %v6928_v10 = vld [vmem:[#allocation2 + $0x70] sm:$0xf0]  ;;  %10472 = vst [vmem:[#allocation18_spill] sm:$0xff] %v9417_v49 }
 0xc17   : > { %v3294_v26 = vand.u32 2147483647, %v3275_v24  ;;  %v3296_v38 = vand.u32 2147483647, %v3288_v62  ;;  %v3251_v25 = vpop.f32.mrf.mxu0  ;;  %v3264_v41 = vpop.f32.mrf.mxu1  ;;  %v9370_v24 = vor.u32 %v7284_v28, %v6942_v29  ;;  %v7282_v62 = vld [vmem:[#allocation2 + $0x84] sm:$0xf] }
 0xc18   : > { %v3315_v8 = vsel %vm1356_vm3, %v9300_v23, %v3301_v63  ;;  %v3323_v23 = vld [vmem:[%s10257_s17] sm:$0x7]  ;;  %v6952_v25 = vld [vmem:[#allocation2 + $0x98] sm:$0xf0]  ;;  %10461 = vst [vmem:[#allocation8_spill] sm:$0xff] %v9382_v54 }
 0xc19   : > { %v3295_v37 = vpack.c.bf16 %v3294_v26, %v3294_v26  ;;  %v3297_v2 = vpack.c.bf16 %v3296_v38, %v3296_v38  ;;  %v3317_v55 = vsel %vm1360_vm4, %v3315_v8, %v3305_v6  ;;  %10458 = vst [vmem:[#allocation26_spill] sm:$0xff] %v9370_v24  ;;  %v7283_v26 = vld [vmem:[#allocation2 + $0x8c] sm:$0xf]  ;;  %v9373_v38 = vor.u32 %v7282_v62, %v6944_v60  ;;  %v7276_v63 = vld [vmem:[#allocation2 + $0x4c] sm:$0xf0] }
 0xc1a   : > { %4126 = vmatpush.bf16.msra.mxu3 %v9370_v24  ;;  %v9376_v41 = vor.u32 %v7283_v26, %v6952_v25  ;;  %v6894_v8 = vld [vmem:[#allocation2 + $0x20] sm:$0xf]  ;;  %v7267_v29 = vld [vmem:[#allocation2 + $0xc] sm:$0xf]  ;;  %v6888_v28 = vld [vmem:[#allocation2 + $0x18] sm:$0xf0]  ;;  %v9420_v62 = vor.u32 %v7266_v1, %v6880_v31 }
 0xc1b   : > { %v3307_v51 = vunpack.c.l.b16 %v3295_v37  ;;  %v3311_v48 = vunpack.c.l.b16 %v3297_v2  ;;  %10459 = vst [vmem:[#allocation30_spill] sm:$0xff] %v9373_v38  ;;  %v7289_v37 = vld [vmem:[#allocation2 + $0xb4] sm:$0xf0]  ;;  %v9406_v35 = vor.u32 %v7272_v36, %v6894_v8  ;;  %v9422_v60 = vor.u32 %v7267_v29, %v6888_v28  ;;  %v6875_v26 = vld [vmem:[%s8474_s30 + $0x8] sm:$0x3f] }
 0xc1c   : > { %v9379_v2 = vor.u32 %v7289_v37, %v6966_v57  ;;  %4165 = vmatpush.bf16.msra.mxu2 %v9376_v41  ;;  %10473 = vst [vmem:[#allocation21_spill] sm:$0xff] %v9420_v62  ;;  %v6902_v25 = vld [vmem:[#allocation2 + $0x28] sm:$0xf]  ;;  %v7273_v57 = vld [vmem:[#allocation2 + $0x34] sm:$0xf0]  ;;  %v9426_v37 = vpack.c.bf16 %v6875_v26, %v6875_v26 }
 0xc1d   : > { %v3308_v21 = vpack.c.b16 %v3307_v51, %v3307_v51  ;;  %v3312_v0 = vpack.c.b16 %v3311_v48, %v3311_v48  ;;  %v7278_v51 = vld [vmem:[#allocation2 + $0x64] sm:$0xf]  ;;  %v7279_v48 = vld [vmem:[#allocation2 + $0x6c] sm:$0xf]  ;;  %10468 = vst [vmem:[#allocation7_spill] sm:$0xff] %v9406_v35  ;;  %v9428_v40 = vor.u32 %v7273_v57, %v6902_v25 }
 0xc1e   : > { %v3277_v15 = vpop.f32.mrf.mxu2  ;;  %v3290_v50 = vpop.f32.mrf.mxu3  ;;  %10460 = vst [vmem:[#allocation6_spill] sm:$0xff] %v9379_v2  ;;  %4151 = vmatpush.bf16.msra.mxu1 %v9379_v2  ;;  %4127 = vmatpush.bf16.msra.mxu3 %v9382_v54  ;;  %v9388_v20 = vor.u32 %v7279_v48, %v6936_v14  ;;  %v6886_v30 = vld [vmem:[#allocation2 + $0x8] sm:$0xf] }
 0xc1f   : > { %v3309_v3 = vrot.slane %v3308_v21, 7  ;;  %v9385_v21 = vor.u32 %v7278_v51, %v6928_v10  ;;  %v6950_v15 = vld [vmem:[#allocation2 + $0x88] sm:$0xf]  ;;  %v7285_v50 = vld [vmem:[#allocation2 + $0x94] sm:$0xf0]  ;;  %10474 = vst [vmem:[#allocation25_spill] sm:$0xff] %v9422_v60  ;;  %v3328_v48 = vpop.permute.xlu2 %3327 }
 0xc20   : > { %4166 = vmatpush.bf16.msra.mxu2 %v9388_v20  ;;  %10475 = vst [vmem:[#allocation29_spill] sm:$0xff] %v9428_v40  ;;  %v7269_v51 = vld [vmem:[#allocation2 + $0x14] sm:$0xf0] }
 0xc21   : > { %v3320_v33 = vsel %vm1364_vm0, %v3305_v6, %v3309_v3  ;;  %10462 = vst [vmem:[#allocation11_spill] sm:$0xff] %v9385_v21  ;;  %v9391_v6 = vor.u32 %v7285_v50, %v6950_v15  ;;  %v6910_v3 = vld [vmem:[#allocation2 + $0x40] sm:$0xf]  ;;  %v9437_v10 = vor.u32 %v7269_v51, %v6886_v30 }
 0xc22   : > { %v3322_v34 = vsel %vm1367_vm1, %v3320_v33, %v3312_v0  ;;  %v9394_v0 = vor.u32 %v7276_v63, %v6910_v3  ;;  %v7274_v33 = vld [vmem:[#allocation2 + $0x44] sm:$0xf] }
 0xc23   : > { %v3333_v44 = vsel %vm1415_vm2, %v3322_v34, 0  ;;  %10463 = vst [vmem:[#allocation14_spill] sm:$0xff] %v9391_v6  ;;  %4152 = vmatpush.bf16.msra.mxu1 %v9391_v6  ;;  %v9397_v34 = vor.u32 %v7274_v33, %v6912_v5 }
 0xc24   : > { %3341 = vmatpush.bf16.msrb.mxu0 %v3333_v44  ;;  %10464 = vst [vmem:[#allocation17_spill] sm:$0xff] %v9394_v0  ;;  %4128 = vmatpush.bf16.msra.mxu3 %v9394_v0  ;;  %v6934_v44 = vld [vmem:[#allocation2 + $0x68] sm:$0xf] }
 0xc25   : > { %10465 = vst [vmem:[#allocation20_spill] sm:$0xff] %v9397_v34  ;;  %v9403_v32 = vor.u32 %v7281_v43, %v6934_v44  ;;  %4167 = vmatpush.bf16.msra.mxu2 %v9400_v19 }
 0xc26   : > { %10476 = vst [vmem:[#allocation16_spill] sm:$0xff] %v9437_v10 }
 0xc27   : > { %10467 = vst [vmem:[#allocation28_spill] sm:$0xff] %v9403_v32  ;;  %4153 = vmatpush.bf16.msra.mxu1 %v9403_v32 }
 0xc28   : > { %3342 = vmatpush.bf16.msrb.mxu0 %v3317_v55  ;;  %v6904_v55 = vld [vmem:[#allocation2 + $0x38] sm:$0xf0]  ;;  %4129 = vmatpush.bf16.msra.mxu3 %v9406_v35 }
 0xc2b   : > { %6744 = vmatmul.msk.bf16.vlgmr.msrb.gmra.mxu0 %vm1408_vm5, %v3323_v23  ;;  %v9412_v23 = vor.u32 %v7271_v9, %v6904_v55  ;;  %4154 = vmatpush.bf16.msra.mxu1 %v9414_v18  ;;  %v3512_v9 = vld [vmem:[%s9485_s22] sm:$0x7] }
 0xc2c   : > { %4136 = vmatpush.bf16.msra.mxu0 %v9341_v46  ;;  %4130 = vmatpush.bf16.msra.mxu3 %v9417_v49 }
 0xc2d   : > { %10470 = vst [vmem:[#allocation12_spill] sm:$0xff] %v9412_v23  ;;  %4168 = vmatpush.bf16.msra.mxu2 %v9412_v23 }
 0xc2f   : > { %4131 = vmatmul.bf16.vlgmr.msra.gmra.mxu3 %v9426_v37  ;;  %4155 = vmatpush.bf16.msra.mxu1 %v9428_v40 }
 0xc30   : > { %4137 = vmatpush.bf16.msra.mxu0 %v9353_v13 }
 0xc31   : > { %4169 = vmatpush.bf16.msra.mxu2 %v9422_v60 }
 0xc33   : > { %4156 = vmatpush.bf16.msra.mxu1 %v9437_v10 }
 0xc34   : > { %4138 = vmatpush.bf16.msra.mxu0 %v9361_v17 }
 0xc38   : > { %4139 = vmatpush.bf16.msra.mxu0 %v9373_v38 }
 0xc3c   : > { %4140 = vmatpush.bf16.msra.mxu0 %v9385_v21 }
 0xc40   : > { %4141 = vmatpush.bf16.msra.mxu0 %v9397_v34 }
 0xc44   : > { %4142 = vmatpush.bf16.msra.mxu0 %v9409_v12 }
 0xc48   : > { %4143 = vmatpush.bf16.msra.mxu0 %v9420_v62 }
 0xc4b   : > { %4144 = vmatmul.bf16.vlgmr.msra.gmra.mxu0 %v9426_v37 }
 0xc4c   : > { %4396 = vmatpush.bf16.msrb.mxu0 %v9318_v16 }
 0xc50   : > { %4397 = vmatpush.bf16.msrb.mxu0 %v9321_v58 }
 0xc54   : > { %4398 = vmatpush.bf16.msrb.mxu0 %v9326_v22 }
 0xc58   : > { %4399 = vmatpush.bf16.msrb.mxu0 %v9370_v24 }
 0xc5c   : > { %4400 = vmatpush.bf16.msrb.mxu0 %v9382_v54 }
 0xc60   : > { %4401 = vmatpush.bf16.msrb.mxu0 %v9394_v0 }
 0xc64   : > { %4402 = vmatpush.bf16.msrb.mxu0 %v9406_v35 }
 0xc68   : > { %4403 = vmatpush.bf16.msrb.mxu0 %v9417_v49 }
 0xca8   : > { %v3344_v14 = vpop.f32.mrf.mxu0 }
 0xca9   : > { %v3345_v15 = vadd.f32 %v3344_v14, %v3328_v48 }
 0xcab   : > { %v3348_v50 = vpack.c.bf16 %v3345_v15, %v3345_v15 }
 0xcad   : > { %v3382_v3 = vshrl.u32 %v3348_v50, 16  ;;  %v3385_v63 = vshll.u32 %v3348_v50, 16  ;;  %3507 = vmatmul.bf16.vlgmr.msrb.gmra.mxu2 %v3348_v50 }
 0xcae   : > { %4453 = vmatpush.bf16.msrb.mxu2 %v9343_v45 }
 0xcaf   : > { %v3384_v33 = vrot.slane %v3382_v3, 1  ;;  %v3387_v5 = vrot.slane %v3385_v63, 2 }
 0xcb0   : > { %v3346_v47 = vpop.f32.mrf.mxu0 }
 0xcb1   : > { %v3388_v39 = vor.u32 %v3387_v5, %v3384_v33 }
 0xcb2   : > { %4454 = vmatpush.bf16.msrb.mxu2 %v9356_v56  ;;  %v4132_v43 = vpop.f32.mrf.mxu3 }
 0xcb3   : > { %3446 = vmatmul.bf16.vlgmr.msrb.gmra.mxu1 %v3388_v39  ;;  %v4175_v1 = vpack.c.bf16 %v4132_v43, %v4132_v43 }
 0xcb4   : > { %4434 = vmatpush.bf16.msrb.mxu1 %v9347_v4 }
 0xcb5   : > { %v4182_v57 = vunpack.c.l.b16 %v4175_v1 }
 0xcb6   : > { %4455 = vmatpush.bf16.msrb.mxu2 %v9364_v61 }
 0xcb7   : > { %v4183_v50 = vpack.c.b16 %v4182_v57, %v4182_v57 }
 0xcb8   : > { %4435 = vmatpush.bf16.msrb.mxu1 %v9368_v52 }
 0xcba   : > { %4456 = vmatpush.bf16.msrb.mxu2 %v9376_v41  ;;  %v4134_v36 = vpop.f32.mrf.mxu3 }
 0xcbc   : > { %4436 = vmatpush.bf16.msrb.mxu1 %v9379_v2 }
 0xcbd   : > { %4170 = vmatmul.bf16.vlgmr.msra.gmra.mxu2 %v9426_v37 }
 0xcbe   : > { %4457 = vmatpush.bf16.msrb.mxu2 %v9388_v20 }
 0xcc0   : > { %4437 = vmatpush.bf16.msrb.mxu1 %v9391_v6 }
 0xcc2   : > { %4458 = vmatpush.bf16.msrb.mxu2 %v9400_v19 }
 0xcc3   : > { %4157 = vmatmul.bf16.vlgmr.msra.gmra.mxu1 %v9426_v37 }
 0xcc4   : > { %4438 = vmatpush.bf16.msrb.mxu1 %v9403_v32 }
 0xcc6   : > { %4459 = vmatpush.bf16.msrb.mxu2 %v9412_v23 }
 0xcc8   : > { %4439 = vmatpush.bf16.msrb.mxu1 %v9414_v18  ;;  %v4145_v44 = vpop.f32.mrf.mxu0 }
 0xcc9   : > { %v4176_v27 = vpack.c.bf16 %v4145_v44, %v4145_v44  ;;  %v4184_v44 = vrot.slane %v4183_v50, 5 }
 0xcca   : > { %4460 = vmatpush.bf16.msrb.mxu2 %v9422_v60 }
 0xccb   : > { %v4186_v31 = vunpack.c.l.b16 %v4176_v27 }
 0xccc   : > { %4440 = vmatpush.bf16.msrb.mxu1 %v9428_v40 }
 0xccd   : > { %v4187_v30 = vpack.c.b16 %v4186_v31, %v4186_v31  ;;  %v10479_v31 = vmov 0.0  }
 0xcce   : > { %4983 = vmatpush.bf16.msra.mxu2 %v9341_v46 }
 0xccf   : > { %v4188_v3 = vrot.slane %v4187_v30, 2 }
 0xcd0   : > { %4441 = vmatpush.bf16.msrb.mxu1 %v9437_v10  ;;  %v4147_v8 = vpop.f32.mrf.mxu0 }
 0xcd2   : > { %4984 = vmatpush.bf16.msra.mxu2 %v9353_v13 }
 0xcd4   : > { %4954 = vmatpush.bf16.msra.mxu1 %v9318_v16 }
 0xcd6   : > { %4985 = vmatpush.bf16.msra.mxu2 %v9361_v17 }
 0xcd8   : > { %4955 = vmatpush.bf16.msra.mxu1 %v9321_v58 }
 0xcda   : > { %4986 = vmatpush.bf16.msra.mxu2 %v9373_v38 }
 0xcdc   : > { %4956 = vmatpush.bf16.msra.mxu1 %v9326_v22 }
 0xcde   : > { %4987 = vmatpush.bf16.msra.mxu2 %v9385_v21 }
 0xce0   : > { %4957 = vmatpush.bf16.msra.mxu1 %v9370_v24 }
 0xce2   : > { %4988 = vmatpush.bf16.msra.mxu2 %v9397_v34 }
 0xce4   : > { %4958 = vmatpush.bf16.msra.mxu1 %v9382_v54 }
 0xce6   : > { %4989 = vmatpush.bf16.msra.mxu2 %v9409_v12 }
 0xce8   : > { %4959 = vmatpush.bf16.msra.mxu1 %v9394_v0 }
 0xcea   : > { %4990 = vmatpush.bf16.msra.mxu2 %v9420_v62 }
 0xcec   : > { %4960 = vmatpush.bf16.msra.mxu1 %v9406_v35 }
 0xcf0   : > { %4961 = vmatpush.bf16.msra.mxu1 %v9417_v49 }
 0xd30   : > { %v3447_v42 = vpop.f32.mrf.mxu1  ;;  %v3508_v11 = vpop.f32.mrf.mxu2 }
 0xd31   : > { %v3509_v55 = vadd.f32 %v3508_v11, %v3447_v42  ;;  %v4198_v42 = vsel %vm1356_vm3, %v9426_v37, %v4184_v44  ;;  %v7299_v37 = vld [vmem:[%s10245_s5 + $0x8] sm:$0xff]  ;;  %v3518_v44 = vstv %s3517_s2 }
 0xd32   : > { %v4200_v11 = vsel %vm1360_vm4, %v4198_v42, %v4188_v3  ;;  %7390 = vrcp.f32 %v3518_v44  ;;  %vm3524_vm9 = vweird.f32 %v3518_v44 }
 0xd33   : > { %v3513_v7 = vadd.f32 %v3512_v9, %v3509_v55  ;;  %v7298_v9 = vld [vmem:[%s10245_s5] sm:$0xff]  ;;  %v3534_v55 = vstv %s9518_s0 }
 0xd35   : > { %3514 = vst [vmem:[%s9492_s3] sm:$0x7] %v3513_v7  ;;  %v4217_v7 = vpop.permute.xlu0 %4216 }
 0xd38   : > { %v3449_v53 = vpop.f32.mrf.mxu1  ;;  %v3510_v59 = vpop.f32.mrf.mxu2 }
 0xd39   : > { %v10478_v59 = vld [vmem:[#allocation10_spill] sm:$0xff] }
 0xd3a   : > { %vm3535_vm12 = vcmp.lt.s32.totalorder %v10478_v59, %v3534_v55 }
 0xd40   : > { %v4158_v29 = vpop.f32.mrf.mxu1  ;;  %v4171_v28 = vpop.f32.mrf.mxu2 }
 0xd41   : > { %v4177_v26 = vand.u32 2147483647, %v4158_v29  ;;  %v4179_v25 = vand.u32 2147483647, %v4171_v28  ;;  %v9523_v29 = vsel %vm3535_vm12, 1.0, %v10479_v31  ;;  %v3530_v31 = vand.u32 2147483648, %v3518_v44 }
 0xd42   : > { %10480 = vst [vmem:[#allocation13_spill] sm:$0xff] %v9523_v29 }
 0xd43   : > { %v4178_v51 = vpack.c.bf16 %v4177_v26, %v4177_v26  ;;  %v4180_v48 = vpack.c.bf16 %v4179_v25, %v4179_v25  ;;  %v4222_v26 = vpop.permute.xlu2 %4221 }
 0xd45   : > { %v4190_v14 = vunpack.c.l.b16 %v4178_v51  ;;  %v4194_v15 = vunpack.c.l.b16 %v4180_v48 }
 0xd47   : > { %v4191_v63 = vpack.c.b16 %v4190_v14, %v4190_v14  ;;  %v4195_v33 = vpack.c.b16 %v4194_v15, %v4194_v15 }
 0xd48   : > { %v4160_v5 = vpop.f32.mrf.mxu1  ;;  %v4173_v47 = vpop.f32.mrf.mxu2 }
 0xd49   : > { %v4192_v39 = vrot.slane %v4191_v63, 7 }
 0xd4b   : > { %v4203_v43 = vsel %vm1364_vm0, %v4188_v3, %v4192_v39  ;;  %v4227_v50 = vpop.permute.xlu2 %4226 }
 0xd4c   : > { %v4205_v8 = vsel %vm1367_vm1, %v4203_v43, %v4195_v33  ;;  %v4232_v43 = vpop.permute.xlu0 %4231 }
 0xd4d   : > { %v4250_v36 = vsel %vm1415_vm2, %v4205_v8, 0 }
 0xd4e   : > { %4258 = vmatpush.bf16.msrb.mxu3 %v4250_v36 }
 0xd52   : > { %4259 = vmatpush.bf16.msrb.mxu3 %v4200_v11 }
 0xd55   : > { %7012 = vmatmul.msk.bf16.vlgmr.msrb.gmra.mxu3 %vm1408_vm5, %v7298_v9 }
 0xd56   : > { %4415 = vmatpush.bf16.msra.mxu3 %v9341_v46 }
 0xd5a   : > { %4416 = vmatpush.bf16.msra.mxu3 %v9353_v13 }
 0xd5e   : > { %4417 = vmatpush.bf16.msra.mxu3 %v9361_v17 }
 0xd62   : > { %4418 = vmatpush.bf16.msra.mxu3 %v9373_v38 }
 0xd65   : > { %7013 = vmatmul.msk.bf16.gmra.mxu3 %vm1408_vm5, %v7299_v37  ;;  %v7391_v37 = vpop.eup %7390 }
 0xd66   : > { %4419 = vmatpush.bf16.msra.mxu3 %v9385_v21  ;;  %v3520_v55 = vmul.f32 %v7391_v37, %v3518_v44  ;;  %vm3525_vm10 = vweird.f32 %v7391_v37 }
 0xd67   : > { %vm3526_vm11 = vmor %vm3524_vm9, %vm3525_vm10 }
 0xd68   : > { %v3521_v59 = vsub.f32 1.0, %v3520_v55 }
 0xd6a   : > { %4420 = vmatpush.bf16.msra.mxu3 %v9397_v34 }
 0xd6e   : > { %4421 = vmatpush.bf16.msra.mxu3 %v9409_v12 }
 0xd72   : > { %4422 = vmatpush.bf16.msra.mxu3 %v9420_v62 }
 0xdd8   : > { %v4261_v53 = vpop.f32.mrf.mxu3 }
 0xdd9   : > { %v4262_v27 = vadd.f32 %v4261_v53, %v4217_v7  ;;  %v4553_v53 = vld [vmem:[%s10248_s8 + $0x8] sm:$0xff] }
 0xddb   : > { %vm4271_vm14 = vcmp.ge.f32.partialorder %v4262_v27, 0.0  ;;  %v4275_v1 = vmul.f32 0.0, %v4262_v27 }
 0xddd   : > { %v9525_v28 = vsel %vm4271_vm14, %v4262_v27, %v4275_v1  ;;  %v3522_v27 = vmul.f32 %v7391_v37, %v3521_v59  ;;  %v3528_v1 = vand.u32 2147483647, %v3518_v44 }
 0xdde   : > { %v4283_v25 = vmul.f32 %v9523_v29, %v9525_v28 }
 0xddf   : > { %vm3529_vm12 = vcmp.eq.f32.partialorder %v3528_v1, 8.507059e+37 }
 0xde0   : > { %v4263_v57 = vpop.f32.mrf.mxu3  ;;  %4287 = vadd.xlane.f32.xlu2 %v4283_v25  ;;  %v4295_v30 = vmul.f32 %v4283_v25, %v9525_v28  ;;  %v3531_v25 = vor.u32 1.1754944e-38, %v3530_v31 }
 0xde1   : > { %v4264_v51 = vadd.f32 %v4263_v57, %v4222_v26  ;;  %v3523_v26 = vadd.f32 %v7391_v37, %v3522_v27 }
 0xde2   : > { %4299 = vadd.xlane.f32.xlu1 %v4295_v30 }
 0xde3   : > { %v4276_v48 = vmul.f32 0.0, %v4264_v51  ;;  %vm4272_vm15 = vcmp.ge.f32.partialorder %v4264_v51, 0.0  ;;  %v3527_v57 = vsel %vm3526_vm11, %v7391_v37, %v3523_v26 }
 0xde5   : > { %v9530_v14 = vsel %vm4272_vm15, %v4264_v51, %v4276_v48  ;;  %v3532_v51 = vsel %vm3529_vm12, %v3531_v25, %v3527_v57  ;;  %v4555_v48 = vld [vmem:[%s10248_s8 + $0x18] sm:$0xff] }
 0xde6   : > { %v4284_v15 = vmul.f32 %v9523_v29, %v9530_v14  ;;  %7336 = vpush %v3532_v51 }
 0xde8   : > { %v4266_v3 = vpop.f32.mrf.mxu3  ;;  %4289 = vadd.xlane.f32.xlu0 %v4284_v15  ;;  %v4296_v63 = vmul.f32 %v4284_v15, %v9530_v14  ;;  %v4552_v15 = vld [vmem:[%s10248_s8] sm:$0xff] }
 0xde9   : > { %v4267_v33 = vadd.f32 %v4266_v3, %v4227_v50  ;;  %v4557_v50 = vld [vmem:[%s10248_s8 + $0x28] sm:$0xff]  ;;  %v4556_v3 = vld [vmem:[%s10248_s8 + $0x20] sm:$0xff] }
 0xdea   : > { %4301 = vadd.xlane.f32.xlu1 %v4296_v63  ;;  %v4558_v63 = vld [vmem:[%s10248_s8 + $0x30] sm:$0xff] }
 0xdeb   : > { %vm4273_vm6 = vcmp.ge.f32.partialorder %v4267_v33, 0.0  ;;  %v4277_v5 = vmul.f32 0.0, %v4267_v33 }
 0xded   : > { %v9536_v47 = vsel %vm4273_vm6, %v4267_v33, %v4277_v5  ;;  %v4554_v33 = vld [vmem:[%s10248_s8 + $0x10] sm:$0xff]  ;;  %v4559_v5 = vld [vmem:[%s10248_s8 + $0x38] sm:$0xff] }
 0xdee   : > { %v4285_v39 = vmul.f32 %v9523_v29, %v9536_v47 }
 0xdf0   : > { %v4268_v8 = vpop.f32.mrf.mxu3  ;;  %v4297_v36 = vmul.f32 %v4285_v39, %v9536_v47 }
 0xdf1   : > { %v4269_v42 = vadd.f32 %v4268_v8, %v4232_v43 }
 0xdf2   : > { %4303 = vadd.xlane.f32.xlu2 %v4297_v36  ;;  %4291 = vadd.xlane.f32.xlu1 %v4285_v39 }
 0xdf3   : > { %v4278_v11 = vmul.f32 0.0, %v4269_v42  ;;  %vm4274_vm8 = vcmp.ge.f32.partialorder %v4269_v42, 0.0 }
 0xdf5   : > { %v9541_v9 = vsel %vm4274_vm8, %v4269_v42, %v4278_v11 }
 0xdf6   : > { %v4286_v7 = vmul.f32 %v9523_v29, %v9541_v9 }
 0xdf8   : > { %v4298_v30 = vmul.f32 %v4286_v7, %v9541_v9 }
 0xdfa   : > { %4293 = vadd.xlane.f32.xlu1 %v4286_v7 }
 0xdfc   : > { %4567 = vperm.xlu0 %7349, %v4553_v53  }
 0xe02   : > { %4305 = vadd.xlane.f32.xlu1 %v4298_v30 }
 0xe04   : > { %4577 = vperm.xlu0 %7349, %v4555_v48  }
 0xe0a   : > { %4562 = vperm.xlu2 %7351, %v4552_v15  }
 0xe0c   : > { %4587 = vperm.xlu0 %7349, %v4557_v50  }
 0xe12   : > { %4582 = vperm.xlu2 %7351, %v4556_v3  }
 0xe17   : > { %s7337_s25 = spop %7336 }
 0xe18   : > { %v9570_v39 = vstv %s7337_s25 }
 0xe19   : > { %10481 = vst [vmem:[#allocation10_spill] sm:$0xff] %v9570_v39 }
 0xe1a   : > { %4592 = vperm.xlu2 %7351, %v4558_v63  }
 0xe1b   : > { %4572 = vperm.xlu1 %7350, %v4554_v33  }
 0xe23   : > { %4597 = vperm.xlu1 %7350, %v4559_v5  }
 0xe53   : > { %v4288_v44 = vpop.xlane.xlu2 %4287 }
 0xe54   : > { %v4308_v43 = vmul.f32 %v9570_v39, %v4288_v44 }
 0xe55   : > { %v4300_v8 = vpop.xlane.xlu1 %4299 }
 0xe56   : > { %v4316_v36 = vmul.f32 %v4308_v43, %v4308_v43  ;;  %v4312_v42 = vmul.f32 %v9570_v39, %v4300_v8 }
 0xe58   : > { %v4320_v11 = vsub.f32 %v4312_v42, %v4316_v36 }
 0xe5a   : > { %v4324_v37 = vmax.f32 %v4320_v11, 0.0 }
 0xe5b   : > { %v4290_v55 = vpop.xlane.xlu0 %4289 }
 0xe5c   : > { %v4332_v7 = vadd.f32 1e-05, %v4324_v37  ;;  %v4309_v53 = vmul.f32 %v9570_v39, %v4290_v55 }
 0xe5d   : > { %v4302_v59 = vpop.xlane.xlu1 %4301 }
 0xe5e   : > { %7392 = vrsqrt.f32 %v4332_v7  ;;  %v4317_v27 = vmul.f32 %v4309_v53, %v4309_v53  ;;  %v4313_v1 = vmul.f32 %v9570_v39, %v4302_v59  ;;  %vm4342_vm15 = vweird.f32 %v4332_v7 }
 0xe60   : > { %v4321_v31 = vsub.f32 %v4313_v1, %v4317_v27 }
 0xe62   : > { %v4325_v26 = vmax.f32 %v4321_v31, 0.0 }
 0xe64   : > { %v7393_v25 = vpop.eup %7392  ;;  %v4333_v30 = vadd.f32 1e-05, %v4325_v26  ;;  %v4328_v26 = vsub.f32 %v9525_v28, %v4308_v43 }
 0xe65   : > { %v4337_v57 = vmul.f32 %v7393_v25, %v4332_v7  ;;  %v4304_v51 = vpop.xlane.xlu2 %4303  ;;  %v4292_v48 = vpop.xlane.xlu1 %4291  ;;  %vm4343_vm14 = vweird.f32 %v7393_v25  ;;  %v4329_v7 = vsub.f32 %v9530_v14, %v4309_v53 }
 0xe66   : > { %v9577_v15 = vmul.f32 %v9570_v39, %v4292_v48  ;;  %7394 = vrsqrt.f32 %v4333_v30  ;;  %v4314_v3 = vmul.f32 %v9570_v39, %v4304_v51  ;;  %vm4344_vm6 = vmor %vm4342_vm15, %vm4343_vm14  ;;  %vm4352_vm9 = vweird.f32 %v4333_v30 }
 0xe67   : > { %v4338_v50 = vmul.f32 %v7393_v25, %v4337_v57 }
 0xe68   : > { %v4318_v63 = vmul.f32 %v9577_v15, %v9577_v15 }
 0xe69   : > { %v4339_v33 = vmul.f32 0.5, %v4338_v50 }
 0xe6a   : > { %v4322_v5 = vsub.f32 %v4314_v3, %v4318_v63 }
 0xe6b   : > { %v4340_v44 = vsub.f32 1.5, %v4339_v33 }
 0xe6c   : > { %v4326_v8 = vmax.f32 %v4322_v5, 0.0  ;;  %v7395_v36 = vpop.eup %7394 }
 0xe6d   : > { %v4294_v42 = vpop.xlane.xlu1 %4293  ;;  %v4341_v11 = vmul.f32 %v7393_v25, %v4340_v44  ;;  %v4347_v37 = vmul.f32 %v7395_v36, %v4333_v30  ;;  %vm4353_vm8 = vweird.f32 %v7395_v36 }
 0xe6e   : > { %v4334_v55 = vadd.f32 1e-05, %v4326_v8  ;;  %v4311_v31 = vmul.f32 %v9570_v39, %v4294_v42  ;;  %vm4354_vm10 = vmor %vm4352_vm9, %vm4353_vm8 }
 0xe6f   : > { %v4348_v59 = vmul.f32 %v7395_v36, %v4347_v37  ;;  %v4345_v27 = vsel %vm4344_vm6, %v7393_v25, %v4341_v11 }
 0xe70   : > { %7396 = vrsqrt.f32 %v4334_v55  ;;  %v4376_v51 = vmul.f32 %v4345_v27, %v4328_v26  ;;  %v4319_v63 = vmul.f32 %v4311_v31, %v4311_v31  ;;  %vm4362_vm12 = vweird.f32 %v4334_v55 }
 0xe71   : > { %v4349_v1 = vmul.f32 0.5, %v4348_v59 }
 0xe72   : > { %v4380_v8 = vpack.c.bf16 %v4376_v51, %v4376_v51 }
 0xe73   : > { %v4350_v57 = vsub.f32 1.5, %v4349_v1 }
 0xe74   : > { %v4388_v59 = vunpack.c.l.b16 %v4380_v8 }
 0xe75   : > { %v4306_v48 = vpop.xlane.xlu1 %4305  ;;  %v4351_v3 = vmul.f32 %v7395_v36, %v4350_v57 }
 0xe76   : > { %v7397_v50 = vpop.eup %7396  ;;  %v4315_v33 = vmul.f32 %v9570_v39, %v4306_v48 }
 0xe77   : > { %v4357_v5 = vmul.f32 %v7397_v50, %v4334_v55  ;;  %v4355_v25 = vsel %vm4354_vm10, %v7395_v36, %v4351_v3  ;;  %vm4363_vm11 = vweird.f32 %v7397_v50  ;;  %v4330_v3 = vsub.f32 %v9536_v47, %v9577_v15 }
 0xe78   : > { %v4323_v44 = vsub.f32 %v4315_v33, %v4319_v63  ;;  %v4377_v42 = vmul.f32 %v4355_v25, %v4329_v7  ;;  %vm4364_vm14 = vmor %vm4362_vm12, %vm4363_vm11 }
 0xe79   : > { %v4358_v11 = vmul.f32 %v7397_v50, %v4357_v5  ;;  %v4331_v5 = vsub.f32 %v9541_v9, %v4311_v31 }
 0xe7a   : > { %v4327_v28 = vmax.f32 %v4323_v44, 0.0  ;;  %v4381_v43 = vpack.c.bf16 %v4377_v42, %v4377_v42 }
 0xe7b   : > { %v4359_v1 = vmul.f32 0.5, %v4358_v11 }
 0xe7c   : > { %v4335_v37 = vadd.f32 1e-05, %v4327_v28  ;;  %v4389_v27 = vunpack.c.l.b16 %v4381_v43 }
 0xe7d   : > { %v4360_v26 = vsub.f32 1.5, %v4359_v1 }
 0xe7e   : > { %7398 = vrsqrt.f32 %v4335_v37  ;;  %v9586_v30 = vpack.c.b16 %v4389_v27, %v4388_v59  ;;  %vm4372_vm6 = vweird.f32 %v4335_v37 }
 0xe7f   : > { %v4361_v53 = vmul.f32 %v7397_v50, %v4360_v26 }
 0xe80   : > { %4404 = vmatmul.bf16.vlgmr.msrb.gmra.mxu0 %v9586_v30  ;;  %4423 = vmatmul.bf16.vlgmr.msra.gmra.mxu3 %v9586_v30 }
 0xe81   : > { %4442 = vmatmul.bf16.vlgmr.msrb.gmra.mxu1 %v9586_v30  ;;  %4461 = vmatmul.bf16.vlgmr.msrb.gmra.mxu2 %v9586_v30  ;;  %v4365_v51 = vsel %vm4364_vm14, %v7397_v50, %v4361_v53 }
 0xe82   : > { %v4378_v33 = vmul.f32 %v4365_v51, %v4330_v3 }
 0xe84   : > { %v7399_v14 = vpop.eup %7398  ;;  %v4382_v44 = vpack.c.bf16 %v4378_v33, %v4378_v33 }
 0xe85   : > { %v4367_v36 = vmul.f32 %v7399_v14, %v4335_v37  ;;  %vm4373_vm15 = vweird.f32 %v7399_v14 }
 0xe86   : > { %vm4374_vm8 = vmor %vm4372_vm6, %vm4373_vm15  ;;  %v4390_v55 = vunpack.c.l.b16 %v4382_v44 }
 0xe87   : > { %v4368_v57 = vmul.f32 %v7399_v14, %v4367_v36 }
 0xe89   : > { %v4369_v48 = vmul.f32 0.5, %v4368_v57 }
 0xe8b   : > { %v4370_v63 = vsub.f32 1.5, %v4369_v48 }
 0xe8d   : > { %v4371_v7 = vmul.f32 %v7399_v14, %v4370_v63 }
 0xe8f   : > { %v4375_v25 = vsel %vm4374_vm8, %v7399_v14, %v4371_v7 }
 0xe90   : > { %v4379_v8 = vmul.f32 %v4375_v25, %v4331_v5 }
 0xe92   : > { %v4383_v42 = vpack.c.bf16 %v4379_v8, %v4379_v8 }
 0xe94   : > { %v4391_v11 = vunpack.c.l.b16 %v4383_v42 }
 0xe96   : > { %v9595_v28 = vpack.c.b16 %v4391_v11, %v4390_v55 }
 0xe98   : > { %4409 = vmatmul.bf16.gmra.mxu0 %v9595_v28  ;;  %4428 = vmatmul.bf16.gmra.mxu3 %v9595_v28 }
 0xe99   : > { %4447 = vmatmul.bf16.gmra.mxu1 %v9595_v28  ;;  %4466 = vmatmul.bf16.gmra.mxu2 %v9595_v28 }
 0xefd   : > { %v9601_v31 = vpop.f32.mrf.mxu0 }
 0xefe   : > { %v4443_v47 = vpop.f32.mrf.mxu1 }
 0xeff   : > { %v4480_v57 = vand.u32 2147483647, %v4443_v47 }
 0xf01   : > { %v4484_v5 = vpack.c.bf16 %v4480_v57, %v4480_v57 }
 0xf03   : > { %v4424_v15 = vpop.f32.mrf.mxu3  ;;  %v4524_v54 = vunpack.c.l.b16 %v4484_v5 }
 0xf04   : > { %v4462_v9 = vpop.f32.mrf.mxu2  ;;  %v4476_v24 = vpack.c.bf16 %v4424_v15, %v4424_v15 }
 0xf05   : > { %v9603_v27 = vpop.f32.mrf.mxu0  ;;  %v4488_v55 = vand.u32 2147483647, %v4462_v9 }
 0xf06   : > { %v4445_v50 = vpop.f32.mrf.mxu1 }
 0xf07   : > { %v4481_v14 = vand.u32 2147483647, %v4445_v50 }
 0xf09   : > { %v4485_v3 = vpack.c.bf16 %v4481_v14, %v4481_v14  ;;  %v4492_v14 = vpack.c.bf16 %v4488_v55, %v4488_v55 }
 0xf0b   : > { %v4426_v43 = vpop.f32.mrf.mxu3  ;;  %v4525_v11 = vunpack.c.l.b16 %v4485_v3 }
 0xf0c   : > { %v4464_v37 = vpop.f32.mrf.mxu2 }
 0xf0d   : > { %v4489_v25 = vand.u32 2147483647, %v4464_v37 }
 0xf0f   : > { %v4493_v47 = vpack.c.bf16 %v4489_v25, %v4489_v25  ;;  %v4473_v25 = vpack.c.bf16 %v9603_v27, %v9603_v27  ;;  %v7302_v27 = vld [vmem:[%s10247_s7 + $0x14] sm:$0xf] }
 0xf11   : > { %v4537_v9 = vunpack.c.l.b16 %v4493_v47  ;;  %v7301_v47 = vld [vmem:[%s10247_s7 + $0x4] sm:$0xf0] }
 0xf15   : > { %v4410_v63 = vpop.f32.mrf.mxu0 }
 0xf16   : > { %v4448_v59 = vpop.f32.mrf.mxu1 }
 0xf17   : > { %v4482_v1 = vand.u32 2147483647, %v4448_v59 }
 0xf19   : > { %v4486_v51 = vpack.c.bf16 %v4482_v1, %v4482_v1 }
 0xf1b   : > { %v4429_v26 = vpop.f32.mrf.mxu3  ;;  %v4526_v44 = vunpack.c.l.b16 %v4486_v51  ;;  %v4528_v51 = vpack.c.b16 %v4525_v11, %v4524_v54  ;;  %v4512_v54 = vunpack.c.l.b16 %v4476_v24  ;;  %v4501_v24 = vunpack.c.l.b16 %v4473_v25 }
 0xf1c   : > { %v4467_v53 = vpop.f32.mrf.mxu2  ;;  %v4478_v1 = vpack.c.bf16 %v4429_v26, %v4429_v26 }
 0xf1d   : > { %v4490_v33 = vand.u32 2147483647, %v4467_v53  ;;  %v4477_v53 = vpack.c.bf16 %v4426_v43, %v4426_v43  ;;  %v4474_v43 = vpack.c.bf16 %v4410_v63, %v4410_v63 }
 0xf1e   : > { %v4450_v36 = vpop.f32.mrf.mxu1  ;;  %v4514_v3 = vunpack.c.l.b16 %v4478_v1 }
 0xf1f   : > { %v4483_v48 = vand.u32 2147483647, %v4450_v36  ;;  %v4494_v59 = vpack.c.bf16 %v4490_v33, %v4490_v33  ;;  %v4536_v33 = vunpack.c.l.b16 %v4492_v14  ;;  %v4502_v55 = vunpack.c.l.b16 %v4474_v43  ;;  %v7024_v14 = vld [vmem:[%s10247_s7 + $0x10] sm:$0xf] }
 0xf21   : > { %v4487_v7 = vpack.c.bf16 %v4483_v48, %v4483_v48  ;;  %v4538_v48 = vunpack.c.l.b16 %v4494_v59  ;;  %v4540_v15 = vpack.c.b16 %v4537_v9, %v4536_v33  ;;  %v7305_v9 = vld [vmem:[%s10247_s7 + $0x24] sm:$0xf0] }
 0xf23   : > { %v4527_v8 = vunpack.c.l.b16 %v4487_v7  ;;  %v4431_v42 = vpop.f32.mrf.mxu3  ;;  %v4412_v7 = vpop.f32.mrf.mxu0 }
 0xf24   : > { %v4469_v49 = vpop.f32.mrf.mxu2  ;;  %v4479_v50 = vpack.c.bf16 %v4431_v42, %v4431_v42  ;;  %v4472_v42 = vpack.c.bf16 %v9601_v31, %v9601_v31  ;;  %v7026_v31 = vld [vmem:[%s10247_s7 + $0x18] sm:$0xf0] }
 0xf25   : > { %v4529_v35 = vpack.c.b16 %v4527_v8, %v4526_v44  ;;  %v4491_v0 = vand.u32 2147483647, %v4469_v49  ;;  %v4513_v44 = vunpack.c.l.b16 %v4477_v53  ;;  %v4475_v49 = vpack.c.bf16 %v4412_v7, %v4412_v7  ;;  %v7303_v53 = vld [vmem:[%s10247_s7 + $0x14] sm:$0xf0]  ;;  %v7032_v7 = vld [vmem:[%s10247_s7 + $0x20] sm:$0xf] }
 0xf26   : > { %v4515_v57 = vunpack.c.l.b16 %v4479_v50  ;;  %v4500_v11 = vunpack.c.l.b16 %v4472_v42  ;;  %v7016_v50 = vld [vmem:[%s10247_s7] sm:$0xf]  ;;  %v7029_v1 = vor.u32 %v7302_v27, %v7026_v31  ;;  %v7033_v33 = vor.u32 %v7305_v9, %v7032_v7 }
 0xf27   : > { %v4495_v36 = vpack.c.bf16 %v4491_v0, %v4491_v0  ;;  %4648 = vmatpush.bf16.msra.mxu0 %v4529_v35  ;;  %v7300_v0 = vld [vmem:[%s10247_s7 + $0x4] sm:$0xf]  ;;  %v7018_v35 = vld [vmem:[%s10247_s7 + $0x8] sm:$0xf0]  ;;  %v4503_v8 = vunpack.c.l.b16 %v4475_v49  ;;  %v7307_v49 = vld [vmem:[%s10247_s7 + $0x34] sm:$0xf0] }
 0xf28   : > { %v4517_v5 = vpack.c.b16 %v4515_v57, %v4514_v3  ;;  %v7021_v26 = vor.u32 %v7300_v0, %v7018_v35  ;;  %v4504_v59 = vpack.c.b16 %v4501_v24, %v4500_v11  ;;  %v7025_v57 = vor.u32 %v7303_v53, %v7024_v14 }
 0xf29   : > { %v4539_v37 = vunpack.c.l.b16 %v4495_v36  ;;  %v4505_v63 = vpack.c.b16 %v4503_v8, %v4502_v55  ;;  %v7017_v36 = vor.u32 %v7301_v47, %v7016_v50  ;;  %v4568_v8 = vpop.permute.xlu0 %4567  ;;  %v4573_v50 = vpop.permute.xlu1 %4572 }
 0xf2b   : > { %v4541_v22 = vpack.c.b16 %v4539_v37, %v4538_v48  ;;  %4649 = vmatpush.bf16.msra.mxu0 %v4528_v51  ;;  %v7306_v37 = vld [vmem:[%s10247_s7 + $0x34] sm:$0xf]  ;;  %v7042_v51 = vld [vmem:[%s10247_s7 + $0x38] sm:$0xf0] }
 0xf2c   : > { %v7045_v3 = vor.u32 %v7306_v37, %v7042_v51 }
 0xf2d   : > { %4683 = vmatpush.bf16.msrb.mxu3 %v4541_v22  ;;  %v4516_v22 = vpack.c.b16 %v4513_v44, %v4512_v54  ;;  %v7040_v44 = vld [vmem:[%s10247_s7 + $0x30] sm:$0xf]  ;;  %v4563_v54 = vpop.permute.xlu2 %4562 }
 0xf2f   : > { %4650 = vmatpush.bf16.msra.mxu0 %v4517_v5  ;;  %v7041_v5 = vor.u32 %v7307_v49, %v7040_v44 }
 0xf31   : > { %4684 = vmatpush.bf16.msrb.mxu3 %v4540_v15 }
 0xf33   : > { %4651 = vmatpush.bf16.msra.mxu0 %v4516_v22 }
 0xf34   : > { %7046 = vmatmul.msk.bf16.vlgmr.msrb.gmra.mxu3 %vm1802_vm7, %v7021_v26 }
 0xf35   : > { %5041 = vmatpush.bf16.msra.mxu3 %v9343_v45 }
 0xf37   : > { %4652 = vmatpush.bf16.msra.mxu0 %v4505_v63 }
 0xf39   : > { %5042 = vmatpush.bf16.msra.mxu3 %v9356_v56 }
 0xf3b   : > { %4653 = vmatpush.bf16.msra.mxu0 %v4504_v59 }
 0xf3d   : > { %5043 = vmatpush.bf16.msra.mxu3 %v9364_v61 }
 0xf3f   : > { %4654 = vmatpush.bf16.msra.mxu0 %v9595_v28  ;;  %v7304_v28 = vld [vmem:[%s10247_s7 + $0x24] sm:$0xf] }
 0xf41   : > { %5044 = vmatpush.bf16.msra.mxu3 %v9376_v41 }
 0xf43   : > { %4655 = vmatpush.bf16.msra.mxu0 %v9586_v30  ;;  %v7034_v30 = vld [vmem:[%s10247_s7 + $0x28] sm:$0xf0] }
 0xf44   : > { %7047 = vmatmul.msk.bf16.gmra.mxu3 %vm1802_vm7, %v7029_v1  ;;  %v7037_v48 = vor.u32 %v7304_v28, %v7034_v30 }
 0xf45   : > { %5045 = vmatpush.bf16.msra.mxu3 %v9388_v20 }
 0xf46   : > { %4656 = vmatmul.bf16.vlgmr.msra.gmra.mxu0 %v7017_v36 }
 0xf47   : > { %5012 = vmatpush.bf16.msrb.mxu0 %v9347_v4 }
 0xf49   : > { %5046 = vmatpush.bf16.msra.mxu3 %v9400_v19 }
 0xf4b   : > { %5013 = vmatpush.bf16.msrb.mxu0 %v9368_v52 }
 0xf4d   : > { %5047 = vmatpush.bf16.msra.mxu3 %v9412_v23 }
 0xf4f   : > { %5014 = vmatpush.bf16.msrb.mxu0 %v9379_v2 }
 0xf51   : > { %5048 = vmatpush.bf16.msra.mxu3 %v9422_v60 }
 0xf53   : > { %5015 = vmatpush.bf16.msrb.mxu0 %v9391_v6 }
 0xf54   : > { %7048 = vmatmul.msk.bf16.gmra.mxu3 %vm1802_vm7, %v7037_v48 }
 0xf55   : > { %5393 = vmatpush.bf16.msrb.mxu3 %v9347_v4 }
 0xf56   : > { %4661 = vmatmul.bf16.gmra.mxu0 %v7025_v57  ;;  %v4578_v57 = vpop.permute.xlu0 %4577 }
 0xf57   : > { %5016 = vmatpush.bf16.msrb.mxu0 %v9403_v32 }
 0xf59   : > { %5394 = vmatpush.bf16.msrb.mxu3 %v9368_v52 }
 0xf5b   : > { %5017 = vmatpush.bf16.msrb.mxu0 %v9414_v18 }
 0xf5d   : > { %5395 = vmatpush.bf16.msrb.mxu3 %v9379_v2 }
 0xf5f   : > { %5018 = vmatpush.bf16.msrb.mxu0 %v9428_v40 }
 0xf61   : > { %5396 = vmatpush.bf16.msrb.mxu3 %v9391_v6 }
 0xf63   : > { %5019 = vmatpush.bf16.msrb.mxu0 %v9437_v10 }
 0xf64   : > { %7049 = vmatmul.msk.bf16.gmra.mxu3 %vm1802_vm7, %v7045_v3 }
 0xf65   : > { %5397 = vmatpush.bf16.msrb.mxu3 %v9403_v32 }
 0xf66   : > { %4666 = vmatmul.bf16.gmra.mxu0 %v7033_v33 }
 0xf67   : > { %5374 = vmatpush.bf16.msra.mxu0 %v9341_v46 }
 0xf69   : > { %5398 = vmatpush.bf16.msrb.mxu3 %v9414_v18 }
 0xf6b   : > { %5375 = vmatpush.bf16.msra.mxu0 %v9353_v13 }
 0xf6d   : > { %5399 = vmatpush.bf16.msrb.mxu3 %v9428_v40 }
 0xf6f   : > { %5376 = vmatpush.bf16.msra.mxu0 %v9361_v17 }
 0xf71   : > { %5400 = vmatpush.bf16.msrb.mxu3 %v9437_v10 }
 0xf73   : > { %5377 = vmatpush.bf16.msra.mxu0 %v9373_v38 }
 0xf76   : > { %4671 = vmatmul.bf16.gmra.mxu0 %v7041_v5  ;;  %v4583_v5 = vpop.permute.xlu2 %4582 }
 0xf77   : > { %5378 = vmatpush.bf16.msra.mxu0 %v9385_v21 }
 0xf7b   : > { %5379 = vmatpush.bf16.msra.mxu0 %v9397_v34 }
 0xf7f   : > { %5380 = vmatpush.bf16.msra.mxu0 %v9409_v12 }
 0xf83   : > { %5381 = vmatpush.bf16.msra.mxu0 %v9420_v62 }
 0xfb7   : > { %v4686_v0 = vpop.f32.mrf.mxu3 }
 0xfbf   : > { %v4688_v35 = vpop.f32.mrf.mxu3 }
 0xfc3   : > { %v4657_v43 = vpop.f32.mrf.mxu0 }
 0xfc4   : > { %v4658_v15 = vadd.f32 %v4657_v43, %v4563_v54 }
 0xfc6   : > { %v4687_v26 = vadd.f32 %v4686_v0, %v4658_v15 }
 0xfc7   : > { %v4691_v55 = vpop.f32.mrf.mxu3 }
 0xfc8   : > { %v4714_v25 = vmul.f32 0.0, %v4687_v26  ;;  %vm4706_vm9 = vcmp.ge.f32.partialorder %v4687_v26, 0.0 }
 0xfca   : > { %v9695_v22 = vsel %vm4706_vm9, %v4687_v26, %v4714_v25 }
 0xfcb   : > { %v4659_v42 = vpop.f32.mrf.mxu0  ;;  %v4730_v24 = vmul.f32 %v9523_v29, %v9695_v22 }
 0xfcc   : > { %v4660_v63 = vadd.f32 %v4659_v42, %v4568_v8  ;;  %v4588_v42 = vpop.permute.xlu0 %4587 }
 0xfcd   : > { %4738 = vadd.xlane.f32.xlu0 %v4730_v24  ;;  %v4754_v11 = vmul.f32 %v4730_v24, %v9695_v22 }
 0xfce   : > { %v4689_v59 = vadd.f32 %v4688_v35, %v4660_v63 }
 0xfcf   : > { %4762 = vadd.xlane.f32.xlu1 %v4754_v11  ;;  %v4693_v28 = vpop.f32.mrf.mxu3 }
 0xfd0   : > { %vm4707_vm10 = vcmp.ge.f32.partialorder %v4689_v59, 0.0  ;;  %v4715_v27 = vmul.f32 0.0, %v4689_v59 }
 0xfd2   : > { %v9700_v31 = vsel %vm4707_vm10, %v4689_v59, %v4715_v27 }
 0xfd3   : > { %v4662_v47 = vpop.f32.mrf.mxu0  ;;  %v4731_v1 = vmul.f32 %v9523_v29, %v9700_v31 }
 0xfd4   : > { %v4663_v36 = vadd.f32 %v4662_v47, %v4573_v50  ;;  %v4593_v50 = vpop.permute.xlu2 %4592 }
 0xfd5   : > { %4740 = vadd.xlane.f32.xlu2 %v4731_v1  ;;  %v4755_v30 = vmul.f32 %v4731_v1, %v9700_v31 }
 0xfd6   : > { %v4692_v14 = vadd.f32 %v4691_v55, %v4663_v36 }
 0xfd7   : > { %4764 = vadd.xlane.f32.xlu0 %v4755_v30  ;;  %v4696_v33 = vpop.f32.mrf.mxu3 }
 0xfd8   : > { %v4716_v53 = vmul.f32 0.0, %v4692_v14  ;;  %vm4708_vm11 = vcmp.ge.f32.partialorder %v4692_v14, 0.0 }
 0xfda   : > { %v9705_v48 = vsel %vm4708_vm11, %v4692_v14, %v4716_v53 }
 0xfdb   : > { %v4664_v37 = vpop.f32.mrf.mxu0  ;;  %v4732_v51 = vmul.f32 %v9523_v29, %v9705_v48 }
 0xfdc   : > { %v4665_v7 = vadd.f32 %v4664_v37, %v4578_v57 }
 0xfdd   : > { %4742 = vadd.xlane.f32.xlu2 %v4732_v51  ;;  %v4756_v9 = vmul.f32 %v4732_v51, %v9705_v48  ;;  %v4598_v51 = vpop.permute.xlu1 %4597 }
 0xfde   : > { %v4694_v3 = vadd.f32 %v4693_v28, %v4665_v7 }
 0xfdf   : > { %4766 = vadd.xlane.f32.xlu0 %v4756_v9  ;;  %v4698_v25 = vpop.f32.mrf.mxu3 }
 0xfe0   : > { %vm4709_vm12 = vcmp.ge.f32.partialorder %v4694_v3, 0.0  ;;  %v4717_v44 = vmul.f32 0.0, %v4694_v3 }
 0xfe2   : > { %v9710_v49 = vsel %vm4709_vm12, %v4694_v3, %v4717_v44 }
 0xfe3   : > { %v4667_v0 = vpop.f32.mrf.mxu0  ;;  %v4733_v35 = vmul.f32 %v9523_v29, %v9710_v49 }
 0xfe4   : > { %v4668_v54 = vadd.f32 %v4667_v0, %v4583_v5 }
 0xfe5   : > { %4744 = vadd.xlane.f32.xlu1 %v4733_v35  ;;  %v4757_v43 = vmul.f32 %v4733_v35, %v9710_v49 }
 0xfe6   : > { %v4697_v15 = vadd.f32 %v4696_v33, %v4668_v54 }
 0xfe7   : > { %4768 = vadd.xlane.f32.xlu2 %v4757_v43  ;;  %v4701_v1 = vpop.f32.mrf.mxu3 }
 0xfe8   : > { %v4718_v26 = vmul.f32 0.0, %v4697_v15  ;;  %vm4710_vm14 = vcmp.ge.f32.partialorder %v4697_v15, 0.0 }
 0xfea   : > { %v9715_v8 = vsel %vm4710_vm14, %v4697_v15, %v4718_v26  ;;  %v5223_v15 = vld [vmem:[%s10250_s10 + $0x8] sm:$0xff]  ;;  %v5224_v26 = vld [vmem:[%s10250_s10 + $0x10] sm:$0xff] }
 0xfeb   : > { %v4669_v55 = vpop.f32.mrf.mxu0  ;;  %v4734_v24 = vmul.f32 %v9523_v29, %v9715_v8 }
 0xfec   : > { %v4670_v63 = vadd.f32 %v4669_v55, %v4588_v42  ;;  %v5508_v42 = vld [vmem:[%s10252_s12 + $0x8] sm:$0xff]  ;;  %v5507_v55 = vld [vmem:[%s10252_s12] sm:$0xff] }
 0xfed   : > { %4746 = vadd.xlane.f32.xlu1 %v4734_v24  ;;  %v4758_v11 = vmul.f32 %v4734_v24, %v9715_v8  ;;  %v5225_v24 = vld [vmem:[%s10250_s10 + $0x18] sm:$0xff] }
 0xfee   : > { %v4699_v59 = vadd.f32 %v4698_v25, %v4670_v63  ;;  %v5222_v25 = vld [vmem:[%s10250_s10] sm:$0xff]  ;;  %v5510_v63 = vld [vmem:[%s10252_s12 + $0x18] sm:$0xff] }
 0xfef   : > { %4770 = vadd.xlane.f32.xlu2 %v4758_v11  ;;  %v4703_v33 = vpop.f32.mrf.mxu3  ;;  %v5509_v11 = vld [vmem:[%s10252_s12 + $0x10] sm:$0xff] }
 0xff0   : > { %vm4711_vm15 = vcmp.ge.f32.partialorder %v4699_v59, 0.0  ;;  %v4719_v27 = vmul.f32 0.0, %v4699_v59 }
 0xff2   : > { %v9720_v47 = vsel %vm4711_vm15, %v4699_v59, %v4719_v27 }
 0xff3   : > { %v4672_v36 = vpop.f32.mrf.mxu0  ;;  %v4735_v28 = vmul.f32 %v9523_v29, %v9720_v47 }
 0xff4   : > { %v4673_v30 = vadd.f32 %v4672_v36, %v4593_v50 }
 0xff5   : > { %4748 = vadd.xlane.f32.xlu0 %v4735_v28  ;;  %v4759_v14 = vmul.f32 %v4735_v28, %v9720_v47 }
 0xff6   : > { %v4702_v53 = vadd.f32 %v4701_v1, %v4673_v30 }
 0xff7   : > { %4772 = vadd.xlane.f32.xlu1 %v4759_v14 }
 0xff8   : > { %v4720_v57 = vmul.f32 0.0, %v4702_v53  ;;  %vm4712_vm6 = vcmp.ge.f32.partialorder %v4702_v53, 0.0 }
 0xffa   : > { %v9725_v37 = vsel %vm4712_vm6, %v4702_v53, %v4720_v57 }
 0xffb   : > { %v4674_v7 = vpop.f32.mrf.mxu0  ;;  %v4736_v9 = vmul.f32 %v9523_v29, %v9725_v37 }
 0xffc   : > { %v4675_v3 = vadd.f32 %v4674_v7, %v4598_v51 }
 0xffd   : > { %4750 = vadd.xlane.f32.xlu0 %v4736_v9  ;;  %v4760_v44 = vmul.f32 %v4736_v9, %v9725_v37 }
 0xffe   : > { %v4704_v5 = vadd.f32 %v4703_v33, %v4675_v3 }
 0xfff   : > { %4774 = vadd.xlane.f32.xlu1 %v4760_v44 }
0x1000   : > { %vm4713_vm8 = vcmp.ge.f32.partialorder %v4704_v5, 0.0  ;;  %v4721_v0 = vmul.f32 0.0, %v4704_v5 }
0x1002   : > { %v9730_v35 = vsel %vm4713_vm8, %v4704_v5, %v4721_v0 }
0x1003   : > { %v4737_v54 = vmul.f32 %v9523_v29, %v9730_v35 }
0x1005   : > { %4752 = vadd.xlane.f32.xlu2 %v4737_v54  ;;  %v4761_v43 = vmul.f32 %v4737_v54, %v9730_v35 }
0x1007   : > { %4776 = vadd.xlane.f32.xlu0 %v4761_v43 }
0x1018   : > { %5233 = vperm.xlu1 %7350, %v5223_v15  }
0x101b   : > { %5238 = vperm.xlu0 %7349, %v5224_v26  }
0x101d   : > { %5228 = vperm.xlu2 %7351, %v5222_v25  }
0x1020   : > { %5518 = vperm.xlu1 %7350, %v5508_v42  }
0x1023   : > { %5513 = vperm.xlu0 %7349, %v5507_v55  }
0x1025   : > { %5243 = vperm.xlu2 %7351, %v5225_v24  }
0x102b   : > { %5528 = vperm.xlu0 %7349, %v5510_v63  }
0x102d   : > { %5523 = vperm.xlu2 %7351, %v5509_v11  }
0x1040   : > { %v4739_v59 = vpop.xlane.xlu0 %4738 }
0x1041   : > { %v4778_v27 = vmul.f32 %v4739_v59, %v9570_v39 }
0x1042   : > { %v4763_v50 = vpop.xlane.xlu1 %4762 }
0x1043   : > { %v4794_v1 = vmul.f32 %v4778_v27, %v4778_v27  ;;  %v4786_v36 = vmul.f32 %v4763_v50, %v9570_v39 }
0x1045   : > { %v4802_v28 = vsub.f32 %v4786_v36, %v4794_v1 }
0x1047   : > { %v4810_v30 = vmax.f32 %v4802_v28, 0.0 }
0x1048   : > { %v4741_v14 = vpop.xlane.xlu2 %4740 }
0x1049   : > { %v4826_v53 = vadd.f32 1e-05, %v4810_v30  ;;  %v4779_v57 = vmul.f32 %v4741_v14, %v9570_v39 }
0x104a   : > { %v4765_v51 = vpop.xlane.xlu0 %4764 }
0x104b   : > { %7400 = vrsqrt.f32 %v4826_v53  ;;  %v4795_v7 = vmul.f32 %v4779_v57, %v4779_v57  ;;  %v4787_v9 = vmul.f32 %v4765_v51, %v9570_v39  ;;  %vm4840_vm10 = vweird.f32 %v4826_v53 }
0x104d   : > { %v4803_v3 = vsub.f32 %v4787_v9, %v4795_v7 }
0x104f   : > { %v4811_v33 = vmax.f32 %v4803_v3, 0.0 }
0x1050   : > { %v4743_v44 = vpop.xlane.xlu2 %4742 }
0x1051   : > { %v7401_v5 = vpop.eup %7400  ;;  %v9764_v0 = vmul.f32 %v4743_v44, %v9570_v39  ;;  %v4827_v43 = vadd.f32 1e-05, %v4811_v33 }
0x1052   : > { %v4835_v54 = vmul.f32 %v7401_v5, %v4826_v53  ;;  %v4767_v15 = vpop.xlane.xlu0 %4766  ;;  %vm4841_vm9 = vweird.f32 %v7401_v5 }
0x1053   : > { %v4796_v26 = vmul.f32 %v9764_v0, %v9764_v0  ;;  %v4788_v25 = vmul.f32 %v4767_v15, %v9570_v39  ;;  %7402 = vrsqrt.f32 %v4827_v43  ;;  %vm4842_vm11 = vmor %vm4840_vm10, %vm4841_vm9  ;;  %vm4850_vm14 = vweird.f32 %v4827_v43 }
0x1054   : > { %v4836_v42 = vmul.f32 %v7401_v5, %v4835_v54  ;;  %v4818_v54 = vsub.f32 %v9695_v22, %v4778_v27  ;;  %v4819_v22 = vsub.f32 %v9700_v31, %v4779_v57 }
0x1055   : > { %v4804_v55 = vsub.f32 %v4788_v25, %v4796_v26 }
0x1056   : > { %v4837_v24 = vmul.f32 0.5, %v4836_v42 }
0x1057   : > { %v4812_v63 = vmax.f32 %v4804_v55, 0.0 }
0x1058   : > { %v4838_v11 = vsub.f32 1.5, %v4837_v24  ;;  %v4745_v59 = vpop.xlane.xlu1 %4744 }
0x1059   : > { %v4828_v50 = vadd.f32 1e-05, %v4812_v63  ;;  %v9770_v1 = vmul.f32 %v4745_v59, %v9570_v39  ;;  %v7403_v36 = vpop.eup %7402 }
0x105a   : > { %v4769_v28 = vpop.xlane.xlu2 %4768  ;;  %v4839_v30 = vmul.f32 %v7401_v5, %v4838_v11  ;;  %v4845_v14 = vmul.f32 %v7403_v36, %v4827_v43  ;;  %vm4851_vm12 = vweird.f32 %v7403_v36 }
0x105b   : > { %7404 = vrsqrt.f32 %v4828_v50  ;;  %v4797_v51 = vmul.f32 %v9770_v1, %v9770_v1  ;;  %v4789_v7 = vmul.f32 %v4769_v28, %v9570_v39  ;;  %vm4852_vm15 = vmor %vm4850_vm14, %vm4851_vm12  ;;  %vm4860_vm8 = vweird.f32 %v4828_v50 }
0x105c   : > { %v4846_v9 = vmul.f32 %v7403_v36, %v4845_v14  ;;  %v4843_v33 = vsel %vm4842_vm11, %v7401_v5, %v4839_v30 }
0x105d   : > { %v4805_v3 = vsub.f32 %v4789_v7, %v4797_v51  ;;  %v4914_v24 = vmul.f32 %v4843_v33, %v4818_v54 }
0x105e   : > { %v4847_v44 = vmul.f32 0.5, %v4846_v9 }
0x105f   : > { %v4813_v15 = vmax.f32 %v4805_v3, 0.0  ;;  %v4922_v51 = vpack.c.bf16 %v4914_v24, %v4914_v24 }
0x1060   : > { %v4747_v26 = vpop.xlane.xlu1 %4746  ;;  %v4848_v42 = vsub.f32 1.5, %v4847_v44 }
0x1061   : > { %v7405_v25 = vpop.eup %7404  ;;  %v9777_v55 = vmul.f32 %v4747_v26, %v9570_v39  ;;  %v4829_v11 = vadd.f32 1e-05, %v4813_v15 }
0x1062   : > { %v4855_v63 = vmul.f32 %v7405_v25, %v4828_v50  ;;  %v4771_v59 = vpop.xlane.xlu2 %4770  ;;  %v4849_v53 = vmul.f32 %v7403_v36, %v4848_v42  ;;  %v4938_v42 = vunpack.c.l.b16 %v4922_v51  ;;  %vm4861_vm6 = vweird.f32 %v7405_v25 }
0x1063   : > { %v4798_v5 = vmul.f32 %v9777_v55, %v9777_v55  ;;  %v4790_v28 = vmul.f32 %v4771_v59, %v9570_v39  ;;  %7406 = vrsqrt.f32 %v4829_v11  ;;  %vm9794_vm9 = vmor %vm4860_vm8, %vm4861_vm6  ;;  %vm4870_vm11 = vweird.f32 %v4829_v11 }
0x1064   : > { %v4856_v27 = vmul.f32 %v7405_v25, %v4855_v63  ;;  %v4853_v30 = vsel %vm4852_vm15, %v7403_v36, %v4849_v53 }
0x1065   : > { %v4806_v14 = vsub.f32 %v4790_v28, %v4798_v5  ;;  %v4915_v7 = vmul.f32 %v4853_v30, %v4819_v22 }
0x1066   : > { %v4857_v9 = vmul.f32 0.5, %v4856_v27 }
0x1067   : > { %v4814_v3 = vmax.f32 %v4806_v14, 0.0  ;;  %v4923_v33 = vpack.c.bf16 %v4915_v7, %v4915_v7  ;;  %v4820_v14 = vsub.f32 %v9705_v48, %v9764_v0 }
0x1068   : > { %v4858_v44 = vsub.f32 1.5, %v4857_v9  ;;  %v4749_v54 = vpop.xlane.xlu0 %4748 }
0x1069   : > { %v9783_v43 = vadd.f32 1e-05, %v4814_v3  ;;  %v9786_v15 = vmul.f32 %v4749_v54, %v9570_v39  ;;  %v7407_v26 = vpop.eup %7406  ;;  %v4939_v31 = vunpack.c.l.b16 %v4923_v33 }
0x106a   : > { %v4773_v57 = vpop.xlane.xlu1 %4772  ;;  %v4859_v63 = vmul.f32 %v7405_v25, %v4858_v44  ;;  %v4865_v36 = vmul.f32 %v7407_v26, %v4829_v11  ;;  %vm4871_vm10 = vweird.f32 %v7407_v26 }
0x106b   : > { %7408 = vrsqrt.f32 %v9783_v43  ;;  %v4799_v24 = vmul.f32 %v9786_v15, %v9786_v15  ;;  %v4791_v59 = vmul.f32 %v4773_v57, %v9570_v39  ;;  %v9792_v5 = vpack.c.b16 %v4939_v31, %v4938_v42  ;;  %vm4872_vm12 = vmor %vm4870_vm11, %vm4871_vm10 }
0x106c   : > { %v4866_v53 = vmul.f32 %v7407_v26, %v4865_v36  ;;  %v4863_v27 = vsel %vm9794_vm9, %v7405_v25, %v4859_v63  ;;  %v4821_v31 = vsub.f32 %v9710_v49, %v9770_v1  ;;  %vm4880_vm15 = vweird.f32 %v9783_v43 }
0x106d   : > { %v4807_v22 = vsub.f32 %v4791_v59, %v4799_v24  ;;  %4962 = vmatmul.bf16.vlgmr.msra.gmra.mxu1 %v9792_v5  ;;  %4991 = vmatmul.bf16.vlgmr.msra.gmra.mxu2 %v9792_v5  ;;  %v4916_v25 = vmul.f32 %v4863_v27, %v4820_v14 }
0x106e   : > { %v4867_v30 = vmul.f32 0.5, %v4866_v53  ;;  %5020 = vmatmul.bf16.vlgmr.msrb.gmra.mxu0 %v9792_v5  ;;  %5049 = vmatmul.bf16.vlgmr.msra.gmra.mxu3 %v9792_v5 }
0x106f   : > { %v4815_v50 = vmax.f32 %v4807_v22, 0.0  ;;  %5717 = vmatpush.bf16.msra.mxu3 %v9318_v16  ;;  %v4924_v24 = vpack.c.bf16 %v4916_v25, %v4916_v25 }
0x1070   : > { %v4751_v51 = vpop.xlane.xlu0 %4750  ;;  %v4868_v9 = vsub.f32 1.5, %v4867_v30 }
0x1071   : > { %v7409_v7 = vpop.eup %7408  ;;  %v9807_v3 = vmul.f32 %v4751_v51, %v9570_v39  ;;  %v4831_v44 = vadd.f32 1e-05, %v4815_v50  ;;  %v10484_v50 = vld [vmem:[#allocation19_spill] sm:$0xff]  ;;  %v4940_v1 = vunpack.c.l.b16 %v4924_v24 }
0x1072   : > { %v4875_v33 = vmul.f32 %v7409_v7, %v9783_v43  ;;  %v4775_v54 = vpop.xlane.xlu1 %4774  ;;  %v4869_v48 = vmul.f32 %v7407_v26, %v4868_v9  ;;  %vm4881_vm14 = vweird.f32 %v7409_v7 }
0x1073   : > { %v4800_v0 = vmul.f32 %v9807_v3, %v9807_v3  ;;  %v4792_v42 = vmul.f32 %v4775_v54, %v9570_v39  ;;  %7410 = vrsqrt.f32 %v4831_v44  ;;  %5718 = vmatpush.bf16.msra.mxu3 %v9321_v58  ;;  %vm4882_vm6 = vmor %vm4880_vm15, %vm4881_vm14  ;;  %vm4890_vm9 = vweird.f32 %v4831_v44 }
0x1074   : > { %v4876_v57 = vmul.f32 %v7409_v7, %v4875_v33  ;;  %v4873_v63 = vsel %vm4872_vm12, %v7407_v26, %v4869_v48 }
0x1075   : > { %v4808_v36 = vsub.f32 %v4792_v42, %v4800_v0  ;;  %v4917_v59 = vmul.f32 %v4873_v63, %v4821_v31  ;;  %v10485_v42 = vld [vmem:[#allocation26_spill] sm:$0xff] }
0x1076   : > { %v4877_v53 = vmul.f32 0.5, %v4876_v57 }
0x1077   : > { %v4816_v28 = vmax.f32 %v4808_v36, 0.0  ;;  %v4925_v11 = vpack.c.bf16 %v4917_v59, %v4917_v59  ;;  %5719 = vmatpush.bf16.msra.mxu3 %v10484_v50  ;;  %v4822_v36 = vsub.f32 %v9715_v8, %v9777_v55 }
0x1078   : > { %v4878_v22 = vsub.f32 1.5, %v4877_v53  ;;  %v4753_v27 = vpop.xlane.xlu2 %4752  ;;  %v10486_v53 = vld [vmem:[#allocation8_spill] sm:$0xff] }
0x1079   : > { %v4832_v30 = vadd.f32 1e-05, %v4816_v28  ;;  %v9818_v14 = vmul.f32 %v4753_v27, %v9570_v39  ;;  %v7411_v49 = vpop.eup %7410  ;;  %v4941_v51 = vunpack.c.l.b16 %v4925_v11  ;;  %v4823_v27 = vsub.f32 %v9720_v47, %v9786_v15 }
0x107a   : > { %v4777_v26 = vpop.xlane.xlu0 %4776  ;;  %v4879_v9 = vmul.f32 %v7409_v7, %v4878_v22  ;;  %v4885_v33 = vmul.f32 %v7411_v49, %v4831_v44  ;;  %vm4891_vm8 = vweird.f32 %v7411_v49 }
0x107b   : > { %7412 = vrsqrt.f32 %v4832_v30  ;;  %v4801_v25 = vmul.f32 %v9818_v14, %v9818_v14  ;;  %v4793_v54 = vmul.f32 %v4777_v26, %v9570_v39  ;;  %v9825_v0 = vpack.c.b16 %v4941_v51, %v4940_v1  ;;  %5720 = vmatpush.bf16.msra.mxu3 %v10485_v42  ;;  %vm4892_vm10 = vmor %vm4890_vm9, %vm4891_vm8  ;;  %v10487_v1 = vld [vmem:[#allocation17_spill] sm:$0xff] }
0x107c   : > { %v4886_v48 = vmul.f32 %v7411_v49, %v4885_v33  ;;  %v4883_v57 = vsel %vm4882_vm6, %v7409_v7, %v4879_v9  ;;  %vm4900_vm12 = vweird.f32 %v4832_v30 }
0x107d   : > { %v4809_v31 = vsub.f32 %v4793_v54, %v4801_v25  ;;  %4967 = vmatmul.bf16.gmra.mxu1 %v9825_v0  ;;  %4996 = vmatmul.bf16.gmra.mxu2 %v9825_v0  ;;  %v4918_v28 = vmul.f32 %v4883_v57, %v4822_v36  ;;  %v10488_v54 = vld [vmem:[#allocation7_spill] sm:$0xff] }
0x107e   : > { %v4887_v63 = vmul.f32 0.5, %v4886_v48  ;;  %5025 = vmatmul.bf16.gmra.mxu0 %v9825_v0  ;;  %5054 = vmatmul.bf16.gmra.mxu3 %v9825_v0 }
0x107f   : > { %v4817_v24 = vmax.f32 %v4809_v31, 0.0  ;;  %5721 = vmatpush.bf16.msra.mxu3 %v10486_v53  ;;  %v4926_v51 = vpack.c.bf16 %v4918_v28, %v4918_v28 }
0x1080   : > { %v4888_v59 = vsub.f32 1.5, %v4887_v63 }
0x1081   : > { %v7413_v43 = vpop.eup %7412  ;;  %v4833_v11 = vadd.f32 1e-05, %v4817_v24  ;;  %v4942_v31 = vunpack.c.l.b16 %v4926_v51 }
0x1082   : > { %v4895_v7 = vmul.f32 %v7413_v43, %v4832_v30  ;;  %v4889_v22 = vmul.f32 %v7411_v49, %v4888_v59  ;;  %vm4901_vm11 = vweird.f32 %v7413_v43  ;;  %v4824_v59 = vsub.f32 %v9725_v37, %v9807_v3 }
0x1083   : > { %7414 = vrsqrt.f32 %v4833_v11  ;;  %5722 = vmatpush.bf16.msra.mxu3 %v10487_v1  ;;  %vm4902_vm14 = vmor %vm4900_vm12, %vm4901_vm11  ;;  %vm4910_vm6 = vweird.f32 %v4833_v11 }
0x1084   : > { %v4896_v8 = vmul.f32 %v7413_v43, %v4895_v7  ;;  %v4893_v55 = vsel %vm4892_vm10, %v7411_v49, %v4889_v22  ;;  %v10489_v49 = vld [vmem:[#allocation18_spill] sm:$0xff] }
0x1085   : > { %v4919_v26 = vmul.f32 %v4893_v55, %v4823_v27 }
0x1086   : > { %v4897_v9 = vmul.f32 0.5, %v4896_v8 }
0x1087   : > { %v4927_v33 = vpack.c.bf16 %v4919_v26, %v4919_v26  ;;  %5723 = vmatpush.bf16.msra.mxu3 %v10488_v54 }
0x1088   : > { %v4898_v25 = vsub.f32 1.5, %v4897_v9 }
0x1089   : > { %v7415_v48 = vpop.eup %7414  ;;  %v4943_v57 = vunpack.c.l.b16 %v4927_v33 }
0x108a   : > { %v4899_v44 = vmul.f32 %v7413_v43, %v4898_v25  ;;  %v4905_v63 = vmul.f32 %v7415_v48, %v4833_v11  ;;  %vm4911_vm15 = vweird.f32 %v7415_v48 }
0x108b   : > { %v9839_v47 = vpack.c.b16 %v4943_v57, %v4942_v31  ;;  %5724 = vmatpush.bf16.msra.mxu3 %v10489_v49  ;;  %vm4912_vm8 = vmor %vm4910_vm6, %vm4911_vm15 }
0x108c   : > { %v4906_v15 = vmul.f32 %v7415_v48, %v4905_v63  ;;  %v4903_v36 = vsel %vm4902_vm14, %v7413_v43, %v4899_v44  ;;  %v4825_v43 = vsub.f32 %v9730_v35, %v9818_v14 }
0x108d   : > { %4972 = vmatmul.bf16.gmra.mxu1 %v9839_v47  ;;  %5001 = vmatmul.bf16.gmra.mxu2 %v9839_v47  ;;  %v4920_v30 = vmul.f32 %v4903_v36, %v4824_v59 }
0x108e   : > { %v4907_v24 = vmul.f32 0.5, %v4906_v15  ;;  %5030 = vmatmul.bf16.gmra.mxu0 %v9839_v47  ;;  %5059 = vmatmul.bf16.gmra.mxu3 %v9839_v47 }
0x108f   : > { %v4928_v27 = vpack.c.bf16 %v4920_v30, %v4920_v30 }
0x1090   : > { %v4908_v28 = vsub.f32 1.5, %v4907_v24 }
0x1091   : > { %v4944_v51 = vunpack.c.l.b16 %v4928_v27 }
0x1092   : > { %v4909_v7 = vmul.f32 %v7415_v48, %v4908_v28 }
0x1094   : > { %v4913_v22 = vsel %vm4912_vm8, %v7415_v48, %v4909_v7 }
0x1095   : > { %v4921_v8 = vmul.f32 %v4913_v22, %v4825_v43 }
0x1097   : > { %v4929_v55 = vpack.c.bf16 %v4921_v8, %v4921_v8 }
0x1099   : > { %v4945_v26 = vunpack.c.l.b16 %v4929_v55 }
0x109b   : > { %v9850_v37 = vpack.c.b16 %v4945_v26, %v4944_v51 }
0x109d   : > { %4977 = vmatmul.bf16.gmra.mxu1 %v9850_v37  ;;  %5006 = vmatmul.bf16.gmra.mxu2 %v9850_v37 }
0x109e   : > { %5035 = vmatmul.bf16.gmra.mxu0 %v9850_v37  ;;  %5064 = vmatmul.bf16.gmra.mxu3 %v9850_v37 }
0x10ea   : > { %v9856_v3 = vpop.f32.mrf.mxu1 }
0x10eb   : > { %v9858_v35 = vpop.f32.mrf.mxu0 }
0x10f0   : > { %v9860_v14 = vpop.f32.mrf.mxu2 }
0x10f1   : > { %v9862_v11 = vpop.f32.mrf.mxu3 }
0x10f2   : > { %v9864_v9 = vpop.f32.mrf.mxu1 }
0x10f3   : > { %v9866_v33 = vpop.f32.mrf.mxu0 }
0x10f8   : > { %v9868_v25 = vpop.f32.mrf.mxu2 }
0x10f9   : > { %v9870_v48 = vpop.f32.mrf.mxu3 }
0x10fa   : > { %v4968_v31 = vpop.f32.mrf.mxu1 }
0x10fb   : > { %v5026_v57 = vpop.f32.mrf.mxu0 }
0x10fc   : > { %v5088_v23 = vand.u32 2147483647, %v5026_v57 }
0x1100   : > { %v9872_v44 = vpop.f32.mrf.mxu2 }
0x1101   : > { %v9874_v15 = vpop.f32.mrf.mxu3 }
0x1102   : > { %v4970_v63 = vpop.f32.mrf.mxu1 }
0x1103   : > { %v5028_v36 = vpop.f32.mrf.mxu0  ;;  %v5073_v46 = vpack.c.bf16 %v4970_v63, %v4970_v63 }
0x1104   : > { %v5089_v38 = vand.u32 2147483647, %v5028_v36 }
0x1108   : > { %v9876_v24 = vpop.f32.mrf.mxu2 }
0x1109   : > { %v9878_v30 = vpop.f32.mrf.mxu3 }
0x110a   : > { %v4973_v59 = vpop.f32.mrf.mxu1 }
0x110b   : > { %v5031_v28 = vpop.f32.mrf.mxu0  ;;  %v5074_v62 = vpack.c.bf16 %v4973_v59, %v4973_v59 }
0x110c   : > { %v5090_v2 = vand.u32 2147483647, %v5031_v28  ;;  %v5087_v28 = vand.u32 2147483647, %v9866_v33 }
0x1110   : > { %v9880_v7 = vpop.f32.mrf.mxu2 }
0x1111   : > { %v9882_v27 = vpop.f32.mrf.mxu3 }
0x1112   : > { %v4975_v43 = vpop.f32.mrf.mxu1 }
0x1113   : > { %v5033_v22 = vpop.f32.mrf.mxu0  ;;  %v5075_v18 = vpack.c.bf16 %v4975_v43, %v4975_v43  ;;  %v5072_v43 = vpack.c.bf16 %v4968_v31, %v4968_v31 }
0x1114   : > { %v5091_v10 = vand.u32 2147483647, %v5033_v22 }
0x1116   : > { %v5099_v17 = vpack.c.bf16 %v5091_v10, %v5091_v10  ;;  %v5129_v10 = vunpack.c.l.b16 %v5073_v46 }
0x1118   : > { %v9884_v55 = vpop.f32.mrf.mxu2  ;;  %v5179_v59 = vunpack.c.l.b16 %v5099_v17 }
0x1119   : > { %v9886_v39 = vpop.f32.mrf.mxu3 }
0x111a   : > { %v4978_v8 = vpop.f32.mrf.mxu1 }
0x111b   : > { %v5036_v51 = vpop.f32.mrf.mxu0  ;;  %v5076_v29 = vpack.c.bf16 %v4978_v8, %v4978_v8  ;;  %v5098_v8 = vpack.c.bf16 %v5090_v2, %v5090_v2 }
0x111c   : > { %v5092_v26 = vand.u32 2147483647, %v5036_v51  ;;  %v5131_v51 = vunpack.c.l.b16 %v5075_v18  ;;  %v5095_v18 = vpack.c.bf16 %v5087_v28, %v5087_v28 }
0x111d   : > { %v5132_v12 = vunpack.c.l.b16 %v5076_v29  ;;  %v5178_v2 = vunpack.c.l.b16 %v5098_v8 }
0x111e   : > { %v5100_v52 = vpack.c.bf16 %v5092_v26, %v5092_v26 }
0x111f   : > { %v5184_v17 = vpack.c.b16 %v5179_v59, %v5178_v2 }
0x1120   : > { %v5007_v34 = vpop.f32.mrf.mxu2  ;;  %v5180_v22 = vunpack.c.l.b16 %v5100_v52  ;;  %v5128_v52 = vunpack.c.l.b16 %v5072_v43  ;;  %v5082_v43 = vpack.c.bf16 %v9880_v7, %v9880_v7  ;;  %v5079_v7 = vpack.c.bf16 %v9868_v25, %v9868_v25  ;;  %v7309_v25 = vld [vmem:[%s10249_s9 + $0x8] sm:$0xf0] }
0x1121   : > { %v5084_v26 = vpack.c.bf16 %v5007_v34, %v5007_v34 }
0x1122   : > { %v4980_v40 = vpop.f32.mrf.mxu1 }
0x1123   : > { %v5077_v32 = vpack.c.bf16 %v4980_v40, %v4980_v40  ;;  %v5038_v6 = vpop.f32.mrf.mxu0  ;;  %v5130_v40 = vunpack.c.l.b16 %v5074_v62 }
0x1124   : > { %v5093_v4 = vand.u32 2147483647, %v5038_v6  ;;  %v5097_v6 = vpack.c.bf16 %v5089_v38, %v5089_v38 }
0x1125   : > { %v5133_v21 = vunpack.c.l.b16 %v5077_v32  ;;  %v5071_v32 = vpack.c.bf16 %v9864_v9, %v9864_v9  ;;  %v5136_v63 = vpack.c.b16 %v5131_v51, %v5130_v40  ;;  %v5083_v51 = vpack.c.bf16 %v9884_v55, %v9884_v55 }
0x1126   : > { %v5101_v13 = vpack.c.bf16 %v5093_v4, %v5093_v4  ;;  %v5065_v4 = vpop.f32.mrf.mxu3  ;;  %v5177_v38 = vunpack.c.l.b16 %v5097_v6  ;;  %v5156_v40 = vunpack.c.l.b16 %v5084_v26  ;;  %v5081_v6 = vpack.c.bf16 %v9876_v24, %v9876_v24 }
0x1127   : > { %v5137_v60 = vpack.c.b16 %v5133_v21, %v5132_v12  ;;  %v5086_v21 = vand.u32 2147483647, %v9858_v35  ;;  %v5096_v12 = vpack.c.bf16 %v5088_v23, %v5088_v23  ;;  %v5175_v35 = vunpack.c.l.b16 %v5095_v18 }
0x1128   : > { %v5181_v19 = vunpack.c.l.b16 %v5101_v13  ;;  %v5070_v13 = vpack.c.bf16 %v9856_v3, %v9856_v3  ;;  %v5009_v62 = vpop.f32.mrf.mxu2  ;;  %v5155_v34 = vunpack.c.l.b16 %v5083_v51  ;;  %v5108_v59 = vand.u32 2147483647, %v5065_v4 }
0x1129   : > { %5282 = vmatpush.bf16.msrb.mxu1 %v5137_v60  ;;  %v5135_v60 = vpack.c.b16 %v5129_v10, %v5128_v52  ;;  %v5094_v9 = vpack.c.bf16 %v5086_v21, %v5086_v21  ;;  %v5176_v46 = vunpack.c.l.b16 %v5096_v12  ;;  %v5085_v31 = vpack.c.bf16 %v5009_v62, %v5009_v62 }
0x112a   : > { %v5185_v29 = vpack.c.b16 %v5181_v19, %v5180_v22  ;;  %v5127_v19 = vunpack.c.l.b16 %v5071_v32  ;;  %v5126_v33 = vunpack.c.l.b16 %v5070_v13  ;;  %v5080_v32 = vpack.c.bf16 %v9872_v44, %v9872_v44 }
0x112b   : > { %v5183_v23 = vpack.c.b16 %v5177_v38, %v5176_v46  ;;  %v5174_v36 = vunpack.c.l.b16 %v5094_v9  ;;  %v5157_v8 = vunpack.c.l.b16 %v5085_v31  ;;  %v5154_v55 = vunpack.c.l.b16 %v5082_v43  ;;  %v7308_v9 = vld [vmem:[%s10249_s9 + $0x4] sm:$0xf]  ;;  %v7054_v46 = vld [vmem:[%s10249_s9 + $0xc] sm:$0xf0] }
0x112c   : > { %5301 = vmatpush.bf16.msrb.mxu2 %v5185_v29  ;;  %v5134_v57 = vpack.c.b16 %v5127_v19, %v5126_v33  ;;  %v5107_v10 = vand.u32 2147483647, %v9886_v39  ;;  %v5106_v21 = vand.u32 2147483647, %v9882_v27  ;;  %v5116_v24 = vpack.c.bf16 %v5108_v59, %v5108_v59  ;;  %v7312_v43 = vld [vmem:[%s10249_s9 + $0x20] sm:$0xf0] }
0x112d   : > { %5283 = vmatpush.bf16.msrb.mxu1 %v5136_v63  ;;  %v5182_v22 = vpack.c.b16 %v5175_v35, %v5174_v36  ;;  %v5161_v29 = vpack.c.b16 %v5157_v8, %v5156_v40  ;;  %v5160_v12 = vpack.c.b16 %v5155_v34, %v5154_v55  ;;  %v5078_v4 = vpack.c.bf16 %v9860_v14, %v9860_v14  ;;  %v7060_v59 = vld [vmem:[%s10249_s9 + $0x8] sm:$0xf]  ;;  %v10490_v55 = vld [vmem:[#allocation24_spill] sm:$0xff] }
0x112e   : > { %v5067_v3 = vpop.f32.mrf.mxu3  ;;  %v5152_v2 = vunpack.c.l.b16 %v5080_v32  ;;  %v5105_v44 = vand.u32 2147483647, %v9878_v30  ;;  %v5115_v13 = vpack.c.bf16 %v5107_v10, %v5107_v10  ;;  %v5151_v52 = vunpack.c.l.b16 %v5079_v7  ;;  %v10491_v10 = vld [vmem:[#allocation12_spill] sm:$0xff]  ;;  %v10493_v7 = vld [vmem:[#allocation23_spill] sm:$0xff] }
0x112f   : > { %v5109_v28 = vand.u32 2147483647, %v5067_v3  ;;  %v5104_v27 = vand.u32 2147483647, %v9874_v15  ;;  %v5114_v14 = vpack.c.bf16 %v5106_v21, %v5106_v21  ;;  %v5204_v18 = vunpack.c.l.b16 %v5116_v24  ;;  %v7313_v21 = vld [vmem:[%s10249_s9 + $0x28] sm:$0xf0] }
0x1130   : > { %5302 = vmatpush.bf16.msrb.mxu2 %v5184_v17  ;;  %v5150_v30 = vunpack.c.l.b16 %v5078_v4  ;;  %v5103_v17 = vand.u32 2147483647, %v9870_v48  ;;  %v5113_v19 = vpack.c.bf16 %v5105_v44, %v5105_v44  ;;  %v5203_v62 = vunpack.c.l.b16 %v5115_v13  ;;  %v10495_v4 = vld [vmem:[#allocation32_spill] sm:$0xff]  ;;  %v10497_v44 = vld [vmem:[#allocation11_spill] sm:$0xff] }
0x1131   : > { %5284 = vmatpush.bf16.msrb.mxu1 %v5135_v60  ;;  %v5117_v63 = vpack.c.bf16 %v5109_v28, %v5109_v28  ;;  %v5102_v15 = vand.u32 2147483647, %v9862_v11  ;;  %v5112_v33 = vpack.c.bf16 %v5104_v27, %v5104_v27  ;;  %v5202_v35 = vunpack.c.l.b16 %v5114_v14  ;;  %v7311_v28 = vld [vmem:[%s10249_s9 + $0x1c] sm:$0xf]  ;;  %v10498_v13 = vld [vmem:[#allocation20_spill] sm:$0xff] }
0x1132   : > { %v5158_v48 = vpack.c.b16 %v5151_v52, %v5150_v30  ;;  %v5111_v31 = vpack.c.bf16 %v5103_v17, %v5103_v17  ;;  %v10500_v52 = vld [vmem:[#allocation21_spill] sm:$0xff] }
0x1133   : > { %v5205_v39 = vunpack.c.l.b16 %v5117_v63  ;;  %v5208_v36 = vpack.c.b16 %v5203_v62, %v5202_v35  ;;  %v5110_v26 = vpack.c.bf16 %v5102_v15, %v5102_v15  ;;  %v5200_v3 = vunpack.c.l.b16 %v5112_v33  ;;  %v10492_v63 = vld [vmem:[#allocation25_spill] sm:$0xff] }
0x1134   : > { %5303 = vmatpush.bf16.msrb.mxu2 %v5183_v23  ;;  %v7057_v23 = vor.u32 %v7308_v9, %v7054_v46  ;;  %v5199_v51 = vunpack.c.l.b16 %v5111_v31 }
0x1135   : > { %5285 = vmatpush.bf16.msrb.mxu1 %v5134_v57  ;;  %v5209_v60 = vpack.c.b16 %v5205_v39, %v5204_v18  ;;  %v5201_v57 = vunpack.c.l.b16 %v5113_v19  ;;  %v5198_v11 = vunpack.c.l.b16 %v5110_v26  ;;  %v10499_v39 = vld [vmem:[#allocation9_spill] sm:$0xff]  ;;  %v5239_v26 = vpop.permute.xlu0 %5238 }
0x1137   : > { %v5206_v8 = vpack.c.b16 %v5199_v51, %v5198_v11 }
0x1138   : > { %5304 = vmatpush.bf16.msrb.mxu2 %v5182_v22  ;;  %v7064_v22 = vld [vmem:[%s10249_s9 + $0x18] sm:$0xf] }
0x1139   : > { %5286 = vmatpush.bf16.msrb.mxu1 %v9850_v37  ;;  %v5153_v37 = vunpack.c.l.b16 %v5081_v6  ;;  %v7065_v40 = vor.u32 %v7312_v43, %v7064_v22  ;;  %v7066_v6 = vld [vmem:[%s10249_s9 + $0x24] sm:$0xf0] }
0x113a   : > { %v7069_v34 = vor.u32 %v7311_v28, %v7066_v6 }
0x113b   : > { %v5159_v38 = vpack.c.b16 %v5153_v37, %v5152_v2  ;;  %v7072_v37 = vld [vmem:[%s10249_s9 + $0x20] sm:$0xf] }
0x113c   : > { %5305 = vmatpush.bf16.msrb.mxu2 %v5161_v29  ;;  %v7310_v29 = vld [vmem:[%s10249_s9 + $0x10] sm:$0xf0]  ;;  %v7073_v24 = vor.u32 %v7313_v21, %v7072_v37  ;;  %v10496_v2 = vld [vmem:[#allocation30_spill] sm:$0xff] }
0x113d   : > { %5287 = vmatpush.bf16.msrb.mxu1 %v9839_v47  ;;  %v7052_v47 = vld [vmem:[%s10249_s9] sm:$0xf]  ;;  %v7061_v32 = vor.u32 %v7310_v29, %v7060_v59 }
0x1140   : > { %5306 = vmatpush.bf16.msrb.mxu2 %v5160_v12  ;;  %v10494_v12 = vld [vmem:[#allocation31_spill] sm:$0xff] }
0x1141   : > { %5288 = vmatpush.bf16.msrb.mxu1 %v9825_v0  ;;  %v7053_v0 = vor.u32 %v7309_v25, %v7052_v47 }
0x1144   : > { %5307 = vmatpush.bf16.msrb.mxu2 %v5159_v38  ;;  %v5229_v38 = vpop.permute.xlu2 %5228 }
0x1145   : > { %5289 = vmatpush.bf16.msrb.mxu1 %v9792_v5  ;;  %v5207_v5 = vpack.c.b16 %v5201_v57, %v5200_v3 }
0x1148   : > { %5308 = vmatpush.bf16.msrb.mxu2 %v5158_v48  ;;  %5290 = vmatmul.bf16.vlgmr.msrb.gmra.mxu1 %v7053_v0 }
0x1149   : > { %5324 = vmatpush.bf16.msra.mxu1 %v5209_v60  ;;  %v5234_v60 = vpop.permute.xlu1 %5233 }
0x114b   : > { %5309 = vmatmul.bf16.vlgmr.msrb.gmra.mxu2 %v7057_v23 }
0x114c   : > { %5355 = vmatpush.bf16.msra.mxu2 %v9318_v16  ;;  %v5244_v11 = vpop.permute.xlu2 %5243 }
0x114d   : > { %5325 = vmatpush.bf16.msra.mxu1 %v5208_v36 }
0x1150   : > { %5356 = vmatpush.bf16.msra.mxu2 %v9321_v58 }
0x1151   : > { %5326 = vmatpush.bf16.msra.mxu1 %v5207_v5 }
0x1154   : > { %5357 = vmatpush.bf16.msra.mxu2 %v10484_v50 }
0x1155   : > { %5327 = vmatpush.bf16.msra.mxu1 %v5206_v8 }
0x1158   : > { %5358 = vmatpush.bf16.msra.mxu2 %v10485_v42  ;;  %5295 = vmatmul.bf16.gmra.mxu1 %v7065_v40 }
0x1159   : > { %5412 = vmatpush.bf16.msrb.mxu1 %v9343_v45 }
0x115b   : > { %5314 = vmatmul.bf16.gmra.mxu2 %v7069_v34 }
0x115c   : > { %5359 = vmatpush.bf16.msra.mxu2 %v10486_v53 }
0x115d   : > { %5413 = vmatpush.bf16.msrb.mxu1 %v9356_v56 }
0x1160   : > { %5360 = vmatpush.bf16.msra.mxu2 %v10487_v1 }
0x1161   : > { %5414 = vmatpush.bf16.msrb.mxu1 %v9364_v61 }
0x1164   : > { %5361 = vmatpush.bf16.msra.mxu2 %v10488_v54 }
0x1165   : > { %5415 = vmatpush.bf16.msrb.mxu1 %v9376_v41 }
0x1168   : > { %5362 = vmatpush.bf16.msra.mxu2 %v10489_v49  ;;  %7074 = vmatmul.msk.bf16.vlgmr.msra.gmra.mxu1 %vm2443_vm13, %v7061_v32 }
0x1169   : > { %5416 = vmatpush.bf16.msrb.mxu1 %v9388_v20 }
0x116d   : > { %5417 = vmatpush.bf16.msrb.mxu1 %v10490_v55 }
0x1171   : > { %5418 = vmatpush.bf16.msrb.mxu1 %v10491_v10 }
0x1175   : > { %5419 = vmatpush.bf16.msrb.mxu1 %v10492_v63 }
0x1178   : > { %7075 = vmatmul.msk.bf16.gmra.mxu1 %vm2443_vm13, %v7073_v24 }
0x1179   : > { %5736 = vmatpush.bf16.msra.mxu1 %v10493_v7 }
0x117d   : > { %5737 = vmatpush.bf16.msra.mxu1 %v10494_v12 }
0x1181   : > { %5738 = vmatpush.bf16.msra.mxu1 %v10495_v4 }
0x1185   : > { %5739 = vmatpush.bf16.msra.mxu1 %v10496_v2 }
0x1189   : > { %5740 = vmatpush.bf16.msra.mxu1 %v10497_v44 }
0x118d   : > { %5741 = vmatpush.bf16.msra.mxu1 %v10498_v13 }
0x1191   : > { %5742 = vmatpush.bf16.msra.mxu1 %v10499_v39 }
0x1195   : > { %5743 = vmatpush.bf16.msra.mxu1 %v10500_v52 }
0x11c5   : > { %v5291_v47 = vpop.f32.mrf.mxu1 }
0x11c6   : > { %v5292_v19 = vadd.f32 %v5291_v47, %v5229_v38 }
0x11cd   : > { %v5293_v25 = vpop.f32.mrf.mxu1 }
0x11ce   : > { %v5310_v14 = vpop.f32.mrf.mxu2  ;;  %v5294_v0 = vadd.f32 %v5293_v25, %v5234_v60 }
0x11cf   : > { %v5311_v62 = vadd.f32 %v5310_v14, %v5292_v19 }
0x11d5   : > { %v5296_v27 = vpop.f32.mrf.mxu1 }
0x11d6   : > { %v5312_v30 = vpop.f32.mrf.mxu2  ;;  %v5297_v51 = vadd.f32 %v5296_v27, %v5239_v26 }
0x11d7   : > { %v5313_v46 = vadd.f32 %v5312_v30, %v5294_v0 }
0x11dd   : > { %v5298_v18 = vpop.f32.mrf.mxu1 }
0x11de   : > { %v5315_v48 = vpop.f32.mrf.mxu2  ;;  %v5299_v22 = vadd.f32 %v5298_v18, %v5244_v11 }
0x11df   : > { %v5316_v5 = vadd.f32 %v5315_v48, %v5297_v51 }
0x11e5   : > { %v5329_v17 = vpop.f32.mrf.mxu1 }
0x11e6   : > { %v5330_v9 = vadd.f32 %v5329_v17, %v5311_v62  ;;  %v5317_v8 = vpop.f32.mrf.mxu2 }
0x11e7   : > { %v5318_v40 = vadd.f32 %v5317_v8, %v5299_v22 }
0x11e8   : > { %v5339_v33 = vpack.c.bf16 %v5330_v9, %v5330_v9 }
0x11ea   : > { %v5347_v31 = vunpack.c.l.b16 %v5339_v33 }
0x11ed   : > { %v5331_v15 = vpop.f32.mrf.mxu1 }
0x11ee   : > { %v5332_v35 = vadd.f32 %v5331_v15, %v5313_v46 }
0x11f0   : > { %v5340_v23 = vpack.c.bf16 %v5332_v35, %v5332_v35 }
0x11f2   : > { %v5348_v57 = vunpack.c.l.b16 %v5340_v23 }
0x11f4   : > { %v9978_v36 = vpack.c.b16 %v5348_v57, %v5347_v31 }
0x11f5   : > { %v5334_v3 = vpop.f32.mrf.mxu1 }
0x11f6   : > { %5363 = vmatmul.bf16.vlgmr.msra.gmra.mxu2 %v9978_v36  ;;  %5382 = vmatmul.bf16.vlgmr.msra.gmra.mxu0 %v9978_v36  ;;  %v5335_v43 = vadd.f32 %v5334_v3, %v5316_v5 }
0x11f7   : > { %5401 = vmatmul.bf16.vlgmr.msrb.gmra.mxu3 %v9978_v36  ;;  %5420 = vmatmul.bf16.vlgmr.msrb.gmra.mxu1 %v9978_v36 }
0x11f8   : > { %v5341_v6 = vpack.c.bf16 %v5335_v43, %v5335_v43 }
0x11fa   : > { %v5349_v29 = vunpack.c.l.b16 %v5341_v6 }
0x11fd   : > { %v5336_v28 = vpop.f32.mrf.mxu1 }
0x11fe   : > { %v5337_v34 = vadd.f32 %v5336_v28, %v5318_v40 }
0x1200   : > { %v5342_v59 = vpack.c.bf16 %v5337_v34, %v5337_v34 }
0x1202   : > { %v5350_v32 = vunpack.c.l.b16 %v5342_v59 }
0x1204   : > { %v9984_v37 = vpack.c.b16 %v5350_v32, %v5349_v29 }
0x1206   : > { %5368 = vmatmul.bf16.gmra.mxu2 %v9984_v37  ;;  %5387 = vmatmul.bf16.gmra.mxu0 %v9984_v37 }
0x1207   : > { %5406 = vmatmul.bf16.gmra.mxu3 %v9984_v37  ;;  %5425 = vmatmul.bf16.gmra.mxu1 %v9984_v37 }
0x1273   : > { %v9990_v24 = vpop.f32.mrf.mxu0 }
0x1274   : > { %v5421_v21 = vpop.f32.mrf.mxu1 }
0x1275   : > { %v5447_v9 = vand.u32 2147483647, %v5421_v21 }
0x1277   : > { %v5451_v23 = vpack.c.bf16 %v5447_v9, %v5447_v9 }
0x1279   : > { %v9992_v27 = vpop.f32.mrf.mxu2  ;;  %v5495_v40 = vunpack.c.l.b16 %v5451_v23 }
0x127a   : > { %v5402_v47 = vpop.f32.mrf.mxu3 }
0x127b   : > { %v5385_v14 = vpop.f32.mrf.mxu0  ;;  %v5439_v3 = vand.u32 2147483647, %v5402_v47  ;;  %v7080_v47 = vld [vmem:[%s10251_s11 + $0x8] sm:$0xf0] }
0x127c   : > { %v5423_v25 = vpop.f32.mrf.mxu1  ;;  %v5436_v9 = vpack.c.bf16 %v5385_v14, %v5385_v14 }
0x127d   : > { %v5448_v62 = vand.u32 2147483647, %v5423_v25  ;;  %v5443_v59 = vpack.c.bf16 %v5439_v3, %v5439_v3  ;;  %v7314_v25 = vld [vmem:[%s10251_s11 + $0x4] sm:$0xf] }
0x127e   : > { %v5472_v23 = vunpack.c.l.b16 %v5436_v9 }
0x127f   : > { %v5452_v33 = vpack.c.bf16 %v5448_v62, %v5448_v62  ;;  %v5483_v62 = vunpack.c.l.b16 %v5443_v59  ;;  %v10501_v59 = vld [vmem:[#allocation27_spill] sm:$0xff] }
0x1281   : > { %v9994_v17 = vpop.f32.mrf.mxu2  ;;  %v5496_v5 = vunpack.c.l.b16 %v5452_v33 }
0x1282   : > { %v5404_v18 = vpop.f32.mrf.mxu3  ;;  %v5432_v14 = vpack.c.bf16 %v9994_v17, %v9994_v17 }
0x1283   : > { %v5388_v60 = vpop.f32.mrf.mxu0  ;;  %v5440_v31 = vand.u32 2147483647, %v5404_v18  ;;  %v5499_v29 = vpack.c.b16 %v5496_v5, %v5495_v40 }
0x1284   : > { %v5426_v38 = vpop.f32.mrf.mxu1 }
0x1285   : > { %v5449_v30 = vand.u32 2147483647, %v5426_v38  ;;  %v5444_v28 = vpack.c.bf16 %v5440_v31, %v5440_v31 }
0x1287   : > { %v5453_v46 = vpack.c.bf16 %v5449_v30, %v5449_v30  ;;  %v5484_v18 = vunpack.c.l.b16 %v5444_v28  ;;  %v7078_v28 = vld [vmem:[%s10251_s11] sm:$0xf] }
0x1289   : > { %v5497_v57 = vunpack.c.l.b16 %v5453_v46  ;;  %v5369_v43 = vpop.f32.mrf.mxu2  ;;  %v5487_v46 = vpack.c.b16 %v5484_v18, %v5483_v62  ;;  %v10506_v18 = vld [vmem:[#allocation15_spill] sm:$0xff]  ;;  %v5514_v62 = vpop.permute.xlu0 %5513 }
0x128a   : > { %v5407_v19 = vpop.f32.mrf.mxu3 }
0x128b   : > { %v5441_v35 = vand.u32 2147483647, %v5407_v19  ;;  %v5390_v34 = vpop.f32.mrf.mxu0  ;;  %v7083_v19 = vor.u32 %v7314_v25, %v7080_v47  ;;  %v10505_v47 = vld [vmem:[#allocation28_spill] sm:$0xff] }
0x128c   : > { %v5428_v0 = vpop.f32.mrf.mxu1  ;;  %v5438_v38 = vpack.c.bf16 %v5390_v34, %v5390_v34 }
0x128d   : > { %v5450_v15 = vand.u32 2147483647, %v5428_v0  ;;  %v5445_v11 = vpack.c.bf16 %v5441_v35, %v5441_v35  ;;  %v5437_v0 = vpack.c.bf16 %v5388_v60, %v5388_v60  ;;  %v5435_v35 = vpack.c.bf16 %v9990_v24, %v9990_v24 }
0x128e   : > { %v5431_v24 = vpack.c.bf16 %v9992_v27, %v9992_v27 }
0x128f   : > { %v5454_v48 = vpack.c.bf16 %v5450_v15, %v5450_v15  ;;  %v5485_v32 = vunpack.c.l.b16 %v5445_v11  ;;  %v5474_v15 = vunpack.c.l.b16 %v5438_v38  ;;  %v5471_v60 = vunpack.c.l.b16 %v5435_v35  ;;  %v7316_v11 = vld [vmem:[%s10251_s11 + $0x14] sm:$0xf]  ;;  %v10507_v38 = vld [vmem:[#allocation29_spill] sm:$0xff] }
0x1290   : > { %v5459_v17 = vunpack.c.l.b16 %v5431_v24 }
0x1291   : > { %v5498_v26 = vunpack.c.l.b16 %v5454_v48  ;;  %v5371_v33 = vpop.f32.mrf.mxu2  ;;  %v5473_v48 = vunpack.c.l.b16 %v5437_v0  ;;  %v5475_v3 = vpack.c.b16 %v5472_v23, %v5471_v60 }
0x1292   : > { %v5409_v51 = vpop.f32.mrf.mxu3 }
0x1293   : > { %v5500_v8 = vpack.c.b16 %v5498_v26, %v5497_v57  ;;  %v5442_v22 = vand.u32 2147483647, %v5409_v51  ;;  %v5476_v31 = vpack.c.b16 %v5474_v15, %v5473_v48  ;;  %v5434_v57 = vpack.c.bf16 %v5371_v33, %v5371_v33  ;;  %v5519_v48 = vpop.permute.xlu1 %5518 }
0x1294   : > { %v5433_v26 = vpack.c.bf16 %v5369_v43, %v5369_v43  ;;  %v5460_v43 = vunpack.c.l.b16 %v5432_v14 }
0x1295   : > { %v5446_v6 = vpack.c.bf16 %v5442_v22, %v5442_v22  ;;  %5580 = vmatpush.bf16.msrb.mxu0 %v5500_v8  ;;  %v5462_v51 = vunpack.c.l.b16 %v5434_v57  ;;  %v7088_v8 = vld [vmem:[%s10251_s11 + $0x18] sm:$0xf0] }
0x1296   : > { %v5461_v5 = vunpack.c.l.b16 %v5433_v26  ;;  %v7091_v22 = vor.u32 %v7316_v11, %v7088_v8  ;;  %v5463_v27 = vpack.c.b16 %v5460_v43, %v5459_v17 }
0x1297   : > { %v5486_v21 = vunpack.c.l.b16 %v5446_v6  ;;  %v7315_v6 = vld [vmem:[%s10251_s11 + $0x4] sm:$0xf0] }
0x1298   : > { %v5464_v40 = vpack.c.b16 %v5462_v51, %v5461_v5  ;;  %v7079_v34 = vor.u32 %v7315_v6, %v7078_v28  ;;  %v5524_v51 = vpop.permute.xlu2 %5523  ;;  %v5529_v28 = vpop.permute.xlu0 %5528 }
0x1299   : > { %v5488_v30 = vpack.c.b16 %v5486_v21, %v5485_v32  ;;  %5581 = vmatpush.bf16.msrb.mxu0 %v5499_v29  ;;  %v10503_v29 = vld [vmem:[#allocation6_spill] sm:$0xff]  ;;  %v7086_v32 = vld [vmem:[%s10251_s11 + $0x10] sm:$0xf] }
0x129a   : > { %v10504_v21 = vld [vmem:[#allocation14_spill] sm:$0xff] }
0x129b   : > { %5555 = vmatpush.bf16.msrb.mxu2 %v5488_v30  ;;  %v10508_v30 = vld [vmem:[#allocation16_spill] sm:$0xff] }
0x129c   : > { %7092 = vmatmul.msk.bf16.vlgmr.msrb.gmra.mxu0 %vm1802_vm7, %v7083_v19 }
0x129d   : > { %5774 = vmatpush.bf16.msra.mxu0 %v9343_v45 }
0x129f   : > { %5556 = vmatpush.bf16.msrb.mxu2 %v5487_v46 }
0x12a1   : > { %5775 = vmatpush.bf16.msra.mxu0 %v9356_v56 }
0x12a3   : > { %5557 = vmatpush.bf16.msrb.mxu2 %v5476_v31  ;;  %v10509_v31 = vld [vmem:[#allocation13_spill] sm:$0xff] }
0x12a5   : > { %5776 = vmatpush.bf16.msra.mxu0 %v9364_v61 }
0x12a7   : > { %5558 = vmatpush.bf16.msrb.mxu2 %v5475_v3 }
0x12a9   : > { %5777 = vmatpush.bf16.msra.mxu0 %v9376_v41 }
0x12ab   : > { %5559 = vmatpush.bf16.msrb.mxu2 %v5464_v40 }
0x12ac   : > { %7093 = vmatmul.msk.bf16.gmra.mxu0 %vm1802_vm7, %v7091_v22 }
0x12ad   : > { %5778 = vmatpush.bf16.msra.mxu0 %v9388_v20 }
0x12af   : > { %5560 = vmatpush.bf16.msrb.mxu2 %v5463_v27 }
0x12b1   : > { %5779 = vmatpush.bf16.msra.mxu0 %v10490_v55 }
0x12b3   : > { %5561 = vmatpush.bf16.msrb.mxu2 %v9984_v37  ;;  %v10502_v37 = vld [vmem:[#allocation22_spill] sm:$0xff] }
0x12b5   : > { %5780 = vmatpush.bf16.msra.mxu0 %v10491_v10 }
0x12b7   : > { %5562 = vmatpush.bf16.msrb.mxu2 %v9978_v36  ;;  %v7317_v36 = vld [vmem:[%s10251_s11 + $0x14] sm:$0xf0] }
0x12b8   : > { %v7087_v25 = vor.u32 %v7317_v36, %v7086_v32 }
0x12b9   : > { %5781 = vmatpush.bf16.msra.mxu0 %v10492_v63 }
0x12ba   : > { %5563 = vmatmul.bf16.vlgmr.msrb.gmra.mxu2 %v7079_v34 }
0x12bb   : > { %5755 = vmatpush.bf16.msra.mxu2 %v10501_v59 }
0x12bd   : > { %5921 = vmatpush.bf16.msrb.mxu0 %v10493_v7 }
0x12bf   : > { %5756 = vmatpush.bf16.msra.mxu2 %v10502_v37 }
0x12c1   : > { %5922 = vmatpush.bf16.msrb.mxu0 %v10494_v12 }
0x12c3   : > { %5757 = vmatpush.bf16.msra.mxu2 %v10503_v29 }
0x12c5   : > { %5923 = vmatpush.bf16.msrb.mxu0 %v10495_v4 }
0x12c7   : > { %5758 = vmatpush.bf16.msra.mxu2 %v10504_v21 }
0x12c9   : > { %5924 = vmatpush.bf16.msrb.mxu0 %v10496_v2 }
0x12ca   : > { %5568 = vmatmul.bf16.gmra.mxu2 %v7087_v25 }
0x12cb   : > { %5759 = vmatpush.bf16.msra.mxu2 %v10505_v47 }
0x12cd   : > { %5925 = vmatpush.bf16.msrb.mxu0 %v10497_v44 }
0x12cf   : > { %5760 = vmatpush.bf16.msra.mxu2 %v10506_v18 }
0x12d1   : > { %5926 = vmatpush.bf16.msrb.mxu0 %v10498_v13 }
0x12d3   : > { %5761 = vmatpush.bf16.msra.mxu2 %v10507_v38 }
0x12d5   : > { %5927 = vmatpush.bf16.msrb.mxu0 %v10499_v39 }
0x12d7   : > { %5762 = vmatpush.bf16.msra.mxu2 %v10508_v30 }
0x12d9   : > { %5928 = vmatpush.bf16.msrb.mxu0 %v10500_v52 }
0x12db   : > { %5908 = vmatpush.bf16.msrb.mxu2 %v9318_v16 }
0x12df   : > { %5909 = vmatpush.bf16.msrb.mxu2 %v9321_v58 }
0x12e3   : > { %5910 = vmatpush.bf16.msrb.mxu2 %v10484_v50 }
0x12e7   : > { %5911 = vmatpush.bf16.msrb.mxu2 %v10485_v42 }
0x12eb   : > { %5912 = vmatpush.bf16.msrb.mxu2 %v10486_v53 }
0x12ef   : > { %5913 = vmatpush.bf16.msrb.mxu2 %v10487_v1 }
0x12f3   : > { %5914 = vmatpush.bf16.msrb.mxu2 %v10488_v54 }
0x12f7   : > { %5915 = vmatpush.bf16.msrb.mxu2 %v10489_v49 }
0x1319   : > { %v5583_v19 = vpop.f32.mrf.mxu0 }
0x1321   : > { %v5585_v33 = vpop.f32.mrf.mxu0 }
0x1329   : > { %v5588_v11 = vpop.f32.mrf.mxu0 }
0x1331   : > { %v5590_v36 = vpop.f32.mrf.mxu0 }
0x133d   : > { %v5564_v0 = vpop.f32.mrf.mxu2 }
0x133e   : > { %v5565_v9 = vadd.f32 %v5564_v0, %v5514_v62 }
0x1340   : > { %v5584_v46 = vadd.f32 %v5583_v19, %v5565_v9 }
0x1342   : > { %vm5593_vm13 = vcmp.ge.f32.partialorder %v5584_v46, 0.0  ;;  %v5597_v15 = vmul.f32 0.0, %v5584_v46 }
0x1344   : > { %v10062_v35 = vsel %vm5593_vm13, %v5584_v46, %v5597_v15  ;;  %v5992_v15 = vld [vmem:[%s10256_s16] sm:$0x3f] }
0x1345   : > { %v5566_v23 = vpop.f32.mrf.mxu2  ;;  %v5605_v57 = vmul.f32 %v10509_v31, %v10062_v35 }
0x1346   : > { %v5567_v60 = vadd.f32 %v5566_v23, %v5519_v48  ;;  %v6156_v48 = vld [vmem:[%s10258_s18] sm:$0x3f] }
0x1347   : > { %5609 = vadd.xlane.f32.xlu1 %v5605_v57  ;;  %v5617_v26 = vmul.f32 %v5605_v57, %v10062_v35  ;;  %v10510_v57 = vld [vmem:[#allocation10_spill] sm:$0xff] }
0x1348   : > { %v5586_v3 = vadd.f32 %v5585_v33, %v5567_v60  ;;  %v5866_v33 = vld [vmem:[%s10254_s14] sm:$0x3f] }
0x1349   : > { %5621 = vadd.xlane.f32.xlu0 %v5617_v26 }
0x134a   : > { %vm5594_vm9 = vcmp.ge.f32.partialorder %v5586_v3, 0.0  ;;  %v5598_v14 = vmul.f32 0.0, %v5586_v3 }
0x134c   : > { %v10067_v24 = vsel %vm5594_vm9, %v5586_v3, %v5598_v14 }
0x134d   : > { %v5569_v5 = vpop.f32.mrf.mxu2  ;;  %v5606_v8 = vmul.f32 %v10509_v31, %v10067_v24 }
0x134e   : > { %v5570_v22 = vadd.f32 %v5569_v5, %v5524_v51 }
0x134f   : > { %5611 = vadd.xlane.f32.xlu2 %v5606_v8  ;;  %v5618_v43 = vmul.f32 %v5606_v8, %v10067_v24 }
0x1350   : > { %v5589_v40 = vadd.f32 %v5588_v11, %v5570_v22 }
0x1351   : > { %5623 = vadd.xlane.f32.xlu1 %v5618_v43 }
0x1352   : > { %vm5595_vm10 = vcmp.ge.f32.partialorder %v5589_v40, 0.0  ;;  %v5599_v17 = vmul.f32 0.0, %v5589_v40 }
0x1354   : > { %v10072_v27 = vsel %vm5595_vm10, %v5589_v40, %v5599_v17 }
0x1355   : > { %v5571_v6 = vpop.f32.mrf.mxu2  ;;  %v5607_v34 = vmul.f32 %v10509_v31, %v10072_v27 }
0x1356   : > { %v5572_v32 = vadd.f32 %v5571_v6, %v5529_v28 }
0x1357   : > { %5613 = vadd.xlane.f32.xlu2 %v5607_v34  ;;  %v5619_v25 = vmul.f32 %v5607_v34, %v10072_v27 }
0x1358   : > { %v5591_v19 = vadd.f32 %v5590_v36, %v5572_v32 }
0x1359   : > { %5625 = vadd.xlane.f32.xlu1 %v5619_v25 }
0x135a   : > { %vm5596_vm11 = vcmp.ge.f32.partialorder %v5591_v19, 0.0  ;;  %v5600_v62 = vmul.f32 0.0, %v5591_v19 }
0x135c   : > { %v10077_v0 = vsel %vm5596_vm11, %v5591_v19, %v5600_v62 }
0x135d   : > { %v5608_v9 = vmul.f32 %v10509_v31, %v10077_v0 }
0x135f   : > { %5615 = vadd.xlane.f32.xlu0 %v5608_v9  ;;  %v5620_v46 = vmul.f32 %v5608_v9, %v10077_v0 }
0x1361   : > { %5627 = vadd.xlane.f32.xlu2 %v5620_v46 }
0x1372   : > { %5995 = vperm.xlu1 %7350, %v5992_v15  }
0x1373   : > { %5869 = vperm.xlu0 %7349, %v5866_v33  }
0x137a   : > { %6159 = vperm.xlu1 %7350, %v6156_v48  }
0x13ba   : > { %v5610_v23 = vpop.xlane.xlu1 %5609 }
0x13bb   : > { %v5629_v60 = vmul.f32 %v5610_v23, %v10510_v57 }
0x13bc   : > { %v5622_v26 = vpop.xlane.xlu0 %5621 }
0x13bd   : > { %v5637_v3 = vmul.f32 %v5629_v60, %v5629_v60  ;;  %v5633_v14 = vmul.f32 %v5622_v26, %v10510_v57 }
0x13bf   : > { %v5641_v51 = vsub.f32 %v5633_v14, %v5637_v3 }
0x13c1   : > { %v5645_v5 = vmax.f32 %v5641_v51, 0.0 }
0x13c2   : > { %v5612_v11 = vpop.xlane.xlu2 %5611 }
0x13c3   : > { %v5653_v8 = vadd.f32 1e-05, %v5645_v5  ;;  %v5630_v22 = vmul.f32 %v5612_v11, %v10510_v57 }
0x13c4   : > { %v5624_v43 = vpop.xlane.xlu1 %5623 }
0x13c5   : > { %7416 = vrsqrt.f32 %v5653_v8  ;;  %v5638_v40 = vmul.f32 %v5630_v22, %v5630_v22  ;;  %v5634_v17 = vmul.f32 %v5624_v43, %v10510_v57  ;;  %vm5663_vm14 = vweird.f32 %v5653_v8 }
0x13c6   : > { %v5650_v31 = vsub.f32 %v10067_v24, %v5630_v22 }
0x13c7   : > { %v5642_v28 = vsub.f32 %v5634_v17, %v5638_v40 }
0x13c9   : > { %v5646_v6 = vmax.f32 %v5642_v28, 0.0 }
0x13ca   : > { %v5614_v34 = vpop.xlane.xlu2 %5613 }
0x13cb   : > { %v7417_v32 = vpop.eup %7416  ;;  %v10096_v36 = vmul.f32 %v5614_v34, %v10510_v57  ;;  %v5654_v19 = vadd.f32 1e-05, %v5646_v6 }
0x13cc   : > { %v5658_v25 = vmul.f32 %v7417_v32, %v5653_v8  ;;  %v5626_v62 = vpop.xlane.xlu1 %5625  ;;  %vm5664_vm12 = vweird.f32 %v7417_v32 }
0x13cd   : > { %v5639_v9 = vmul.f32 %v10096_v36, %v10096_v36  ;;  %v5635_v46 = vmul.f32 %v5626_v62, %v10510_v57  ;;  %7418 = vrsqrt.f32 %v5654_v19  ;;  %vm5665_vm15 = vmor %vm5663_vm14, %vm5664_vm12  ;;  %vm5673_vm8 = vweird.f32 %v5654_v19 }
0x13ce   : > { %v5659_v15 = vmul.f32 %v7417_v32, %v5658_v25  ;;  %v5651_v22 = vsub.f32 %v10072_v27, %v10096_v36 }
0x13cf   : > { %v5643_v33 = vsub.f32 %v5635_v46, %v5639_v9  ;;  %v5649_v9 = vsub.f32 %v10062_v35, %v5629_v60 }
0x13d0   : > { %v5660_v48 = vmul.f32 0.5, %v5659_v15 }
0x13d1   : > { %v5647_v23 = vmax.f32 %v5643_v33, 0.0 }
0x13d2   : > { %v5661_v26 = vsub.f32 1.5, %v5660_v48  ;;  %v5616_v3 = vpop.xlane.xlu0 %5615 }
0x13d3   : > { %v5655_v14 = vadd.f32 1e-05, %v5647_v23  ;;  %v10102_v51 = vmul.f32 %v5616_v3, %v10510_v57  ;;  %v7419_v5 = vpop.eup %7418 }
0x13d4   : > { %v5628_v11 = vpop.xlane.xlu2 %5627  ;;  %v5662_v43 = vmul.f32 %v7417_v32, %v5661_v26  ;;  %v5668_v40 = vmul.f32 %v7419_v5, %v5654_v19  ;;  %vm5674_vm6 = vweird.f32 %v7419_v5 }
0x13d5   : > { %7420 = vrsqrt.f32 %v5655_v14  ;;  %v5640_v17 = vmul.f32 %v10102_v51, %v10102_v51  ;;  %v5636_v28 = vmul.f32 %v5628_v11, %v10510_v57  ;;  %vm5675_vm13 = vmor %vm5673_vm8, %vm5674_vm6  ;;  %vm5683_vm10 = vweird.f32 %v5655_v14 }
0x13d6   : > { %v5669_v6 = vmul.f32 %v7419_v5, %v5668_v40  ;;  %v5666_v25 = vsel %vm5665_vm15, %v7417_v32, %v5662_v43 }
0x13d7   : > { %v5644_v34 = vsub.f32 %v5636_v28, %v5640_v17  ;;  %v5697_v48 = vmul.f32 %v5666_v25, %v5649_v9 }
0x13d8   : > { %v5670_v62 = vmul.f32 0.5, %v5669_v6 }
0x13d9   : > { %v5648_v46 = vmax.f32 %v5644_v34, 0.0  ;;  %v5701_v40 = vpack.c.bf16 %v5697_v48, %v5697_v48 }
0x13da   : > { %v5671_v33 = vsub.f32 1.5, %v5670_v62 }
0x13db   : > { %v7421_v15 = vpop.eup %7420  ;;  %v5656_v26 = vadd.f32 1e-05, %v5648_v46  ;;  %v5709_v28 = vunpack.c.l.b16 %v5701_v40  ;;  %v5652_v46 = vsub.f32 %v10077_v0, %v10102_v51 }
0x13dc   : > { %v5678_v23 = vmul.f32 %v7421_v15, %v5655_v14  ;;  %v5672_v3 = vmul.f32 %v7419_v5, %v5671_v33  ;;  %vm5684_vm9 = vweird.f32 %v7421_v15 }
0x13dd   : > { %7422 = vrsqrt.f32 %v5656_v26  ;;  %vm5685_vm11 = vmor %vm5683_vm10, %vm5684_vm9  ;;  %vm5693_vm14 = vweird.f32 %v5656_v26 }
0x13de   : > { %v5679_v8 = vmul.f32 %v7421_v15, %v5678_v23  ;;  %v5676_v11 = vsel %vm5675_vm13, %v7419_v5, %v5672_v3 }
0x13df   : > { %v5698_v32 = vmul.f32 %v5676_v11, %v5650_v31 }
0x13e0   : > { %v5680_v43 = vmul.f32 0.5, %v5679_v8 }
0x13e1   : > { %v5702_v17 = vpack.c.bf16 %v5698_v32, %v5698_v32 }
0x13e2   : > { %v5681_v35 = vsub.f32 1.5, %v5680_v43 }
0x13e3   : > { %v7423_v60 = vpop.eup %7422  ;;  %v5710_v6 = vunpack.c.l.b16 %v5702_v17 }
0x13e4   : > { %v5682_v34 = vmul.f32 %v7421_v15, %v5681_v35  ;;  %v5688_v25 = vmul.f32 %v7423_v60, %v5656_v26  ;;  %vm5694_vm12 = vweird.f32 %v7423_v60 }
0x13e5   : > { %v10109_v62 = vpack.c.b16 %v5710_v6, %v5709_v28  ;;  %vm5695_vm15 = vmor %vm5693_vm14, %vm5694_vm12 }
0x13e6   : > { %v5689_v19 = vmul.f32 %v7423_v60, %v5688_v25  ;;  %v5686_v24 = vsel %vm5685_vm11, %v7421_v15, %v5682_v34 }
0x13e7   : > { %5725 = vmatmul.bf16.vlgmr.msra.gmra.mxu3 %v10109_v62  ;;  %5744 = vmatmul.bf16.vlgmr.msra.gmra.mxu1 %v10109_v62  ;;  %v5699_v14 = vmul.f32 %v5686_v24, %v5651_v22 }
0x13e8   : > { %v5690_v31 = vmul.f32 0.5, %v5689_v19  ;;  %5763 = vmatmul.bf16.vlgmr.msra.gmra.mxu2 %v10109_v62  ;;  %5782 = vmatmul.bf16.vlgmr.msra.gmra.mxu0 %v10109_v62 }
0x13e9   : > { %6072 = vmatpush.bf16.msra.mxu0 %v9318_v16  ;;  %v5703_v33 = vpack.c.bf16 %v5699_v14, %v5699_v14 }
0x13ea   : > { %v5691_v5 = vsub.f32 1.5, %v5690_v31 }
0x13eb   : > { %v5711_v27 = vunpack.c.l.b16 %v5703_v33 }
0x13ec   : > { %v5692_v9 = vmul.f32 %v7423_v60, %v5691_v5 }
0x13ed   : > { %6073 = vmatpush.bf16.msra.mxu0 %v9321_v58 }
0x13ee   : > { %v5696_v15 = vsel %vm5695_vm15, %v7423_v60, %v5692_v9 }
0x13ef   : > { %v5700_v48 = vmul.f32 %v5696_v15, %v5652_v46 }
0x13f1   : > { %v5704_v23 = vpack.c.bf16 %v5700_v48, %v5700_v48  ;;  %6074 = vmatpush.bf16.msra.mxu0 %v10484_v50 }
0x13f3   : > { %v5712_v36 = vunpack.c.l.b16 %v5704_v23  ;;  %v5865_v23 = vld [vmem:[%s10253_s13] sm:$0x77] }
0x13f5   : > { %v10122_v16 = vpack.c.b16 %v5712_v36, %v5711_v27  ;;  %6075 = vmatpush.bf16.msra.mxu0 %v10485_v42  ;;  %v5874_v36 = vunpack.c.h.b16 %v5865_v23 }
0x13f7   : > { %5730 = vmatmul.bf16.gmra.mxu3 %v10122_v16  ;;  %5749 = vmatmul.bf16.gmra.mxu1 %v10122_v16 }
0x13f8   : > { %5768 = vmatmul.bf16.gmra.mxu2 %v10122_v16  ;;  %5787 = vmatmul.bf16.gmra.mxu0 %v10122_v16 }
0x13f9   : > { %6076 = vmatpush.bf16.msra.mxu0 %v10486_v53 }
0x13fd   : > { %6077 = vmatpush.bf16.msra.mxu0 %v10487_v1 }
0x1401   : > { %6078 = vmatpush.bf16.msra.mxu0 %v10488_v54 }
0x1405   : > { %6079 = vmatpush.bf16.msra.mxu0 %v10489_v49 }
0x1464   : > { %v10133_v50 = vpop.f32.mrf.mxu1 }
0x1465   : > { %v5783_v58 = vpop.f32.mrf.mxu0 }
0x1466   : > { %v5809_v54 = vand.u32 2147483647, %v5783_v58 }
0x1468   : > { %v5813_v6 = vpack.c.bf16 %v5809_v54, %v5809_v54 }
0x146a   : > { %v10135_v51 = vpop.f32.mrf.mxu3  ;;  %v5857_v15 = vunpack.c.l.b16 %v5813_v6 }
0x146b   : > { %v5764_v42 = vpop.f32.mrf.mxu2 }
0x146c   : > { %v5747_v26 = vpop.f32.mrf.mxu1  ;;  %v5801_v24 = vand.u32 2147483647, %v5764_v42 }
0x146d   : > { %v5785_v0 = vpop.f32.mrf.mxu0 }
0x146e   : > { %v5810_v32 = vand.u32 2147483647, %v5785_v0  ;;  %v5805_v58 = vpack.c.bf16 %v5801_v24, %v5801_v24 }
0x1470   : > { %v5814_v35 = vpack.c.bf16 %v5810_v32, %v5810_v32 }
0x1472   : > { %v10137_v40 = vpop.f32.mrf.mxu3  ;;  %v5858_v22 = vunpack.c.l.b16 %v5814_v35 }
0x1473   : > { %v5766_v3 = vpop.f32.mrf.mxu2 }
0x1474   : > { %v5750_v1 = vpop.f32.mrf.mxu1  ;;  %v5802_v34 = vand.u32 2147483647, %v5766_v3  ;;  %v5861_v0 = vpack.c.b16 %v5858_v22, %v5857_v15 }
0x1475   : > { %v5788_v8 = vpop.f32.mrf.mxu0  ;;  %v5799_v54 = vpack.c.bf16 %v5750_v1, %v5750_v1 }
0x1476   : > { %v5811_v11 = vand.u32 2147483647, %v5788_v8  ;;  %v5806_v33 = vpack.c.bf16 %v5802_v34, %v5802_v34  ;;  %v5876_v8 = vpack.c.b16 %v5874_v36, %v5874_v36 }
0x1477   : > { %v5835_v6 = vunpack.c.l.b16 %v5799_v54 }
0x1478   : > { %v5815_v17 = vpack.c.bf16 %v5811_v11, %v5811_v11  ;;  %v5846_v11 = vunpack.c.l.b16 %v5806_v33  ;;  %v5873_v33 = vunpack.c.l.b16 %v5865_v23 }
0x147a   : > { %v5859_v25 = vunpack.c.l.b16 %v5815_v17  ;;  %v5731_v46 = vpop.f32.mrf.mxu3  ;;  %v5798_v17 = vpack.c.bf16 %v5747_v26, %v5747_v26  ;;  %v5794_v26 = vpack.c.bf16 %v10137_v40, %v10137_v40  ;;  %v5875_v40 = vpack.c.b16 %v5873_v33, %v5873_v33 }
0x147b   : > { %v5769_v53 = vpop.f32.mrf.mxu2  ;;  %v5795_v24 = vpack.c.bf16 %v5731_v46, %v5731_v46 }
0x147c   : > { %v5803_v60 = vand.u32 2147483647, %v5769_v53  ;;  %v5752_v27 = vpop.f32.mrf.mxu1  ;;  %v5834_v34 = vunpack.c.l.b16 %v5798_v17 }
0x147d   : > { %v5790_v43 = vpop.f32.mrf.mxu0  ;;  %v5800_v53 = vpack.c.bf16 %v5752_v27, %v5752_v27 }
0x147e   : > { %v5812_v49 = vand.u32 2147483647, %v5790_v43  ;;  %v5807_v5 = vpack.c.bf16 %v5803_v60, %v5803_v60  ;;  %v5845_v43 = vunpack.c.l.b16 %v5805_v58 }
0x147f   : > { %v5836_v35 = vunpack.c.l.b16 %v5800_v53 }
0x1480   : > { %v5816_v28 = vpack.c.bf16 %v5812_v49, %v5812_v49  ;;  %v5847_v3 = vunpack.c.l.b16 %v5807_v5  ;;  %v5849_v49 = vpack.c.b16 %v5846_v11, %v5845_v43  ;;  %v5823_v5 = vunpack.c.l.b16 %v5795_v24  ;;  %v10511_v24 = vld [vmem:[#allocation13_spill] sm:$0xff] }
0x1482   : > { %v5860_v19 = vunpack.c.l.b16 %v5816_v28  ;;  %v5733_v60 = vpop.f32.mrf.mxu3  ;;  %v5797_v28 = vpack.c.bf16 %v10133_v50, %v10133_v50  ;;  %v5793_v50 = vpack.c.bf16 %v10135_v51, %v10135_v51 }
0x1483   : > { %v5771_v31 = vpop.f32.mrf.mxu2 }
0x1484   : > { %v5862_v14 = vpack.c.b16 %v5860_v19, %v5859_v25  ;;  %v5804_v9 = vand.u32 2147483647, %v5771_v31  ;;  %v5838_v25 = vpack.c.b16 %v5836_v35, %v5835_v6  ;;  %v5796_v19 = vpack.c.bf16 %v5733_v60, %v5733_v60  ;;  %v5991_v6 = vld [vmem:[%s10255_s15] sm:$0x7] }
0x1485   : > { %v5833_v1 = vunpack.c.l.b16 %v5797_v28  ;;  %v5821_v15 = vunpack.c.l.b16 %v5793_v50 }
0x1486   : > { %v5808_v48 = vpack.c.bf16 %v5804_v9, %v5804_v9  ;;  %5900 = vmatpush.bf16.msrb.mxu1 %v5862_v14  ;;  %v5824_v22 = vunpack.c.l.b16 %v5796_v19  ;;  %v5822_v14 = vunpack.c.l.b16 %v5794_v26 }
0x1487   : > { %v5837_v31 = vpack.c.b16 %v5834_v34, %v5833_v1  ;;  %v5996_v34 = vpop.permute.xlu1 %5995 }
0x1488   : > { %v5848_v42 = vunpack.c.l.b16 %v5808_v48  ;;  %v5826_v9 = vpack.c.b16 %v5824_v22, %v5823_v5  ;;  %v5825_v46 = vpack.c.b16 %v5822_v14, %v5821_v15 }
0x148a   : > { %v5850_v32 = vpack.c.b16 %v5848_v42, %v5847_v3  ;;  %5901 = vmatpush.bf16.msrb.mxu1 %v5861_v0 }
0x148c   : > { %5881 = vmatpush.bf16.msrb.mxu3 %v5850_v32 }
0x148d   : > { %7094 = vmatmul.msk.bf16.vlgmr.msrb.gmra.mxu1 %vm1802_vm7, %v5876_v8 }
0x148e   : > { %5947 = vmatpush.bf16.msra.mxu1 %v9343_v45 }
0x1490   : > { %5882 = vmatpush.bf16.msrb.mxu3 %v5849_v49 }
0x1492   : > { %5948 = vmatpush.bf16.msra.mxu1 %v9356_v56 }
0x1494   : > { %5883 = vmatpush.bf16.msrb.mxu3 %v5838_v25 }
0x1496   : > { %5949 = vmatpush.bf16.msra.mxu1 %v9364_v61 }
0x1498   : > { %5884 = vmatpush.bf16.msrb.mxu3 %v5837_v31 }
0x149a   : > { %5950 = vmatpush.bf16.msra.mxu1 %v9376_v41 }
0x149c   : > { %5885 = vmatpush.bf16.msrb.mxu3 %v5826_v9 }
0x149e   : > { %5951 = vmatpush.bf16.msra.mxu1 %v9388_v20 }
0x14a0   : > { %5886 = vmatpush.bf16.msrb.mxu3 %v5825_v46 }
0x14a2   : > { %5952 = vmatpush.bf16.msra.mxu1 %v10490_v55 }
0x14a4   : > { %5887 = vmatpush.bf16.msrb.mxu3 %v10122_v16 }
0x14a6   : > { %5953 = vmatpush.bf16.msra.mxu1 %v10491_v10 }
0x14a8   : > { %5888 = vmatpush.bf16.msrb.mxu3 %v10109_v62 }
0x14aa   : > { %5954 = vmatpush.bf16.msra.mxu1 %v10492_v63 }
0x14ab   : > { %5889 = vmatmul.bf16.vlgmr.msrb.gmra.mxu3 %v5875_v40 }
0x14ac   : > { %5934 = vmatpush.bf16.msra.mxu3 %v10501_v59 }
0x14ae   : > { %6111 = vmatpush.bf16.msrb.mxu1 %v9343_v45 }
0x14b0   : > { %5935 = vmatpush.bf16.msra.mxu3 %v10502_v37 }
0x14b2   : > { %6112 = vmatpush.bf16.msrb.mxu1 %v9356_v56 }
0x14b4   : > { %5936 = vmatpush.bf16.msra.mxu3 %v10503_v29 }
0x14b6   : > { %6113 = vmatpush.bf16.msrb.mxu1 %v9364_v61  ;;  %v5870_v61 = vpop.permute.xlu0 %5869 }
0x14b8   : > { %5937 = vmatpush.bf16.msra.mxu3 %v10504_v21 }
0x14ba   : > { %6114 = vmatpush.bf16.msrb.mxu1 %v9376_v41 }
0x14bc   : > { %5938 = vmatpush.bf16.msra.mxu3 %v10505_v47 }
0x14be   : > { %6115 = vmatpush.bf16.msrb.mxu1 %v9388_v20 }
0x14c0   : > { %5939 = vmatpush.bf16.msra.mxu3 %v10506_v18 }
0x14c2   : > { %6116 = vmatpush.bf16.msrb.mxu1 %v10490_v55 }
0x14c4   : > { %5940 = vmatpush.bf16.msra.mxu3 %v10507_v38 }
0x14c6   : > { %6117 = vmatpush.bf16.msrb.mxu1 %v10491_v10 }
0x14c8   : > { %5941 = vmatpush.bf16.msra.mxu3 %v10508_v30 }
0x14ca   : > { %6118 = vmatpush.bf16.msrb.mxu1 %v10492_v63 }
0x14cc   : > { %6098 = vmatpush.bf16.msrb.mxu3 %v10501_v59 }
0x14d0   : > { %6099 = vmatpush.bf16.msrb.mxu3 %v10502_v37 }
0x14d4   : > { %6100 = vmatpush.bf16.msrb.mxu3 %v10503_v29 }
0x14d8   : > { %6101 = vmatpush.bf16.msrb.mxu3 %v10504_v21 }
0x14dc   : > { %6102 = vmatpush.bf16.msrb.mxu3 %v10505_v47 }
0x14e0   : > { %6103 = vmatpush.bf16.msrb.mxu3 %v10506_v18 }
0x14e4   : > { %6104 = vmatpush.bf16.msrb.mxu3 %v10507_v38 }
0x14e8   : > { %6105 = vmatpush.bf16.msrb.mxu3 %v10508_v30 }
0x150a   : > { %v5903_v45 = vpop.f32.mrf.mxu1 }
0x1512   : > { %v5905_v56 = vpop.f32.mrf.mxu1 }
0x152e   : > { %v5890_v41 = vpop.f32.mrf.mxu3 }
0x152f   : > { %v5891_v20 = vadd.f32 %v5890_v41, %v5870_v61 }
0x1531   : > { %v5904_v55 = vadd.f32 %v5903_v45, %v5891_v20 }
0x1533   : > { %v5907_v10 = vpack.c.bf16 %v5904_v55, %v5904_v55 }
0x1535   : > { %5916 = vmatmul.bf16.vlgmr.msrb.gmra.mxu2 %v5907_v10  ;;  %5929 = vmatmul.bf16.vlgmr.msrb.gmra.mxu0 %v5907_v10 }
0x1536   : > { %5942 = vmatmul.bf16.vlgmr.msra.gmra.mxu3 %v5907_v10  ;;  %5955 = vmatmul.bf16.vlgmr.msra.gmra.mxu1 %v5907_v10  ;;  %v5892_v63 = vpop.f32.mrf.mxu3 }
0x15b2   : > { %v5930_v59 = vpop.f32.mrf.mxu0 }
0x15b3   : > { %v5956_v37 = vpop.f32.mrf.mxu1  ;;  %v5961_v29 = vpack.c.bf16 %v5930_v59, %v5930_v59 }
0x15b4   : > { %v5964_v21 = vand.u32 2147483647, %v5956_v37 }
0x15b5   : > { %v5971_v30 = vunpack.c.l.b16 %v5961_v29 }
0x15b6   : > { %v5965_v51 = vpack.c.bf16 %v5964_v21, %v5964_v21 }
0x15b7   : > { %v5972_v36 = vpack.c.b16 %v5971_v30, %v5971_v30 }
0x15b8   : > { %v5917_v47 = vpop.f32.mrf.mxu2  ;;  %v5979_v0 = vunpack.c.l.b16 %v5965_v51 }
0x15b9   : > { %v5960_v18 = vpack.c.bf16 %v5917_v47, %v5917_v47  ;;  %v5943_v38 = vpop.f32.mrf.mxu3  ;;  %v5973_v53 = vrot.slane %v5972_v36, 2 }
0x15ba   : > { %v5962_v62 = vand.u32 2147483647, %v5943_v38  ;;  %v5932_v16 = vpop.f32.mrf.mxu0  ;;  %v5980_v43 = vpack.c.b16 %v5979_v0, %v5979_v0 }
0x15bb   : > { %v5967_v48 = vunpack.c.l.b16 %v5960_v18  ;;  %v5958_v23 = vpop.f32.mrf.mxu1 }
0x15bc   : > { %v5963_v27 = vpack.c.bf16 %v5962_v62, %v5962_v62 }
0x15bd   : > { %v5968_v3 = vpack.c.b16 %v5967_v48, %v5967_v48 }
0x15be   : > { %v5975_v58 = vunpack.c.l.b16 %v5963_v27 }
0x15bf   : > { %v5969_v54 = vrot.slane %v5968_v3, 5  ;;  %v7325_v3 = vld [vmem:[%s9310_s29 + $0xb8] sm:$0xff] }
0x15c0   : > { %v5976_v42 = vpack.c.b16 %v5975_v58, %v5975_v58  ;;  %v5919_v8 = vpop.f32.mrf.mxu2  ;;  %6332 = vmatpush.bf16.msra.mxu3 %v7325_v3 }
0x15c1   : > { %v5945_v11 = vpop.f32.mrf.mxu3  ;;  %v5983_v60 = vsel %vm1356_vm3, %v5907_v10, %v5969_v54  ;;  %v7324_v8 = vld [vmem:[%s9310_s29 + $0xb0] sm:$0xff]  ;;  %v7331_v54 = vld [vmem:[%s9310_s29 + $0xe8] sm:$0xff] }
0x15c2   : > { %v5977_v32 = vrot.slane %v5976_v42, 7  ;;  %v5985_v28 = vsel %vm1360_vm4, %v5983_v60, %v5973_v53  ;;  %v7333_v42 = vld [vmem:[%s9310_s29 + $0xf8] sm:$0xff]  ;;  %v7332_v11 = vld [vmem:[%s9310_s29 + $0xf0] sm:$0xff]  ;;  %v7330_v60 = vld [vmem:[%s9310_s29 + $0xe0] sm:$0xff] }
0x15c4   : > { %v5988_v17 = vsel %vm1364_vm0, %v5973_v53, %v5977_v32  ;;  %6333 = vmatpush.bf16.msra.mxu3 %v7324_v8 }
0x15c5   : > { %v5990_v49 = vsel %vm1367_vm1, %v5988_v17, %v5980_v43  ;;  %v7323_v43 = vld [vmem:[%s9310_s29 + $0xa8] sm:$0xff] }
0x15c6   : > { %v6001_v35 = vsel %vm1415_vm2, %v5990_v49, 0 }
0x15c7   : > { %6009 = vmatpush.bf16.msra.mxu2 %v6001_v35  ;;  %v7322_v35 = vld [vmem:[%s9310_s29 + $0xa0] sm:$0xff] }
0x15c8   : > { %6334 = vmatpush.bf16.msra.mxu3 %v7323_v43 }
0x15cb   : > { %6010 = vmatpush.bf16.msra.mxu2 %v5985_v28 }
0x15cc   : > { %6335 = vmatpush.bf16.msra.mxu3 %v7322_v35 }
0x15ce   : > { %7095 = vmatmul.msk.bf16.vlgmr.msra.gmra.mxu2 %vm1408_vm5, %v5991_v6 }
0x15cf   : > { %6085 = vmatpush.bf16.msrb.mxu2 %v10493_v7 }
0x15d3   : > { %6086 = vmatpush.bf16.msrb.mxu2 %v10494_v12 }
0x15d7   : > { %6087 = vmatpush.bf16.msrb.mxu2 %v10495_v4 }
0x15db   : > { %6088 = vmatpush.bf16.msrb.mxu2 %v10496_v2 }
0x15df   : > { %6089 = vmatpush.bf16.msrb.mxu2 %v10497_v44 }
0x15e3   : > { %6090 = vmatpush.bf16.msrb.mxu2 %v10498_v13 }
0x15e7   : > { %6091 = vmatpush.bf16.msrb.mxu2 %v10499_v39 }
0x15eb   : > { %6092 = vmatpush.bf16.msrb.mxu2 %v10500_v52 }
0x15ef   : > { %6271 = vmatpush.bf16.msra.mxu2 %v7333_v42 }
0x15f3   : > { %6272 = vmatpush.bf16.msra.mxu2 %v7332_v11 }
0x15f7   : > { %6273 = vmatpush.bf16.msra.mxu2 %v7331_v54 }
0x15fb   : > { %6274 = vmatpush.bf16.msra.mxu2 %v7330_v60 }
0x1651   : > { %v6012_v25 = vpop.f32.mrf.mxu2 }
0x1652   : > { %v6013_v19 = vadd.f32 %v6012_v25, %v5996_v34 }
0x1654   : > { %vm6016_vm7 = vcmp.ge.f32.partialorder %v6013_v19, 0.0  ;;  %v6017_v7 = vmul.f32 0.0, %v6013_v19 }
0x1656   : > { %v6018_v1 = vsel %vm6016_vm7, %v6013_v19, %v6017_v7 }
0x1657   : > { %v6019_v12 = vmul.f32 %v10511_v24, %v6018_v1 }
0x1659   : > { %v6020_v4 = vsel %vm1360_vm4, %v6019_v12, 0.0  ;;  %v6014_v31 = vpop.f32.mrf.mxu2  ;;  %v6023_v2 = vmul.f32 %v6019_v12, %v6018_v1 }
0x165a   : > { %6021 = vadd.xlane.f32.xlu2 %v6020_v4  ;;  %v7321_v4 = vld [vmem:[%s9310_s29 + $0x98] sm:$0xff] }
0x165b   : > { %v6024_v44 = vsel %vm1360_vm4, %v6023_v2, 0.0  ;;  %v7329_v31 = vld [vmem:[%s9310_s29 + $0xd8] sm:$0xff]  ;;  %6336 = vmatpush.bf16.msra.mxu3 %v7321_v4 }
0x165c   : > { %6275 = vmatpush.bf16.msra.mxu2 %v7329_v31 }
0x1662   : > { %6025 = vadd.xlane.f32.xlu2 %v6024_v44 }
0x16cd   : > { %v6022_v13 = vpop.xlane.xlu2 %6021 }
0x16ce   : > { %v6027_v39 = vmul.f32 %v6022_v13, %v10510_v57 }
0x16d0   : > { %v6029_v26 = vmul.f32 %v6027_v39, %v6027_v39  ;;  %v6032_v56 = vsub.f32 %v6018_v1, %v6027_v39 }
0x16d5   : > { %v6026_v52 = vpop.xlane.xlu2 %6025 }
0x16d6   : > { %v6028_v22 = vmul.f32 %v6026_v52, %v10510_v57 }
0x16d8   : > { %v6030_v50 = vsub.f32 %v6028_v22, %v6029_v26  ;;  %v7320_v22 = vld [vmem:[%s9310_s29 + $0x90] sm:$0xff] }
0x16d9   : > { %6337 = vmatpush.bf16.msra.mxu3 %v7320_v22 }
0x16da   : > { %v6031_v5 = vmax.f32 %v6030_v50, 0.0 }
0x16dc   : > { %v6033_v14 = vadd.f32 1e-05, %v6031_v5 }
0x16de   : > { %7424 = vrsqrt.f32 %v6033_v14  ;;  %vm6040_vm8 = vweird.f32 %v6033_v14 }
0x16e4   : > { %v7425_v9 = vpop.eup %7424 }
0x16e5   : > { %v6035_v15 = vmul.f32 %v7425_v9, %v6033_v14  ;;  %vm6041_vm6 = vweird.f32 %v7425_v9 }
0x16e6   : > { %vm6042_vm13 = vmor %vm6040_vm8, %vm6041_vm6 }
0x16e7   : > { %v6036_v46 = vmul.f32 %v7425_v9, %v6035_v15 }
0x16e9   : > { %v6037_v33 = vmul.f32 0.5, %v6036_v46 }
0x16eb   : > { %v6038_v40 = vsub.f32 1.5, %v6037_v33  ;;  %v7319_v33 = vld [vmem:[%s9310_s29 + $0x88] sm:$0xff] }
0x16ec   : > { %6338 = vmatpush.bf16.msra.mxu3 %v7319_v33 }
0x16ed   : > { %v6039_v45 = vmul.f32 %v7425_v9, %v6038_v40 }
0x16ef   : > { %v6043_v61 = vsel %vm6042_vm13, %v7425_v9, %v6039_v45 }
0x16f0   : > { %v6044_v41 = vmul.f32 %v6043_v61, %v6032_v56 }
0x16f2   : > { %v6045_v20 = vmul.f32 %v10511_v24, %v6044_v41 }
0x16f4   : > { %v6046_v55 = vsel %vm1360_vm4, %v6045_v20, 0.0  ;;  %v6049_v10 = vmul.f32 %v6045_v20, %v6044_v41  ;;  %v6155_v20 = vld [vmem:[%s10257_s17] sm:$0x7] }
0x16f5   : > { %6047 = vadd.xlane.f32.xlu0 %v6046_v55  ;;  %v7328_v55 = vld [vmem:[%s9310_s29 + $0xd0] sm:$0xff] }
0x16f6   : > { %v6050_v63 = vsel %vm1360_vm4, %v6049_v10, 0.0  ;;  %6276 = vmatpush.bf16.msra.mxu2 %v7328_v55  ;;  %v7318_v10 = vld [vmem:[%s9310_s29 + $0x80] sm:$0xff] }
0x16f7   : > { %6051 = vadd.xlane.f32.xlu2 %v6050_v63  ;;  %6339 = vmatpush.bf16.msra.mxu3 %v7318_v10  ;;  %v7327_v63 = vld [vmem:[%s9310_s29 + $0xc8] sm:$0xff] }
0x16fa   : > { %6277 = vmatpush.bf16.msra.mxu2 %v7327_v63 }
0x1768   : > { %v6048_v59 = vpop.xlane.xlu0 %6047 }
0x1769   : > { %v6053_v37 = vmul.f32 %v6048_v59, %v10510_v57  ;;  %v7326_v59 = vld [vmem:[%s9310_s29 + $0xc0] sm:$0xff] }
0x176a   : > { %v6052_v29 = vpop.xlane.xlu2 %6051  ;;  %6278 = vmatpush.bf16.msra.mxu2 %v7326_v59 }
0x176b   : > { %v6055_v21 = vmul.f32 %v6053_v37, %v6053_v37  ;;  %v6054_v47 = vmul.f32 %v6052_v29, %v10510_v57  ;;  %v6058_v36 = vsub.f32 %v6044_v41, %v6053_v37  ;;  %v6160_v37 = vpop.permute.xlu1 %6159 }
0x176d   : > { %v6056_v18 = vsub.f32 %v6054_v47, %v6055_v21 }
0x176f   : > { %v6057_v38 = vmax.f32 %v6056_v18, 0.0 }
0x1771   : > { %v6059_v30 = vadd.f32 1e-05, %v6057_v38 }
0x1773   : > { %7426 = vrsqrt.f32 %v6059_v30  ;;  %vm6066_vm10 = vweird.f32 %v6059_v30 }
0x1779   : > { %v7427_v62 = vpop.eup %7426 }
0x177a   : > { %v6061_v16 = vmul.f32 %v7427_v62, %v6059_v30  ;;  %vm6067_vm9 = vweird.f32 %v7427_v62 }
0x177b   : > { %vm6068_vm11 = vmor %vm6066_vm10, %vm6067_vm9 }
0x177c   : > { %v6062_v51 = vmul.f32 %v7427_v62, %v6061_v16 }
0x177e   : > { %v6063_v48 = vmul.f32 0.5, %v6062_v51 }
0x1780   : > { %v6064_v23 = vsub.f32 1.5, %v6063_v48 }
0x1782   : > { %v6065_v27 = vmul.f32 %v7427_v62, %v6064_v23 }
0x1784   : > { %v6069_v58 = vsel %vm6068_vm11, %v7427_v62, %v6065_v27  ;;  %v7193_v27 = vld [vmem:[%s9485_s22 + $0x4] sm:$0x7] }
0x1785   : > { %v6070_v57 = vmul.f32 %v6069_v58, %v6058_v36 }
0x1787   : > { %v6071_v0 = vpack.c.bf16 %v6070_v57, %v6070_v57 }
0x1789   : > { %6080 = vmatmul.bf16.vlgmr.msra.gmra.mxu0 %v6071_v0  ;;  %6093 = vmatmul.bf16.vlgmr.msrb.gmra.mxu2 %v6071_v0 }
0x178a   : > { %6106 = vmatmul.bf16.vlgmr.msrb.gmra.mxu3 %v6071_v0  ;;  %6119 = vmatmul.bf16.vlgmr.msrb.gmra.mxu1 %v6071_v0 }
0x1806   : > { %v6081_v53 = vpop.f32.mrf.mxu0 }
0x1807   : > { %v6120_v32 = vpop.f32.mrf.mxu1  ;;  %v6124_v28 = vpack.c.bf16 %v6081_v53, %v6081_v53 }
0x1808   : > { %v6128_v17 = vand.u32 2147483647, %v6120_v32 }
0x1809   : > { %v6131_v2 = vunpack.c.l.b16 %v6124_v28 }
0x180a   : > { %v6129_v7 = vpack.c.bf16 %v6128_v17, %v6128_v17 }
0x180b   : > { %v6132_v50 = vpack.c.b16 %v6131_v2, %v6131_v2 }
0x180c   : > { %v6094_v49 = vpop.f32.mrf.mxu2  ;;  %v6143_v39 = vunpack.c.l.b16 %v6129_v7 }
0x180d   : > { %v6125_v6 = vpack.c.bf16 %v6094_v49, %v6094_v49  ;;  %v6107_v34 = vpop.f32.mrf.mxu3  ;;  %v6133_v40 = vrot.slane %v6132_v50, 5 }
0x180e   : > { %v6126_v25 = vand.u32 2147483647, %v6107_v34  ;;  %v6083_v19 = vpop.f32.mrf.mxu0  ;;  %v6144_v15 = vpack.c.b16 %v6143_v39, %v6143_v39 }
0x180f   : > { %v6135_v1 = vunpack.c.l.b16 %v6125_v6  ;;  %v6122_v24 = vpop.f32.mrf.mxu1  ;;  %v6147_v61 = vsel %vm1356_vm3, %v6071_v0, %v6133_v40 }
0x1810   : > { %v6127_v12 = vpack.c.bf16 %v6126_v25, %v6126_v25 }
0x1811   : > { %v6136_v44 = vpack.c.b16 %v6135_v1, %v6135_v1 }
0x1812   : > { %v6139_v13 = vunpack.c.l.b16 %v6127_v12 }
0x1813   : > { %v6137_v14 = vrot.slane %v6136_v44, 2 }
0x1814   : > { %v6140_v52 = vpack.c.b16 %v6139_v13, %v6139_v13  ;;  %v6096_v26 = vpop.f32.mrf.mxu2 }
0x1815   : > { %v6109_v5 = vpop.f32.mrf.mxu3  ;;  %v6149_v41 = vsel %vm1360_vm4, %v6147_v61, %v6137_v14 }
0x1816   : > { %v6141_v9 = vrot.slane %v6140_v52, 7 }
0x1818   : > { %v6152_v46 = vsel %vm1364_vm0, %v6137_v14, %v6141_v9 }
0x1819   : > { %v6154_v45 = vsel %vm1367_vm1, %v6152_v46, %v6144_v15 }
0x181a   : > { %v6165_v56 = vsel %vm1415_vm2, %v6154_v45, 0 }
0x181b   : > { %6173 = vmatpush.bf16.msrb.mxu0 %v6165_v56 }
0x181f   : > { %6174 = vmatpush.bf16.msrb.mxu0 %v6149_v41 }
0x1822   : > { %7096 = vmatmul.msk.bf16.vlgmr.msrb.gmra.mxu0 %vm1408_vm5, %v6155_v20 }
0x189f   : > { %v6176_v29 = vpop.f32.mrf.mxu0 }
0x18a0   : > { %v6177_v21 = vadd.f32 %v6176_v29, %v6160_v37 }
0x18a2   : > { %v6180_v47 = vpack.c.bf16 %v6177_v21, %v6177_v21 }
0x18a4   : > { %v6215_v18 = vshrl.u32 %v6180_v47, 16  ;;  %v6218_v38 = vshll.u32 %v6180_v47, 16  ;;  %6340 = vmatmul.bf16.vlgmr.msra.gmra.mxu3 %v6180_v47 }
0x18a6   : > { %v6217_v30 = vrot.slane %v6215_v18, 1  ;;  %v6220_v62 = vrot.slane %v6218_v38, 2 }
0x18a7   : > { %v6178_v16 = vpop.f32.mrf.mxu0 }
0x18a8   : > { %v6221_v51 = vor.u32 %v6220_v62, %v6217_v30 }
0x18aa   : > { %6279 = vmatmul.bf16.vlgmr.msra.gmra.mxu2 %v6221_v51 }
0x1927   : > { %v6341_v48 = vpop.f32.mrf.mxu3 }
0x192d   : > { %v6280_v23 = vpop.f32.mrf.mxu2 }
0x192e   : > { %v6342_v36 = vadd.f32 %v6341_v48, %v6280_v23 }
0x192f   : > { %v6343_v58 = vpop.f32.mrf.mxu3 }
0x1930   : > { %v6347_v57 = vadd.f32 %v7193_v27, %v6342_v36 }
0x1932   : > { %7194 = vst [vmem:[%s9492_s3 + $0x4] sm:$0x7] %v6347_v57 }
0x1935   : > { %v6282_v0 = vpop.f32.mrf.mxu2 }
0x1936 PF: > { %s37_s1 = sadd.s32 1, %s7448_s1  }
0x1937   : > { %p34_p4 = scmp.ge.s32.totalorder %s37_s1, 4  }
0x1939   :  { %36 = sbr.rel (!%p34_p4) target bundleno = 18 (0x12), region = 136 }

</bundles_post_ra>
